<compile_context>
chip_gen: v5e
topology: v5e:2x2
jax: 0.10.0
libtpu: 0.0.40
codegen_flags: <defaults>
</compile_context>

<pallas_src>
import functools

import numpy as np

import jax
import jax.numpy as jnp
from jax.experimental import pallas as pl
from jax.experimental.pallas import tpu as pltpu


def _round_up(n, m):
    return ((n + m - 1) // m) * m


_TARGET_BLOCK_BYTES = 2 * 1024 * 1024   # ~2 MiB per in/out block -> efficient DMA lines
_MAX_TILE = 4096                        # rows; keeps the widest (C~512) layers v7x-safe
_VMEM_LIMIT = 48 * 1024 * 1024          # raised scoped VMEM; still < v7x 64 MiB physical


def _pick_tile(T, row_bytes_in, row_bytes_out):
    per_row = max(row_bytes_in, row_bytes_out, 1)
    tile = max(256, _TARGET_BLOCK_BYTES // per_row)
    tile = min(tile, _MAX_TILE, _round_up(T, 8))
    return max(8, (tile // 8) * 8)


def _elu(x):
    return jnp.where(x > 0.0, x, jnp.exp(jnp.minimum(x, 0.0)) - 1.0)


# ----------------------------------------------------------------------------
# Pallas kernel: causal, stride-1, dilated conv on one (T_tile, Cin) block,
# optionally fused with ELU -> 1x1 conv -> residual add (residual unit).
# Taps = K accumulated MXU dots over shifted slices of [halo | block].
# ----------------------------------------------------------------------------
def _conv_kernel(*refs, K, dil, Cin, H, has_halo, has_bias, activation,
                 fuse, has_bias2):
    i = 0
    h_ref = None
    if has_halo:
        h_ref = refs[i]; i += 1          # (H, Cin)   rows preceding the tile
    x_ref = refs[i]; i += 1              # (T_tile, Cin)
    w1_ref = refs[i]; i += 1             # (K, Cin, Cmid) bf16
    b1_ref = None
    if has_bias:
        b1_ref = refs[i]; i += 1         # (1, Cmid) f32
    w2_ref = b2_ref = None
    if fuse:
        w2_ref = refs[i]; i += 1         # (Cmid, Cout) bf16
        if has_bias2:
            b2_ref = refs[i]; i += 1     # (1, Cout) f32
    o_ref = refs[i]                      # (T_tile, Cout)

    T_tile = x_ref.shape[0]
    Cmid = w1_ref.shape[2]

    x = x_ref[...].astype(jnp.float32)
    if has_halo:
        win = jnp.concatenate([h_ref[...].astype(jnp.float32), x], axis=0)
    else:
        win = x
    a = _elu(win) if activation else win          # ELU once per element (f32)
    ab = a.astype(jnp.bfloat16)

    base = (H - (K - 1) * dil) if has_halo else 0
    acc = jnp.zeros((T_tile, Cmid), jnp.float32)
    for k in range(K):                            # static unroll; no lane-axis concat
        s = base + k * dil
        tap = ab if K == 1 else ab[s:s + T_tile, :]
        if Cin == 1:                              # degenerate contraction guard
            acc = acc + tap.astype(jnp.float32) * w1_ref[k].astype(jnp.float32)
        else:
            acc = acc + jnp.dot(tap, w1_ref[k], preferred_element_type=jnp.float32)
    if has_bias:
        acc = acc + b1_ref[...].astype(jnp.float32)

    if fuse:   # fused residual unit tail: ELU -> 1x1 conv -> bias -> +x
        a2 = _elu(acc).astype(jnp.bfloat16)
        acc = jnp.dot(a2, w2_ref[...], preferred_element_type=jnp.float32)
        if has_bias2:
            acc = acc + b2_ref[...].astype(jnp.float32)
        acc = acc + x
    o_ref[...] = acc.astype(o_ref.dtype)


def _causal_conv_core(x, w1, b1=None, *, dilation=1, activation=False,
                      w2=None, b2=None, pad_mode='zero',
                      out_dtype=jnp.bfloat16):
    """Stride-1 causal dilated conv (optionally fused with ELU->1x1 conv->+x).

    x: (B, T, Cin); w1: (K, Cin, Cmid); w2: (Cmid, Cout) or None.
    """
    B, T, Cin = x.shape
    K, _, Cmid = w1.shape
    Cout = w2.shape[1] if w2 is not None else Cmid
    halo = (K - 1) * dilation
    H = _round_up(halo, 8) if halo > 0 else 0

    in_bytes = Cin * x.dtype.itemsize
    out_bytes = Cout * jnp.dtype(out_dtype).itemsize
    tile = _pick_tile(T, in_bytes, out_bytes)
    nt = -(-T // tile)
    T_pad = nt * tile
    x_main = x if T_pad == T else jnp.pad(x, ((0, 0), (0, T_pad - T), (0, 0)))

    args, in_specs = [], []
    has_halo = H > 0
    if has_halo:
        # Gather only the H rows preceding each tile (no full padded copy).
        row = np.arange(nt)[:, None] * tile - H + np.arange(H)[None, :]   # (nt, H)
        idx = np.maximum(row, 0)
        halo_x = x_main[:, idx, :]                                        # (B, nt, H, Cin)
        if pad_mode != 'edge':                                            # causal zero pad
            halo_x = jnp.where(jnp.asarray(row >= 0)[None, :, :, None], halo_x, 0)
        args.append(halo_x)
        in_specs.append(pl.BlockSpec((None, None, H, Cin),
                                     lambda bi, ti: (bi, ti, 0, 0)))
    args.append(x_main)
    in_specs.append(pl.BlockSpec((None, tile, Cin), lambda bi, ti: (bi, ti, 0)))
    args.append(w1.astype(jnp.bfloat16))
    in_specs.append(pl.BlockSpec((K, Cin, Cmid), lambda bi, ti: (0, 0, 0)))
    has_bias = b1 is not None
    if has_bias:
        args.append(b1.reshape(1, Cmid).astype(jnp.float32))
        in_specs.append(pl.BlockSpec((1, Cmid), lambda bi, ti: (0, 0)))
    fuse = w2 is not None
    has_bias2 = fuse and (b2 is not None)
    if fuse:
        args.append(w2.astype(jnp.bfloat16))
        in_specs.append(pl.BlockSpec((Cmid, Cout), lambda bi, ti: (0, 0)))
        if has_bias2:
            args.append(b2.reshape(1, Cout).astype(jnp.float32))
            in_specs.append(pl.BlockSpec((1, Cout), lambda bi, ti: (0, 0)))

    kernel = functools.partial(
        _conv_kernel, K=K, dil=dilation, Cin=Cin, H=H, has_halo=has_halo,
        has_bias=has_bias, activation=activation, fuse=fuse, has_bias2=has_bias2)

    out = pl.pallas_call(
        kernel,
        out_shape=jax.ShapeDtypeStruct((B, T_pad, Cout), out_dtype),
        grid=(B, nt),
        in_specs=in_specs,
        out_specs=pl.BlockSpec((None, tile, Cout), lambda bi, ti: (bi, ti, 0)),
        compiler_params=pltpu.CompilerParams(
            dimension_semantics=("parallel", "parallel"),
            vmem_limit_bytes=_VMEM_LIMIT),
    )(*args)
    return out if T_pad == T else out[:, :T, :]


# ----------------------------------------------------------------------------
# Conv wrappers
# ----------------------------------------------------------------------------
def causal_conv1d(x, w, b=None, *, stride=1, dilation=1, activation=False,
                  out_dtype=jnp.bfloat16):
    """CausalConv1d: left zero pad (K-1)*dilation, cross-correlation.
    Strided (K == 2*stride) convs use space-to-depth -> stride-1 K=2 conv
    over stride*Cin channels (no wasted MACs)."""
    K, Cin, Cout = w.shape
    if stride == 1:
        return _causal_conv_core(x, w, b, dilation=dilation,
                                 activation=activation, out_dtype=out_dtype)
    assert K == 2 * stride and dilation == 1
    B, T, _ = x.shape
    T_out = (T - 1) // stride + 1
    xp = jnp.pad(x, ((0, 0), (stride - 1, 0), (0, 0)))[:, :T_out * stride, :]
    xf = xp.reshape(B, T_out, stride * Cin)
    wf = w.reshape(2, stride * Cin, Cout)
    return _causal_conv_core(xf, wf, b, activation=activation, out_dtype=out_dtype)


def causal_conv_transpose1d(x, w, b=None, *, stride, out_dtype=jnp.bfloat16):
    """CausalConvTranspose1d (replication-pad 1 left, ConvTranspose1d(K=2*stride,
    stride), crop [stride:-stride]) via polyphase: y frame j = x[j-1] @ w[s:2s]
    + x[j] @ w[0:s] -> stride-1 K=2 conv producing stride*Cout channels, then
    depth-to-space (no MACs on inserted zeros)."""
    K, Cin, Cout = w.shape
    s = stride
    assert K == 2 * s
    B, T, _ = x.shape
    w_prev = jnp.transpose(w[s:2 * s], (1, 0, 2)).reshape(Cin, s * Cout)  # tap x[j-1]
    w_curr = jnp.transpose(w[0:s], (1, 0, 2)).reshape(Cin, s * Cout)      # tap x[j]
    wf = jnp.stack([w_prev, w_curr], axis=0)                              # (2, Cin, s*Cout)
    b2 = jnp.tile(b, s) if b is not None else None
    y = _causal_conv_core(x, wf, b2, pad_mode='edge', out_dtype=out_dtype)
    return y.reshape(B, T * s, Cout)


def _fold_weight(w, p):
    """Fold a stride-1 dilation-1 causal conv weight (K, Cin, Cout) into a K=2
    conv weight (2, p*Cin, p*Cout) over time-folded frames of p samples."""
    K, Cin, Cout = w.shape
    assert K - 1 <= p
    sel = np.zeros((2, p, K, p), dtype=np.float32)
    for r in range(p):
        for k in range(K):
            m = r - (K - 1 - k)
            if m >= 0:
                sel[1, m, k, r] = 1.0
            else:
                sel[0, p + m, k, r] = 1.0
    W = jnp.einsum('fmkr,kco->fmcro', jnp.asarray(sel), w)
    return W.reshape(2, p * Cin, p * Cout)


def lane_dense_conv1d(x, w, b=None, *, out_dtype=jnp.bfloat16):
    """Causal stride-1 conv for narrow-channel layers (Cin=1 stem / Cout=1 head):
    time is folded into lanes (space-to-depth by p), the conv becomes a K=2 conv
    over p*Cin -> p*Cout frames, then depth-to-space -> dense loads/stores."""
    K, Cin, Cout = w.shape
    p = 128 // max(1, min(Cin, Cout))
    p = min(p, 128)
    if p < max(8, K - 1):                 # channels already wide enough
        return causal_conv1d(x, w, b, out_dtype=out_dtype)
    B, T, _ = x.shape
    T_pad = _round_up(T, p)
    xp = x if T_pad == T else jnp.pad(x, ((0, 0), (0, T_pad - T), (0, 0)))
    xf = xp.reshape(B, T_pad // p, p * Cin)
    wf = _fold_weight(w, p)
    bf = jnp.tile(b, p) if b is not None else None
    y = _causal_conv_core(xf, wf, bf, out_dtype=out_dtype)
    y = y.reshape(B, T_pad, Cout)
    return y if T_pad == T else y[:, :T, :]


def residual_unit(x, p, dilation):
    # x + conv2(ELU(conv1(ELU(x)))) fused into a single pallas_call
    # (no HBM round-trip of the intermediate activation).
    w2 = p['conv2']['w'][0]                       # (1, C, C) -> (C, C)
    return _causal_conv_core(x, p['conv1']['w'], p['conv1']['b'],
                             dilation=dilation, activation=True,
                             w2=w2, b2=p['conv2']['b'],
                             out_dtype=jnp.bfloat16)


# ----------------------------------------------------------------------------
# Pallas kernel: fused residual vector quantization (all codebooks), tiled on N.
# Per-tile partial usage/SSE are outputs -> grid axis is safely "parallel".
# ----------------------------------------------------------------------------
def _rvq_kernel(f_ref, e_ref, q_ref, usage_ref, sse_ref, *, ncb, n_valid,
                n_tile, C):
    ti = pl.program_id(0)
    f = f_ref[...].astype(jnp.float32)                              # (n_tile, D)
    row = jax.lax.broadcasted_iota(jnp.int32, (n_tile, 1), 0) + ti * n_tile
    valid = (row < n_valid).astype(jnp.float32)                     # (n_tile, 1)
    col = jax.lax.broadcasted_iota(jnp.int32, (n_tile, C), 1)

    residual = f
    qtot = jnp.zeros_like(f)
    usage_rows, sse_rows = [], []
    for cb in range(ncb):                                           # static unroll
        e = e_ref[cb].astype(jnp.float32)                           # (D, C)
        # ||residual||^2 omitted (constant per row, doesn't change argmin).
        # Dominant distance matmul in bf16 on the MXU; e*e and the
        # reconstruction stay f32.
        dist = (jnp.sum(e * e, axis=0, keepdims=True)
                - 2.0 * jnp.dot(residual.astype(jnp.bfloat16),
                                e.astype(jnp.bfloat16),
                                preferred_element_type=jnp.float32))
        min_d = jnp.min(dist, axis=1, keepdims=True)
        idx = jnp.min(jnp.where(dist <= min_d, col, C), axis=1, keepdims=True)
        onehot = (col == idx).astype(jnp.float32)                   # (n_tile, C)
        quant = jax.lax.dot_general(onehot, e, (((1,), (1,)), ((), ())),
                                    preferred_element_type=jnp.float32)  # (n_tile, D)
        d2 = ((quant - residual) ** 2) * valid
        sse_rows.append(jnp.sum(jnp.sum(d2, axis=1, keepdims=True),
                                axis=0, keepdims=True))             # (1, 1)
        usage_rows.append(jnp.sum(onehot * valid, axis=0, keepdims=True))  # (1, C)
        residual = residual - quant
        qtot = qtot + quant
    q_ref[...] = qtot.astype(q_ref.dtype)
    usage_ref[...] = jnp.concatenate(usage_rows, axis=0)
    sse_ref[...] = jnp.concatenate(sse_rows, axis=0)


def residual_vq_apply(z_btd, codebooks):
    # TODO(synk): training-mode EMA codebook updates (buffer side effects) are
    # not reproduced; forward return values are unaffected by them.
    B, T, D = z_btd.shape
    ncb, _, C = codebooks.shape
    N = B * T
    n_tile = min(2048, _round_up(N, 8))
    n_tiles = -(-N // n_tile)
    N_pad = n_tiles * n_tile
    flat = z_btd.reshape(N, D).astype(jnp.float32)
    if N_pad > N:
        flat = jnp.pad(flat, ((0, N_pad - N), (0, 0)))

    kernel = functools.partial(_rvq_kernel, ncb=ncb, n_valid=N, n_tile=n_tile, C=C)
    q, usage, sse = pl.pallas_call(
        kernel,
        out_shape=(jax.ShapeDtypeStruct((N_pad, D), jnp.float32),
                   jax.ShapeDtypeStruct((n_tiles, ncb, C), jnp.float32),
                   jax.ShapeDtypeStruct((n_tiles, ncb, 1), jnp.float32)),
        grid=(n_tiles,),
        in_specs=[pl.BlockSpec((n_tile, D), lambda i: (i, 0)),
                  pl.BlockSpec((ncb, D, C), lambda i: (0, 0, 0))],
        out_specs=(pl.BlockSpec((n_tile, D), lambda i: (i, 0)),
                   pl.BlockSpec((None, ncb, C), lambda i: (i, 0, 0)),
                   pl.BlockSpec((None, ncb, 1), lambda i: (i, 0, 0))),
        compiler_params=pltpu.CompilerParams(
            dimension_semantics=("parallel",),
            vmem_limit_bytes=_VMEM_LIMIT),
    )(flat, codebooks)

    zq = q[:N].reshape(B, T, D)
    usage_tot = jnp.sum(usage, axis=0)                    # (ncb, C)
    sse_tot = jnp.sum(sse, axis=0)[:, 0]                  # (ncb,)
    vqloss = sse_tot / float(N * D)                       # MSE(quant, residual) per codebook
    avg = usage_tot / float(N)
    perplexity = jnp.exp(-jnp.sum(avg * jnp.log(avg + 1e-10), axis=1))
    return zq, vqloss, perplexity


# ----------------------------------------------------------------------------
# Model pieces (AudioDec Encoder / Decoder / Projector / residual VQ)
# ----------------------------------------------------------------------------
def encoder_apply(x, p, strides, dilations=(1, 3, 9)):
    # Cin=1 stem -> lane-dense (time-folded) conv.
    x = lane_dense_conv1d(x, p['conv0']['w'], p['conv0']['b'])
    for bp, s in zip(p['blocks'], strides):
        for rp, d in zip(bp['res'], dilations):
            x = residual_unit(x, rp, d)
        x = causal_conv1d(x, bp['conv']['w'], bp['conv']['b'], stride=s)
    return x


def decoder_apply(z, p, strides, dilations=(1, 3, 9)):
    x = causal_conv1d(z, p['conv1']['w'], p['conv1']['b'])
    for bp, s in zip(p['blocks'], strides):
        x = causal_conv_transpose1d(x, bp['conv']['w'], bp['conv']['b'], stride=s)
        for rp, d in zip(bp['res'], dilations):
            x = residual_unit(x, rp, d)
    # Cout=1 head -> lane-dense (time-folded) conv, f32 waveform out.
    x = lane_dense_conv1d(x, p['conv2']['w'], p['conv2']['b'],
                          out_dtype=jnp.float32)
    return x


def generator_forward(x_ncl, params, config):
    B, C, L = x_ncl.shape
    if C != config['input_channels']:
        x_ncl = x_ncl.reshape(-1, config['input_channels'], L)
    x = jnp.transpose(x_ncl, (0, 2, 1))                       # (B, T, C)
    h = encoder_apply(x, params['encoder'], config['enc_strides'])
    z = causal_conv1d(h, params['projector']['w'], params['projector']['b'],
                      out_dtype=jnp.float32)
    zq, vqloss, ppl = residual_vq_apply(z, params['codebooks'])   # channels-last
    y = decoder_apply(zq, params['decoder'], config['dec_strides'])
    y_ncl = jnp.transpose(y, (0, 2, 1))                       # (B, out_ch, L)
    z_nct = jnp.transpose(z, (0, 2, 1))
    zq_nct = jnp.transpose(zq, (0, 2, 1))
    return y_ncl, zq_nct, z_nct, vqloss, ppl


# ----------------------------------------------------------------------------
# Deterministic parameter init (shapes follow the torch module's __init__)
# ----------------------------------------------------------------------------
def init_params(key, cfg):
    keys = iter(jax.random.split(key, 512))

    def conv(cin, cout, K, use_bias, scale=0.01):
        kw, kb = next(keys), next(keys)
        return {'w': scale * jax.random.normal(kw, (K, cin, cout), jnp.float32),
                'b': (scale * jax.random.normal(kb, (cout,), jnp.float32)
                      if use_bias else None)}

    ks, bias = cfg['kernel_size'], cfg['bias']

    # Encoder
    cin = cfg['encode_channels']
    enc = {'conv0': conv(cfg['input_channels'], cin, ks, False)}
    enc_blocks = []
    for ratio, stride in zip(cfg['enc_ratios'], cfg['enc_strides']):
        cout = cfg['encode_channels'] * ratio
        res = [{'conv1': conv(cin, cin, ks, bias),
                'conv2': conv(cin, cin, 1, bias)} for _ in range(3)]
        enc_blocks.append({'res': res, 'conv': conv(cin, cout, 2 * stride, bias)})
        cin = cout
    enc['blocks'] = enc_blocks
    enc_out_channels = cin

    # Projector (conv1d, kernel 3, bias=False)
    proj = conv(enc_out_channels, cfg['code_dim'], 3, False)

    # Residual VQ codebooks: (num_quantizers, dim, codebook_size)
    codebooks = jax.random.normal(
        next(keys), (cfg['codebook_num'], cfg['code_dim'], cfg['codebook_size']),
        jnp.float32)

    # Decoder
    dec = {}
    cin = cfg['decode_channels'] * cfg['dec_ratios'][0]
    dec['conv1'] = conv(cfg['code_dim'], cin, ks, False)
    dec_blocks = []
    n = len(cfg['dec_ratios'])
    for idx, stride in enumerate(cfg['dec_strides']):
        cout = (cfg['decode_channels'] * cfg['dec_ratios'][idx + 1]
                if idx < n - 1 else cfg['decode_channels'])
        res = [{'conv1': conv(cout, cout, ks, bias),
                'conv2': conv(cout, cout, 1, bias)} for _ in range(3)]
        dec_blocks.append({'conv': conv(cin, cout, 2 * stride, bias), 'res': res})
        cin = cout
    dec['blocks'] = dec_blocks
    dec['conv2'] = conv(cin, cfg['output_channels'], ks, False)

    return {'encoder': enc, 'projector': proj, 'codebooks': codebooks,
            'decoder': dec}


# ----------------------------------------------------------------------------
if __name__ == "__main__":
    # Small Generator configuration (same architecture, reduced widths/depth so
    # the demo stays tiny; the code is fully general in these hyperparameters).
    cfg = dict(
        input_channels=1, output_channels=1,
        encode_channels=8, decode_channels=8,
        code_dim=16, codebook_num=4, codebook_size=64,
        enc_ratios=(2, 4), dec_ratios=(4, 2),
        enc_strides=(2, 3), dec_strides=(3, 2),
        kernel_size=7, bias=True,
    )
    B, L = 2, 24   # total downsampling = 2*3 = 6 -> 4 code frames

    key = jax.random.PRNGKey(0)
    kx, kp = jax.random.split(key)
    x = jax.random.normal(kx, (B, cfg['input_channels'], L), jnp.float32)
    params = init_params(kp, cfg)

    fwd = jax.jit(functools.partial(generator_forward, config=cfg))
    y, zq, z, vqloss, perplexity = fwd(x, params)
    jax.block_until_ready((y, zq, z, vqloss, perplexity))

    t_code = L // (cfg['enc_strides'][0] * cfg['enc_strides'][1])
    assert y.shape == (B, cfg['output_channels'], L)
    assert zq.shape == (B, cfg['code_dim'], t_code)
    assert z.shape == (B, cfg['code_dim'], t_code)
    assert vqloss.shape == (cfg['codebook_num'],)
    assert perplexity.shape == (cfg['codebook_num'],)
    print("KERNEL_OK")
</pallas_src>

<mosaic_0001>
module attributes {stable_mosaic.version = 11 : i64} {
  func.func @_conv_kernel(%arg0: i32, %arg1: i32, %arg2: memref<1x1x8x128xf32, #tpu.memory_space<vmem>>, %arg3: memref<1x8x128xf32, #tpu.memory_space<vmem>>, %arg4: memref<2x128x1024xbf16, #tpu.memory_space<vmem>>, %arg5: memref<1x8x1024xbf16, #tpu.memory_space<vmem>>) attributes {dimension_semantics = [#tpu.dimension_semantics<parallel>, #tpu.dimension_semantics<parallel>], iteration_bounds = array<i64: 2, 1>, scalar_prefetch = 0 : i64, scratch_operands = 0 : i64, tpu.core_type = #tpu.core_type<tc>, window_params = [{transform_indices = @transform_0, window_bounds = array<i64: 1, 1, 8, 128>}, {transform_indices = @transform_1, window_bounds = array<i64: 1, 8, 128>}, {pipeline_mode = #tpu.pipeline_mode<synchronous>, transform_indices = @transform_2, window_bounds = array<i64: 2, 128, 1024>}, {transform_indices = @transform_3, window_bounds = array<i64: 1, 8, 1024>}]} {
    %c0 = arith.constant 0 : index
    %c0_0 = arith.constant 0 : index
    %c0_1 = arith.constant 0 : index
    %0 = vector.load %arg3[%c0, %c0_0, %c0_1] : memref<1x8x128xf32, #tpu.memory_space<vmem>>, vector<1x8x128xf32>
    %1 = vector.shape_cast %0 : vector<1x8x128xf32> to vector<8x128xf32>
    %c0_2 = arith.constant 0 : index
    %c0_3 = arith.constant 0 : index
    %c0_4 = arith.constant 0 : index
    %c0_5 = arith.constant 0 : index
    %2 = vector.load %arg2[%c0_2, %c0_3, %c0_4, %c0_5] : memref<1x1x8x128xf32, #tpu.memory_space<vmem>>, vector<1x1x8x128xf32>
    %3 = vector.shape_cast %2 : vector<1x1x8x128xf32> to vector<8x128xf32>
    %4 = tpu.concatenate %3, %1 in 0 : vector<8x128xf32>, vector<8x128xf32> -> vector<16x128xf32>
    %5 = arith.truncf %4 : vector<16x128xf32> to vector<16x128xbf16>
    %cst = arith.constant 0.000000e+00 : f32
    %6 = vector.broadcast %cst : f32 to vector<8x1024xf32>
    %7 = vector.extract_strided_slice %5 {offsets = [7, 0], sizes = [8, 128], strides = [1, 1]} : vector<16x128xbf16> to vector<8x128xbf16>
    %c0_6 = arith.constant 0 : index
    %c0_7 = arith.constant 0 : index
    %c0_8 = arith.constant 0 : index
    %8 = vector.load %arg4[%c0_6, %c0_7, %c0_8] : memref<2x128x1024xbf16, #tpu.memory_space<vmem>>, vector<1x128x1024xbf16>
    %9 = vector.shape_cast %8 : vector<1x128x1024xbf16> to vector<128x1024xbf16>
    %cst_9 = arith.constant dense<0.000000e+00> : vector<8x1024xf32>
    %10 = tpu.matmul %7, %9, %cst_9 {dimension_numbers = #tpu.dot_dimension_numbers<[1], [0], [0], [1], [0, 0, 1, 1], [], []>} : vector<8x128xbf16>, vector<128x1024xbf16>, vector<8x1024xf32> -> vector<8x1024xf32>
    %11 = arith.addf %6, %10 : vector<8x1024xf32>
    %12 = vector.extract_strided_slice %5 {offsets = [8, 0], sizes = [8, 128], strides = [1, 1]} : vector<16x128xbf16> to vector<8x128xbf16>
    %c1 = arith.constant 1 : index
    %c0_10 = arith.constant 0 : index
    %c0_11 = arith.constant 0 : index
    %13 = vector.load %arg4[%c1, %c0_10, %c0_11] : memref<2x128x1024xbf16, #tpu.memory_space<vmem>>, vector<1x128x1024xbf16>
    %14 = vector.shape_cast %13 : vector<1x128x1024xbf16> to vector<128x1024xbf16>
    %cst_12 = arith.constant dense<0.000000e+00> : vector<8x1024xf32>
    %15 = tpu.matmul %12, %14, %cst_12 {dimension_numbers = #tpu.dot_dimension_numbers<[1], [0], [0], [1], [0, 0, 1, 1], [], []>} : vector<8x128xbf16>, vector<128x1024xbf16>, vector<8x1024xf32> -> vector<8x1024xf32>
    %16 = arith.addf %11, %15 : vector<8x1024xf32>
    %17 = arith.truncf %16 : vector<8x1024xf32> to vector<8x1024xbf16>
    %c0_13 = arith.constant 0 : index
    %c0_14 = arith.constant 0 : index
    %c0_15 = arith.constant 0 : index
    %18 = vector.load %arg5[%c0_13, %c0_14, %c0_15] : memref<1x8x1024xbf16, #tpu.memory_space<vmem>>, vector<1x8x1024xbf16>
    %19 = vector.shape_cast %18 : vector<1x8x1024xbf16> to vector<8x1024xbf16>
    %20 = vector.shape_cast %17 : vector<8x1024xbf16> to vector<1x8x1024xbf16>
    tpu.vector_store %arg5[%c0_13, %c0_14, %c0_15], %20 {strides = array<i32>} : memref<1x8x1024xbf16, #tpu.memory_space<vmem>>, vector<1x8x1024xbf16>,
    return
  }
  func.func @transform_0(%arg0: i32, %arg1: i32) -> (i32, i32, i32, i32) {
    %c0_i32 = arith.constant 0 : i32
    %c0_i32_0 = arith.constant 0 : i32
    %c0_i32_1 = arith.constant 0 : i32
    return %arg0, %arg1, %c0_i32, %c0_i32_0 : i32, i32, i32, i32
  }
  func.func @transform_1(%arg0: i32, %arg1: i32) -> (i32, i32, i32) {
    %c0_i32 = arith.constant 0 : i32
    %c0_i32_0 = arith.constant 0 : i32
    return %arg0, %arg1, %c0_i32 : i32, i32, i32
  }
  func.func @transform_2(%arg0: i32, %arg1: i32) -> (i32, i32, i32) {
    %c0_i32 = arith.constant 0 : i32
    %c0_i32_0 = arith.constant 0 : i32
    %c0_i32_1 = arith.constant 0 : i32
    %c0_i32_2 = arith.constant 0 : i32
    return %c0_i32, %c0_i32_0, %c0_i32_1 : i32, i32, i32
  }
  func.func @transform_3(%arg0: i32, %arg1: i32) -> (i32, i32, i32) {
    %c0_i32 = arith.constant 0 : i32
    %c0_i32_0 = arith.constant 0 : i32
    return %arg0, %arg1, %c0_i32 : i32, i32, i32
  }
}

module attributes {stable_mosaic.version = 11 : i64} {
  func.func @_conv_kernel(%arg0: i32, %arg1: i32, %arg2: memref<1x1x24x8xbf16, #tpu.memory_space<vmem>>, %arg3: memref<1x24x8xbf16, #tpu.memory_space<vmem>>, %arg4: memref<7x8x8xbf16, #tpu.memory_space<vmem>>, %arg5: memref<1x8xf32, #tpu.memory_space<vmem>>, %arg6: memref<8x8xbf16, #tpu.memory_space<vmem>>, %arg7: memref<1x8xf32, #tpu.memory_space<vmem>>, %arg8: memref<1x24x8xbf16, #tpu.memory_space<vmem>>) attributes {dimension_semantics = [#tpu.dimension_semantics<parallel>, #tpu.dimension_semantics<parallel>], iteration_bounds = array<i64: 2, 1>, scalar_prefetch = 0 : i64, scratch_operands = 0 : i64, tpu.core_type = #tpu.core_type<tc>, window_params = [{transform_indices = @transform_0, window_bounds = array<i64: 1, 1, 24, 8>}, {transform_indices = @transform_1, window_bounds = array<i64: 1, 24, 8>}, {pipeline_mode = #tpu.pipeline_mode<synchronous>, transform_indices = @transform_2, window_bounds = array<i64: 7, 8, 8>}, {pipeline_mode = #tpu.pipeline_mode<synchronous>, transform_indices = @transform_3, window_bounds = array<i64: 1, 8>}, {pipeline_mode = #tpu.pipeline_mode<synchronous>, transform_indices = @transform_4, window_bounds = array<i64: 8, 8>}, {pipeline_mode = #tpu.pipeline_mode<synchronous>, transform_indices = @transform_5, window_bounds = array<i64: 1, 8>}, {transform_indices = @transform_6, window_bounds = array<i64: 1, 24, 8>}]} {
    %c0 = arith.constant 0 : index
    %c0_0 = arith.constant 0 : index
    %c0_1 = arith.constant 0 : index
    %0 = vector.load %arg3[%c0, %c0_0, %c0_1] : memref<1x24x8xbf16, #tpu.memory_space<vmem>>, vector<1x24x8xbf16>
    %1 = vector.shape_cast %0 : vector<1x24x8xbf16> to vector<24x8xbf16>
    %2 = arith.extf %1 : vector<24x8xbf16> to vector<24x8xf32>
    %c0_2 = arith.constant 0 : index
    %c0_3 = arith.constant 0 : index
    %c0_4 = arith.constant 0 : index
    %c0_5 = arith.constant 0 : index
    %3 = vector.load %arg2[%c0_2, %c0_3, %c0_4, %c0_5] : memref<1x1x24x8xbf16, #tpu.memory_space<vmem>>, vector<1x1x24x8xbf16>
    %4 = vector.shape_cast %3 : vector<1x1x24x8xbf16> to vector<24x8xbf16>
    %5 = arith.extf %4 : vector<24x8xbf16> to vector<24x8xf32>
    %6 = tpu.concatenate %5, %2 in 0 : vector<24x8xf32>, vector<24x8xf32> -> vector<48x8xf32>
    %cst = arith.constant 0.000000e+00 : f32
    %7 = vector.broadcast %cst : f32 to vector<48x8xf32>
    %8 = arith.cmpf ogt, %6, %7 : vector<48x8xf32>
    %cst_6 = arith.constant 0.000000e+00 : f32
    %9 = vector.broadcast %cst_6 : f32 to vector<48x8xf32>
    %10 = arith.minimumf %6, %9 : vector<48x8xf32>
    %11 = math.exp %10 : vector<48x8xf32>
    %cst_7 = arith.constant 1.000000e+00 : f32
    %12 = vector.broadcast %cst_7 : f32 to vector<48x8xf32>
    %13 = arith.subf %11, %12 : vector<48x8xf32>
    %14 = arith.select %8, %6, %13 : vector<48x8xi1>, vector<48x8xf32>
    %15 = arith.truncf %14 : vector<48x8xf32> to vector<48x8xbf16>
    %cst_8 = arith.constant 0.000000e+00 : f32
    %16 = vector.broadcast %cst_8 : f32 to vector<24x8xf32>
    %17 = vector.extract_strided_slice %15 {offsets = [6, 0], sizes = [24, 8], strides = [1, 1]} : vector<48x8xbf16> to vector<24x8xbf16>
    %c0_9 = arith.constant 0 : index
    %c0_10 = arith.constant 0 : index
    %c0_11 = arith.constant 0 : index
    %18 = vector.load %arg4[%c0_9, %c0_10, %c0_11] : memref<7x8x8xbf16, #tpu.memory_space<vmem>>, vector<1x8x8xbf16>
    %19 = vector.shape_cast %18 : vector<1x8x8xbf16> to vector<8x8xbf16>
    %cst_12 = arith.constant dense<0.000000e+00> : vector<24x8xf32>
    %20 = tpu.matmul %17, %19, %cst_12 {dimension_numbers = #tpu.dot_dimension_numbers<[1], [0], [0], [1], [0, 0, 1, 1], [], []>} : vector<24x8xbf16>, vector<8x8xbf16>, vector<24x8xf32> -> vector<24x8xf32>
    %21 = arith.addf %16, %20 : vector<24x8xf32>
    %22 = vector.extract_strided_slice %15 {offsets = [9, 0], sizes = [24, 8], strides = [1, 1]} : vector<48x8xbf16> to vector<24x8xbf16>
    %c1 = arith.constant 1 : index
    %c0_13 = arith.constant 0 : index
    %c0_14 = arith.constant 0 : index
    %23 = vector.load %arg4[%c1, %c0_13, %c0_14] : memref<7x8x8xbf16, #tpu.memory_space<vmem>>, vector<1x8x8xbf16>
    %24 = vector.shape_cast %23 : vector<1x8x8xbf16> to vector<8x8xbf16>
    %cst_15 = arith.constant dense<0.000000e+00> : vector<24x8xf32>
    %25 = tpu.matmul %22, %24, %cst_15 {dimension_numbers = #tpu.dot_dimension_numbers<[1], [0], [0], [1], [0, 0, 1, 1], [], []>} : vector<24x8xbf16>, vector<8x8xbf16>, vector<24x8xf32> -> vector<24x8xf32>
    %26 = arith.addf %21, %25 : vector<24x8xf32>
    %27 = vector.extract_strided_slice %15 {offsets = [12, 0], sizes = [24, 8], strides = [1, 1]} : vector<48x8xbf16> to vector<24x8xbf16>
    %c2 = arith.constant 2 : index
    %c0_16 = arith.constant 0 : index
    %c0_17 = arith.constant 0 : index
    %28 = vector.load %arg4[%c2, %c0_16, %c0_17] : memref<7x8x8xbf16, #tpu.memory_space<vmem>>, vector<1x8x8xbf16>
    %29 = vector.shape_cast %28 : vector<1x8x8xbf16> to vector<8x8xbf16>
    %cst_18 = arith.constant dense<0.000000e+00> : vector<24x8xf32>
    %30 = tpu.matmul %27, %29, %cst_18 {dimension_numbers = #tpu.dot_dimension_numbers<[1], [0], [0], [1], [0, 0, 1, 1], [], []>} : vector<24x8xbf16>, vector<8x8xbf16>, vector<24x8xf32> -> vector<24x8xf32>
    %31 = arith.addf %26, %30 : vector<24x8xf32>
    %32 = vector.extract_strided_slice %15 {offsets = [15, 0], sizes = [24, 8], strides = [1, 1]} : vector<48x8xbf16> to vector<24x8xbf16>
    %c3 = arith.constant 3 : index
    %c0_19 = arith.constant 0 : index
    %c0_20 = arith.constant 0 : index
    %33 = vector.load %arg4[%c3, %c0_19, %c0_20] : memref<7x8x8xbf16, #tpu.memory_space<vmem>>, vector<1x8x8xbf16>
    %34 = vector.shape_cast %33 : vector<1x8x8xbf16> to vector<8x8xbf16>
    %cst_21 = arith.constant dense<0.000000e+00> : vector<24x8xf32>
    %35 = tpu.matmul %32, %34, %cst_21 {dimension_numbers = #tpu.dot_dimension_numbers<[1], [0], [0], [1], [0, 0, 1, 1], [], []>} : vector<24x8xbf16>, vector<8x8xbf16>, vector<24x8xf32> -> vector<24x8xf32>
    %36 = arith.addf %31, %35 : vector<24x8xf32>
    %37 = vector.extract_strided_slice %15 {offsets = [18, 0], sizes = [24, 8], strides = [1, 1]} : vector<48x8xbf16> to vector<24x8xbf16>
    %c4 = arith.constant 4 : index
    %c0_22 = arith.constant 0 : index
    %c0_23 = arith.constant 0 : index
    %38 = vector.load %arg4[%c4, %c0_22, %c0_23] : memref<7x8x8xbf16, #tpu.memory_space<vmem>>, vector<1x8x8xbf16>
    %39 = vector.shape_cast %38 : vector<1x8x8xbf16> to vector<8x8xbf16>
    %cst_24 = arith.constant dense<0.000000e+00> : vector<24x8xf32>
    %40 = tpu.matmul %37, %39, %cst_24 {dimension_numbers = #tpu.dot_dimension_numbers<[1], [0], [0], [1], [0, 0, 1, 1], [], []>} : vector<24x8xbf16>, vector<8x8xbf16>, vector<24x8xf32> -> vector<24x8xf32>
    %41 = arith.addf %36, %40 : vector<24x8xf32>
    %42 = vector.extract_strided_slice %15 {offsets = [21, 0], sizes = [24, 8], strides = [1, 1]} : vector<48x8xbf16> to vector<24x8xbf16>
    %c5 = arith.constant 5 : index
    %c0_25 = arith.constant 0 : index
    %c0_26 = arith.constant 0 : index
    %43 = vector.load %arg4[%c5, %c0_25, %c0_26] : memref<7x8x8xbf16, #tpu.memory_space<vmem>>, vector<1x8x8xbf16>
    %44 = vector.shape_cast %43 : vector<1x8x8xbf16> to vector<8x8xbf16>
    %cst_27 = arith.constant dense<0.000000e+00> : vector<24x8xf32>
    %45 = tpu.matmul %42, %44, %cst_27 {dimension_numbers = #tpu.dot_dimension_numbers<[1], [0], [0], [1], [0, 0, 1, 1], [], []>} : vector<24x8xbf16>, vector<8x8xbf16>, vector<24x8xf32> -> vector<24x8xf32>
    %46 = arith.addf %41, %45 : vector<24x8xf32>
    %47 = vector.extract_strided_slice %15 {offsets = [24, 0], sizes = [24, 8], strides = [1, 1]} : vector<48x8xbf16> to vector<24x8xbf16>
    %c6 = arith.constant 6 : index
    %c0_28 = arith.constant 0 : index
    %c0_29 = arith.constant 0 : index
    %48 = vector.load %arg4[%c6, %c0_28, %c0_29] : memref<7x8x8xbf16, #tpu.memory_space<vmem>>, vector<1x8x8xbf16>
    %49 = vector.shape_cast %48 : vector<1x8x8xbf16> to vector<8x8xbf16>
    %cst_30 = arith.constant dense<0.000000e+00> : vector<24x8xf32>
    %50 = tpu.matmul %47, %49, %cst_30 {dimension_numbers = #tpu.dot_dimension_numbers<[1], [0], [0], [1], [0, 0, 1, 1], [], []>} : vector<24x8xbf16>, vector<8x8xbf16>, vector<24x8xf32> -> vector<24x8xf32>
    %51 = arith.addf %46, %50 : vector<24x8xf32>
    %c0_31 = arith.constant 0 : index
    %c0_32 = arith.constant 0 : index
    %52 = vector.load %arg5[%c0_31, %c0_32] : memref<1x8xf32, #tpu.memory_space<vmem>>, vector<1x8xf32>
    %53 = vector.broadcast %52 : vector<1x8xf32> to vector<24x8xf32>
    %54 = arith.addf %51, %53 : vector<24x8xf32>
    %cst_33 = arith.constant 0.000000e+00 : f32
    %55 = vector.broadcast %cst_33 : f32 to vector<24x8xf32>
    %56 = arith.cmpf ogt, %54, %55 : vector<24x8xf32>
    %cst_34 = arith.constant 0.000000e+00 : f32
    %57 = vector.broadcast %cst_34 : f32 to vector<24x8xf32>
    %58 = arith.minimumf %54, %57 : vector<24x8xf32>
    %59 = math.exp %58 : vector<24x8xf32>
    %cst_35 = arith.constant 1.000000e+00 : f32
    %60 = vector.broadcast %cst_35 : f32 to vector<24x8xf32>
    %61 = arith.subf %59, %60 : vector<24x8xf32>
    %62 = arith.select %56, %54, %61 : vector<24x8xi1>, vector<24x8xf32>
    %63 = arith.truncf %62 : vector<24x8xf32> to vector<24x8xbf16>
    %c0_36 = arith.constant 0 : index
    %c0_37 = arith.constant 0 : index
    %64 = vector.load %arg6[%c0_36, %c0_37] : memref<8x8xbf16, #tpu.memory_space<vmem>>, vector<8x8xbf16>
    %cst_38 = arith.constant dense<0.000000e+00> : vector<24x8xf32>
    %65 = tpu.matmul %63, %64, %cst_38 {dimension_numbers = #tpu.dot_dimension_numbers<[1], [0], [0], [1], [0, 0, 1, 1], [], []>} : vector<24x8xbf16>, vector<8x8xbf16>, vector<24x8xf32> -> vector<24x8xf32>
    %c0_39 = arith.constant 0 : index
    %c0_40 = arith.constant 0 : index
    %66 = vector.load %arg7[%c0_39, %c0_40] : memref<1x8xf32, #tpu.memory_space<vmem>>, vector<1x8xf32>
    %67 = vector.broadcast %66 : vector<1x8xf32> to vector<24x8xf32>
    %68 = arith.addf %65, %67 : vector<24x8xf32>
    %69 = arith.addf %68, %2 : vector<24x8xf32>
    %70 = arith.truncf %69 : vector<24x8xf32> to vector<24x8xbf16>
    %c0_41 = arith.constant 0 : index
    %c0_42 = arith.constant 0 : index
    %c0_43 = arith.constant 0 : index
    %71 = vector.load %arg8[%c0_41, %c0_42, %c0_43] : memref<1x24x8xbf16, #tpu.memory_space<vmem>>, vector<1x24x8xbf16>
    %72 = vector.shape_cast %71 : vector<1x24x8xbf16> to vector<24x8xbf16>
    %73 = vector.shape_cast %70 : vector<24x8xbf16> to vector<1x24x8xbf16>
    tpu.vector_store %arg8[%c0_41, %c0_42, %c0_43], %73 {strides = array<i32>} : memref<1x24x8xbf16, #tpu.memory_space<vmem>>, vector<1x24x8xbf16>,
    return
  }
  func.func @transform_0(%arg0: i32, %arg1: i32) -> (i32, i32, i32, i32) {
    %c0_i32 = arith.constant 0 : i32
    %c0_i32_0 = arith.constant 0 : i32
    %c0_i32_1 = arith.constant 0 : i32
    return %arg0, %arg1, %c0_i32, %c0_i32_0 : i32, i32, i32, i32
  }
  func.func @transform_1(%arg0: i32, %arg1: i32) -> (i32, i32, i32) {
    %c0_i32 = arith.constant 0 : i32
    %c0_i32_0 = arith.constant 0 : i32
    return %arg0, %arg1, %c0_i32 : i32, i32, i32
  }
  func.func @transform_2(%arg0: i32, %arg1: i32) -> (i32, i32, i32) {
    %c0_i32 = arith.constant 0 : i32
    %c0_i32_0 = arith.constant 0 : i32
    %c0_i32_1 = arith.constant 0 : i32
    %c0_i32_2 = arith.constant 0 : i32
    return %c0_i32, %c0_i32_0, %c0_i32_1 : i32, i32, i32
  }
  func.func @transform_3(%arg0: i32, %arg1: i32) -> (i32, i32) {
    %c0_i32 = arith.constant 0 : i32
    %c0_i32_0 = arith.constant 0 : i32
    %c0_i32_1 = arith.constant 0 : i32
    return %c0_i32, %c0_i32_0 : i32, i32
  }
  func.func @transform_4(%arg0: i32, %arg1: i32) -> (i32, i32) {
    %c0_i32 = arith.constant 0 : i32
    %c0_i32_0 = arith.constant 0 : i32
    %c0_i32_1 = arith.constant 0 : i32
    return %c0_i32, %c0_i32_0 : i32, i32
  }
  func.func @transform_5(%arg0: i32, %arg1: i32) -> (i32, i32) {
    %c0_i32 = arith.constant 0 : i32
    %c0_i32_0 = arith.constant 0 : i32
    %c0_i32_1 = arith.constant 0 : i32
    return %c0_i32, %c0_i32_0 : i32, i32
  }
  func.func @transform_6(%arg0: i32, %arg1: i32) -> (i32, i32, i32) {
    %c0_i32 = arith.constant 0 : i32
    %c0_i32_0 = arith.constant 0 : i32
    return %arg0, %arg1, %c0_i32 : i32, i32, i32
  }
}

module attributes {stable_mosaic.version = 11 : i64} {
  func.func @_conv_kernel(%arg0: i32, %arg1: i32, %arg2: memref<1x1x8x8xbf16, #tpu.memory_space<vmem>>, %arg3: memref<1x24x8xbf16, #tpu.memory_space<vmem>>, %arg4: memref<7x8x8xbf16, #tpu.memory_space<vmem>>, %arg5: memref<1x8xf32, #tpu.memory_space<vmem>>, %arg6: memref<8x8xbf16, #tpu.memory_space<vmem>>, %arg7: memref<1x8xf32, #tpu.memory_space<vmem>>, %arg8: memref<1x24x8xbf16, #tpu.memory_space<vmem>>) attributes {dimension_semantics = [#tpu.dimension_semantics<parallel>, #tpu.dimension_semantics<parallel>], iteration_bounds = array<i64: 2, 1>, scalar_prefetch = 0 : i64, scratch_operands = 0 : i64, tpu.core_type = #tpu.core_type<tc>, window_params = [{transform_indices = @transform_0, window_bounds = array<i64: 1, 1, 8, 8>}, {transform_indices = @transform_1, window_bounds = array<i64: 1, 24, 8>}, {pipeline_mode = #tpu.pipeline_mode<synchronous>, transform_indices = @transform_2, window_bounds = array<i64: 7, 8, 8>}, {pipeline_mode = #tpu.pipeline_mode<synchronous>, transform_indices = @transform_3, window_bounds = array<i64: 1, 8>}, {pipeline_mode = #tpu.pipeline_mode<synchronous>, transform_indices = @transform_4, window_bounds = array<i64: 8, 8>}, {pipeline_mode = #tpu.pipeline_mode<synchronous>, transform_indices = @transform_5, window_bounds = array<i64: 1, 8>}, {transform_indices = @transform_6, window_bounds = array<i64: 1, 24, 8>}]} {
    %c0 = arith.constant 0 : index
    %c0_0 = arith.constant 0 : index
    %c0_1 = arith.constant 0 : index
    %0 = vector.load %arg3[%c0, %c0_0, %c0_1] : memref<1x24x8xbf16, #tpu.memory_space<vmem>>, vector<1x24x8xbf16>
    %1 = vector.shape_cast %0 : vector<1x24x8xbf16> to vector<24x8xbf16>
    %2 = arith.extf %1 : vector<24x8xbf16> to vector<24x8xf32>
    %c0_2 = arith.constant 0 : index
    %c0_3 = arith.constant 0 : index
    %c0_4 = arith.constant 0 : index
    %c0_5 = arith.constant 0 : index
    %3 = vector.load %arg2[%c0_2, %c0_3, %c0_4, %c0_5] : memref<1x1x8x8xbf16, #tpu.memory_space<vmem>>, vector<1x1x8x8xbf16>
    %4 = vector.shape_cast %3 : vector<1x1x8x8xbf16> to vector<8x8xbf16>
    %5 = arith.extf %4 : vector<8x8xbf16> to vector<8x8xf32>
    %6 = tpu.concatenate %5, %2 in 0 : vector<8x8xf32>, vector<24x8xf32> -> vector<32x8xf32>
    %cst = arith.constant 0.000000e+00 : f32
    %7 = vector.broadcast %cst : f32 to vector<32x8xf32>
    %8 = arith.cmpf ogt, %6, %7 : vector<32x8xf32>
    %cst_6 = arith.constant 0.000000e+00 : f32
    %9 = vector.broadcast %cst_6 : f32 to vector<32x8xf32>
    %10 = arith.minimumf %6, %9 : vector<32x8xf32>
    %11 = math.exp %10 : vector<32x8xf32>
    %cst_7 = arith.constant 1.000000e+00 : f32
    %12 = vector.broadcast %cst_7 : f32 to vector<32x8xf32>
    %13 = arith.subf %11, %12 : vector<32x8xf32>
    %14 = arith.select %8, %6, %13 : vector<32x8xi1>, vector<32x8xf32>
    %15 = arith.truncf %14 : vector<32x8xf32> to vector<32x8xbf16>
    %cst_8 = arith.constant 0.000000e+00 : f32
    %16 = vector.broadcast %cst_8 : f32 to vector<24x8xf32>
    %17 = vector.extract_strided_slice %15 {offsets = [2, 0], sizes = [24, 8], strides = [1, 1]} : vector<32x8xbf16> to vector<24x8xbf16>
    %c0_9 = arith.constant 0 : index
    %c0_10 = arith.constant 0 : index
    %c0_11 = arith.constant 0 : index
    %18 = vector.load %arg4[%c0_9, %c0_10, %c0_11] : memref<7x8x8xbf16, #tpu.memory_space<vmem>>, vector<1x8x8xbf16>
    %19 = vector.shape_cast %18 : vector<1x8x8xbf16> to vector<8x8xbf16>
    %cst_12 = arith.constant dense<0.000000e+00> : vector<24x8xf32>
    %20 = tpu.matmul %17, %19, %cst_12 {dimension_numbers = #tpu.dot_dimension_numbers<[1], [0], [0], [1], [0, 0, 1, 1], [], []>} : vector<24x8xbf16>, vector<8x8xbf16>, vector<24x8xf32> -> vector<24x8xf32>
    %21 = arith.addf %16, %20 : vector<24x8xf32>
    %22 = vector.extract_strided_slice %15 {offsets = [3, 0], sizes = [24, 8], strides = [1, 1]} : vector<32x8xbf16> to vector<24x8xbf16>
    %c1 = arith.constant 1 : index
    %c0_13 = arith.constant 0 : index
    %c0_14 = arith.constant 0 : index
    %23 = vector.load %arg4[%c1, %c0_13, %c0_14] : memref<7x8x8xbf16, #tpu.memory_space<vmem>>, vector<1x8x8xbf16>
    %24 = vector.shape_cast %23 : vector<1x8x8xbf16> to vector<8x8xbf16>
    %cst_15 = arith.constant dense<0.000000e+00> : vector<24x8xf32>
    %25 = tpu.matmul %22, %24, %cst_15 {dimension_numbers = #tpu.dot_dimension_numbers<[1], [0], [0], [1], [0, 0, 1, 1], [], []>} : vector<24x8xbf16>, vector<8x8xbf16>, vector<24x8xf32> -> vector<24x8xf32>
    %26 = arith.addf %21, %25 : vector<24x8xf32>
    %27 = vector.extract_strided_slice %15 {offsets = [4, 0], sizes = [24, 8], strides = [1, 1]} : vector<32x8xbf16> to vector<24x8xbf16>
    %c2 = arith.constant 2 : index
    %c0_16 = arith.constant 0 : index
    %c0_17 = arith.constant 0 : index
    %28 = vector.load %arg4[%c2, %c0_16, %c0_17] : memref<7x8x8xbf16, #tpu.memory_space<vmem>>, vector<1x8x8xbf16>
    %29 = vector.shape_cast %28 : vector<1x8x8xbf16> to vector<8x8xbf16>
    %cst_18 = arith.constant dense<0.000000e+00> : vector<24x8xf32>
    %30 = tpu.matmul %27, %29, %cst_18 {dimension_numbers = #tpu.dot_dimension_numbers<[1], [0], [0], [1], [0, 0, 1, 1], [], []>} : vector<24x8xbf16>, vector<8x8xbf16>, vector<24x8xf32> -> vector<24x8xf32>
    %31 = arith.addf %26, %30 : vector<24x8xf32>
    %32 = vector.extract_strided_slice %15 {offsets = [5, 0], sizes = [24, 8], strides = [1, 1]} : vector<32x8xbf16> to vector<24x8xbf16>
    %c3 = arith.constant 3 : index
    %c0_19 = arith.constant 0 : index
    %c0_20 = arith.constant 0 : index
    %33 = vector.load %arg4[%c3, %c0_19, %c0_20] : memref<7x8x8xbf16, #tpu.memory_space<vmem>>, vector<1x8x8xbf16>
    %34 = vector.shape_cast %33 : vector<1x8x8xbf16> to vector<8x8xbf16>
    %cst_21 = arith.constant dense<0.000000e+00> : vector<24x8xf32>
    %35 = tpu.matmul %32, %34, %cst_21 {dimension_numbers = #tpu.dot_dimension_numbers<[1], [0], [0], [1], [0, 0, 1, 1], [], []>} : vector<24x8xbf16>, vector<8x8xbf16>, vector<24x8xf32> -> vector<24x8xf32>
    %36 = arith.addf %31, %35 : vector<24x8xf32>
    %37 = vector.extract_strided_slice %15 {offsets = [6, 0], sizes = [24, 8], strides = [1, 1]} : vector<32x8xbf16> to vector<24x8xbf16>
    %c4 = arith.constant 4 : index
    %c0_22 = arith.constant 0 : index
    %c0_23 = arith.constant 0 : index
    %38 = vector.load %arg4[%c4, %c0_22, %c0_23] : memref<7x8x8xbf16, #tpu.memory_space<vmem>>, vector<1x8x8xbf16>
    %39 = vector.shape_cast %38 : vector<1x8x8xbf16> to vector<8x8xbf16>
    %cst_24 = arith.constant dense<0.000000e+00> : vector<24x8xf32>
    %40 = tpu.matmul %37, %39, %cst_24 {dimension_numbers = #tpu.dot_dimension_numbers<[1], [0], [0], [1], [0, 0, 1, 1], [], []>} : vector<24x8xbf16>, vector<8x8xbf16>, vector<24x8xf32> -> vector<24x8xf32>
    %41 = arith.addf %36, %40 : vector<24x8xf32>
    %42 = vector.extract_strided_slice %15 {offsets = [7, 0], sizes = [24, 8], strides = [1, 1]} : vector<32x8xbf16> to vector<24x8xbf16>
    %c5 = arith.constant 5 : index
    %c0_25 = arith.constant 0 : index
    %c0_26 = arith.constant 0 : index
    %43 = vector.load %arg4[%c5, %c0_25, %c0_26] : memref<7x8x8xbf16, #tpu.memory_space<vmem>>, vector<1x8x8xbf16>
    %44 = vector.shape_cast %43 : vector<1x8x8xbf16> to vector<8x8xbf16>
    %cst_27 = arith.constant dense<0.000000e+00> : vector<24x8xf32>
    %45 = tpu.matmul %42, %44, %cst_27 {dimension_numbers = #tpu.dot_dimension_numbers<[1], [0], [0], [1], [0, 0, 1, 1], [], []>} : vector<24x8xbf16>, vector<8x8xbf16>, vector<24x8xf32> -> vector<24x8xf32>
    %46 = arith.addf %41, %45 : vector<24x8xf32>
    %47 = vector.extract_strided_slice %15 {offsets = [8, 0], sizes = [24, 8], strides = [1, 1]} : vector<32x8xbf16> to vector<24x8xbf16>
    %c6 = arith.constant 6 : index
    %c0_28 = arith.constant 0 : index
    %c0_29 = arith.constant 0 : index
    %48 = vector.load %arg4[%c6, %c0_28, %c0_29] : memref<7x8x8xbf16, #tpu.memory_space<vmem>>, vector<1x8x8xbf16>
    %49 = vector.shape_cast %48 : vector<1x8x8xbf16> to vector<8x8xbf16>
    %cst_30 = arith.constant dense<0.000000e+00> : vector<24x8xf32>
    %50 = tpu.matmul %47, %49, %cst_30 {dimension_numbers = #tpu.dot_dimension_numbers<[1], [0], [0], [1], [0, 0, 1, 1], [], []>} : vector<24x8xbf16>, vector<8x8xbf16>, vector<24x8xf32> -> vector<24x8xf32>
    %51 = arith.addf %46, %50 : vector<24x8xf32>
    %c0_31 = arith.constant 0 : index
    %c0_32 = arith.constant 0 : index
    %52 = vector.load %arg5[%c0_31, %c0_32] : memref<1x8xf32, #tpu.memory_space<vmem>>, vector<1x8xf32>
    %53 = vector.broadcast %52 : vector<1x8xf32> to vector<24x8xf32>
    %54 = arith.addf %51, %53 : vector<24x8xf32>
    %cst_33 = arith.constant 0.000000e+00 : f32
    %55 = vector.broadcast %cst_33 : f32 to vector<24x8xf32>
    %56 = arith.cmpf ogt, %54, %55 : vector<24x8xf32>
    %cst_34 = arith.constant 0.000000e+00 : f32
    %57 = vector.broadcast %cst_34 : f32 to vector<24x8xf32>
    %58 = arith.minimumf %54, %57 : vector<24x8xf32>
    %59 = math.exp %58 : vector<24x8xf32>
    %cst_35 = arith.constant 1.000000e+00 : f32
    %60 = vector.broadcast %cst_35 : f32 to vector<24x8xf32>
    %61 = arith.subf %59, %60 : vector<24x8xf32>
    %62 = arith.select %56, %54, %61 : vector<24x8xi1>, vector<24x8xf32>
    %63 = arith.truncf %62 : vector<24x8xf32> to vector<24x8xbf16>
    %c0_36 = arith.constant 0 : index
    %c0_37 = arith.constant 0 : index
    %64 = vector.load %arg6[%c0_36, %c0_37] : memref<8x8xbf16, #tpu.memory_space<vmem>>, vector<8x8xbf16>
    %cst_38 = arith.constant dense<0.000000e+00> : vector<24x8xf32>
    %65 = tpu.matmul %63, %64, %cst_38 {dimension_numbers = #tpu.dot_dimension_numbers<[1], [0], [0], [1], [0, 0, 1, 1], [], []>} : vector<24x8xbf16>, vector<8x8xbf16>, vector<24x8xf32> -> vector<24x8xf32>
    %c0_39 = arith.constant 0 : index
    %c0_40 = arith.constant 0 : index
    %66 = vector.load %arg7[%c0_39, %c0_40] : memref<1x8xf32, #tpu.memory_space<vmem>>, vector<1x8xf32>
    %67 = vector.broadcast %66 : vector<1x8xf32> to vector<24x8xf32>
    %68 = arith.addf %65, %67 : vector<24x8xf32>
    %69 = arith.addf %68, %2 : vector<24x8xf32>
    %70 = arith.truncf %69 : vector<24x8xf32> to vector<24x8xbf16>
    %c0_41 = arith.constant 0 : index
    %c0_42 = arith.constant 0 : index
    %c0_43 = arith.constant 0 : index
    %71 = vector.load %arg8[%c0_41, %c0_42, %c0_43] : memref<1x24x8xbf16, #tpu.memory_space<vmem>>, vector<1x24x8xbf16>
    %72 = vector.shape_cast %71 : vector<1x24x8xbf16> to vector<24x8xbf16>
    %73 = vector.shape_cast %70 : vector<24x8xbf16> to vector<1x24x8xbf16>
    tpu.vector_store %arg8[%c0_41, %c0_42, %c0_43], %73 {strides = array<i32>} : memref<1x24x8xbf16, #tpu.memory_space<vmem>>, vector<1x24x8xbf16>,
    return
  }
  func.func @transform_0(%arg0: i32, %arg1: i32) -> (i32, i32, i32, i32) {
    %c0_i32 = arith.constant 0 : i32
    %c0_i32_0 = arith.constant 0 : i32
    %c0_i32_1 = arith.constant 0 : i32
    return %arg0, %arg1, %c0_i32, %c0_i32_0 : i32, i32, i32, i32
  }
  func.func @transform_1(%arg0: i32, %arg1: i32) -> (i32, i32, i32) {
    %c0_i32 = arith.constant 0 : i32
    %c0_i32_0 = arith.constant 0 : i32
    return %arg0, %arg1, %c0_i32 : i32, i32, i32
  }
  func.func @transform_2(%arg0: i32, %arg1: i32) -> (i32, i32, i32) {
    %c0_i32 = arith.constant 0 : i32
    %c0_i32_0 = arith.constant 0 : i32
    %c0_i32_1 = arith.constant 0 : i32
    %c0_i32_2 = arith.constant 0 : i32
    return %c0_i32, %c0_i32_0, %c0_i32_1 : i32, i32, i32
  }
  func.func @transform_3(%arg0: i32, %arg1: i32) -> (i32, i32) {
    %c0_i32 = arith.constant 0 : i32
    %c0_i32_0 = arith.constant 0 : i32
    %c0_i32_1 = arith.constant 0 : i32
    return %c0_i32, %c0_i32_0 : i32, i32
  }
  func.func @transform_4(%arg0: i32, %arg1: i32) -> (i32, i32) {
    %c0_i32 = arith.constant 0 : i32
    %c0_i32_0 = arith.constant 0 : i32
    %c0_i32_1 = arith.constant 0 : i32
    return %c0_i32, %c0_i32_0 : i32, i32
  }
  func.func @transform_5(%arg0: i32, %arg1: i32) -> (i32, i32) {
    %c0_i32 = arith.constant 0 : i32
    %c0_i32_0 = arith.constant 0 : i32
    %c0_i32_1 = arith.constant 0 : i32
    return %c0_i32, %c0_i32_0 : i32, i32
  }
  func.func @transform_6(%arg0: i32, %arg1: i32) -> (i32, i32, i32) {
    %c0_i32 = arith.constant 0 : i32
    %c0_i32_0 = arith.constant 0 : i32
    return %arg0, %arg1, %c0_i32 : i32, i32, i32
  }
}

module attributes {stable_mosaic.version = 11 : i64} {
  func.func @_conv_kernel(%arg0: i32, %arg1: i32, %arg2: memref<1x1x56x8xbf16, #tpu.memory_space<vmem>>, %arg3: memref<1x24x8xbf16, #tpu.memory_space<vmem>>, %arg4: memref<7x8x8xbf16, #tpu.memory_space<vmem>>, %arg5: memref<1x8xf32, #tpu.memory_space<vmem>>, %arg6: memref<8x8xbf16, #tpu.memory_space<vmem>>, %arg7: memref<1x8xf32, #tpu.memory_space<vmem>>, %arg8: memref<1x24x8xbf16, #tpu.memory_space<vmem>>) attributes {dimension_semantics = [#tpu.dimension_semantics<parallel>, #tpu.dimension_semantics<parallel>], iteration_bounds = array<i64: 2, 1>, scalar_prefetch = 0 : i64, scratch_operands = 0 : i64, tpu.core_type = #tpu.core_type<tc>, window_params = [{transform_indices = @transform_0, window_bounds = array<i64: 1, 1, 56, 8>}, {transform_indices = @transform_1, window_bounds = array<i64: 1, 24, 8>}, {pipeline_mode = #tpu.pipeline_mode<synchronous>, transform_indices = @transform_2, window_bounds = array<i64: 7, 8, 8>}, {pipeline_mode = #tpu.pipeline_mode<synchronous>, transform_indices = @transform_3, window_bounds = array<i64: 1, 8>}, {pipeline_mode = #tpu.pipeline_mode<synchronous>, transform_indices = @transform_4, window_bounds = array<i64: 8, 8>}, {pipeline_mode = #tpu.pipeline_mode<synchronous>, transform_indices = @transform_5, window_bounds = array<i64: 1, 8>}, {transform_indices = @transform_6, window_bounds = array<i64: 1, 24, 8>}]} {
    %c0 = arith.constant 0 : index
    %c0_0 = arith.constant 0 : index
    %c0_1 = arith.constant 0 : index
    %0 = vector.load %arg3[%c0, %c0_0, %c0_1] : memref<1x24x8xbf16, #tpu.memory_space<vmem>>, vector<1x24x8xbf16>
    %1 = vector.shape_cast %0 : vector<1x24x8xbf16> to vector<24x8xbf16>
    %2 = arith.extf %1 : vector<24x8xbf16> to vector<24x8xf32>
    %c0_2 = arith.constant 0 : index
    %c0_3 = arith.constant 0 : index
    %c0_4 = arith.constant 0 : index
    %c0_5 = arith.constant 0 : index
    %3 = vector.load %arg2[%c0_2, %c0_3, %c0_4, %c0_5] : memref<1x1x56x8xbf16, #tpu.memory_space<vmem>>, vector<1x1x56x8xbf16>
    %4 = vector.shape_cast %3 : vector<1x1x56x8xbf16> to vector<56x8xbf16>
    %5 = arith.extf %4 : vector<56x8xbf16> to vector<56x8xf32>
    %6 = tpu.concatenate %5, %2 in 0 : vector<56x8xf32>, vector<24x8xf32> -> vector<80x8xf32>
    %cst = arith.constant 0.000000e+00 : f32
    %7 = vector.broadcast %cst : f32 to vector<80x8xf32>
    %8 = arith.cmpf ogt, %6, %7 : vector<80x8xf32>
    %cst_6 = arith.constant 0.000000e+00 : f32
    %9 = vector.broadcast %cst_6 : f32 to vector<80x8xf32>
    %10 = arith.minimumf %6, %9 : vector<80x8xf32>
    %11 = math.exp %10 : vector<80x8xf32>
    %cst_7 = arith.constant 1.000000e+00 : f32
    %12 = vector.broadcast %cst_7 : f32 to vector<80x8xf32>
    %13 = arith.subf %11, %12 : vector<80x8xf32>
    %14 = arith.select %8, %6, %13 : vector<80x8xi1>, vector<80x8xf32>
    %15 = arith.truncf %14 : vector<80x8xf32> to vector<80x8xbf16>
    %cst_8 = arith.constant 0.000000e+00 : f32
    %16 = vector.broadcast %cst_8 : f32 to vector<24x8xf32>
    %17 = vector.extract_strided_slice %15 {offsets = [2, 0], sizes = [24, 8], strides = [1, 1]} : vector<80x8xbf16> to vector<24x8xbf16>
    %c0_9 = arith.constant 0 : index
    %c0_10 = arith.constant 0 : index
    %c0_11 = arith.constant 0 : index
    %18 = vector.load %arg4[%c0_9, %c0_10, %c0_11] : memref<7x8x8xbf16, #tpu.memory_space<vmem>>, vector<1x8x8xbf16>
    %19 = vector.shape_cast %18 : vector<1x8x8xbf16> to vector<8x8xbf16>
    %cst_12 = arith.constant dense<0.000000e+00> : vector<24x8xf32>
    %20 = tpu.matmul %17, %19, %cst_12 {dimension_numbers = #tpu.dot_dimension_numbers<[1], [0], [0], [1], [0, 0, 1, 1], [], []>} : vector<24x8xbf16>, vector<8x8xbf16>, vector<24x8xf32> -> vector<24x8xf32>
    %21 = arith.addf %16, %20 : vector<24x8xf32>
    %22 = vector.extract_strided_slice %15 {offsets = [11, 0], sizes = [24, 8], strides = [1, 1]} : vector<80x8xbf16> to vector<24x8xbf16>
    %c1 = arith.constant 1 : index
    %c0_13 = arith.constant 0 : index
    %c0_14 = arith.constant 0 : index
    %23 = vector.load %arg4[%c1, %c0_13, %c0_14] : memref<7x8x8xbf16, #tpu.memory_space<vmem>>, vector<1x8x8xbf16>
    %24 = vector.shape_cast %23 : vector<1x8x8xbf16> to vector<8x8xbf16>
    %cst_15 = arith.constant dense<0.000000e+00> : vector<24x8xf32>
    %25 = tpu.matmul %22, %24, %cst_15 {dimension_numbers = #tpu.dot_dimension_numbers<[1], [0], [0], [1], [0, 0, 1, 1], [], []>} : vector<24x8xbf16>, vector<8x8xbf16>, vector<24x8xf32> -> vector<24x8xf32>
    %26 = arith.addf %21, %25 : vector<24x8xf32>
    %27 = vector.extract_strided_slice %15 {offsets = [20, 0], sizes = [24, 8], strides = [1, 1]} : vector<80x8xbf16> to vector<24x8xbf16>
    %c2 = arith.constant 2 : index
    %c0_16 = arith.constant 0 : index
    %c0_17 = arith.constant 0 : index
    %28 = vector.load %arg4[%c2, %c0_16, %c0_17] : memref<7x8x8xbf16, #tpu.memory_space<vmem>>, vector<1x8x8xbf16>
    %29 = vector.shape_cast %28 : vector<1x8x8xbf16> to vector<8x8xbf16>
    %cst_18 = arith.constant dense<0.000000e+00> : vector<24x8xf32>
    %30 = tpu.matmul %27, %29, %cst_18 {dimension_numbers = #tpu.dot_dimension_numbers<[1], [0], [0], [1], [0, 0, 1, 1], [], []>} : vector<24x8xbf16>, vector<8x8xbf16>, vector<24x8xf32> -> vector<24x8xf32>
    %31 = arith.addf %26, %30 : vector<24x8xf32>
    %32 = vector.extract_strided_slice %15 {offsets = [29, 0], sizes = [24, 8], strides = [1, 1]} : vector<80x8xbf16> to vector<24x8xbf16>
    %c3 = arith.constant 3 : index
    %c0_19 = arith.constant 0 : index
    %c0_20 = arith.constant 0 : index
    %33 = vector.load %arg4[%c3, %c0_19, %c0_20] : memref<7x8x8xbf16, #tpu.memory_space<vmem>>, vector<1x8x8xbf16>
    %34 = vector.shape_cast %33 : vector<1x8x8xbf16> to vector<8x8xbf16>
    %cst_21 = arith.constant dense<0.000000e+00> : vector<24x8xf32>
    %35 = tpu.matmul %32, %34, %cst_21 {dimension_numbers = #tpu.dot_dimension_numbers<[1], [0], [0], [1], [0, 0, 1, 1], [], []>} : vector<24x8xbf16>, vector<8x8xbf16>, vector<24x8xf32> -> vector<24x8xf32>
    %36 = arith.addf %31, %35 : vector<24x8xf32>
    %37 = vector.extract_strided_slice %15 {offsets = [38, 0], sizes = [24, 8], strides = [1, 1]} : vector<80x8xbf16> to vector<24x8xbf16>
    %c4 = arith.constant 4 : index
    %c0_22 = arith.constant 0 : index
    %c0_23 = arith.constant 0 : index
    %38 = vector.load %arg4[%c4, %c0_22, %c0_23] : memref<7x8x8xbf16, #tpu.memory_space<vmem>>, vector<1x8x8xbf16>
    %39 = vector.shape_cast %38 : vector<1x8x8xbf16> to vector<8x8xbf16>
    %cst_24 = arith.constant dense<0.000000e+00> : vector<24x8xf32>
    %40 = tpu.matmul %37, %39, %cst_24 {dimension_numbers = #tpu.dot_dimension_numbers<[1], [0], [0], [1], [0, 0, 1, 1], [], []>} : vector<24x8xbf16>, vector<8x8xbf16>, vector<24x8xf32> -> vector<24x8xf32>
    %41 = arith.addf %36, %40 : vector<24x8xf32>
    %42 = vector.extract_strided_slice %15 {offsets = [47, 0], sizes = [24, 8], strides = [1, 1]} : vector<80x8xbf16> to vector<24x8xbf16>
    %c5 = arith.constant 5 : index
    %c0_25 = arith.constant 0 : index
    %c0_26 = arith.constant 0 : index
    %43 = vector.load %arg4[%c5, %c0_25, %c0_26] : memref<7x8x8xbf16, #tpu.memory_space<vmem>>, vector<1x8x8xbf16>
    %44 = vector.shape_cast %43 : vector<1x8x8xbf16> to vector<8x8xbf16>
    %cst_27 = arith.constant dense<0.000000e+00> : vector<24x8xf32>
    %45 = tpu.matmul %42, %44, %cst_27 {dimension_numbers = #tpu.dot_dimension_numbers<[1], [0], [0], [1], [0, 0, 1, 1], [], []>} : vector<24x8xbf16>, vector<8x8xbf16>, vector<24x8xf32> -> vector<24x8xf32>
    %46 = arith.addf %41, %45 : vector<24x8xf32>
    %47 = vector.extract_strided_slice %15 {offsets = [56, 0], sizes = [24, 8], strides = [1, 1]} : vector<80x8xbf16> to vector<24x8xbf16>
    %c6 = arith.constant 6 : index
    %c0_28 = arith.constant 0 : index
    %c0_29 = arith.constant 0 : index
    %48 = vector.load %arg4[%c6, %c0_28, %c0_29] : memref<7x8x8xbf16, #tpu.memory_space<vmem>>, vector<1x8x8xbf16>
    %49 = vector.shape_cast %48 : vector<1x8x8xbf16> to vector<8x8xbf16>
    %cst_30 = arith.constant dense<0.000000e+00> : vector<24x8xf32>
    %50 = tpu.matmul %47, %49, %cst_30 {dimension_numbers = #tpu.dot_dimension_numbers<[1], [0], [0], [1], [0, 0, 1, 1], [], []>} : vector<24x8xbf16>, vector<8x8xbf16>, vector<24x8xf32> -> vector<24x8xf32>
    %51 = arith.addf %46, %50 : vector<24x8xf32>
    %c0_31 = arith.constant 0 : index
    %c0_32 = arith.constant 0 : index
    %52 = vector.load %arg5[%c0_31, %c0_32] : memref<1x8xf32, #tpu.memory_space<vmem>>, vector<1x8xf32>
    %53 = vector.broadcast %52 : vector<1x8xf32> to vector<24x8xf32>
    %54 = arith.addf %51, %53 : vector<24x8xf32>
    %cst_33 = arith.constant 0.000000e+00 : f32
    %55 = vector.broadcast %cst_33 : f32 to vector<24x8xf32>
    %56 = arith.cmpf ogt, %54, %55 : vector<24x8xf32>
    %cst_34 = arith.constant 0.000000e+00 : f32
    %57 = vector.broadcast %cst_34 : f32 to vector<24x8xf32>
    %58 = arith.minimumf %54, %57 : vector<24x8xf32>
    %59 = math.exp %58 : vector<24x8xf32>
    %cst_35 = arith.constant 1.000000e+00 : f32
    %60 = vector.broadcast %cst_35 : f32 to vector<24x8xf32>
    %61 = arith.subf %59, %60 : vector<24x8xf32>
    %62 = arith.select %56, %54, %61 : vector<24x8xi1>, vector<24x8xf32>
    %63 = arith.truncf %62 : vector<24x8xf32> to vector<24x8xbf16>
    %c0_36 = arith.constant 0 : index
    %c0_37 = arith.constant 0 : index
    %64 = vector.load %arg6[%c0_36, %c0_37] : memref<8x8xbf16, #tpu.memory_space<vmem>>, vector<8x8xbf16>
    %cst_38 = arith.constant dense<0.000000e+00> : vector<24x8xf32>
    %65 = tpu.matmul %63, %64, %cst_38 {dimension_numbers = #tpu.dot_dimension_numbers<[1], [0], [0], [1], [0, 0, 1, 1], [], []>} : vector<24x8xbf16>, vector<8x8xbf16>, vector<24x8xf32> -> vector<24x8xf32>
    %c0_39 = arith.constant 0 : index
    %c0_40 = arith.constant 0 : index
    %66 = vector.load %arg7[%c0_39, %c0_40] : memref<1x8xf32, #tpu.memory_space<vmem>>, vector<1x8xf32>
    %67 = vector.broadcast %66 : vector<1x8xf32> to vector<24x8xf32>
    %68 = arith.addf %65, %67 : vector<24x8xf32>
    %69 = arith.addf %68, %2 : vector<24x8xf32>
    %70 = arith.truncf %69 : vector<24x8xf32> to vector<24x8xbf16>
    %c0_41 = arith.constant 0 : index
    %c0_42 = arith.constant 0 : index
    %c0_43 = arith.constant 0 : index
    %71 = vector.load %arg8[%c0_41, %c0_42, %c0_43] : memref<1x24x8xbf16, #tpu.memory_space<vmem>>, vector<1x24x8xbf16>
    %72 = vector.shape_cast %71 : vector<1x24x8xbf16> to vector<24x8xbf16>
    %73 = vector.shape_cast %70 : vector<24x8xbf16> to vector<1x24x8xbf16>
    tpu.vector_store %arg8[%c0_41, %c0_42, %c0_43], %73 {strides = array<i32>} : memref<1x24x8xbf16, #tpu.memory_space<vmem>>, vector<1x24x8xbf16>,
    return
  }
  func.func @transform_0(%arg0: i32, %arg1: i32) -> (i32, i32, i32, i32) {
    %c0_i32 = arith.constant 0 : i32
    %c0_i32_0 = arith.constant 0 : i32
    %c0_i32_1 = arith.constant 0 : i32
    return %arg0, %arg1, %c0_i32, %c0_i32_0 : i32, i32, i32, i32
  }
  func.func @transform_1(%arg0: i32, %arg1: i32) -> (i32, i32, i32) {
    %c0_i32 = arith.constant 0 : i32
    %c0_i32_0 = arith.constant 0 : i32
    return %arg0, %arg1, %c0_i32 : i32, i32, i32
  }
  func.func @transform_2(%arg0: i32, %arg1: i32) -> (i32, i32, i32) {
    %c0_i32 = arith.constant 0 : i32
    %c0_i32_0 = arith.constant 0 : i32
    %c0_i32_1 = arith.constant 0 : i32
    %c0_i32_2 = arith.constant 0 : i32
    return %c0_i32, %c0_i32_0, %c0_i32_1 : i32, i32, i32
  }
  func.func @transform_3(%arg0: i32, %arg1: i32) -> (i32, i32) {
    %c0_i32 = arith.constant 0 : i32
    %c0_i32_0 = arith.constant 0 : i32
    %c0_i32_1 = arith.constant 0 : i32
    return %c0_i32, %c0_i32_0 : i32, i32
  }
  func.func @transform_4(%arg0: i32, %arg1: i32) -> (i32, i32) {
    %c0_i32 = arith.constant 0 : i32
    %c0_i32_0 = arith.constant 0 : i32
    %c0_i32_1 = arith.constant 0 : i32
    return %c0_i32, %c0_i32_0 : i32, i32
  }
  func.func @transform_5(%arg0: i32, %arg1: i32) -> (i32, i32) {
    %c0_i32 = arith.constant 0 : i32
    %c0_i32_0 = arith.constant 0 : i32
    %c0_i32_1 = arith.constant 0 : i32
    return %c0_i32, %c0_i32_0 : i32, i32
  }
  func.func @transform_6(%arg0: i32, %arg1: i32) -> (i32, i32, i32) {
    %c0_i32 = arith.constant 0 : i32
    %c0_i32_0 = arith.constant 0 : i32
    return %arg0, %arg1, %c0_i32 : i32, i32, i32
  }
}

module attributes {stable_mosaic.version = 11 : i64} {
  func.func @_conv_kernel(%arg0: i32, %arg1: i32, %arg2: memref<1x1x8x16xbf16, #tpu.memory_space<vmem>>, %arg3: memref<1x16x16xbf16, #tpu.memory_space<vmem>>, %arg4: memref<2x16x16xbf16, #tpu.memory_space<vmem>>, %arg5: memref<1x16xf32, #tpu.memory_space<vmem>>, %arg6: memref<1x16x16xbf16, #tpu.memory_space<vmem>>) attributes {dimension_semantics = [#tpu.dimension_semantics<parallel>, #tpu.dimension_semantics<parallel>], iteration_bounds = array<i64: 2, 1>, scalar_prefetch = 0 : i64, scratch_operands = 0 : i64, tpu.core_type = #tpu.core_type<tc>, window_params = [{transform_indices = @transform_0, window_bounds = array<i64: 1, 1, 8, 16>}, {transform_indices = @transform_1, window_bounds = array<i64: 1, 16, 16>}, {pipeline_mode = #tpu.pipeline_mode<synchronous>, transform_indices = @transform_2, window_bounds = array<i64: 2, 16, 16>}, {pipeline_mode = #tpu.pipeline_mode<synchronous>, transform_indices = @transform_3, window_bounds = array<i64: 1, 16>}, {transform_indices = @transform_4, window_bounds = array<i64: 1, 16, 16>}]} {
    %c0 = arith.constant 0 : index
    %c0_0 = arith.constant 0 : index
    %c0_1 = arith.constant 0 : index
    %0 = vector.load %arg3[%c0, %c0_0, %c0_1] : memref<1x16x16xbf16, #tpu.memory_space<vmem>>, vector<1x16x16xbf16>
    %1 = vector.shape_cast %0 : vector<1x16x16xbf16> to vector<16x16xbf16>
    %2 = arith.extf %1 : vector<16x16xbf16> to vector<16x16xf32>
    %c0_2 = arith.constant 0 : index
    %c0_3 = arith.constant 0 : index
    %c0_4 = arith.constant 0 : index
    %c0_5 = arith.constant 0 : index
    %3 = vector.load %arg2[%c0_2, %c0_3, %c0_4, %c0_5] : memref<1x1x8x16xbf16, #tpu.memory_space<vmem>>, vector<1x1x8x16xbf16>
    %4 = vector.shape_cast %3 : vector<1x1x8x16xbf16> to vector<8x16xbf16>
    %5 = arith.extf %4 : vector<8x16xbf16> to vector<8x16xf32>
    %6 = tpu.concatenate %5, %2 in 0 : vector<8x16xf32>, vector<16x16xf32> -> vector<24x16xf32>
    %7 = arith.truncf %6 : vector<24x16xf32> to vector<24x16xbf16>
    %cst = arith.constant 0.000000e+00 : f32
    %8 = vector.broadcast %cst : f32 to vector<16x16xf32>
    %9 = vector.extract_strided_slice %7 {offsets = [7, 0], sizes = [16, 16], strides = [1, 1]} : vector<24x16xbf16> to vector<16x16xbf16>
    %c0_6 = arith.constant 0 : index
    %c0_7 = arith.constant 0 : index
    %c0_8 = arith.constant 0 : index
    %10 = vector.load %arg4[%c0_6, %c0_7, %c0_8] : memref<2x16x16xbf16, #tpu.memory_space<vmem>>, vector<1x16x16xbf16>
    %11 = vector.shape_cast %10 : vector<1x16x16xbf16> to vector<16x16xbf16>
    %cst_9 = arith.constant dense<0.000000e+00> : vector<16x16xf32>
    %12 = tpu.matmul %9, %11, %cst_9 {dimension_numbers = #tpu.dot_dimension_numbers<[1], [0], [0], [1], [0, 0, 1, 1], [], []>} : vector<16x16xbf16>, vector<16x16xbf16>, vector<16x16xf32> -> vector<16x16xf32>
    %13 = arith.addf %8, %12 : vector<16x16xf32>
    %14 = vector.extract_strided_slice %7 {offsets = [8, 0], sizes = [16, 16], strides = [1, 1]} : vector<24x16xbf16> to vector<16x16xbf16>
    %c1 = arith.constant 1 : index
    %c0_10 = arith.constant 0 : index
    %c0_11 = arith.constant 0 : index
    %15 = vector.load %arg4[%c1, %c0_10, %c0_11] : memref<2x16x16xbf16, #tpu.memory_space<vmem>>, vector<1x16x16xbf16>
    %16 = vector.shape_cast %15 : vector<1x16x16xbf16> to vector<16x16xbf16>
    %cst_12 = arith.constant dense<0.000000e+00> : vector<16x16xf32>
    %17 = tpu.matmul %14, %16, %cst_12 {dimension_numbers = #tpu.dot_dimension_numbers<[1], [0], [0], [1], [0, 0, 1, 1], [], []>} : vector<16x16xbf16>, vector<16x16xbf16>, vector<16x16xf32> -> vector<16x16xf32>
    %18 = arith.addf %13, %17 : vector<16x16xf32>
    %c0_13 = arith.constant 0 : index
    %c0_14 = arith.constant 0 : index
    %19 = vector.load %arg5[%c0_13, %c0_14] : memref<1x16xf32, #tpu.memory_space<vmem>>, vector<1x16xf32>
    %20 = vector.broadcast %19 : vector<1x16xf32> to vector<16x16xf32>
    %21 = arith.addf %18, %20 : vector<16x16xf32>
    %22 = arith.truncf %21 : vector<16x16xf32> to vector<16x16xbf16>
    %c0_15 = arith.constant 0 : index
    %c0_16 = arith.constant 0 : index
    %c0_17 = arith.constant 0 : index
    %23 = vector.load %arg6[%c0_15, %c0_16, %c0_17] : memref<1x16x16xbf16, #tpu.memory_space<vmem>>, vector<1x16x16xbf16>
    %24 = vector.shape_cast %23 : vector<1x16x16xbf16> to vector<16x16xbf16>
    %25 = vector.shape_cast %22 : vector<16x16xbf16> to vector<1x16x16xbf16>
    tpu.vector_store %arg6[%c0_15, %c0_16, %c0_17], %25 {strides = array<i32>} : memref<1x16x16xbf16, #tpu.memory_space<vmem>>, vector<1x16x16xbf16>,
    return
  }
  func.func @transform_0(%arg0: i32, %arg1: i32) -> (i32, i32, i32, i32) {
    %c0_i32 = arith.constant 0 : i32
    %c0_i32_0 = arith.constant 0 : i32
    %c0_i32_1 = arith.constant 0 : i32
    return %arg0, %arg1, %c0_i32, %c0_i32_0 : i32, i32, i32, i32
  }
  func.func @transform_1(%arg0: i32, %arg1: i32) -> (i32, i32, i32) {
    %c0_i32 = arith.constant 0 : i32
    %c0_i32_0 = arith.constant 0 : i32
    return %arg0, %arg1, %c0_i32 : i32, i32, i32
  }
  func.func @transform_2(%arg0: i32, %arg1: i32) -> (i32, i32, i32) {
    %c0_i32 = arith.constant 0 : i32
    %c0_i32_0 = arith.constant 0 : i32
    %c0_i32_1 = arith.constant 0 : i32
    %c0_i32_2 = arith.constant 0 : i32
    return %c0_i32, %c0_i32_0, %c0_i32_1 : i32, i32, i32
  }
  func.func @transform_3(%arg0: i32, %arg1: i32) -> (i32, i32) {
    %c0_i32 = arith.constant 0 : i32
    %c0_i32_0 = arith.constant 0 : i32
    %c0_i32_1 = arith.constant 0 : i32
    return %c0_i32, %c0_i32_0 : i32, i32
  }
  func.func @transform_4(%arg0: i32, %arg1: i32) -> (i32, i32, i32) {
    %c0_i32 = arith.constant 0 : i32
    %c0_i32_0 = arith.constant 0 : i32
    return %arg0, %arg1, %c0_i32 : i32, i32, i32
  }
}

module attributes {stable_mosaic.version = 11 : i64} {
  func.func @_conv_kernel(%arg0: i32, %arg1: i32, %arg2: memref<1x1x8x16xbf16, #tpu.memory_space<vmem>>, %arg3: memref<1x16x16xbf16, #tpu.memory_space<vmem>>, %arg4: memref<7x16x16xbf16, #tpu.memory_space<vmem>>, %arg5: memref<1x16xf32, #tpu.memory_space<vmem>>, %arg6: memref<16x16xbf16, #tpu.memory_space<vmem>>, %arg7: memref<1x16xf32, #tpu.memory_space<vmem>>, %arg8: memref<1x16x16xbf16, #tpu.memory_space<vmem>>) attributes {dimension_semantics = [#tpu.dimension_semantics<parallel>, #tpu.dimension_semantics<parallel>], iteration_bounds = array<i64: 2, 1>, scalar_prefetch = 0 : i64, scratch_operands = 0 : i64, tpu.core_type = #tpu.core_type<tc>, window_params = [{transform_indices = @transform_0, window_bounds = array<i64: 1, 1, 8, 16>}, {transform_indices = @transform_1, window_bounds = array<i64: 1, 16, 16>}, {pipeline_mode = #tpu.pipeline_mode<synchronous>, transform_indices = @transform_2, window_bounds = array<i64: 7, 16, 16>}, {pipeline_mode = #tpu.pipeline_mode<synchronous>, transform_indices = @transform_3, window_bounds = array<i64: 1, 16>}, {pipeline_mode = #tpu.pipeline_mode<synchronous>, transform_indices = @transform_4, window_bounds = array<i64: 16, 16>}, {pipeline_mode = #tpu.pipeline_mode<synchronous>, transform_indices = @transform_5, window_bounds = array<i64: 1, 16>}, {transform_indices = @transform_6, window_bounds = array<i64: 1, 16, 16>}]} {
    %c0 = arith.constant 0 : index
    %c0_0 = arith.constant 0 : index
    %c0_1 = arith.constant 0 : index
    %0 = vector.load %arg3[%c0, %c0_0, %c0_1] : memref<1x16x16xbf16, #tpu.memory_space<vmem>>, vector<1x16x16xbf16>
    %1 = vector.shape_cast %0 : vector<1x16x16xbf16> to vector<16x16xbf16>
    %2 = arith.extf %1 : vector<16x16xbf16> to vector<16x16xf32>
    %c0_2 = arith.constant 0 : index
    %c0_3 = arith.constant 0 : index
    %c0_4 = arith.constant 0 : index
    %c0_5 = arith.constant 0 : index
    %3 = vector.load %arg2[%c0_2, %c0_3, %c0_4, %c0_5] : memref<1x1x8x16xbf16, #tpu.memory_space<vmem>>, vector<1x1x8x16xbf16>
    %4 = vector.shape_cast %3 : vector<1x1x8x16xbf16> to vector<8x16xbf16>
    %5 = arith.extf %4 : vector<8x16xbf16> to vector<8x16xf32>
    %6 = tpu.concatenate %5, %2 in 0 : vector<8x16xf32>, vector<16x16xf32> -> vector<24x16xf32>
    %cst = arith.constant 0.000000e+00 : f32
    %7 = vector.broadcast %cst : f32 to vector<24x16xf32>
    %8 = arith.cmpf ogt, %6, %7 : vector<24x16xf32>
    %cst_6 = arith.constant 0.000000e+00 : f32
    %9 = vector.broadcast %cst_6 : f32 to vector<24x16xf32>
    %10 = arith.minimumf %6, %9 : vector<24x16xf32>
    %11 = math.exp %10 : vector<24x16xf32>
    %cst_7 = arith.constant 1.000000e+00 : f32
    %12 = vector.broadcast %cst_7 : f32 to vector<24x16xf32>
    %13 = arith.subf %11, %12 : vector<24x16xf32>
    %14 = arith.select %8, %6, %13 : vector<24x16xi1>, vector<24x16xf32>
    %15 = arith.truncf %14 : vector<24x16xf32> to vector<24x16xbf16>
    %cst_8 = arith.constant 0.000000e+00 : f32
    %16 = vector.broadcast %cst_8 : f32 to vector<16x16xf32>
    %17 = vector.extract_strided_slice %15 {offsets = [2, 0], sizes = [16, 16], strides = [1, 1]} : vector<24x16xbf16> to vector<16x16xbf16>
    %c0_9 = arith.constant 0 : index
    %c0_10 = arith.constant 0 : index
    %c0_11 = arith.constant 0 : index
    %18 = vector.load %arg4[%c0_9, %c0_10, %c0_11] : memref<7x16x16xbf16, #tpu.memory_space<vmem>>, vector<1x16x16xbf16>
    %19 = vector.shape_cast %18 : vector<1x16x16xbf16> to vector<16x16xbf16>
    %cst_12 = arith.constant dense<0.000000e+00> : vector<16x16xf32>
    %20 = tpu.matmul %17, %19, %cst_12 {dimension_numbers = #tpu.dot_dimension_numbers<[1], [0], [0], [1], [0, 0, 1, 1], [], []>} : vector<16x16xbf16>, vector<16x16xbf16>, vector<16x16xf32> -> vector<16x16xf32>
    %21 = arith.addf %16, %20 : vector<16x16xf32>
    %22 = vector.extract_strided_slice %15 {offsets = [3, 0], sizes = [16, 16], strides = [1, 1]} : vector<24x16xbf16> to vector<16x16xbf16>
    %c1 = arith.constant 1 : index
    %c0_13 = arith.constant 0 : index
    %c0_14 = arith.constant 0 : index
    %23 = vector.load %arg4[%c1, %c0_13, %c0_14] : memref<7x16x16xbf16, #tpu.memory_space<vmem>>, vector<1x16x16xbf16>
    %24 = vector.shape_cast %23 : vector<1x16x16xbf16> to vector<16x16xbf16>
    %cst_15 = arith.constant dense<0.000000e+00> : vector<16x16xf32>
    %25 = tpu.matmul %22, %24, %cst_15 {dimension_numbers = #tpu.dot_dimension_numbers<[1], [0], [0], [1], [0, 0, 1, 1], [], []>} : vector<16x16xbf16>, vector<16x16xbf16>, vector<16x16xf32> -> vector<16x16xf32>
    %26 = arith.addf %21, %25 : vector<16x16xf32>
    %27 = vector.extract_strided_slice %15 {offsets = [4, 0], sizes = [16, 16], strides = [1, 1]} : vector<24x16xbf16> to vector<16x16xbf16>
    %c2 = arith.constant 2 : index
    %c0_16 = arith.constant 0 : index
    %c0_17 = arith.constant 0 : index
    %28 = vector.load %arg4[%c2, %c0_16, %c0_17] : memref<7x16x16xbf16, #tpu.memory_space<vmem>>, vector<1x16x16xbf16>
    %29 = vector.shape_cast %28 : vector<1x16x16xbf16> to vector<16x16xbf16>
    %cst_18 = arith.constant dense<0.000000e+00> : vector<16x16xf32>
    %30 = tpu.matmul %27, %29, %cst_18 {dimension_numbers = #tpu.dot_dimension_numbers<[1], [0], [0], [1], [0, 0, 1, 1], [], []>} : vector<16x16xbf16>, vector<16x16xbf16>, vector<16x16xf32> -> vector<16x16xf32>
    %31 = arith.addf %26, %30 : vector<16x16xf32>
    %32 = vector.extract_strided_slice %15 {offsets = [5, 0], sizes = [16, 16], strides = [1, 1]} : vector<24x16xbf16> to vector<16x16xbf16>
    %c3 = arith.constant 3 : index
    %c0_19 = arith.constant 0 : index
    %c0_20 = arith.constant 0 : index
    %33 = vector.load %arg4[%c3, %c0_19, %c0_20] : memref<7x16x16xbf16, #tpu.memory_space<vmem>>, vector<1x16x16xbf16>
    %34 = vector.shape_cast %33 : vector<1x16x16xbf16> to vector<16x16xbf16>
    %cst_21 = arith.constant dense<0.000000e+00> : vector<16x16xf32>
    %35 = tpu.matmul %32, %34, %cst_21 {dimension_numbers = #tpu.dot_dimension_numbers<[1], [0], [0], [1], [0, 0, 1, 1], [], []>} : vector<16x16xbf16>, vector<16x16xbf16>, vector<16x16xf32> -> vector<16x16xf32>
    %36 = arith.addf %31, %35 : vector<16x16xf32>
    %37 = vector.extract_strided_slice %15 {offsets = [6, 0], sizes = [16, 16], strides = [1, 1]} : vector<24x16xbf16> to vector<16x16xbf16>
    %c4 = arith.constant 4 : index
    %c0_22 = arith.constant 0 : index
    %c0_23 = arith.constant 0 : index
    %38 = vector.load %arg4[%c4, %c0_22, %c0_23] : memref<7x16x16xbf16, #tpu.memory_space<vmem>>, vector<1x16x16xbf16>
    %39 = vector.shape_cast %38 : vector<1x16x16xbf16> to vector<16x16xbf16>
    %cst_24 = arith.constant dense<0.000000e+00> : vector<16x16xf32>
    %40 = tpu.matmul %37, %39, %cst_24 {dimension_numbers = #tpu.dot_dimension_numbers<[1], [0], [0], [1], [0, 0, 1, 1], [], []>} : vector<16x16xbf16>, vector<16x16xbf16>, vector<16x16xf32> -> vector<16x16xf32>
    %41 = arith.addf %36, %40 : vector<16x16xf32>
    %42 = vector.extract_strided_slice %15 {offsets = [7, 0], sizes = [16, 16], strides = [1, 1]} : vector<24x16xbf16> to vector<16x16xbf16>
    %c5 = arith.constant 5 : index
    %c0_25 = arith.constant 0 : index
    %c0_26 = arith.constant 0 : index
    %43 = vector.load %arg4[%c5, %c0_25, %c0_26] : memref<7x16x16xbf16, #tpu.memory_space<vmem>>, vector<1x16x16xbf16>
    %44 = vector.shape_cast %43 : vector<1x16x16xbf16> to vector<16x16xbf16>
    %cst_27 = arith.constant dense<0.000000e+00> : vector<16x16xf32>
    %45 = tpu.matmul %42, %44, %cst_27 {dimension_numbers = #tpu.dot_dimension_numbers<[1], [0], [0], [1], [0, 0, 1, 1], [], []>} : vector<16x16xbf16>, vector<16x16xbf16>, vector<16x16xf32> -> vector<16x16xf32>
    %46 = arith.addf %41, %45 : vector<16x16xf32>
    %47 = vector.extract_strided_slice %15 {offsets = [8, 0], sizes = [16, 16], strides = [1, 1]} : vector<24x16xbf16> to vector<16x16xbf16>
    %c6 = arith.constant 6 : index
    %c0_28 = arith.constant 0 : index
    %c0_29 = arith.constant 0 : index
    %48 = vector.load %arg4[%c6, %c0_28, %c0_29] : memref<7x16x16xbf16, #tpu.memory_space<vmem>>, vector<1x16x16xbf16>
    %49 = vector.shape_cast %48 : vector<1x16x16xbf16> to vector<16x16xbf16>
    %cst_30 = arith.constant dense<0.000000e+00> : vector<16x16xf32>
    %50 = tpu.matmul %47, %49, %cst_30 {dimension_numbers = #tpu.dot_dimension_numbers<[1], [0], [0], [1], [0, 0, 1, 1], [], []>} : vector<16x16xbf16>, vector<16x16xbf16>, vector<16x16xf32> -> vector<16x16xf32>
    %51 = arith.addf %46, %50 : vector<16x16xf32>
    %c0_31 = arith.constant 0 : index
    %c0_32 = arith.constant 0 : index
    %52 = vector.load %arg5[%c0_31, %c0_32] : memref<1x16xf32, #tpu.memory_space<vmem>>, vector<1x16xf32>
    %53 = vector.broadcast %52 : vector<1x16xf32> to vector<16x16xf32>
    %54 = arith.addf %51, %53 : vector<16x16xf32>
    %cst_33 = arith.constant 0.000000e+00 : f32
    %55 = vector.broadcast %cst_33 : f32 to vector<16x16xf32>
    %56 = arith.cmpf ogt, %54, %55 : vector<16x16xf32>
    %cst_34 = arith.constant 0.000000e+00 : f32
    %57 = vector.broadcast %cst_34 : f32 to vector<16x16xf32>
    %58 = arith.minimumf %54, %57 : vector<16x16xf32>
    %59 = math.exp %58 : vector<16x16xf32>
    %cst_35 = arith.constant 1.000000e+00 : f32
    %60 = vector.broadcast %cst_35 : f32 to vector<16x16xf32>
    %61 = arith.subf %59, %60 : vector<16x16xf32>
    %62 = arith.select %56, %54, %61 : vector<16x16xi1>, vector<16x16xf32>
    %63 = arith.truncf %62 : vector<16x16xf32> to vector<16x16xbf16>
    %c0_36 = arith.constant 0 : index
    %c0_37 = arith.constant 0 : index
    %64 = vector.load %arg6[%c0_36, %c0_37] : memref<16x16xbf16, #tpu.memory_space<vmem>>, vector<16x16xbf16>
    %cst_38 = arith.constant dense<0.000000e+00> : vector<16x16xf32>
    %65 = tpu.matmul %63, %64, %cst_38 {dimension_numbers = #tpu.dot_dimension_numbers<[1], [0], [0], [1], [0, 0, 1, 1], [], []>} : vector<16x16xbf16>, vector<16x16xbf16>, vector<16x16xf32> -> vector<16x16xf32>
    %c0_39 = arith.constant 0 : index
    %c0_40 = arith.constant 0 : index
    %66 = vector.load %arg7[%c0_39, %c0_40] : memref<1x16xf32, #tpu.memory_space<vmem>>, vector<1x16xf32>
    %67 = vector.broadcast %66 : vector<1x16xf32> to vector<16x16xf32>
    %68 = arith.addf %65, %67 : vector<16x16xf32>
    %69 = arith.addf %68, %2 : vector<16x16xf32>
    %70 = arith.truncf %69 : vector<16x16xf32> to vector<16x16xbf16>
    %c0_41 = arith.constant 0 : index
    %c0_42 = arith.constant 0 : index
    %c0_43 = arith.constant 0 : index
    %71 = vector.load %arg8[%c0_41, %c0_42, %c0_43] : memref<1x16x16xbf16, #tpu.memory_space<vmem>>, vector<1x16x16xbf16>
    %72 = vector.shape_cast %71 : vector<1x16x16xbf16> to vector<16x16xbf16>
    %73 = vector.shape_cast %70 : vector<16x16xbf16> to vector<1x16x16xbf16>
    tpu.vector_store %arg8[%c0_41, %c0_42, %c0_43], %73 {strides = array<i32>} : memref<1x16x16xbf16, #tpu.memory_space<vmem>>, vector<1x16x16xbf16>,
    return
  }
  func.func @transform_0(%arg0: i32, %arg1: i32) -> (i32, i32, i32, i32) {
    %c0_i32 = arith.constant 0 : i32
    %c0_i32_0 = arith.constant 0 : i32
    %c0_i32_1 = arith.constant 0 : i32
    return %arg0, %arg1, %c0_i32, %c0_i32_0 : i32, i32, i32, i32
  }
  func.func @transform_1(%arg0: i32, %arg1: i32) -> (i32, i32, i32) {
    %c0_i32 = arith.constant 0 : i32
    %c0_i32_0 = arith.constant 0 : i32
    return %arg0, %arg1, %c0_i32 : i32, i32, i32
  }
  func.func @transform_2(%arg0: i32, %arg1: i32) -> (i32, i32, i32) {
    %c0_i32 = arith.constant 0 : i32
    %c0_i32_0 = arith.constant 0 : i32
    %c0_i32_1 = arith.constant 0 : i32
    %c0_i32_2 = arith.constant 0 : i32
    return %c0_i32, %c0_i32_0, %c0_i32_1 : i32, i32, i32
  }
  func.func @transform_3(%arg0: i32, %arg1: i32) -> (i32, i32) {
    %c0_i32 = arith.constant 0 : i32
    %c0_i32_0 = arith.constant 0 : i32
    %c0_i32_1 = arith.constant 0 : i32
    return %c0_i32, %c0_i32_0 : i32, i32
  }
  func.func @transform_4(%arg0: i32, %arg1: i32) -> (i32, i32) {
    %c0_i32 = arith.constant 0 : i32
    %c0_i32_0 = arith.constant 0 : i32
    %c0_i32_1 = arith.constant 0 : i32
    return %c0_i32, %c0_i32_0 : i32, i32
  }
  func.func @transform_5(%arg0: i32, %arg1: i32) -> (i32, i32) {
    %c0_i32 = arith.constant 0 : i32
    %c0_i32_0 = arith.constant 0 : i32
    %c0_i32_1 = arith.constant 0 : i32
    return %c0_i32, %c0_i32_0 : i32, i32
  }
  func.func @transform_6(%arg0: i32, %arg1: i32) -> (i32, i32, i32) {
    %c0_i32 = arith.constant 0 : i32
    %c0_i32_0 = arith.constant 0 : i32
    return %arg0, %arg1, %c0_i32 : i32, i32, i32
  }
}

module attributes {stable_mosaic.version = 11 : i64} {
  func.func @_conv_kernel(%arg0: i32, %arg1: i32, %arg2: memref<1x1x24x16xbf16, #tpu.memory_space<vmem>>, %arg3: memref<1x16x16xbf16, #tpu.memory_space<vmem>>, %arg4: memref<7x16x16xbf16, #tpu.memory_space<vmem>>, %arg5: memref<1x16xf32, #tpu.memory_space<vmem>>, %arg6: memref<16x16xbf16, #tpu.memory_space<vmem>>, %arg7: memref<1x16xf32, #tpu.memory_space<vmem>>, %arg8: memref<1x16x16xbf16, #tpu.memory_space<vmem>>) attributes {dimension_semantics = [#tpu.dimension_semantics<parallel>, #tpu.dimension_semantics<parallel>], iteration_bounds = array<i64: 2, 1>, scalar_prefetch = 0 : i64, scratch_operands = 0 : i64, tpu.core_type = #tpu.core_type<tc>, window_params = [{transform_indices = @transform_0, window_bounds = array<i64: 1, 1, 24, 16>}, {transform_indices = @transform_1, window_bounds = array<i64: 1, 16, 16>}, {pipeline_mode = #tpu.pipeline_mode<synchronous>, transform_indices = @transform_2, window_bounds = array<i64: 7, 16, 16>}, {pipeline_mode = #tpu.pipeline_mode<synchronous>, transform_indices = @transform_3, window_bounds = array<i64: 1, 16>}, {pipeline_mode = #tpu.pipeline_mode<synchronous>, transform_indices = @transform_4, window_bounds = array<i64: 16, 16>}, {pipeline_mode = #tpu.pipeline_mode<synchronous>, transform_indices = @transform_5, window_bounds = array<i64: 1, 16>}, {transform_indices = @transform_6, window_bounds = array<i64: 1, 16, 16>}]} {
    %c0 = arith.constant 0 : index
    %c0_0 = arith.constant 0 : index
    %c0_1 = arith.constant 0 : index
    %0 = vector.load %arg3[%c0, %c0_0, %c0_1] : memref<1x16x16xbf16, #tpu.memory_space<vmem>>, vector<1x16x16xbf16>
    %1 = vector.shape_cast %0 : vector<1x16x16xbf16> to vector<16x16xbf16>
    %2 = arith.extf %1 : vector<16x16xbf16> to vector<16x16xf32>
    %c0_2 = arith.constant 0 : index
    %c0_3 = arith.constant 0 : index
    %c0_4 = arith.constant 0 : index
    %c0_5 = arith.constant 0 : index
    %3 = vector.load %arg2[%c0_2, %c0_3, %c0_4, %c0_5] : memref<1x1x24x16xbf16, #tpu.memory_space<vmem>>, vector<1x1x24x16xbf16>
    %4 = vector.shape_cast %3 : vector<1x1x24x16xbf16> to vector<24x16xbf16>
    %5 = arith.extf %4 : vector<24x16xbf16> to vector<24x16xf32>
    %6 = tpu.concatenate %5, %2 in 0 : vector<24x16xf32>, vector<16x16xf32> -> vector<40x16xf32>
    %cst = arith.constant 0.000000e+00 : f32
    %7 = vector.broadcast %cst : f32 to vector<40x16xf32>
    %8 = arith.cmpf ogt, %6, %7 : vector<40x16xf32>
    %cst_6 = arith.constant 0.000000e+00 : f32
    %9 = vector.broadcast %cst_6 : f32 to vector<40x16xf32>
    %10 = arith.minimumf %6, %9 : vector<40x16xf32>
    %11 = math.exp %10 : vector<40x16xf32>
    %cst_7 = arith.constant 1.000000e+00 : f32
    %12 = vector.broadcast %cst_7 : f32 to vector<40x16xf32>
    %13 = arith.subf %11, %12 : vector<40x16xf32>
    %14 = arith.select %8, %6, %13 : vector<40x16xi1>, vector<40x16xf32>
    %15 = arith.truncf %14 : vector<40x16xf32> to vector<40x16xbf16>
    %cst_8 = arith.constant 0.000000e+00 : f32
    %16 = vector.broadcast %cst_8 : f32 to vector<16x16xf32>
    %17 = vector.extract_strided_slice %15 {offsets = [6, 0], sizes = [16, 16], strides = [1, 1]} : vector<40x16xbf16> to vector<16x16xbf16>
    %c0_9 = arith.constant 0 : index
    %c0_10 = arith.constant 0 : index
    %c0_11 = arith.constant 0 : index
    %18 = vector.load %arg4[%c0_9, %c0_10, %c0_11] : memref<7x16x16xbf16, #tpu.memory_space<vmem>>, vector<1x16x16xbf16>
    %19 = vector.shape_cast %18 : vector<1x16x16xbf16> to vector<16x16xbf16>
    %cst_12 = arith.constant dense<0.000000e+00> : vector<16x16xf32>
    %20 = tpu.matmul %17, %19, %cst_12 {dimension_numbers = #tpu.dot_dimension_numbers<[1], [0], [0], [1], [0, 0, 1, 1], [], []>} : vector<16x16xbf16>, vector<16x16xbf16>, vector<16x16xf32> -> vector<16x16xf32>
    %21 = arith.addf %16, %20 : vector<16x16xf32>
    %22 = vector.extract_strided_slice %15 {offsets = [9, 0], sizes = [16, 16], strides = [1, 1]} : vector<40x16xbf16> to vector<16x16xbf16>
    %c1 = arith.constant 1 : index
    %c0_13 = arith.constant 0 : index
    %c0_14 = arith.constant 0 : index
    %23 = vector.load %arg4[%c1, %c0_13, %c0_14] : memref<7x16x16xbf16, #tpu.memory_space<vmem>>, vector<1x16x16xbf16>
    %24 = vector.shape_cast %23 : vector<1x16x16xbf16> to vector<16x16xbf16>
    %cst_15 = arith.constant dense<0.000000e+00> : vector<16x16xf32>
    %25 = tpu.matmul %22, %24, %cst_15 {dimension_numbers = #tpu.dot_dimension_numbers<[1], [0], [0], [1], [0, 0, 1, 1], [], []>} : vector<16x16xbf16>, vector<16x16xbf16>, vector<16x16xf32> -> vector<16x16xf32>
    %26 = arith.addf %21, %25 : vector<16x16xf32>
    %27 = vector.extract_strided_slice %15 {offsets = [12, 0], sizes = [16, 16], strides = [1, 1]} : vector<40x16xbf16> to vector<16x16xbf16>
    %c2 = arith.constant 2 : index
    %c0_16 = arith.constant 0 : index
    %c0_17 = arith.constant 0 : index
    %28 = vector.load %arg4[%c2, %c0_16, %c0_17] : memref<7x16x16xbf16, #tpu.memory_space<vmem>>, vector<1x16x16xbf16>
    %29 = vector.shape_cast %28 : vector<1x16x16xbf16> to vector<16x16xbf16>
    %cst_18 = arith.constant dense<0.000000e+00> : vector<16x16xf32>
    %30 = tpu.matmul %27, %29, %cst_18 {dimension_numbers = #tpu.dot_dimension_numbers<[1], [0], [0], [1], [0, 0, 1, 1], [], []>} : vector<16x16xbf16>, vector<16x16xbf16>, vector<16x16xf32> -> vector<16x16xf32>
    %31 = arith.addf %26, %30 : vector<16x16xf32>
    %32 = vector.extract_strided_slice %15 {offsets = [15, 0], sizes = [16, 16], strides = [1, 1]} : vector<40x16xbf16> to vector<16x16xbf16>
    %c3 = arith.constant 3 : index
    %c0_19 = arith.constant 0 : index
    %c0_20 = arith.constant 0 : index
    %33 = vector.load %arg4[%c3, %c0_19, %c0_20] : memref<7x16x16xbf16, #tpu.memory_space<vmem>>, vector<1x16x16xbf16>
    %34 = vector.shape_cast %33 : vector<1x16x16xbf16> to vector<16x16xbf16>
    %cst_21 = arith.constant dense<0.000000e+00> : vector<16x16xf32>
    %35 = tpu.matmul %32, %34, %cst_21 {dimension_numbers = #tpu.dot_dimension_numbers<[1], [0], [0], [1], [0, 0, 1, 1], [], []>} : vector<16x16xbf16>, vector<16x16xbf16>, vector<16x16xf32> -> vector<16x16xf32>
    %36 = arith.addf %31, %35 : vector<16x16xf32>
    %37 = vector.extract_strided_slice %15 {offsets = [18, 0], sizes = [16, 16], strides = [1, 1]} : vector<40x16xbf16> to vector<16x16xbf16>
    %c4 = arith.constant 4 : index
    %c0_22 = arith.constant 0 : index
    %c0_23 = arith.constant 0 : index
    %38 = vector.load %arg4[%c4, %c0_22, %c0_23] : memref<7x16x16xbf16, #tpu.memory_space<vmem>>, vector<1x16x16xbf16>
    %39 = vector.shape_cast %38 : vector<1x16x16xbf16> to vector<16x16xbf16>
    %cst_24 = arith.constant dense<0.000000e+00> : vector<16x16xf32>
    %40 = tpu.matmul %37, %39, %cst_24 {dimension_numbers = #tpu.dot_dimension_numbers<[1], [0], [0], [1], [0, 0, 1, 1], [], []>} : vector<16x16xbf16>, vector<16x16xbf16>, vector<16x16xf32> -> vector<16x16xf32>
    %41 = arith.addf %36, %40 : vector<16x16xf32>
    %42 = vector.extract_strided_slice %15 {offsets = [21, 0], sizes = [16, 16], strides = [1, 1]} : vector<40x16xbf16> to vector<16x16xbf16>
    %c5 = arith.constant 5 : index
    %c0_25 = arith.constant 0 : index
    %c0_26 = arith.constant 0 : index
    %43 = vector.load %arg4[%c5, %c0_25, %c0_26] : memref<7x16x16xbf16, #tpu.memory_space<vmem>>, vector<1x16x16xbf16>
    %44 = vector.shape_cast %43 : vector<1x16x16xbf16> to vector<16x16xbf16>
    %cst_27 = arith.constant dense<0.000000e+00> : vector<16x16xf32>
    %45 = tpu.matmul %42, %44, %cst_27 {dimension_numbers = #tpu.dot_dimension_numbers<[1], [0], [0], [1], [0, 0, 1, 1], [], []>} : vector<16x16xbf16>, vector<16x16xbf16>, vector<16x16xf32> -> vector<16x16xf32>
    %46 = arith.addf %41, %45 : vector<16x16xf32>
    %47 = vector.extract_strided_slice %15 {offsets = [24, 0], sizes = [16, 16], strides = [1, 1]} : vector<40x16xbf16> to vector<16x16xbf16>
    %c6 = arith.constant 6 : index
    %c0_28 = arith.constant 0 : index
    %c0_29 = arith.constant 0 : index
    %48 = vector.load %arg4[%c6, %c0_28, %c0_29] : memref<7x16x16xbf16, #tpu.memory_space<vmem>>, vector<1x16x16xbf16>
    %49 = vector.shape_cast %48 : vector<1x16x16xbf16> to vector<16x16xbf16>
    %cst_30 = arith.constant dense<0.000000e+00> : vector<16x16xf32>
    %50 = tpu.matmul %47, %49, %cst_30 {dimension_numbers = #tpu.dot_dimension_numbers<[1], [0], [0], [1], [0, 0, 1, 1], [], []>} : vector<16x16xbf16>, vector<16x16xbf16>, vector<16x16xf32> -> vector<16x16xf32>
    %51 = arith.addf %46, %50 : vector<16x16xf32>
    %c0_31 = arith.constant 0 : index
    %c0_32 = arith.constant 0 : index
    %52 = vector.load %arg5[%c0_31, %c0_32] : memref<1x16xf32, #tpu.memory_space<vmem>>, vector<1x16xf32>
    %53 = vector.broadcast %52 : vector<1x16xf32> to vector<16x16xf32>
    %54 = arith.addf %51, %53 : vector<16x16xf32>
    %cst_33 = arith.constant 0.000000e+00 : f32
    %55 = vector.broadcast %cst_33 : f32 to vector<16x16xf32>
    %56 = arith.cmpf ogt, %54, %55 : vector<16x16xf32>
    %cst_34 = arith.constant 0.000000e+00 : f32
    %57 = vector.broadcast %cst_34 : f32 to vector<16x16xf32>
    %58 = arith.minimumf %54, %57 : vector<16x16xf32>
    %59 = math.exp %58 : vector<16x16xf32>
    %cst_35 = arith.constant 1.000000e+00 : f32
    %60 = vector.broadcast %cst_35 : f32 to vector<16x16xf32>
    %61 = arith.subf %59, %60 : vector<16x16xf32>
    %62 = arith.select %56, %54, %61 : vector<16x16xi1>, vector<16x16xf32>
    %63 = arith.truncf %62 : vector<16x16xf32> to vector<16x16xbf16>
    %c0_36 = arith.constant 0 : index
    %c0_37 = arith.constant 0 : index
    %64 = vector.load %arg6[%c0_36, %c0_37] : memref<16x16xbf16, #tpu.memory_space<vmem>>, vector<16x16xbf16>
    %cst_38 = arith.constant dense<0.000000e+00> : vector<16x16xf32>
    %65 = tpu.matmul %63, %64, %cst_38 {dimension_numbers = #tpu.dot_dimension_numbers<[1], [0], [0], [1], [0, 0, 1, 1], [], []>} : vector<16x16xbf16>, vector<16x16xbf16>, vector<16x16xf32> -> vector<16x16xf32>
    %c0_39 = arith.constant 0 : index
    %c0_40 = arith.constant 0 : index
    %66 = vector.load %arg7[%c0_39, %c0_40] : memref<1x16xf32, #tpu.memory_space<vmem>>, vector<1x16xf32>
    %67 = vector.broadcast %66 : vector<1x16xf32> to vector<16x16xf32>
    %68 = arith.addf %65, %67 : vector<16x16xf32>
    %69 = arith.addf %68, %2 : vector<16x16xf32>
    %70 = arith.truncf %69 : vector<16x16xf32> to vector<16x16xbf16>
    %c0_41 = arith.constant 0 : index
    %c0_42 = arith.constant 0 : index
    %c0_43 = arith.constant 0 : index
    %71 = vector.load %arg8[%c0_41, %c0_42, %c0_43] : memref<1x16x16xbf16, #tpu.memory_space<vmem>>, vector<1x16x16xbf16>
    %72 = vector.shape_cast %71 : vector<1x16x16xbf16> to vector<16x16xbf16>
    %73 = vector.shape_cast %70 : vector<16x16xbf16> to vector<1x16x16xbf16>
    tpu.vector_store %arg8[%c0_41, %c0_42, %c0_43], %73 {strides = array<i32>} : memref<1x16x16xbf16, #tpu.memory_space<vmem>>, vector<1x16x16xbf16>,
    return
  }
  func.func @transform_0(%arg0: i32, %arg1: i32) -> (i32, i32, i32, i32) {
    %c0_i32 = arith.constant 0 : i32
    %c0_i32_0 = arith.constant 0 : i32
    %c0_i32_1 = arith.constant 0 : i32
    return %arg0, %arg1, %c0_i32, %c0_i32_0 : i32, i32, i32, i32
  }
  func.func @transform_1(%arg0: i32, %arg1: i32) -> (i32, i32, i32) {
    %c0_i32 = arith.constant 0 : i32
    %c0_i32_0 = arith.constant 0 : i32
    return %arg0, %arg1, %c0_i32 : i32, i32, i32
  }
  func.func @transform_2(%arg0: i32, %arg1: i32) -> (i32, i32, i32) {
    %c0_i32 = arith.constant 0 : i32
    %c0_i32_0 = arith.constant 0 : i32
    %c0_i32_1 = arith.constant 0 : i32
    %c0_i32_2 = arith.constant 0 : i32
    return %c0_i32, %c0_i32_0, %c0_i32_1 : i32, i32, i32
  }
  func.func @transform_3(%arg0: i32, %arg1: i32) -> (i32, i32) {
    %c0_i32 = arith.constant 0 : i32
    %c0_i32_0 = arith.constant 0 : i32
    %c0_i32_1 = arith.constant 0 : i32
    return %c0_i32, %c0_i32_0 : i32, i32
  }
  func.func @transform_4(%arg0: i32, %arg1: i32) -> (i32, i32) {
    %c0_i32 = arith.constant 0 : i32
    %c0_i32_0 = arith.constant 0 : i32
    %c0_i32_1 = arith.constant 0 : i32
    return %c0_i32, %c0_i32_0 : i32, i32
  }
  func.func @transform_5(%arg0: i32, %arg1: i32) -> (i32, i32) {
    %c0_i32 = arith.constant 0 : i32
    %c0_i32_0 = arith.constant 0 : i32
    %c0_i32_1 = arith.constant 0 : i32
    return %c0_i32, %c0_i32_0 : i32, i32
  }
  func.func @transform_6(%arg0: i32, %arg1: i32) -> (i32, i32, i32) {
    %c0_i32 = arith.constant 0 : i32
    %c0_i32_0 = arith.constant 0 : i32
    return %arg0, %arg1, %c0_i32 : i32, i32, i32
  }
}

module attributes {stable_mosaic.version = 11 : i64} {
  func.func @_conv_kernel(%arg0: i32, %arg1: i32, %arg2: memref<1x1x56x16xbf16, #tpu.memory_space<vmem>>, %arg3: memref<1x16x16xbf16, #tpu.memory_space<vmem>>, %arg4: memref<7x16x16xbf16, #tpu.memory_space<vmem>>, %arg5: memref<1x16xf32, #tpu.memory_space<vmem>>, %arg6: memref<16x16xbf16, #tpu.memory_space<vmem>>, %arg7: memref<1x16xf32, #tpu.memory_space<vmem>>, %arg8: memref<1x16x16xbf16, #tpu.memory_space<vmem>>) attributes {dimension_semantics = [#tpu.dimension_semantics<parallel>, #tpu.dimension_semantics<parallel>], iteration_bounds = array<i64: 2, 1>, scalar_prefetch = 0 : i64, scratch_operands = 0 : i64, tpu.core_type = #tpu.core_type<tc>, window_params = [{transform_indices = @transform_0, window_bounds = array<i64: 1, 1, 56, 16>}, {transform_indices = @transform_1, window_bounds = array<i64: 1, 16, 16>}, {pipeline_mode = #tpu.pipeline_mode<synchronous>, transform_indices = @transform_2, window_bounds = array<i64: 7, 16, 16>}, {pipeline_mode = #tpu.pipeline_mode<synchronous>, transform_indices = @transform_3, window_bounds = array<i64: 1, 16>}, {pipeline_mode = #tpu.pipeline_mode<synchronous>, transform_indices = @transform_4, window_bounds = array<i64: 16, 16>}, {pipeline_mode = #tpu.pipeline_mode<synchronous>, transform_indices = @transform_5, window_bounds = array<i64: 1, 16>}, {transform_indices = @transform_6, window_bounds = array<i64: 1, 16, 16>}]} {
    %c0 = arith.constant 0 : index
    %c0_0 = arith.constant 0 : index
    %c0_1 = arith.constant 0 : index
    %0 = vector.load %arg3[%c0, %c0_0, %c0_1] : memref<1x16x16xbf16, #tpu.memory_space<vmem>>, vector<1x16x16xbf16>
    %1 = vector.shape_cast %0 : vector<1x16x16xbf16> to vector<16x16xbf16>
    %2 = arith.extf %1 : vector<16x16xbf16> to vector<16x16xf32>
    %c0_2 = arith.constant 0 : index
    %c0_3 = arith.constant 0 : index
    %c0_4 = arith.constant 0 : index
    %c0_5 = arith.constant 0 : index
    %3 = vector.load %arg2[%c0_2, %c0_3, %c0_4, %c0_5] : memref<1x1x56x16xbf16, #tpu.memory_space<vmem>>, vector<1x1x56x16xbf16>
    %4 = vector.shape_cast %3 : vector<1x1x56x16xbf16> to vector<56x16xbf16>
    %5 = arith.extf %4 : vector<56x16xbf16> to vector<56x16xf32>
    %6 = tpu.concatenate %5, %2 in 0 : vector<56x16xf32>, vector<16x16xf32> -> vector<72x16xf32>
    %cst = arith.constant 0.000000e+00 : f32
    %7 = vector.broadcast %cst : f32 to vector<72x16xf32>
    %8 = arith.cmpf ogt, %6, %7 : vector<72x16xf32>
    %cst_6 = arith.constant 0.000000e+00 : f32
    %9 = vector.broadcast %cst_6 : f32 to vector<72x16xf32>
    %10 = arith.minimumf %6, %9 : vector<72x16xf32>
    %11 = math.exp %10 : vector<72x16xf32>
    %cst_7 = arith.constant 1.000000e+00 : f32
    %12 = vector.broadcast %cst_7 : f32 to vector<72x16xf32>
    %13 = arith.subf %11, %12 : vector<72x16xf32>
    %14 = arith.select %8, %6, %13 : vector<72x16xi1>, vector<72x16xf32>
    %15 = arith.truncf %14 : vector<72x16xf32> to vector<72x16xbf16>
    %cst_8 = arith.constant 0.000000e+00 : f32
    %16 = vector.broadcast %cst_8 : f32 to vector<16x16xf32>
    %17 = vector.extract_strided_slice %15 {offsets = [2, 0], sizes = [16, 16], strides = [1, 1]} : vector<72x16xbf16> to vector<16x16xbf16>
    %c0_9 = arith.constant 0 : index
    %c0_10 = arith.constant 0 : index
    %c0_11 = arith.constant 0 : index
    %18 = vector.load %arg4[%c0_9, %c0_10, %c0_11] : memref<7x16x16xbf16, #tpu.memory_space<vmem>>, vector<1x16x16xbf16>
    %19 = vector.shape_cast %18 : vector<1x16x16xbf16> to vector<16x16xbf16>
    %cst_12 = arith.constant dense<0.000000e+00> : vector<16x16xf32>
    %20 = tpu.matmul %17, %19, %cst_12 {dimension_numbers = #tpu.dot_dimension_numbers<[1], [0], [0], [1], [0, 0, 1, 1], [], []>} : vector<16x16xbf16>, vector<16x16xbf16>, vector<16x16xf32> -> vector<16x16xf32>
    %21 = arith.addf %16, %20 : vector<16x16xf32>
    %22 = vector.extract_strided_slice %15 {offsets = [11, 0], sizes = [16, 16], strides = [1, 1]} : vector<72x16xbf16> to vector<16x16xbf16>
    %c1 = arith.constant 1 : index
    %c0_13 = arith.constant 0 : index
    %c0_14 = arith.constant 0 : index
    %23 = vector.load %arg4[%c1, %c0_13, %c0_14] : memref<7x16x16xbf16, #tpu.memory_space<vmem>>, vector<1x16x16xbf16>
    %24 = vector.shape_cast %23 : vector<1x16x16xbf16> to vector<16x16xbf16>
    %cst_15 = arith.constant dense<0.000000e+00> : vector<16x16xf32>
    %25 = tpu.matmul %22, %24, %cst_15 {dimension_numbers = #tpu.dot_dimension_numbers<[1], [0], [0], [1], [0, 0, 1, 1], [], []>} : vector<16x16xbf16>, vector<16x16xbf16>, vector<16x16xf32> -> vector<16x16xf32>
    %26 = arith.addf %21, %25 : vector<16x16xf32>
    %27 = vector.extract_strided_slice %15 {offsets = [20, 0], sizes = [16, 16], strides = [1, 1]} : vector<72x16xbf16> to vector<16x16xbf16>
    %c2 = arith.constant 2 : index
    %c0_16 = arith.constant 0 : index
    %c0_17 = arith.constant 0 : index
    %28 = vector.load %arg4[%c2, %c0_16, %c0_17] : memref<7x16x16xbf16, #tpu.memory_space<vmem>>, vector<1x16x16xbf16>
    %29 = vector.shape_cast %28 : vector<1x16x16xbf16> to vector<16x16xbf16>
    %cst_18 = arith.constant dense<0.000000e+00> : vector<16x16xf32>
    %30 = tpu.matmul %27, %29, %cst_18 {dimension_numbers = #tpu.dot_dimension_numbers<[1], [0], [0], [1], [0, 0, 1, 1], [], []>} : vector<16x16xbf16>, vector<16x16xbf16>, vector<16x16xf32> -> vector<16x16xf32>
    %31 = arith.addf %26, %30 : vector<16x16xf32>
    %32 = vector.extract_strided_slice %15 {offsets = [29, 0], sizes = [16, 16], strides = [1, 1]} : vector<72x16xbf16> to vector<16x16xbf16>
    %c3 = arith.constant 3 : index
    %c0_19 = arith.constant 0 : index
    %c0_20 = arith.constant 0 : index
    %33 = vector.load %arg4[%c3, %c0_19, %c0_20] : memref<7x16x16xbf16, #tpu.memory_space<vmem>>, vector<1x16x16xbf16>
    %34 = vector.shape_cast %33 : vector<1x16x16xbf16> to vector<16x16xbf16>
    %cst_21 = arith.constant dense<0.000000e+00> : vector<16x16xf32>
    %35 = tpu.matmul %32, %34, %cst_21 {dimension_numbers = #tpu.dot_dimension_numbers<[1], [0], [0], [1], [0, 0, 1, 1], [], []>} : vector<16x16xbf16>, vector<16x16xbf16>, vector<16x16xf32> -> vector<16x16xf32>
    %36 = arith.addf %31, %35 : vector<16x16xf32>
    %37 = vector.extract_strided_slice %15 {offsets = [38, 0], sizes = [16, 16], strides = [1, 1]} : vector<72x16xbf16> to vector<16x16xbf16>
    %c4 = arith.constant 4 : index
    %c0_22 = arith.constant 0 : index
    %c0_23 = arith.constant 0 : index
    %38 = vector.load %arg4[%c4, %c0_22, %c0_23] : memref<7x16x16xbf16, #tpu.memory_space<vmem>>, vector<1x16x16xbf16>
    %39 = vector.shape_cast %38 : vector<1x16x16xbf16> to vector<16x16xbf16>
    %cst_24 = arith.constant dense<0.000000e+00> : vector<16x16xf32>
    %40 = tpu.matmul %37, %39, %cst_24 {dimension_numbers = #tpu.dot_dimension_numbers<[1], [0], [0], [1], [0, 0, 1, 1], [], []>} : vector<16x16xbf16>, vector<16x16xbf16>, vector<16x16xf32> -> vector<16x16xf32>
    %41 = arith.addf %36, %40 : vector<16x16xf32>
    %42 = vector.extract_strided_slice %15 {offsets = [47, 0], sizes = [16, 16], strides = [1, 1]} : vector<72x16xbf16> to vector<16x16xbf16>
    %c5 = arith.constant 5 : index
    %c0_25 = arith.constant 0 : index
    %c0_26 = arith.constant 0 : index
    %43 = vector.load %arg4[%c5, %c0_25, %c0_26] : memref<7x16x16xbf16, #tpu.memory_space<vmem>>, vector<1x16x16xbf16>
    %44 = vector.shape_cast %43 : vector<1x16x16xbf16> to vector<16x16xbf16>
    %cst_27 = arith.constant dense<0.000000e+00> : vector<16x16xf32>
    %45 = tpu.matmul %42, %44, %cst_27 {dimension_numbers = #tpu.dot_dimension_numbers<[1], [0], [0], [1], [0, 0, 1, 1], [], []>} : vector<16x16xbf16>, vector<16x16xbf16>, vector<16x16xf32> -> vector<16x16xf32>
    %46 = arith.addf %41, %45 : vector<16x16xf32>
    %47 = vector.extract_strided_slice %15 {offsets = [56, 0], sizes = [16, 16], strides = [1, 1]} : vector<72x16xbf16> to vector<16x16xbf16>
    %c6 = arith.constant 6 : index
    %c0_28 = arith.constant 0 : index
    %c0_29 = arith.constant 0 : index
    %48 = vector.load %arg4[%c6, %c0_28, %c0_29] : memref<7x16x16xbf16, #tpu.memory_space<vmem>>, vector<1x16x16xbf16>
    %49 = vector.shape_cast %48 : vector<1x16x16xbf16> to vector<16x16xbf16>
    %cst_30 = arith.constant dense<0.000000e+00> : vector<16x16xf32>
    %50 = tpu.matmul %47, %49, %cst_30 {dimension_numbers = #tpu.dot_dimension_numbers<[1], [0], [0], [1], [0, 0, 1, 1], [], []>} : vector<16x16xbf16>, vector<16x16xbf16>, vector<16x16xf32> -> vector<16x16xf32>
    %51 = arith.addf %46, %50 : vector<16x16xf32>
    %c0_31 = arith.constant 0 : index
    %c0_32 = arith.constant 0 : index
    %52 = vector.load %arg5[%c0_31, %c0_32] : memref<1x16xf32, #tpu.memory_space<vmem>>, vector<1x16xf32>
    %53 = vector.broadcast %52 : vector<1x16xf32> to vector<16x16xf32>
    %54 = arith.addf %51, %53 : vector<16x16xf32>
    %cst_33 = arith.constant 0.000000e+00 : f32
    %55 = vector.broadcast %cst_33 : f32 to vector<16x16xf32>
    %56 = arith.cmpf ogt, %54, %55 : vector<16x16xf32>
    %cst_34 = arith.constant 0.000000e+00 : f32
    %57 = vector.broadcast %cst_34 : f32 to vector<16x16xf32>
    %58 = arith.minimumf %54, %57 : vector<16x16xf32>
    %59 = math.exp %58 : vector<16x16xf32>
    %cst_35 = arith.constant 1.000000e+00 : f32
    %60 = vector.broadcast %cst_35 : f32 to vector<16x16xf32>
    %61 = arith.subf %59, %60 : vector<16x16xf32>
    %62 = arith.select %56, %54, %61 : vector<16x16xi1>, vector<16x16xf32>
    %63 = arith.truncf %62 : vector<16x16xf32> to vector<16x16xbf16>
    %c0_36 = arith.constant 0 : index
    %c0_37 = arith.constant 0 : index
    %64 = vector.load %arg6[%c0_36, %c0_37] : memref<16x16xbf16, #tpu.memory_space<vmem>>, vector<16x16xbf16>
    %cst_38 = arith.constant dense<0.000000e+00> : vector<16x16xf32>
    %65 = tpu.matmul %63, %64, %cst_38 {dimension_numbers = #tpu.dot_dimension_numbers<[1], [0], [0], [1], [0, 0, 1, 1], [], []>} : vector<16x16xbf16>, vector<16x16xbf16>, vector<16x16xf32> -> vector<16x16xf32>
    %c0_39 = arith.constant 0 : index
    %c0_40 = arith.constant 0 : index
    %66 = vector.load %arg7[%c0_39, %c0_40] : memref<1x16xf32, #tpu.memory_space<vmem>>, vector<1x16xf32>
    %67 = vector.broadcast %66 : vector<1x16xf32> to vector<16x16xf32>
    %68 = arith.addf %65, %67 : vector<16x16xf32>
    %69 = arith.addf %68, %2 : vector<16x16xf32>
    %70 = arith.truncf %69 : vector<16x16xf32> to vector<16x16xbf16>
    %c0_41 = arith.constant 0 : index
    %c0_42 = arith.constant 0 : index
    %c0_43 = arith.constant 0 : index
    %71 = vector.load %arg8[%c0_41, %c0_42, %c0_43] : memref<1x16x16xbf16, #tpu.memory_space<vmem>>, vector<1x16x16xbf16>
    %72 = vector.shape_cast %71 : vector<1x16x16xbf16> to vector<16x16xbf16>
    %73 = vector.shape_cast %70 : vector<16x16xbf16> to vector<1x16x16xbf16>
    tpu.vector_store %arg8[%c0_41, %c0_42, %c0_43], %73 {strides = array<i32>} : memref<1x16x16xbf16, #tpu.memory_space<vmem>>, vector<1x16x16xbf16>,
    return
  }
  func.func @transform_0(%arg0: i32, %arg1: i32) -> (i32, i32, i32, i32) {
    %c0_i32 = arith.constant 0 : i32
    %c0_i32_0 = arith.constant 0 : i32
    %c0_i32_1 = arith.constant 0 : i32
    return %arg0, %arg1, %c0_i32, %c0_i32_0 : i32, i32, i32, i32
  }
  func.func @transform_1(%arg0: i32, %arg1: i32) -> (i32, i32, i32) {
    %c0_i32 = arith.constant 0 : i32
    %c0_i32_0 = arith.constant 0 : i32
    return %arg0, %arg1, %c0_i32 : i32, i32, i32
  }
  func.func @transform_2(%arg0: i32, %arg1: i32) -> (i32, i32, i32) {
    %c0_i32 = arith.constant 0 : i32
    %c0_i32_0 = arith.constant 0 : i32
    %c0_i32_1 = arith.constant 0 : i32
    %c0_i32_2 = arith.constant 0 : i32
    return %c0_i32, %c0_i32_0, %c0_i32_1 : i32, i32, i32
  }
  func.func @transform_3(%arg0: i32, %arg1: i32) -> (i32, i32) {
    %c0_i32 = arith.constant 0 : i32
    %c0_i32_0 = arith.constant 0 : i32
    %c0_i32_1 = arith.constant 0 : i32
    return %c0_i32, %c0_i32_0 : i32, i32
  }
  func.func @transform_4(%arg0: i32, %arg1: i32) -> (i32, i32) {
    %c0_i32 = arith.constant 0 : i32
    %c0_i32_0 = arith.constant 0 : i32
    %c0_i32_1 = arith.constant 0 : i32
    return %c0_i32, %c0_i32_0 : i32, i32
  }
  func.func @transform_5(%arg0: i32, %arg1: i32) -> (i32, i32) {
    %c0_i32 = arith.constant 0 : i32
    %c0_i32_0 = arith.constant 0 : i32
    %c0_i32_1 = arith.constant 0 : i32
    return %c0_i32, %c0_i32_0 : i32, i32
  }
  func.func @transform_6(%arg0: i32, %arg1: i32) -> (i32, i32, i32) {
    %c0_i32 = arith.constant 0 : i32
    %c0_i32_0 = arith.constant 0 : i32
    return %arg0, %arg1, %c0_i32 : i32, i32, i32
  }
}

module attributes {stable_mosaic.version = 11 : i64} {
  func.func @_conv_kernel(%arg0: i32, %arg1: i32, %arg2: memref<1x1x8x48xbf16, #tpu.memory_space<vmem>>, %arg3: memref<1x8x48xbf16, #tpu.memory_space<vmem>>, %arg4: memref<2x48x32xbf16, #tpu.memory_space<vmem>>, %arg5: memref<1x32xf32, #tpu.memory_space<vmem>>, %arg6: memref<1x8x32xbf16, #tpu.memory_space<vmem>>) attributes {dimension_semantics = [#tpu.dimension_semantics<parallel>, #tpu.dimension_semantics<parallel>], iteration_bounds = array<i64: 2, 1>, scalar_prefetch = 0 : i64, scratch_operands = 0 : i64, tpu.core_type = #tpu.core_type<tc>, window_params = [{transform_indices = @transform_0, window_bounds = array<i64: 1, 1, 8, 48>}, {transform_indices = @transform_1, window_bounds = array<i64: 1, 8, 48>}, {pipeline_mode = #tpu.pipeline_mode<synchronous>, transform_indices = @transform_2, window_bounds = array<i64: 2, 48, 32>}, {pipeline_mode = #tpu.pipeline_mode<synchronous>, transform_indices = @transform_3, window_bounds = array<i64: 1, 32>}, {transform_indices = @transform_4, window_bounds = array<i64: 1, 8, 32>}]} {
    %c0 = arith.constant 0 : index
    %c0_0 = arith.constant 0 : index
    %c0_1 = arith.constant 0 : index
    %0 = vector.load %arg3[%c0, %c0_0, %c0_1] : memref<1x8x48xbf16, #tpu.memory_space<vmem>>, vector<1x8x48xbf16>
    %1 = vector.shape_cast %0 : vector<1x8x48xbf16> to vector<8x48xbf16>
    %2 = arith.extf %1 : vector<8x48xbf16> to vector<8x48xf32>
    %c0_2 = arith.constant 0 : index
    %c0_3 = arith.constant 0 : index
    %c0_4 = arith.constant 0 : index
    %c0_5 = arith.constant 0 : index
    %3 = vector.load %arg2[%c0_2, %c0_3, %c0_4, %c0_5] : memref<1x1x8x48xbf16, #tpu.memory_space<vmem>>, vector<1x1x8x48xbf16>
    %4 = vector.shape_cast %3 : vector<1x1x8x48xbf16> to vector<8x48xbf16>
    %5 = arith.extf %4 : vector<8x48xbf16> to vector<8x48xf32>
    %6 = tpu.concatenate %5, %2 in 0 : vector<8x48xf32>, vector<8x48xf32> -> vector<16x48xf32>
    %7 = arith.truncf %6 : vector<16x48xf32> to vector<16x48xbf16>
    %cst = arith.constant 0.000000e+00 : f32
    %8 = vector.broadcast %cst : f32 to vector<8x32xf32>
    %9 = vector.extract_strided_slice %7 {offsets = [7, 0], sizes = [8, 48], strides = [1, 1]} : vector<16x48xbf16> to vector<8x48xbf16>
    %c0_6 = arith.constant 0 : index
    %c0_7 = arith.constant 0 : index
    %c0_8 = arith.constant 0 : index
    %10 = vector.load %arg4[%c0_6, %c0_7, %c0_8] : memref<2x48x32xbf16, #tpu.memory_space<vmem>>, vector<1x48x32xbf16>
    %11 = vector.shape_cast %10 : vector<1x48x32xbf16> to vector<48x32xbf16>
    %cst_9 = arith.constant dense<0.000000e+00> : vector<8x32xf32>
    %12 = tpu.matmul %9, %11, %cst_9 {dimension_numbers = #tpu.dot_dimension_numbers<[1], [0], [0], [1], [0, 0, 1, 1], [], []>} : vector<8x48xbf16>, vector<48x32xbf16>, vector<8x32xf32> -> vector<8x32xf32>
    %13 = arith.addf %8, %12 : vector<8x32xf32>
    %14 = vector.extract_strided_slice %7 {offsets = [8, 0], sizes = [8, 48], strides = [1, 1]} : vector<16x48xbf16> to vector<8x48xbf16>
    %c1 = arith.constant 1 : index
    %c0_10 = arith.constant 0 : index
    %c0_11 = arith.constant 0 : index
    %15 = vector.load %arg4[%c1, %c0_10, %c0_11] : memref<2x48x32xbf16, #tpu.memory_space<vmem>>, vector<1x48x32xbf16>
    %16 = vector.shape_cast %15 : vector<1x48x32xbf16> to vector<48x32xbf16>
    %cst_12 = arith.constant dense<0.000000e+00> : vector<8x32xf32>
    %17 = tpu.matmul %14, %16, %cst_12 {dimension_numbers = #tpu.dot_dimension_numbers<[1], [0], [0], [1], [0, 0, 1, 1], [], []>} : vector<8x48xbf16>, vector<48x32xbf16>, vector<8x32xf32> -> vector<8x32xf32>
    %18 = arith.addf %13, %17 : vector<8x32xf32>
    %c0_13 = arith.constant 0 : index
    %c0_14 = arith.constant 0 : index
    %19 = vector.load %arg5[%c0_13, %c0_14] : memref<1x32xf32, #tpu.memory_space<vmem>>, vector<1x32xf32>
    %20 = vector.broadcast %19 : vector<1x32xf32> to vector<8x32xf32>
    %21 = arith.addf %18, %20 : vector<8x32xf32>
    %22 = arith.truncf %21 : vector<8x32xf32> to vector<8x32xbf16>
    %c0_15 = arith.constant 0 : index
    %c0_16 = arith.constant 0 : index
    %c0_17 = arith.constant 0 : index
    %23 = vector.load %arg6[%c0_15, %c0_16, %c0_17] : memref<1x8x32xbf16, #tpu.memory_space<vmem>>, vector<1x8x32xbf16>
    %24 = vector.shape_cast %23 : vector<1x8x32xbf16> to vector<8x32xbf16>
    %25 = vector.shape_cast %22 : vector<8x32xbf16> to vector<1x8x32xbf16>
    tpu.vector_store %arg6[%c0_15, %c0_16, %c0_17], %25 {strides = array<i32>} : memref<1x8x32xbf16, #tpu.memory_space<vmem>>, vector<1x8x32xbf16>,
    return
  }
  func.func @transform_0(%arg0: i32, %arg1: i32) -> (i32, i32, i32, i32) {
    %c0_i32 = arith.constant 0 : i32
    %c0_i32_0 = arith.constant 0 : i32
    %c0_i32_1 = arith.constant 0 : i32
    return %arg0, %arg1, %c0_i32, %c0_i32_0 : i32, i32, i32, i32
  }
  func.func @transform_1(%arg0: i32, %arg1: i32) -> (i32, i32, i32) {
    %c0_i32 = arith.constant 0 : i32
    %c0_i32_0 = arith.constant 0 : i32
    return %arg0, %arg1, %c0_i32 : i32, i32, i32
  }
  func.func @transform_2(%arg0: i32, %arg1: i32) -> (i32, i32, i32) {
    %c0_i32 = arith.constant 0 : i32
    %c0_i32_0 = arith.constant 0 : i32
    %c0_i32_1 = arith.constant 0 : i32
    %c0_i32_2 = arith.constant 0 : i32
    return %c0_i32, %c0_i32_0, %c0_i32_1 : i32, i32, i32
  }
  func.func @transform_3(%arg0: i32, %arg1: i32) -> (i32, i32) {
    %c0_i32 = arith.constant 0 : i32
    %c0_i32_0 = arith.constant 0 : i32
    %c0_i32_1 = arith.constant 0 : i32
    return %c0_i32, %c0_i32_0 : i32, i32
  }
  func.func @transform_4(%arg0: i32, %arg1: i32) -> (i32, i32, i32) {
    %c0_i32 = arith.constant 0 : i32
    %c0_i32_0 = arith.constant 0 : i32
    return %arg0, %arg1, %c0_i32 : i32, i32, i32
  }
}

module attributes {stable_mosaic.version = 11 : i64} {
  func.func @_conv_kernel(%arg0: i32, %arg1: i32, %arg2: memref<1x1x8x32xbf16, #tpu.memory_space<vmem>>, %arg3: memref<1x8x32xbf16, #tpu.memory_space<vmem>>, %arg4: memref<3x32x16xbf16, #tpu.memory_space<vmem>>, %arg5: memref<1x8x16xf32, #tpu.memory_space<vmem>>) attributes {dimension_semantics = [#tpu.dimension_semantics<parallel>, #tpu.dimension_semantics<parallel>], iteration_bounds = array<i64: 2, 1>, scalar_prefetch = 0 : i64, scratch_operands = 0 : i64, tpu.core_type = #tpu.core_type<tc>, window_params = [{transform_indices = @transform_0, window_bounds = array<i64: 1, 1, 8, 32>}, {transform_indices = @transform_1, window_bounds = array<i64: 1, 8, 32>}, {pipeline_mode = #tpu.pipeline_mode<synchronous>, transform_indices = @transform_2, window_bounds = array<i64: 3, 32, 16>}, {transform_indices = @transform_3, window_bounds = array<i64: 1, 8, 16>}]} {
    %c0 = arith.constant 0 : index
    %c0_0 = arith.constant 0 : index
    %c0_1 = arith.constant 0 : index
    %0 = vector.load %arg3[%c0, %c0_0, %c0_1] : memref<1x8x32xbf16, #tpu.memory_space<vmem>>, vector<1x8x32xbf16>
    %1 = vector.shape_cast %0 : vector<1x8x32xbf16> to vector<8x32xbf16>
    %2 = arith.extf %1 : vector<8x32xbf16> to vector<8x32xf32>
    %c0_2 = arith.constant 0 : index
    %c0_3 = arith.constant 0 : index
    %c0_4 = arith.constant 0 : index
    %c0_5 = arith.constant 0 : index
    %3 = vector.load %arg2[%c0_2, %c0_3, %c0_4, %c0_5] : memref<1x1x8x32xbf16, #tpu.memory_space<vmem>>, vector<1x1x8x32xbf16>
    %4 = vector.shape_cast %3 : vector<1x1x8x32xbf16> to vector<8x32xbf16>
    %5 = arith.extf %4 : vector<8x32xbf16> to vector<8x32xf32>
    %6 = tpu.concatenate %5, %2 in 0 : vector<8x32xf32>, vector<8x32xf32> -> vector<16x32xf32>
    %7 = arith.truncf %6 : vector<16x32xf32> to vector<16x32xbf16>
    %cst = arith.constant 0.000000e+00 : f32
    %8 = vector.broadcast %cst : f32 to vector<8x16xf32>
    %9 = vector.extract_strided_slice %7 {offsets = [6, 0], sizes = [8, 32], strides = [1, 1]} : vector<16x32xbf16> to vector<8x32xbf16>
    %c0_6 = arith.constant 0 : index
    %c0_7 = arith.constant 0 : index
    %c0_8 = arith.constant 0 : index
    %10 = vector.load %arg4[%c0_6, %c0_7, %c0_8] : memref<3x32x16xbf16, #tpu.memory_space<vmem>>, vector<1x32x16xbf16>
    %11 = vector.shape_cast %10 : vector<1x32x16xbf16> to vector<32x16xbf16>
    %cst_9 = arith.constant dense<0.000000e+00> : vector<8x16xf32>
    %12 = tpu.matmul %9, %11, %cst_9 {dimension_numbers = #tpu.dot_dimension_numbers<[1], [0], [0], [1], [0, 0, 1, 1], [], []>} : vector<8x32xbf16>, vector<32x16xbf16>, vector<8x16xf32> -> vector<8x16xf32>
    %13 = arith.addf %8, %12 : vector<8x16xf32>
    %14 = vector.extract_strided_slice %7 {offsets = [7, 0], sizes = [8, 32], strides = [1, 1]} : vector<16x32xbf16> to vector<8x32xbf16>
    %c1 = arith.constant 1 : index
    %c0_10 = arith.constant 0 : index
    %c0_11 = arith.constant 0 : index
    %15 = vector.load %arg4[%c1, %c0_10, %c0_11] : memref<3x32x16xbf16, #tpu.memory_space<vmem>>, vector<1x32x16xbf16>
    %16 = vector.shape_cast %15 : vector<1x32x16xbf16> to vector<32x16xbf16>
    %cst_12 = arith.constant dense<0.000000e+00> : vector<8x16xf32>
    %17 = tpu.matmul %14, %16, %cst_12 {dimension_numbers = #tpu.dot_dimension_numbers<[1], [0], [0], [1], [0, 0, 1, 1], [], []>} : vector<8x32xbf16>, vector<32x16xbf16>, vector<8x16xf32> -> vector<8x16xf32>
    %18 = arith.addf %13, %17 : vector<8x16xf32>
    %19 = vector.extract_strided_slice %7 {offsets = [8, 0], sizes = [8, 32], strides = [1, 1]} : vector<16x32xbf16> to vector<8x32xbf16>
    %c2 = arith.constant 2 : index
    %c0_13 = arith.constant 0 : index
    %c0_14 = arith.constant 0 : index
    %20 = vector.load %arg4[%c2, %c0_13, %c0_14] : memref<3x32x16xbf16, #tpu.memory_space<vmem>>, vector<1x32x16xbf16>
    %21 = vector.shape_cast %20 : vector<1x32x16xbf16> to vector<32x16xbf16>
    %cst_15 = arith.constant dense<0.000000e+00> : vector<8x16xf32>
    %22 = tpu.matmul %19, %21, %cst_15 {dimension_numbers = #tpu.dot_dimension_numbers<[1], [0], [0], [1], [0, 0, 1, 1], [], []>} : vector<8x32xbf16>, vector<32x16xbf16>, vector<8x16xf32> -> vector<8x16xf32>
    %23 = arith.addf %18, %22 : vector<8x16xf32>
    %c0_16 = arith.constant 0 : index
    %c0_17 = arith.constant 0 : index
    %c0_18 = arith.constant 0 : index
    %24 = vector.load %arg5[%c0_16, %c0_17, %c0_18] : memref<1x8x16xf32, #tpu.memory_space<vmem>>, vector<1x8x16xf32>
    %25 = vector.shape_cast %24 : vector<1x8x16xf32> to vector<8x16xf32>
    %26 = vector.shape_cast %23 : vector<8x16xf32> to vector<1x8x16xf32>
    tpu.vector_store %arg5[%c0_16, %c0_17, %c0_18], %26 {strides = array<i32>} : memref<1x8x16xf32, #tpu.memory_space<vmem>>, vector<1x8x16xf32>,
    return
  }
  func.func @transform_0(%arg0: i32, %arg1: i32) -> (i32, i32, i32, i32) {
    %c0_i32 = arith.constant 0 : i32
    %c0_i32_0 = arith.constant 0 : i32
    %c0_i32_1 = arith.constant 0 : i32
    return %arg0, %arg1, %c0_i32, %c0_i32_0 : i32, i32, i32, i32
  }
  func.func @transform_1(%arg0: i32, %arg1: i32) -> (i32, i32, i32) {
    %c0_i32 = arith.constant 0 : i32
    %c0_i32_0 = arith.constant 0 : i32
    return %arg0, %arg1, %c0_i32 : i32, i32, i32
  }
  func.func @transform_2(%arg0: i32, %arg1: i32) -> (i32, i32, i32) {
    %c0_i32 = arith.constant 0 : i32
    %c0_i32_0 = arith.constant 0 : i32
    %c0_i32_1 = arith.constant 0 : i32
    %c0_i32_2 = arith.constant 0 : i32
    return %c0_i32, %c0_i32_0, %c0_i32_1 : i32, i32, i32
  }
  func.func @transform_3(%arg0: i32, %arg1: i32) -> (i32, i32, i32) {
    %c0_i32 = arith.constant 0 : i32
    %c0_i32_0 = arith.constant 0 : i32
    return %arg0, %arg1, %c0_i32 : i32, i32, i32
  }
}

module attributes {stable_mosaic.version = 11 : i64} {
  func.func @_rvq_kernel(%arg0: i32, %arg1: memref<8x16xf32, #tpu.memory_space<vmem>>, %arg2: memref<4x16x64xf32, #tpu.memory_space<vmem>>, %arg3: memref<8x16xf32, #tpu.memory_space<vmem>>, %arg4: memref<1x4x64xf32, #tpu.memory_space<vmem>>, %arg5: memref<1x4x1xf32, #tpu.memory_space<vmem>>) attributes {dimension_semantics = [#tpu.dimension_semantics<parallel>], iteration_bounds = array<i64: 1>, scalar_prefetch = 0 : i64, scratch_operands = 0 : i64, tpu.core_type = #tpu.core_type<tc>, window_params = [{transform_indices = @transform_0, window_bounds = array<i64: 8, 16>}, {pipeline_mode = #tpu.pipeline_mode<synchronous>, transform_indices = @transform_1, window_bounds = array<i64: 4, 16, 64>}, {transform_indices = @transform_2, window_bounds = array<i64: 8, 16>}, {transform_indices = @transform_3, window_bounds = array<i64: 1, 4, 64>}, {transform_indices = @transform_4, window_bounds = array<i64: 1, 4, 1>}]} {
    %c0 = arith.constant 0 : index
    %c0_0 = arith.constant 0 : index
    %0 = vector.load %arg1[%c0, %c0_0] : memref<8x16xf32, #tpu.memory_space<vmem>>, vector<8x16xf32>
    %1 = tpu.iota {dimensions = array<i32: 0>} : vector<8x1xi32>
    %c8_i32 = arith.constant 8 : i32
    %2 = arith.muli %arg0, %c8_i32 : i32
    %3 = vector.broadcast %2 : i32 to vector<8x1xi32>
    %4 = arith.addi %1, %3 : vector<8x1xi32>
    %c8_i32_1 = arith.constant 8 : i32
    %5 = vector.broadcast %c8_i32_1 : i32 to vector<8x1xi32>
    %6 = arith.cmpi slt, %4, %5 : vector<8x1xi32>
    %7 = arith.extui %6 : vector<8x1xi1> to vector<8x1xi32>
    %8 = arith.sitofp %7 : vector<8x1xi32> to vector<8x1xf32>
    %9 = tpu.iota {dimensions = array<i32: 1>} : vector<8x64xi32>
    %cst = arith.constant 0.000000e+00 : f32
    %10 = vector.broadcast %cst : f32 to vector<8x16xf32>
    %c0_2 = arith.constant 0 : index
    %c0_3 = arith.constant 0 : index
    %c0_4 = arith.constant 0 : index
    %11 = vector.load %arg2[%c0_2, %c0_3, %c0_4] : memref<4x16x64xf32, #tpu.memory_space<vmem>>, vector<1x16x64xf32>
    %12 = vector.shape_cast %11 : vector<1x16x64xf32> to vector<16x64xf32>
    %13 = arith.mulf %12, %12 : vector<16x64xf32>
    %cst_5 = arith.constant dense<0.000000e+00> : vector<64xf32>
    %14 = vector.multi_reduction <add>, %13, %cst_5 [0] : vector<16x64xf32> to vector<64xf32>
    %15 = vector.shape_cast %14 : vector<64xf32> to vector<1x64xf32>
    %16 = arith.truncf %0 : vector<8x16xf32> to vector<8x16xbf16>
    %17 = arith.truncf %12 : vector<16x64xf32> to vector<16x64xbf16>
    %cst_6 = arith.constant dense<0.000000e+00> : vector<8x64xf32>
    %18 = tpu.matmul %16, %17, %cst_6 {dimension_numbers = #tpu.dot_dimension_numbers<[1], [0], [0], [1], [0, 0, 1, 1], [], []>} : vector<8x16xbf16>, vector<16x64xbf16>, vector<8x64xf32> -> vector<8x64xf32>
    %cst_7 = arith.constant 2.000000e+00 : f32
    %19 = vector.broadcast %cst_7 : f32 to vector<8x64xf32>
    %20 = arith.mulf %19, %18 : vector<8x64xf32>
    %21 = vector.broadcast %15 : vector<1x64xf32> to vector<8x64xf32>
    %22 = arith.subf %21, %20 : vector<8x64xf32>
    %cst_8 = arith.constant dense<0x7F800000> : vector<8xf32>
    %23 = vector.multi_reduction <minimumf>, %22, %cst_8 [1] : vector<8x64xf32> to vector<8xf32>
    %24 = vector.shape_cast %23 : vector<8xf32> to vector<8x1xf32>
    %25 = vector.broadcast %24 : vector<8x1xf32> to vector<8x64xf32>
    %26 = arith.cmpf ole, %22, %25 : vector<8x64xf32>
    %c64_i32 = arith.constant 64 : i32
    %27 = vector.broadcast %c64_i32 : i32 to vector<8x64xi32>
    %28 = arith.select %26, %9, %27 : vector<8x64xi1>, vector<8x64xi32>
    %cst_9 = arith.constant dense<2147483647> : vector<8xi32>
    %29 = vector.multi_reduction <minsi>, %28, %cst_9 [1] : vector<8x64xi32> to vector<8xi32>
    %30 = vector.shape_cast %29 : vector<8xi32> to vector<8x1xi32>
    %31 = vector.broadcast %30 : vector<8x1xi32> to vector<8x64xi32>
    %32 = arith.cmpi eq, %9, %31 : vector<8x64xi32>
    %33 = arith.extui %32 : vector<8x64xi1> to vector<8x64xi32>
    %34 = arith.sitofp %33 : vector<8x64xi32> to vector<8x64xf32>
    %cst_10 = arith.constant dense<0.000000e+00> : vector<8x16xf32>
    %35 = tpu.matmul %34, %12, %cst_10 {dimension_numbers = #tpu.dot_dimension_numbers<[1], [1], [0], [0], [0, 0, 1, 0], [], []>} : vector<8x64xf32>, vector<16x64xf32>, vector<8x16xf32> -> vector<8x16xf32>
    %36 = arith.subf %35, %0 : vector<8x16xf32>
    %37 = arith.mulf %36, %36 : vector<8x16xf32>
    %38 = vector.broadcast %8 : vector<8x1xf32> to vector<8x16xf32>
    %39 = arith.mulf %37, %38 : vector<8x16xf32>
    %cst_11 = arith.constant dense<0.000000e+00> : vector<8xf32>
    %40 = vector.multi_reduction <add>, %39, %cst_11 [1] : vector<8x16xf32> to vector<8xf32>
    %41 = vector.shape_cast %40 : vector<8xf32> to vector<8x1xf32>
    %cst_12 = arith.constant dense<0.000000e+00> : vector<1xf32>
    %42 = vector.multi_reduction <add>, %41, %cst_12 [0] : vector<8x1xf32> to vector<1xf32>
    %43 = vector.shape_cast %42 : vector<1xf32> to vector<1x1xf32>
    %44 = vector.broadcast %8 : vector<8x1xf32> to vector<8x64xf32>
    %45 = arith.mulf %34, %44 : vector<8x64xf32>
    %cst_13 = arith.constant dense<0.000000e+00> : vector<64xf32>
    %46 = vector.multi_reduction <add>, %45, %cst_13 [0] : vector<8x64xf32> to vector<64xf32>
    %47 = vector.shape_cast %46 : vector<64xf32> to vector<1x64xf32>
    %48 = arith.subf %0, %35 : vector<8x16xf32>
    %49 = arith.addf %10, %35 : vector<8x16xf32>
    %c1 = arith.constant 1 : index
    %c0_14 = arith.constant 0 : index
    %c0_15 = arith.constant 0 : index
    %50 = vector.load %arg2[%c1, %c0_14, %c0_15] : memref<4x16x64xf32, #tpu.memory_space<vmem>>, vector<1x16x64xf32>
    %51 = vector.shape_cast %50 : vector<1x16x64xf32> to vector<16x64xf32>
    %52 = arith.mulf %51, %51 : vector<16x64xf32>
    %cst_16 = arith.constant dense<0.000000e+00> : vector<64xf32>
    %53 = vector.multi_reduction <add>, %52, %cst_16 [0] : vector<16x64xf32> to vector<64xf32>
    %54 = vector.shape_cast %53 : vector<64xf32> to vector<1x64xf32>
    %55 = arith.truncf %48 : vector<8x16xf32> to vector<8x16xbf16>
    %56 = arith.truncf %51 : vector<16x64xf32> to vector<16x64xbf16>
    %cst_17 = arith.constant dense<0.000000e+00> : vector<8x64xf32>
    %57 = tpu.matmul %55, %56, %cst_17 {dimension_numbers = #tpu.dot_dimension_numbers<[1], [0], [0], [1], [0, 0, 1, 1], [], []>} : vector<8x16xbf16>, vector<16x64xbf16>, vector<8x64xf32> -> vector<8x64xf32>
    %cst_18 = arith.constant 2.000000e+00 : f32
    %58 = vector.broadcast %cst_18 : f32 to vector<8x64xf32>
    %59 = arith.mulf %58, %57 : vector<8x64xf32>
    %60 = vector.broadcast %54 : vector<1x64xf32> to vector<8x64xf32>
    %61 = arith.subf %60, %59 : vector<8x64xf32>
    %cst_19 = arith.constant dense<0x7F800000> : vector<8xf32>
    %62 = vector.multi_reduction <minimumf>, %61, %cst_19 [1] : vector<8x64xf32> to vector<8xf32>
    %63 = vector.shape_cast %62 : vector<8xf32> to vector<8x1xf32>
    %64 = vector.broadcast %63 : vector<8x1xf32> to vector<8x64xf32>
    %65 = arith.cmpf ole, %61, %64 : vector<8x64xf32>
    %c64_i32_20 = arith.constant 64 : i32
    %66 = vector.broadcast %c64_i32_20 : i32 to vector<8x64xi32>
    %67 = arith.select %65, %9, %66 : vector<8x64xi1>, vector<8x64xi32>
    %cst_21 = arith.constant dense<2147483647> : vector<8xi32>
    %68 = vector.multi_reduction <minsi>, %67, %cst_21 [1] : vector<8x64xi32> to vector<8xi32>
    %69 = vector.shape_cast %68 : vector<8xi32> to vector<8x1xi32>
    %70 = vector.broadcast %69 : vector<8x1xi32> to vector<8x64xi32>
    %71 = arith.cmpi eq, %9, %70 : vector<8x64xi32>
    %72 = arith.extui %71 : vector<8x64xi1> to vector<8x64xi32>
    %73 = arith.sitofp %72 : vector<8x64xi32> to vector<8x64xf32>
    %cst_22 = arith.constant dense<0.000000e+00> : vector<8x16xf32>
    %74 = tpu.matmul %73, %51, %cst_22 {dimension_numbers = #tpu.dot_dimension_numbers<[1], [1], [0], [0], [0, 0, 1, 0], [], []>} : vector<8x64xf32>, vector<16x64xf32>, vector<8x16xf32> -> vector<8x16xf32>
    %75 = arith.subf %74, %48 : vector<8x16xf32>
    %76 = arith.mulf %75, %75 : vector<8x16xf32>
    %77 = vector.broadcast %8 : vector<8x1xf32> to vector<8x16xf32>
    %78 = arith.mulf %76, %77 : vector<8x16xf32>
    %cst_23 = arith.constant dense<0.000000e+00> : vector<8xf32>
    %79 = vector.multi_reduction <add>, %78, %cst_23 [1] : vector<8x16xf32> to vector<8xf32>
    %80 = vector.shape_cast %79 : vector<8xf32> to vector<8x1xf32>
    %cst_24 = arith.constant dense<0.000000e+00> : vector<1xf32>
    %81 = vector.multi_reduction <add>, %80, %cst_24 [0] : vector<8x1xf32> to vector<1xf32>
    %82 = vector.shape_cast %81 : vector<1xf32> to vector<1x1xf32>
    %83 = vector.broadcast %8 : vector<8x1xf32> to vector<8x64xf32>
    %84 = arith.mulf %73, %83 : vector<8x64xf32>
    %cst_25 = arith.constant dense<0.000000e+00> : vector<64xf32>
    %85 = vector.multi_reduction <add>, %84, %cst_25 [0] : vector<8x64xf32> to vector<64xf32>
    %86 = vector.shape_cast %85 : vector<64xf32> to vector<1x64xf32>
    %87 = arith.subf %48, %74 : vector<8x16xf32>
    %88 = arith.addf %49, %74 : vector<8x16xf32>
    %c2 = arith.constant 2 : index
    %c0_26 = arith.constant 0 : index
    %c0_27 = arith.constant 0 : index
    %89 = vector.load %arg2[%c2, %c0_26, %c0_27] : memref<4x16x64xf32, #tpu.memory_space<vmem>>, vector<1x16x64xf32>
    %90 = vector.shape_cast %89 : vector<1x16x64xf32> to vector<16x64xf32>
    %91 = arith.mulf %90, %90 : vector<16x64xf32>
    %cst_28 = arith.constant dense<0.000000e+00> : vector<64xf32>
    %92 = vector.multi_reduction <add>, %91, %cst_28 [0] : vector<16x64xf32> to vector<64xf32>
    %93 = vector.shape_cast %92 : vector<64xf32> to vector<1x64xf32>
    %94 = arith.truncf %87 : vector<8x16xf32> to vector<8x16xbf16>
    %95 = arith.truncf %90 : vector<16x64xf32> to vector<16x64xbf16>
    %cst_29 = arith.constant dense<0.000000e+00> : vector<8x64xf32>
    %96 = tpu.matmul %94, %95, %cst_29 {dimension_numbers = #tpu.dot_dimension_numbers<[1], [0], [0], [1], [0, 0, 1, 1], [], []>} : vector<8x16xbf16>, vector<16x64xbf16>, vector<8x64xf32> -> vector<8x64xf32>
    %cst_30 = arith.constant 2.000000e+00 : f32
    %97 = vector.broadcast %cst_30 : f32 to vector<8x64xf32>
    %98 = arith.mulf %97, %96 : vector<8x64xf32>
    %99 = vector.broadcast %93 : vector<1x64xf32> to vector<8x64xf32>
    %100 = arith.subf %99, %98 : vector<8x64xf32>
    %cst_31 = arith.constant dense<0x7F800000> : vector<8xf32>
    %101 = vector.multi_reduction <minimumf>, %100, %cst_31 [1] : vector<8x64xf32> to vector<8xf32>
    %102 = vector.shape_cast %101 : vector<8xf32> to vector<8x1xf32>
    %103 = vector.broadcast %102 : vector<8x1xf32> to vector<8x64xf32>
    %104 = arith.cmpf ole, %100, %103 : vector<8x64xf32>
    %c64_i32_32 = arith.constant 64 : i32
    %105 = vector.broadcast %c64_i32_32 : i32 to vector<8x64xi32>
    %106 = arith.select %104, %9, %105 : vector<8x64xi1>, vector<8x64xi32>
    %cst_33 = arith.constant dense<2147483647> : vector<8xi32>
    %107 = vector.multi_reduction <minsi>, %106, %cst_33 [1] : vector<8x64xi32> to vector<8xi32>
    %108 = vector.shape_cast %107 : vector<8xi32> to vector<8x1xi32>
    %109 = vector.broadcast %108 : vector<8x1xi32> to vector<8x64xi32>
    %110 = arith.cmpi eq, %9, %109 : vector<8x64xi32>
    %111 = arith.extui %110 : vector<8x64xi1> to vector<8x64xi32>
    %112 = arith.sitofp %111 : vector<8x64xi32> to vector<8x64xf32>
    %cst_34 = arith.constant dense<0.000000e+00> : vector<8x16xf32>
    %113 = tpu.matmul %112, %90, %cst_34 {dimension_numbers = #tpu.dot_dimension_numbers<[1], [1], [0], [0], [0, 0, 1, 0], [], []>} : vector<8x64xf32>, vector<16x64xf32>, vector<8x16xf32> -> vector<8x16xf32>
    %114 = arith.subf %113, %87 : vector<8x16xf32>
    %115 = arith.mulf %114, %114 : vector<8x16xf32>
    %116 = vector.broadcast %8 : vector<8x1xf32> to vector<8x16xf32>
    %117 = arith.mulf %115, %116 : vector<8x16xf32>
    %cst_35 = arith.constant dense<0.000000e+00> : vector<8xf32>
    %118 = vector.multi_reduction <add>, %117, %cst_35 [1] : vector<8x16xf32> to vector<8xf32>
    %119 = vector.shape_cast %118 : vector<8xf32> to vector<8x1xf32>
    %cst_36 = arith.constant dense<0.000000e+00> : vector<1xf32>
    %120 = vector.multi_reduction <add>, %119, %cst_36 [0] : vector<8x1xf32> to vector<1xf32>
    %121 = vector.shape_cast %120 : vector<1xf32> to vector<1x1xf32>
    %122 = vector.broadcast %8 : vector<8x1xf32> to vector<8x64xf32>
    %123 = arith.mulf %112, %122 : vector<8x64xf32>
    %cst_37 = arith.constant dense<0.000000e+00> : vector<64xf32>
    %124 = vector.multi_reduction <add>, %123, %cst_37 [0] : vector<8x64xf32> to vector<64xf32>
    %125 = vector.shape_cast %124 : vector<64xf32> to vector<1x64xf32>
    %126 = arith.subf %87, %113 : vector<8x16xf32>
    %127 = arith.addf %88, %113 : vector<8x16xf32>
    %c3 = arith.constant 3 : index
    %c0_38 = arith.constant 0 : index
    %c0_39 = arith.constant 0 : index
    %128 = vector.load %arg2[%c3, %c0_38, %c0_39] : memref<4x16x64xf32, #tpu.memory_space<vmem>>, vector<1x16x64xf32>
    %129 = vector.shape_cast %128 : vector<1x16x64xf32> to vector<16x64xf32>
    %130 = arith.mulf %129, %129 : vector<16x64xf32>
    %cst_40 = arith.constant dense<0.000000e+00> : vector<64xf32>
    %131 = vector.multi_reduction <add>, %130, %cst_40 [0] : vector<16x64xf32> to vector<64xf32>
    %132 = vector.shape_cast %131 : vector<64xf32> to vector<1x64xf32>
    %133 = arith.truncf %126 : vector<8x16xf32> to vector<8x16xbf16>
    %134 = arith.truncf %129 : vector<16x64xf32> to vector<16x64xbf16>
    %cst_41 = arith.constant dense<0.000000e+00> : vector<8x64xf32>
    %135 = tpu.matmul %133, %134, %cst_41 {dimension_numbers = #tpu.dot_dimension_numbers<[1], [0], [0], [1], [0, 0, 1, 1], [], []>} : vector<8x16xbf16>, vector<16x64xbf16>, vector<8x64xf32> -> vector<8x64xf32>
    %cst_42 = arith.constant 2.000000e+00 : f32
    %136 = vector.broadcast %cst_42 : f32 to vector<8x64xf32>
    %137 = arith.mulf %136, %135 : vector<8x64xf32>
    %138 = vector.broadcast %132 : vector<1x64xf32> to vector<8x64xf32>
    %139 = arith.subf %138, %137 : vector<8x64xf32>
    %cst_43 = arith.constant dense<0x7F800000> : vector<8xf32>
    %140 = vector.multi_reduction <minimumf>, %139, %cst_43 [1] : vector<8x64xf32> to vector<8xf32>
    %141 = vector.shape_cast %140 : vector<8xf32> to vector<8x1xf32>
    %142 = vector.broadcast %141 : vector<8x1xf32> to vector<8x64xf32>
    %143 = arith.cmpf ole, %139, %142 : vector<8x64xf32>
    %c64_i32_44 = arith.constant 64 : i32
    %144 = vector.broadcast %c64_i32_44 : i32 to vector<8x64xi32>
    %145 = arith.select %143, %9, %144 : vector<8x64xi1>, vector<8x64xi32>
    %cst_45 = arith.constant dense<2147483647> : vector<8xi32>
    %146 = vector.multi_reduction <minsi>, %145, %cst_45 [1] : vector<8x64xi32> to vector<8xi32>
    %147 = vector.shape_cast %146 : vector<8xi32> to vector<8x1xi32>
    %148 = vector.broadcast %147 : vector<8x1xi32> to vector<8x64xi32>
    %149 = arith.cmpi eq, %9, %148 : vector<8x64xi32>
    %150 = arith.extui %149 : vector<8x64xi1> to vector<8x64xi32>
    %151 = arith.sitofp %150 : vector<8x64xi32> to vector<8x64xf32>
    %cst_46 = arith.constant dense<0.000000e+00> : vector<8x16xf32>
    %152 = tpu.matmul %151, %129, %cst_46 {dimension_numbers = #tpu.dot_dimension_numbers<[1], [1], [0], [0], [0, 0, 1, 0], [], []>} : vector<8x64xf32>, vector<16x64xf32>, vector<8x16xf32> -> vector<8x16xf32>
    %153 = arith.subf %152, %126 : vector<8x16xf32>
    %154 = arith.mulf %153, %153 : vector<8x16xf32>
    %155 = vector.broadcast %8 : vector<8x1xf32> to vector<8x16xf32>
    %156 = arith.mulf %154, %155 : vector<8x16xf32>
    %cst_47 = arith.constant dense<0.000000e+00> : vector<8xf32>
    %157 = vector.multi_reduction <add>, %156, %cst_47 [1] : vector<8x16xf32> to vector<8xf32>
    %158 = vector.shape_cast %157 : vector<8xf32> to vector<8x1xf32>
    %cst_48 = arith.constant dense<0.000000e+00> : vector<1xf32>
    %159 = vector.multi_reduction <add>, %158, %cst_48 [0] : vector<8x1xf32> to vector<1xf32>
    %160 = vector.shape_cast %159 : vector<1xf32> to vector<1x1xf32>
    %161 = vector.broadcast %8 : vector<8x1xf32> to vector<8x64xf32>
    %162 = arith.mulf %151, %161 : vector<8x64xf32>
    %cst_49 = arith.constant dense<0.000000e+00> : vector<64xf32>
    %163 = vector.multi_reduction <add>, %162, %cst_49 [0] : vector<8x64xf32> to vector<64xf32>
    %164 = vector.shape_cast %163 : vector<64xf32> to vector<1x64xf32>
    %165 = arith.addf %127, %152 : vector<8x16xf32>
    %c0_50 = arith.constant 0 : index
    %c0_51 = arith.constant 0 : index
    %166 = vector.load %arg3[%c0_50, %c0_51] : memref<8x16xf32, #tpu.memory_space<vmem>>, vector<8x16xf32>
    tpu.vector_store %arg3[%c0_50, %c0_51], %165 {strides = array<i32>} : memref<8x16xf32, #tpu.memory_space<vmem>>, vector<8x16xf32>,
    %167 = tpu.concatenate %47, %86, %125, %164 in 0 : vector<1x64xf32>, vector<1x64xf32>, vector<1x64xf32>, vector<1x64xf32> -> vector<4x64xf32>
    %c0_52 = arith.constant 0 : index
    %c0_53 = arith.constant 0 : index
    %c0_54 = arith.constant 0 : index
    %168 = vector.load %arg4[%c0_52, %c0_53, %c0_54] : memref<1x4x64xf32, #tpu.memory_space<vmem>>, vector<1x4x64xf32>
    %169 = vector.shape_cast %168 : vector<1x4x64xf32> to vector<4x64xf32>
    %170 = vector.shape_cast %167 : vector<4x64xf32> to vector<1x4x64xf32>
    tpu.vector_store %arg4[%c0_52, %c0_53, %c0_54], %170 {strides = array<i32>} : memref<1x4x64xf32, #tpu.memory_space<vmem>>, vector<1x4x64xf32>,
    %171 = tpu.concatenate %43, %82, %121, %160 in 0 : vector<1x1xf32>, vector<1x1xf32>, vector<1x1xf32>, vector<1x1xf32> -> vector<4x1xf32>
    %c0_55 = arith.constant 0 : index
    %c0_56 = arith.constant 0 : index
    %c0_57 = arith.constant 0 : index
    %172 = vector.load %arg5[%c0_55, %c0_56, %c0_57] : memref<1x4x1xf32, #tpu.memory_space<vmem>>, vector<1x4x1xf32>
    %173 = vector.shape_cast %172 : vector<1x4x1xf32> to vector<4x1xf32>
    %174 = vector.shape_cast %171 : vector<4x1xf32> to vector<1x4x1xf32>
    tpu.vector_store %arg5[%c0_55, %c0_56, %c0_57], %174 {strides = array<i32>} : memref<1x4x1xf32, #tpu.memory_space<vmem>>, vector<1x4x1xf32>,
    return
  }
  func.func @transform_0(%arg0: i32) -> (i32, i32) {
    %c0_i32 = arith.constant 0 : i32
    %c0_i32_0 = arith.constant 0 : i32
    return %arg0, %c0_i32 : i32, i32
  }
  func.func @transform_1(%arg0: i32) -> (i32, i32, i32) {
    %c0_i32 = arith.constant 0 : i32
    %c0_i32_0 = arith.constant 0 : i32
    %c0_i32_1 = arith.constant 0 : i32
    %c0_i32_2 = arith.constant 0 : i32
    return %c0_i32, %c0_i32_0, %c0_i32_1 : i32, i32, i32
  }
  func.func @transform_2(%arg0: i32) -> (i32, i32) {
    %c0_i32 = arith.constant 0 : i32
    %c0_i32_0 = arith.constant 0 : i32
    return %arg0, %c0_i32 : i32, i32
  }
  func.func @transform_3(%arg0: i32) -> (i32, i32, i32) {
    %c0_i32 = arith.constant 0 : i32
    %c0_i32_0 = arith.constant 0 : i32
    %c0_i32_1 = arith.constant 0 : i32
    return %arg0, %c0_i32, %c0_i32_0 : i32, i32, i32
  }
  func.func @transform_4(%arg0: i32) -> (i32, i32, i32) {
    %c0_i32 = arith.constant 0 : i32
    %c0_i32_0 = arith.constant 0 : i32
    %c0_i32_1 = arith.constant 0 : i32
    return %arg0, %c0_i32, %c0_i32_0 : i32, i32, i32
  }
}

module attributes {stable_mosaic.version = 11 : i64} {
  func.func @_conv_kernel(%arg0: i32, %arg1: i32, %arg2: memref<1x1x8x16xf32, #tpu.memory_space<vmem>>, %arg3: memref<1x8x16xf32, #tpu.memory_space<vmem>>, %arg4: memref<7x16x32xbf16, #tpu.memory_space<vmem>>, %arg5: memref<1x8x32xbf16, #tpu.memory_space<vmem>>) attributes {dimension_semantics = [#tpu.dimension_semantics<parallel>, #tpu.dimension_semantics<parallel>], iteration_bounds = array<i64: 2, 1>, scalar_prefetch = 0 : i64, scratch_operands = 0 : i64, tpu.core_type = #tpu.core_type<tc>, window_params = [{transform_indices = @transform_0, window_bounds = array<i64: 1, 1, 8, 16>}, {transform_indices = @transform_1, window_bounds = array<i64: 1, 8, 16>}, {pipeline_mode = #tpu.pipeline_mode<synchronous>, transform_indices = @transform_2, window_bounds = array<i64: 7, 16, 32>}, {transform_indices = @transform_3, window_bounds = array<i64: 1, 8, 32>}]} {
    %c0 = arith.constant 0 : index
    %c0_0 = arith.constant 0 : index
    %c0_1 = arith.constant 0 : index
    %0 = vector.load %arg3[%c0, %c0_0, %c0_1] : memref<1x8x16xf32, #tpu.memory_space<vmem>>, vector<1x8x16xf32>
    %1 = vector.shape_cast %0 : vector<1x8x16xf32> to vector<8x16xf32>
    %c0_2 = arith.constant 0 : index
    %c0_3 = arith.constant 0 : index
    %c0_4 = arith.constant 0 : index
    %c0_5 = arith.constant 0 : index
    %2 = vector.load %arg2[%c0_2, %c0_3, %c0_4, %c0_5] : memref<1x1x8x16xf32, #tpu.memory_space<vmem>>, vector<1x1x8x16xf32>
    %3 = vector.shape_cast %2 : vector<1x1x8x16xf32> to vector<8x16xf32>
    %4 = tpu.concatenate %3, %1 in 0 : vector<8x16xf32>, vector<8x16xf32> -> vector<16x16xf32>
    %5 = arith.truncf %4 : vector<16x16xf32> to vector<16x16xbf16>
    %cst = arith.constant 0.000000e+00 : f32
    %6 = vector.broadcast %cst : f32 to vector<8x32xf32>
    %7 = vector.extract_strided_slice %5 {offsets = [2, 0], sizes = [8, 16], strides = [1, 1]} : vector<16x16xbf16> to vector<8x16xbf16>
    %c0_6 = arith.constant 0 : index
    %c0_7 = arith.constant 0 : index
    %c0_8 = arith.constant 0 : index
    %8 = vector.load %arg4[%c0_6, %c0_7, %c0_8] : memref<7x16x32xbf16, #tpu.memory_space<vmem>>, vector<1x16x32xbf16>
    %9 = vector.shape_cast %8 : vector<1x16x32xbf16> to vector<16x32xbf16>
    %cst_9 = arith.constant dense<0.000000e+00> : vector<8x32xf32>
    %10 = tpu.matmul %7, %9, %cst_9 {dimension_numbers = #tpu.dot_dimension_numbers<[1], [0], [0], [1], [0, 0, 1, 1], [], []>} : vector<8x16xbf16>, vector<16x32xbf16>, vector<8x32xf32> -> vector<8x32xf32>
    %11 = arith.addf %6, %10 : vector<8x32xf32>
    %12 = vector.extract_strided_slice %5 {offsets = [3, 0], sizes = [8, 16], strides = [1, 1]} : vector<16x16xbf16> to vector<8x16xbf16>
    %c1 = arith.constant 1 : index
    %c0_10 = arith.constant 0 : index
    %c0_11 = arith.constant 0 : index
    %13 = vector.load %arg4[%c1, %c0_10, %c0_11] : memref<7x16x32xbf16, #tpu.memory_space<vmem>>, vector<1x16x32xbf16>
    %14 = vector.shape_cast %13 : vector<1x16x32xbf16> to vector<16x32xbf16>
    %cst_12 = arith.constant dense<0.000000e+00> : vector<8x32xf32>
    %15 = tpu.matmul %12, %14, %cst_12 {dimension_numbers = #tpu.dot_dimension_numbers<[1], [0], [0], [1], [0, 0, 1, 1], [], []>} : vector<8x16xbf16>, vector<16x32xbf16>, vector<8x32xf32> -> vector<8x32xf32>
    %16 = arith.addf %11, %15 : vector<8x32xf32>
    %17 = vector.extract_strided_slice %5 {offsets = [4, 0], sizes = [8, 16], strides = [1, 1]} : vector<16x16xbf16> to vector<8x16xbf16>
    %c2 = arith.constant 2 : index
    %c0_13 = arith.constant 0 : index
    %c0_14 = arith.constant 0 : index
    %18 = vector.load %arg4[%c2, %c0_13, %c0_14] : memref<7x16x32xbf16, #tpu.memory_space<vmem>>, vector<1x16x32xbf16>
    %19 = vector.shape_cast %18 : vector<1x16x32xbf16> to vector<16x32xbf16>
    %cst_15 = arith.constant dense<0.000000e+00> : vector<8x32xf32>
    %20 = tpu.matmul %17, %19, %cst_15 {dimension_numbers = #tpu.dot_dimension_numbers<[1], [0], [0], [1], [0, 0, 1, 1], [], []>} : vector<8x16xbf16>, vector<16x32xbf16>, vector<8x32xf32> -> vector<8x32xf32>
    %21 = arith.addf %16, %20 : vector<8x32xf32>
    %22 = vector.extract_strided_slice %5 {offsets = [5, 0], sizes = [8, 16], strides = [1, 1]} : vector<16x16xbf16> to vector<8x16xbf16>
    %c3 = arith.constant 3 : index
    %c0_16 = arith.constant 0 : index
    %c0_17 = arith.constant 0 : index
    %23 = vector.load %arg4[%c3, %c0_16, %c0_17] : memref<7x16x32xbf16, #tpu.memory_space<vmem>>, vector<1x16x32xbf16>
    %24 = vector.shape_cast %23 : vector<1x16x32xbf16> to vector<16x32xbf16>
    %cst_18 = arith.constant dense<0.000000e+00> : vector<8x32xf32>
    %25 = tpu.matmul %22, %24, %cst_18 {dimension_numbers = #tpu.dot_dimension_numbers<[1], [0], [0], [1], [0, 0, 1, 1], [], []>} : vector<8x16xbf16>, vector<16x32xbf16>, vector<8x32xf32> -> vector<8x32xf32>
    %26 = arith.addf %21, %25 : vector<8x32xf32>
    %27 = vector.extract_strided_slice %5 {offsets = [6, 0], sizes = [8, 16], strides = [1, 1]} : vector<16x16xbf16> to vector<8x16xbf16>
    %c4 = arith.constant 4 : index
    %c0_19 = arith.constant 0 : index
    %c0_20 = arith.constant 0 : index
    %28 = vector.load %arg4[%c4, %c0_19, %c0_20] : memref<7x16x32xbf16, #tpu.memory_space<vmem>>, vector<1x16x32xbf16>
    %29 = vector.shape_cast %28 : vector<1x16x32xbf16> to vector<16x32xbf16>
    %cst_21 = arith.constant dense<0.000000e+00> : vector<8x32xf32>
    %30 = tpu.matmul %27, %29, %cst_21 {dimension_numbers = #tpu.dot_dimension_numbers<[1], [0], [0], [1], [0, 0, 1, 1], [], []>} : vector<8x16xbf16>, vector<16x32xbf16>, vector<8x32xf32> -> vector<8x32xf32>
    %31 = arith.addf %26, %30 : vector<8x32xf32>
    %32 = vector.extract_strided_slice %5 {offsets = [7, 0], sizes = [8, 16], strides = [1, 1]} : vector<16x16xbf16> to vector<8x16xbf16>
    %c5 = arith.constant 5 : index
    %c0_22 = arith.constant 0 : index
    %c0_23 = arith.constant 0 : index
    %33 = vector.load %arg4[%c5, %c0_22, %c0_23] : memref<7x16x32xbf16, #tpu.memory_space<vmem>>, vector<1x16x32xbf16>
    %34 = vector.shape_cast %33 : vector<1x16x32xbf16> to vector<16x32xbf16>
    %cst_24 = arith.constant dense<0.000000e+00> : vector<8x32xf32>
    %35 = tpu.matmul %32, %34, %cst_24 {dimension_numbers = #tpu.dot_dimension_numbers<[1], [0], [0], [1], [0, 0, 1, 1], [], []>} : vector<8x16xbf16>, vector<16x32xbf16>, vector<8x32xf32> -> vector<8x32xf32>
    %36 = arith.addf %31, %35 : vector<8x32xf32>
    %37 = vector.extract_strided_slice %5 {offsets = [8, 0], sizes = [8, 16], strides = [1, 1]} : vector<16x16xbf16> to vector<8x16xbf16>
    %c6 = arith.constant 6 : index
    %c0_25 = arith.constant 0 : index
    %c0_26 = arith.constant 0 : index
    %38 = vector.load %arg4[%c6, %c0_25, %c0_26] : memref<7x16x32xbf16, #tpu.memory_space<vmem>>, vector<1x16x32xbf16>
    %39 = vector.shape_cast %38 : vector<1x16x32xbf16> to vector<16x32xbf16>
    %cst_27 = arith.constant dense<0.000000e+00> : vector<8x32xf32>
    %40 = tpu.matmul %37, %39, %cst_27 {dimension_numbers = #tpu.dot_dimension_numbers<[1], [0], [0], [1], [0, 0, 1, 1], [], []>} : vector<8x16xbf16>, vector<16x32xbf16>, vector<8x32xf32> -> vector<8x32xf32>
    %41 = arith.addf %36, %40 : vector<8x32xf32>
    %42 = arith.truncf %41 : vector<8x32xf32> to vector<8x32xbf16>
    %c0_28 = arith.constant 0 : index
    %c0_29 = arith.constant 0 : index
    %c0_30 = arith.constant 0 : index
    %43 = vector.load %arg5[%c0_28, %c0_29, %c0_30] : memref<1x8x32xbf16, #tpu.memory_space<vmem>>, vector<1x8x32xbf16>
    %44 = vector.shape_cast %43 : vector<1x8x32xbf16> to vector<8x32xbf16>
    %45 = vector.shape_cast %42 : vector<8x32xbf16> to vector<1x8x32xbf16>
    tpu.vector_store %arg5[%c0_28, %c0_29, %c0_30], %45 {strides = array<i32>} : memref<1x8x32xbf16, #tpu.memory_space<vmem>>, vector<1x8x32xbf16>,
    return
  }
  func.func @transform_0(%arg0: i32, %arg1: i32) -> (i32, i32, i32, i32) {
    %c0_i32 = arith.constant 0 : i32
    %c0_i32_0 = arith.constant 0 : i32
    %c0_i32_1 = arith.constant 0 : i32
    return %arg0, %arg1, %c0_i32, %c0_i32_0 : i32, i32, i32, i32
  }
  func.func @transform_1(%arg0: i32, %arg1: i32) -> (i32, i32, i32) {
    %c0_i32 = arith.constant 0 : i32
    %c0_i32_0 = arith.constant 0 : i32
    return %arg0, %arg1, %c0_i32 : i32, i32, i32
  }
  func.func @transform_2(%arg0: i32, %arg1: i32) -> (i32, i32, i32) {
    %c0_i32 = arith.constant 0 : i32
    %c0_i32_0 = arith.constant 0 : i32
    %c0_i32_1 = arith.constant 0 : i32
    %c0_i32_2 = arith.constant 0 : i32
    return %c0_i32, %c0_i32_0, %c0_i32_1 : i32, i32, i32
  }
  func.func @transform_3(%arg0: i32, %arg1: i32) -> (i32, i32, i32) {
    %c0_i32 = arith.constant 0 : i32
    %c0_i32_0 = arith.constant 0 : i32
    return %arg0, %arg1, %c0_i32 : i32, i32, i32
  }
}

module attributes {stable_mosaic.version = 11 : i64} {
  func.func @_conv_kernel(%arg0: i32, %arg1: i32, %arg2: memref<1x1x8x32xbf16, #tpu.memory_space<vmem>>, %arg3: memref<1x8x32xbf16, #tpu.memory_space<vmem>>, %arg4: memref<2x32x48xbf16, #tpu.memory_space<vmem>>, %arg5: memref<1x48xf32, #tpu.memory_space<vmem>>, %arg6: memref<1x8x48xbf16, #tpu.memory_space<vmem>>) attributes {dimension_semantics = [#tpu.dimension_semantics<parallel>, #tpu.dimension_semantics<parallel>], iteration_bounds = array<i64: 2, 1>, scalar_prefetch = 0 : i64, scratch_operands = 0 : i64, tpu.core_type = #tpu.core_type<tc>, window_params = [{transform_indices = @transform_0, window_bounds = array<i64: 1, 1, 8, 32>}, {transform_indices = @transform_1, window_bounds = array<i64: 1, 8, 32>}, {pipeline_mode = #tpu.pipeline_mode<synchronous>, transform_indices = @transform_2, window_bounds = array<i64: 2, 32, 48>}, {pipeline_mode = #tpu.pipeline_mode<synchronous>, transform_indices = @transform_3, window_bounds = array<i64: 1, 48>}, {transform_indices = @transform_4, window_bounds = array<i64: 1, 8, 48>}]} {
    %c0 = arith.constant 0 : index
    %c0_0 = arith.constant 0 : index
    %c0_1 = arith.constant 0 : index
    %0 = vector.load %arg3[%c0, %c0_0, %c0_1] : memref<1x8x32xbf16, #tpu.memory_space<vmem>>, vector<1x8x32xbf16>
    %1 = vector.shape_cast %0 : vector<1x8x32xbf16> to vector<8x32xbf16>
    %2 = arith.extf %1 : vector<8x32xbf16> to vector<8x32xf32>
    %c0_2 = arith.constant 0 : index
    %c0_3 = arith.constant 0 : index
    %c0_4 = arith.constant 0 : index
    %c0_5 = arith.constant 0 : index
    %3 = vector.load %arg2[%c0_2, %c0_3, %c0_4, %c0_5] : memref<1x1x8x32xbf16, #tpu.memory_space<vmem>>, vector<1x1x8x32xbf16>
    %4 = vector.shape_cast %3 : vector<1x1x8x32xbf16> to vector<8x32xbf16>
    %5 = arith.extf %4 : vector<8x32xbf16> to vector<8x32xf32>
    %6 = tpu.concatenate %5, %2 in 0 : vector<8x32xf32>, vector<8x32xf32> -> vector<16x32xf32>
    %7 = arith.truncf %6 : vector<16x32xf32> to vector<16x32xbf16>
    %cst = arith.constant 0.000000e+00 : f32
    %8 = vector.broadcast %cst : f32 to vector<8x48xf32>
    %9 = vector.extract_strided_slice %7 {offsets = [7, 0], sizes = [8, 32], strides = [1, 1]} : vector<16x32xbf16> to vector<8x32xbf16>
    %c0_6 = arith.constant 0 : index
    %c0_7 = arith.constant 0 : index
    %c0_8 = arith.constant 0 : index
    %10 = vector.load %arg4[%c0_6, %c0_7, %c0_8] : memref<2x32x48xbf16, #tpu.memory_space<vmem>>, vector<1x32x48xbf16>
    %11 = vector.shape_cast %10 : vector<1x32x48xbf16> to vector<32x48xbf16>
    %cst_9 = arith.constant dense<0.000000e+00> : vector<8x48xf32>
    %12 = tpu.matmul %9, %11, %cst_9 {dimension_numbers = #tpu.dot_dimension_numbers<[1], [0], [0], [1], [0, 0, 1, 1], [], []>} : vector<8x32xbf16>, vector<32x48xbf16>, vector<8x48xf32> -> vector<8x48xf32>
    %13 = arith.addf %8, %12 : vector<8x48xf32>
    %14 = vector.extract_strided_slice %7 {offsets = [8, 0], sizes = [8, 32], strides = [1, 1]} : vector<16x32xbf16> to vector<8x32xbf16>
    %c1 = arith.constant 1 : index
    %c0_10 = arith.constant 0 : index
    %c0_11 = arith.constant 0 : index
    %15 = vector.load %arg4[%c1, %c0_10, %c0_11] : memref<2x32x48xbf16, #tpu.memory_space<vmem>>, vector<1x32x48xbf16>
    %16 = vector.shape_cast %15 : vector<1x32x48xbf16> to vector<32x48xbf16>
    %cst_12 = arith.constant dense<0.000000e+00> : vector<8x48xf32>
    %17 = tpu.matmul %14, %16, %cst_12 {dimension_numbers = #tpu.dot_dimension_numbers<[1], [0], [0], [1], [0, 0, 1, 1], [], []>} : vector<8x32xbf16>, vector<32x48xbf16>, vector<8x48xf32> -> vector<8x48xf32>
    %18 = arith.addf %13, %17 : vector<8x48xf32>
    %c0_13 = arith.constant 0 : index
    %c0_14 = arith.constant 0 : index
    %19 = vector.load %arg5[%c0_13, %c0_14] : memref<1x48xf32, #tpu.memory_space<vmem>>, vector<1x48xf32>
    %20 = vector.broadcast %19 : vector<1x48xf32> to vector<8x48xf32>
    %21 = arith.addf %18, %20 : vector<8x48xf32>
    %22 = arith.truncf %21 : vector<8x48xf32> to vector<8x48xbf16>
    %c0_15 = arith.constant 0 : index
    %c0_16 = arith.constant 0 : index
    %c0_17 = arith.constant 0 : index
    %23 = vector.load %arg6[%c0_15, %c0_16, %c0_17] : memref<1x8x48xbf16, #tpu.memory_space<vmem>>, vector<1x8x48xbf16>
    %24 = vector.shape_cast %23 : vector<1x8x48xbf16> to vector<8x48xbf16>
    %25 = vector.shape_cast %22 : vector<8x48xbf16> to vector<1x8x48xbf16>
    tpu.vector_store %arg6[%c0_15, %c0_16, %c0_17], %25 {strides = array<i32>} : memref<1x8x48xbf16, #tpu.memory_space<vmem>>, vector<1x8x48xbf16>,
    return
  }
  func.func @transform_0(%arg0: i32, %arg1: i32) -> (i32, i32, i32, i32) {
    %c0_i32 = arith.constant 0 : i32
    %c0_i32_0 = arith.constant 0 : i32
    %c0_i32_1 = arith.constant 0 : i32
    return %arg0, %arg1, %c0_i32, %c0_i32_0 : i32, i32, i32, i32
  }
  func.func @transform_1(%arg0: i32, %arg1: i32) -> (i32, i32, i32) {
    %c0_i32 = arith.constant 0 : i32
    %c0_i32_0 = arith.constant 0 : i32
    return %arg0, %arg1, %c0_i32 : i32, i32, i32
  }
  func.func @transform_2(%arg0: i32, %arg1: i32) -> (i32, i32, i32) {
    %c0_i32 = arith.constant 0 : i32
    %c0_i32_0 = arith.constant 0 : i32
    %c0_i32_1 = arith.constant 0 : i32
    %c0_i32_2 = arith.constant 0 : i32
    return %c0_i32, %c0_i32_0, %c0_i32_1 : i32, i32, i32
  }
  func.func @transform_3(%arg0: i32, %arg1: i32) -> (i32, i32) {
    %c0_i32 = arith.constant 0 : i32
    %c0_i32_0 = arith.constant 0 : i32
    %c0_i32_1 = arith.constant 0 : i32
    return %c0_i32, %c0_i32_0 : i32, i32
  }
  func.func @transform_4(%arg0: i32, %arg1: i32) -> (i32, i32, i32) {
    %c0_i32 = arith.constant 0 : i32
    %c0_i32_0 = arith.constant 0 : i32
    return %arg0, %arg1, %c0_i32 : i32, i32, i32
  }
}

module attributes {stable_mosaic.version = 11 : i64} {
  func.func @_conv_kernel(%arg0: i32, %arg1: i32, %arg2: memref<1x1x8x1024xbf16, #tpu.memory_space<vmem>>, %arg3: memref<1x8x1024xbf16, #tpu.memory_space<vmem>>, %arg4: memref<2x1024x128xbf16, #tpu.memory_space<vmem>>, %arg5: memref<1x8x128xf32, #tpu.memory_space<vmem>>) attributes {dimension_semantics = [#tpu.dimension_semantics<parallel>, #tpu.dimension_semantics<parallel>], iteration_bounds = array<i64: 2, 1>, scalar_prefetch = 0 : i64, scratch_operands = 0 : i64, tpu.core_type = #tpu.core_type<tc>, window_params = [{transform_indices = @transform_0, window_bounds = array<i64: 1, 1, 8, 1024>}, {transform_indices = @transform_1, window_bounds = array<i64: 1, 8, 1024>}, {pipeline_mode = #tpu.pipeline_mode<synchronous>, transform_indices = @transform_2, window_bounds = array<i64: 2, 1024, 128>}, {transform_indices = @transform_3, window_bounds = array<i64: 1, 8, 128>}]} {
    %c0 = arith.constant 0 : index
    %c0_0 = arith.constant 0 : index
    %c0_1 = arith.constant 0 : index
    %0 = vector.load %arg3[%c0, %c0_0, %c0_1] : memref<1x8x1024xbf16, #tpu.memory_space<vmem>>, vector<1x8x1024xbf16>
    %1 = vector.shape_cast %0 : vector<1x8x1024xbf16> to vector<8x1024xbf16>
    %2 = arith.extf %1 : vector<8x1024xbf16> to vector<8x1024xf32>
    %c0_2 = arith.constant 0 : index
    %c0_3 = arith.constant 0 : index
    %c0_4 = arith.constant 0 : index
    %c0_5 = arith.constant 0 : index
    %3 = vector.load %arg2[%c0_2, %c0_3, %c0_4, %c0_5] : memref<1x1x8x1024xbf16, #tpu.memory_space<vmem>>, vector<1x1x8x1024xbf16>
    %4 = vector.shape_cast %3 : vector<1x1x8x1024xbf16> to vector<8x1024xbf16>
    %5 = arith.extf %4 : vector<8x1024xbf16> to vector<8x1024xf32>
    %6 = tpu.concatenate %5, %2 in 0 : vector<8x1024xf32>, vector<8x1024xf32> -> vector<16x1024xf32>
    %7 = arith.truncf %6 : vector<16x1024xf32> to vector<16x1024xbf16>
    %cst = arith.constant 0.000000e+00 : f32
    %8 = vector.broadcast %cst : f32 to vector<8x128xf32>
    %9 = vector.extract_strided_slice %7 {offsets = [7, 0], sizes = [8, 1024], strides = [1, 1]} : vector<16x1024xbf16> to vector<8x1024xbf16>
    %c0_6 = arith.constant 0 : index
    %c0_7 = arith.constant 0 : index
    %c0_8 = arith.constant 0 : index
    %10 = vector.load %arg4[%c0_6, %c0_7, %c0_8] : memref<2x1024x128xbf16, #tpu.memory_space<vmem>>, vector<1x1024x128xbf16>
    %11 = vector.shape_cast %10 : vector<1x1024x128xbf16> to vector<1024x128xbf16>
    %cst_9 = arith.constant dense<0.000000e+00> : vector<8x128xf32>
    %12 = tpu.matmul %9, %11, %cst_9 {dimension_numbers = #tpu.dot_dimension_numbers<[1], [0], [0], [1], [0, 0, 1, 1], [], []>} : vector<8x1024xbf16>, vector<1024x128xbf16>, vector<8x128xf32> -> vector<8x128xf32>
    %13 = arith.addf %8, %12 : vector<8x128xf32>
    %14 = vector.extract_strided_slice %7 {offsets = [8, 0], sizes = [8, 1024], strides = [1, 1]} : vector<16x1024xbf16> to vector<8x1024xbf16>
    %c1 = arith.constant 1 : index
    %c0_10 = arith.constant 0 : index
    %c0_11 = arith.constant 0 : index
    %15 = vector.load %arg4[%c1, %c0_10, %c0_11] : memref<2x1024x128xbf16, #tpu.memory_space<vmem>>, vector<1x1024x128xbf16>
    %16 = vector.shape_cast %15 : vector<1x1024x128xbf16> to vector<1024x128xbf16>
    %cst_12 = arith.constant dense<0.000000e+00> : vector<8x128xf32>
    %17 = tpu.matmul %14, %16, %cst_12 {dimension_numbers = #tpu.dot_dimension_numbers<[1], [0], [0], [1], [0, 0, 1, 1], [], []>} : vector<8x1024xbf16>, vector<1024x128xbf16>, vector<8x128xf32> -> vector<8x128xf32>
    %18 = arith.addf %13, %17 : vector<8x128xf32>
    %c0_13 = arith.constant 0 : index
    %c0_14 = arith.constant 0 : index
    %c0_15 = arith.constant 0 : index
    %19 = vector.load %arg5[%c0_13, %c0_14, %c0_15] : memref<1x8x128xf32, #tpu.memory_space<vmem>>, vector<1x8x128xf32>
    %20 = vector.shape_cast %19 : vector<1x8x128xf32> to vector<8x128xf32>
    %21 = vector.shape_cast %18 : vector<8x128xf32> to vector<1x8x128xf32>
    tpu.vector_store %arg5[%c0_13, %c0_14, %c0_15], %21 {strides = array<i32>} : memref<1x8x128xf32, #tpu.memory_space<vmem>>, vector<1x8x128xf32>,
    return
  }
  func.func @transform_0(%arg0: i32, %arg1: i32) -> (i32, i32, i32, i32) {
    %c0_i32 = arith.constant 0 : i32
    %c0_i32_0 = arith.constant 0 : i32
    %c0_i32_1 = arith.constant 0 : i32
    return %arg0, %arg1, %c0_i32, %c0_i32_0 : i32, i32, i32, i32
  }
  func.func @transform_1(%arg0: i32, %arg1: i32) -> (i32, i32, i32) {
    %c0_i32 = arith.constant 0 : i32
    %c0_i32_0 = arith.constant 0 : i32
    return %arg0, %arg1, %c0_i32 : i32, i32, i32
  }
  func.func @transform_2(%arg0: i32, %arg1: i32) -> (i32, i32, i32) {
    %c0_i32 = arith.constant 0 : i32
    %c0_i32_0 = arith.constant 0 : i32
    %c0_i32_1 = arith.constant 0 : i32
    %c0_i32_2 = arith.constant 0 : i32
    return %c0_i32, %c0_i32_0, %c0_i32_1 : i32, i32, i32
  }
  func.func @transform_3(%arg0: i32, %arg1: i32) -> (i32, i32, i32) {
    %c0_i32 = arith.constant 0 : i32
    %c0_i32_0 = arith.constant 0 : i32
    return %arg0, %arg1, %c0_i32 : i32, i32, i32
  }
}

</mosaic_0001>

<bundles_post_ra>
// kernel: generator_forward.21
= control target key start
LH: loop header
LB: loop body
LE: loop exit
PB: predicated region body
PF: predicated region fallthrough
CT: control target
= control target key end

     0   :  { %s2117_s12 = smov 0   ;;  %s2119_s13 = smov 0   ;;  %s2954_s0 = inlined_call_operand.vmem [shape: f32[2,1,8,128], index: 0, kind: input, shape index: {}]   ;;  %s2955_s1 = inlined_call_operand.vmem [shape: f32[2,8,128], index: 1, kind: input, shape index: {}]   ;;  %s2956_s2 = inlined_call_operand.vmem [shape: bf16[2,128,1024], index: 2, kind: input, shape index: {}]   ;;  %s2957_s3 = inlined_call_operand.vmem [shape: bf16[2,8,1024], index: 3, kind: output, shape index: {}]  }
   0x1   :  { %s2121_s14 = smov 0  }
   0x2 LB: > { %s25_s15 = sadd.s32 1, %s2091_s13  ;;  %p1337_p0 = scmp.ge.s32.totalorder %s2095_s14, 1  ;;  %s2095_s14 = sphi %s2121_s14, %s13_s14   ;;  %s2091_s13 = sphi %s2119_s13, %s2959_s13   ;;  %s2087_s12 = sphi %s2117_s12, %s2958_s12  }
   0x3   : > { %p27_p1 = scmp.ge.s32.totalorder %s25_s15, 2  ;;  %p169_p2 = scmp.lt.s32.totalorder %s2095_s14, 3 }
   0x5   : > { %s2961_s15 = smov (%p27_p1, %s25_s15), 0  ;;  %p170_p3 = pnand %p1337_p0, %p169_p2 }
   0x6   : > { %p206_p4 = scmp.lt.s32.totalorder (!%p170_p3), %s2087_s12, 1 }
   0x7   : > { %173 = sbr.rel (%p170_p3) target bundleno = 285 (0x11d), region = 32 }
   0xc   : > { %v1632_v0 = vld [vmem:[%s2956_s2 + $0x3c0] sm:$0xf]  ;;  %v2041_v2 = vld [vmem:[%s2956_s2 + $0x3c4] sm:$0xf]  ;;  %v1640_v5 = vld [vmem:[%s2956_s2 + $0x3c8] sm:$0xf] }
   0xd   : > { %v2045_v1 = vld [vmem:[%s2956_s2 + $0x3dc] sm:$0xf0]  ;;  %v1634_v4 = vld [vmem:[%s2956_s2 + $0x3e0] sm:$0xf0]  ;;  %v2046_v6 = vld [vmem:[%s2956_s2 + $0x3e4] sm:$0xf0] }
   0xe   : > { %v1633_v3 = vor.u32 %v2045_v1, %v1632_v0  ;;  %v1637_v7 = vor.u32 %v2041_v2, %v1634_v4  ;;  %v1641_v8 = vor.u32 %v2046_v6, %v1640_v5  ;;  %v2042_v9 = vld [vmem:[%s2956_s2 + $0x3cc] sm:$0xf]  ;;  %v1600_v11 = vld [vmem:[%s2956_s2 + $0x380] sm:$0xf]  ;;  %v2033_v14 = vld [vmem:[%s2956_s2 + $0x384] sm:$0xf] }
   0xf   : > { %v1642_v10 = vld [vmem:[%s2956_s2 + $0x3e8] sm:$0xf0]  ;;  %v2037_v13 = vld [vmem:[%s2956_s2 + $0x39c] sm:$0xf0]  ;;  %v1602_v15 = vld [vmem:[%s2956_s2 + $0x3a0] sm:$0xf0] }
  0x10   : > { %682 = vmatpush.bf16.msra.mxu0 %v1633_v3  ;;  %v1645_v12 = vor.u32 %v2042_v9, %v1642_v10  ;;  %695 = vmatpush.bf16.msra.mxu1 %v1637_v7  ;;  %v1601_v16 = vor.u32 %v2037_v13, %v1600_v11  ;;  %v1605_v17 = vor.u32 %v2033_v14, %v1602_v15  ;;  %v1608_v18 = vld [vmem:[%s2956_s2 + $0x388] sm:$0xf]  ;;  %v2034_v20 = vld [vmem:[%s2956_s2 + $0x38c] sm:$0xf]  ;;  %v1568_v23 = vld [vmem:[%s2956_s2 + $0x340] sm:$0xf] }
  0x11   : > { %708 = vmatpush.bf16.msra.mxu2 %v1641_v8  ;;  %v2038_v19 = vld [vmem:[%s2956_s2 + $0x3a4] sm:$0xf0]  ;;  %v1610_v22 = vld [vmem:[%s2956_s2 + $0x3a8] sm:$0xf0]  ;;  %v2029_v24 = vld [vmem:[%s2956_s2 + $0x35c] sm:$0xf0] }
  0x12   : > { %721 = vmatpush.bf16.msra.mxu3 %v1645_v12  ;;  %v1609_v21 = vor.u32 %v2038_v19, %v1608_v18  ;;  %v1613_v25 = vor.u32 %v2034_v20, %v1610_v22  ;;  %v2025_v26 = vld [vmem:[%s2956_s2 + $0x344] sm:$0xf]  ;;  %v1576_v28 = vld [vmem:[%s2956_s2 + $0x348] sm:$0xf]  ;;  %v1569_v29 = vor.u32 %v2029_v24, %v1568_v23  ;;  %v2026_v31 = vld [vmem:[%s2956_s2 + $0x34c] sm:$0xf] }
  0x13   : > { %v1570_v27 = vld [vmem:[%s2956_s2 + $0x360] sm:$0xf0]  ;;  %v2030_v30 = vld [vmem:[%s2956_s2 + $0x364] sm:$0xf0]  ;;  %v1578_v32 = vld [vmem:[%s2956_s2 + $0x368] sm:$0xf0] }
  0x14   : > { %683 = vmatpush.bf16.msra.mxu0 %v1601_v16  ;;  %696 = vmatpush.bf16.msra.mxu1 %v1605_v17  ;;  %v1573_v33 = vor.u32 %v2025_v26, %v1570_v27  ;;  %v1577_v34 = vor.u32 %v2030_v30, %v1576_v28  ;;  %v1536_v35 = vld [vmem:[%s2956_s2 + $0x300] sm:$0xf]  ;;  %v2017_v37 = vld [vmem:[%s2956_s2 + $0x304] sm:$0xf]  ;;  %v1581_v38 = vor.u32 %v2026_v31, %v1578_v32  ;;  %v1544_v40 = vld [vmem:[%s2956_s2 + $0x308] sm:$0xf] }
  0x15   : > { %709 = vmatpush.bf16.msra.mxu2 %v1609_v21  ;;  %v2021_v36 = vld [vmem:[%s2956_s2 + $0x31c] sm:$0xf0]  ;;  %v1538_v39 = vld [vmem:[%s2956_s2 + $0x320] sm:$0xf0]  ;;  %v2022_v41 = vld [vmem:[%s2956_s2 + $0x324] sm:$0xf0] }
  0x16   : > { %722 = vmatpush.bf16.msra.mxu3 %v1613_v25  ;;  %v2018_v42 = vld [vmem:[%s2956_s2 + $0x30c] sm:$0xf]  ;;  %v1537_v44 = vor.u32 %v2021_v36, %v1536_v35  ;;  %v1541_v45 = vor.u32 %v2017_v37, %v1538_v39  ;;  %v1545_v46 = vor.u32 %v2022_v41, %v1544_v40  ;;  %v1504_v47 = vld [vmem:[%s2956_s2 + $0x2c0] sm:$0xf]  ;;  %v2009_v49 = vld [vmem:[%s2956_s2 + $0x2c4] sm:$0xf] }
  0x17   : > { %v1546_v43 = vld [vmem:[%s2956_s2 + $0x328] sm:$0xf0]  ;;  %v2013_v48 = vld [vmem:[%s2956_s2 + $0x2dc] sm:$0xf0]  ;;  %v1506_v51 = vld [vmem:[%s2956_s2 + $0x2e0] sm:$0xf0] }
  0x18   : > { %684 = vmatpush.bf16.msra.mxu0 %v1569_v29  ;;  %697 = vmatpush.bf16.msra.mxu1 %v1573_v33  ;;  %v1549_v50 = vor.u32 %v2018_v42, %v1546_v43  ;;  %v1512_v52 = vld [vmem:[%s2956_s2 + $0x2c8] sm:$0xf]  ;;  %v2010_v54 = vld [vmem:[%s2956_s2 + $0x2cc] sm:$0xf]  ;;  %v1505_v56 = vor.u32 %v2013_v48, %v1504_v47  ;;  %v1509_v57 = vor.u32 %v2009_v49, %v1506_v51  ;;  %v1472_v59 = vld [vmem:[%s2956_s2 + $0x280] sm:$0xf] }
  0x19   : > { %710 = vmatpush.bf16.msra.mxu2 %v1577_v34  ;;  %v2014_v53 = vld [vmem:[%s2956_s2 + $0x2e4] sm:$0xf0]  ;;  %v1514_v55 = vld [vmem:[%s2956_s2 + $0x2e8] sm:$0xf0]  ;;  %v2005_v60 = vld [vmem:[%s2956_s2 + $0x29c] sm:$0xf0] }
  0x1a   : > { %723 = vmatpush.bf16.msra.mxu3 %v1581_v38  ;;  %v1513_v58 = vor.u32 %v2014_v53, %v1512_v52  ;;  %v2001_v61 = vld [vmem:[%s2956_s2 + $0x284] sm:$0xf]  ;;  %v1517_v62 = vor.u32 %v2010_v54, %v1514_v55  ;;  %v1480_v0 = vld [vmem:[%s2956_s2 + $0x288] sm:$0xf]  ;;  %v2002_v2 = vld [vmem:[%s2956_s2 + $0x28c] sm:$0xf]  ;;  %v1473_v4 = vor.u32 %v2005_v60, %v1472_v59 }
  0x1b   : > { %v1474_v63 = vld [vmem:[%s2956_s2 + $0x2a0] sm:$0xf0]  ;;  %v2006_v1 = vld [vmem:[%s2956_s2 + $0x2a4] sm:$0xf0]  ;;  %v1482_v3 = vld [vmem:[%s2956_s2 + $0x2a8] sm:$0xf0] }
  0x1c   : > { %685 = vmatpush.bf16.msra.mxu0 %v1537_v44  ;;  %698 = vmatpush.bf16.msra.mxu1 %v1541_v45  ;;  %v1477_v5 = vor.u32 %v2001_v61, %v1474_v63  ;;  %v1481_v6 = vor.u32 %v2006_v1, %v1480_v0  ;;  %v1440_v7 = vld [vmem:[%s2956_s2 + $0x240] sm:$0xf]  ;;  %v1993_v9 = vld [vmem:[%s2956_s2 + $0x244] sm:$0xf]  ;;  %v1485_v10 = vor.u32 %v2002_v2, %v1482_v3  ;;  %v1448_v12 = vld [vmem:[%s2956_s2 + $0x248] sm:$0xf] }
  0x1d   : > { %711 = vmatpush.bf16.msra.mxu2 %v1545_v46  ;;  %v1997_v8 = vld [vmem:[%s2956_s2 + $0x25c] sm:$0xf0]  ;;  %v1442_v11 = vld [vmem:[%s2956_s2 + $0x260] sm:$0xf0]  ;;  %v1998_v13 = vld [vmem:[%s2956_s2 + $0x264] sm:$0xf0] }
  0x1e   : > { %724 = vmatpush.bf16.msra.mxu3 %v1549_v50  ;;  %v1994_v14 = vld [vmem:[%s2956_s2 + $0x24c] sm:$0xf]  ;;  %v1441_v16 = vor.u32 %v1997_v8, %v1440_v7  ;;  %v1408_v17 = vld [vmem:[%s2956_s2 + $0x200] sm:$0xf]  ;;  %v1445_v19 = vor.u32 %v1993_v9, %v1442_v11  ;;  %v1449_v20 = vor.u32 %v1998_v13, %v1448_v12  ;;  %v1985_v21 = vld [vmem:[%s2956_s2 + $0x204] sm:$0xf] }
  0x1f   : > { %v1450_v15 = vld [vmem:[%s2956_s2 + $0x268] sm:$0xf0]  ;;  %v1989_v18 = vld [vmem:[%s2956_s2 + $0x21c] sm:$0xf0]  ;;  %v1410_v22 = vld [vmem:[%s2956_s2 + $0x220] sm:$0xf0] }
  0x20   : > { %686 = vmatpush.bf16.msra.mxu0 %v1505_v56  ;;  %699 = vmatpush.bf16.msra.mxu1 %v1509_v57  ;;  %v1416_v23 = vld [vmem:[%s2956_s2 + $0x208] sm:$0xf]  ;;  %v1453_v24 = vor.u32 %v1994_v14, %v1450_v15  ;;  %v1986_v26 = vld [vmem:[%s2956_s2 + $0x20c] sm:$0xf]  ;;  %v1648_v28 = vld [vmem:[%s2956_s2 + $0x3d0] sm:$0xf]  ;;  %v1409_v31 = vor.u32 %v1989_v18, %v1408_v17  ;;  %v1413_v35 = vor.u32 %v1985_v21, %v1410_v22 }
  0x21   : > { %712 = vmatpush.bf16.msra.mxu2 %v1513_v58  ;;  %v1990_v25 = vld [vmem:[%s2956_s2 + $0x224] sm:$0xf0]  ;;  %v1418_v27 = vld [vmem:[%s2956_s2 + $0x228] sm:$0xf0]  ;;  %v2047_v29 = vld [vmem:[%s2956_s2 + $0x3ec] sm:$0xf0] }
  0x22   : > { %725 = vmatpush.bf16.msra.mxu3 %v1517_v62  ;;  %v2043_v30 = vld [vmem:[%s2956_s2 + $0x3d4] sm:$0xf]  ;;  %v1656_v33 = vld [vmem:[%s2956_s2 + $0x3d8] sm:$0xf]  ;;  %v1417_v36 = vor.u32 %v1990_v25, %v1416_v23  ;;  %v2044_v37 = vld [vmem:[%s2956_s2 + $0x3dc] sm:$0xf]  ;;  %v1421_v39 = vor.u32 %v1986_v26, %v1418_v27  ;;  %v1649_v40 = vor.u32 %v2047_v29, %v1648_v28 }
  0x23   : > { %v1650_v32 = vld [vmem:[%s2956_s2 + $0x3f0] sm:$0xf0]  ;;  %v2048_v34 = vld [vmem:[%s2956_s2 + $0x3f4] sm:$0xf0]  ;;  %v1658_v38 = vld [vmem:[%s2956_s2 + $0x3f8] sm:$0xf0] }
  0x24   : > { %687 = vmatpush.bf16.msra.mxu0 %v1473_v4  ;;  %700 = vmatpush.bf16.msra.mxu1 %v1477_v5  ;;  %v1653_v41 = vor.u32 %v2043_v30, %v1650_v32  ;;  %v1657_v42 = vor.u32 %v2048_v34, %v1656_v33  ;;  %v1616_v43 = vld [vmem:[%s2956_s2 + $0x390] sm:$0xf]  ;;  %v2035_v45 = vld [vmem:[%s2956_s2 + $0x394] sm:$0xf]  ;;  %v1661_v46 = vor.u32 %v2044_v37, %v1658_v38  ;;  %v1624_v48 = vld [vmem:[%s2956_s2 + $0x398] sm:$0xf] }
  0x25   : > { %713 = vmatpush.bf16.msra.mxu2 %v1481_v6  ;;  %v2039_v44 = vld [vmem:[%s2956_s2 + $0x3ac] sm:$0xf0]  ;;  %v1618_v47 = vld [vmem:[%s2956_s2 + $0x3b0] sm:$0xf0]  ;;  %v2040_v49 = vld [vmem:[%s2956_s2 + $0x3b4] sm:$0xf0] }
  0x26   : > { %726 = vmatpush.bf16.msra.mxu3 %v1485_v10  ;;  %v2036_v50 = vld [vmem:[%s2956_s2 + $0x39c] sm:$0xf]  ;;  %v1617_v52 = vor.u32 %v2039_v44, %v1616_v43  ;;  %v1621_v53 = vor.u32 %v2035_v45, %v1618_v47  ;;  %v1625_v54 = vor.u32 %v2040_v49, %v1624_v48  ;;  %v1584_v55 = vld [vmem:[%s2956_s2 + $0x350] sm:$0xf]  ;;  %v2027_v57 = vld [vmem:[%s2956_s2 + $0x354] sm:$0xf] }
  0x27   : > { %v1626_v51 = vld [vmem:[%s2956_s2 + $0x3b8] sm:$0xf0]  ;;  %v2031_v56 = vld [vmem:[%s2956_s2 + $0x36c] sm:$0xf0]  ;;  %v1586_v59 = vld [vmem:[%s2956_s2 + $0x370] sm:$0xf0] }
  0x28   : > { %688 = vmatpush.bf16.msra.mxu0 %v1441_v16  ;;  %701 = vmatpush.bf16.msra.mxu1 %v1445_v19  ;;  %v1629_v58 = vor.u32 %v2036_v50, %v1626_v51  ;;  %v1592_v60 = vld [vmem:[%s2956_s2 + $0x358] sm:$0xf]  ;;  %v2028_v62 = vld [vmem:[%s2956_s2 + $0x35c] sm:$0xf]  ;;  %v1585_v0 = vor.u32 %v2031_v56, %v1584_v55  ;;  %v1552_v1 = vld [vmem:[%s2956_s2 + $0x310] sm:$0xf]  ;;  %v1589_v2 = vor.u32 %v2027_v57, %v1586_v59 }
  0x29   : > { %714 = vmatpush.bf16.msra.mxu2 %v1449_v20  ;;  %v2032_v61 = vld [vmem:[%s2956_s2 + $0x374] sm:$0xf0]  ;;  %v1594_v63 = vld [vmem:[%s2956_s2 + $0x378] sm:$0xf0]  ;;  %v2023_v4 = vld [vmem:[%s2956_s2 + $0x32c] sm:$0xf0] }
  0x2a   : > { %727 = vmatpush.bf16.msra.mxu3 %v1453_v24  ;;  %v1593_v3 = vor.u32 %v2032_v61, %v1592_v60  ;;  %v2019_v5 = vld [vmem:[%s2956_s2 + $0x314] sm:$0xf]  ;;  %v1597_v7 = vor.u32 %v2028_v62, %v1594_v63  ;;  %v1560_v8 = vld [vmem:[%s2956_s2 + $0x318] sm:$0xf]  ;;  %s2963_s12 = smov (!%p206_p4, %s2087_s12), 1  ;;  %v1553_v12 = vor.u32 %v2023_v4, %v1552_v1 }
  0x2b   : > { %v1554_v6 = vld [vmem:[%s2956_s2 + $0x330] sm:$0xf0]  ;;  %v2024_v9 = vld [vmem:[%s2956_s2 + $0x334] sm:$0xf0]  ;;  %v2020_v10 = vld [vmem:[%s2956_s2 + $0x31c] sm:$0xf] }
  0x2c   : > { %689 = vmatpush.bf16.msra.mxu0 %v1409_v31  ;;  %702 = vmatpush.bf16.msra.mxu1 %v1413_v35  ;;  %v1562_v11 = vld [vmem:[%s2956_s2 + $0x338] sm:$0xf0]  ;;  %v1520_v13 = vld [vmem:[%s2956_s2 + $0x2d0] sm:$0xf]  ;;  %s1338_s26 = sshll.u32 %s2963_s12, 3  ;;  %v1557_v14 = vor.u32 %v2019_v5, %v1554_v6  ;;  %v1561_v15 = vor.u32 %v2024_v9, %v1560_v8  ;;  %s1920_s7 = sshll.u32 %s2963_s12, 5 }
  0x2d   : > { %715 = vmatpush.bf16.msra.mxu2 %v1417_v36  ;;  %v2015_v16 = vld [vmem:[%s2956_s2 + $0x2ec] sm:$0xf0]  ;;  %v2011_v17 = vld [vmem:[%s2956_s2 + $0x2d4] sm:$0xf]  ;;  %s219_s8 = scalar_lea.vmem %s2955_s1, %s1338_s26  ;;  %v1565_v19 = vor.u32 %v2020_v10, %v1562_v11  ;;  %v1528_v20 = vld [vmem:[%s2956_s2 + $0x2d8] sm:$0xf]  ;;  %s212_s28 = scalar_lea.vmem %s2954_s0, %s1338_s26 }
  0x2e   : > { %728 = vmatpush.bf16.msra.mxu3 %v1421_v39  ;;  %v1522_v18 = vld [vmem:[%s2956_s2 + $0x2f0] sm:$0xf0]  ;;  %v2016_v21 = vld [vmem:[%s2956_s2 + $0x2f4] sm:$0xf0]  ;;  %v229_v22 = vld [vmem:[%s219_s8] sm:$0xff]  ;;  %v1521_v26 = vor.u32 %v2015_v16, %v1520_v13  ;;  %s228_s9 = scalar_lea.vmem %s2957_s3, %s1920_s7 }
  0x2f   : > { %v2012_v23 = vld [vmem:[%s2956_s2 + $0x2dc] sm:$0xf]  ;;  %v2459_v25 = vpack.c.bf16 %v229_v22, %v229_v22  ;;  %v1525_v27 = vor.u32 %v2011_v17, %v1522_v18  ;;  %v1529_v28 = vor.u32 %v2016_v21, %v1528_v20  ;;  %v1488_v29 = vld [vmem:[%s2956_s2 + $0x290] sm:$0xf]  ;;  %v2003_v31 = vld [vmem:[%s2956_s2 + $0x294] sm:$0xf] }
  0x30   : > { %734 = vmatpush.bf16.msrb.mxu0 %v1649_v40  ;;  %747 = vmatpush.bf16.msrb.mxu1 %v1653_v41  ;;  %v1530_v24 = vld [vmem:[%s2956_s2 + $0x2f8] sm:$0xf0]  ;;  %v2007_v30 = vld [vmem:[%s2956_s2 + $0x2ac] sm:$0xf0]  ;;  %v1490_v33 = vld [vmem:[%s2956_s2 + $0x2b0] sm:$0xf0] }
  0x31   : > { %760 = vmatpush.bf16.msrb.mxu2 %v1657_v42  ;;  %v1533_v32 = vor.u32 %v2012_v23, %v1530_v24  ;;  %v1496_v34 = vld [vmem:[%s2956_s2 + $0x298] sm:$0xf]  ;;  %v2004_v36 = vld [vmem:[%s2956_s2 + $0x29c] sm:$0xf]  ;;  %729 = vmatmul.bf16.vlgmr.msra.gmra.mxu3 %v2459_v25  ;;  %v1489_v38 = vor.u32 %v2007_v30, %v1488_v29  ;;  %v1493_v39 = vor.u32 %v2003_v31, %v1490_v33  ;;  %v1456_v41 = vld [vmem:[%s2956_s2 + $0x250] sm:$0xf] }
  0x32   : > { %773 = vmatpush.bf16.msrb.mxu3 %v1661_v46  ;;  %v2008_v35 = vld [vmem:[%s2956_s2 + $0x2b4] sm:$0xf0]  ;;  %716 = vmatmul.bf16.vlgmr.msra.gmra.mxu2 %v2459_v25  ;;  %v1498_v37 = vld [vmem:[%s2956_s2 + $0x2b8] sm:$0xf0]  ;;  %v1999_v42 = vld [vmem:[%s2956_s2 + $0x26c] sm:$0xf0] }
  0x33   : > { %690 = vmatmul.bf16.vlgmr.msra.gmra.mxu0 %v2459_v25  ;;  %703 = vmatmul.bf16.vlgmr.msra.gmra.mxu1 %v2459_v25  ;;  %v1497_v40 = vor.u32 %v2008_v35, %v1496_v34  ;;  %v1995_v43 = vld [vmem:[%s2956_s2 + $0x254] sm:$0xf]  ;;  %v1501_v44 = vor.u32 %v2004_v36, %v1498_v37  ;;  %v1464_v46 = vld [vmem:[%s2956_s2 + $0x258] sm:$0xf]  ;;  %v1996_v48 = vld [vmem:[%s2956_s2 + $0x25c] sm:$0xf]  ;;  %v1457_v50 = vor.u32 %v1999_v42, %v1456_v41 }
  0x34   : > { %735 = vmatpush.bf16.msrb.mxu0 %v1617_v52  ;;  %748 = vmatpush.bf16.msrb.mxu1 %v1621_v53  ;;  %v1458_v45 = vld [vmem:[%s2956_s2 + $0x270] sm:$0xf0]  ;;  %v2000_v47 = vld [vmem:[%s2956_s2 + $0x274] sm:$0xf0]  ;;  %v1466_v49 = vld [vmem:[%s2956_s2 + $0x278] sm:$0xf0] }
  0x35   : > { %761 = vmatpush.bf16.msrb.mxu2 %v1625_v54  ;;  %v1424_v51 = vld [vmem:[%s2956_s2 + $0x210] sm:$0xf]  ;;  %v1461_v53 = vor.u32 %v1995_v43, %v1458_v45  ;;  %v1465_v54 = vor.u32 %v2000_v47, %v1464_v46  ;;  %v1987_v55 = vld [vmem:[%s2956_s2 + $0x214] sm:$0xf]  ;;  %v1432_v57 = vld [vmem:[%s2956_s2 + $0x218] sm:$0xf] }
  0x36   : > { %774 = vmatpush.bf16.msrb.mxu3 %v1629_v58  ;;  %v1991_v52 = vld [vmem:[%s2956_s2 + $0x22c] sm:$0xf0]  ;;  %v1426_v56 = vld [vmem:[%s2956_s2 + $0x230] sm:$0xf0]  ;;  %v1469_v58 = vor.u32 %v1996_v48, %v1466_v49  ;;  %v1992_v59 = vld [vmem:[%s2956_s2 + $0x234] sm:$0xf0] }
  0x37   : > { %v1988_v60 = vld [vmem:[%s2956_s2 + $0x21c] sm:$0xf]  ;;  %v1888_v62 = vld [vmem:[%s2956_s2 + $0x1c0] sm:$0xf]  ;;  %v1425_v1 = vor.u32 %v1991_v52, %v1424_v51  ;;  %v1982_v4 = vld [vmem:[%s2956_s2 + $0x1e4] sm:$0xf0]  ;;  %v1429_v5 = vor.u32 %v1987_v55, %v1426_v56  ;;  %v1433_v6 = vor.u32 %v1992_v59, %v1432_v57 }
  0x38   : > { %736 = vmatpush.bf16.msrb.mxu0 %v1585_v0  ;;  %749 = vmatpush.bf16.msrb.mxu1 %v1589_v2  ;;  %v1434_v61 = vld [vmem:[%s2956_s2 + $0x238] sm:$0xf0]  ;;  %v1981_v63 = vld [vmem:[%s2956_s2 + $0x1dc] sm:$0xf0]  ;;  %v1977_v0 = vld [vmem:[%s2956_s2 + $0x1c4] sm:$0xf] }
  0x39   : > { %762 = vmatpush.bf16.msrb.mxu2 %v1593_v3  ;;  %v1890_v2 = vld [vmem:[%s2956_s2 + $0x1e0] sm:$0xf0]  ;;  %v1896_v3 = vld [vmem:[%s2956_s2 + $0x1c8] sm:$0xf]  ;;  %v1898_v8 = vld [vmem:[%s2956_s2 + $0x1e8] sm:$0xf0]  ;;  %v1437_v9 = vor.u32 %v1988_v60, %v1434_v61  ;;  %v1889_v10 = vor.u32 %v1981_v63, %v1888_v62  ;;  %v789_v63 = vunpack.c.l.b16 %v2459_v25 }
  0x3a   : > { %775 = vmatpush.bf16.msrb.mxu3 %v1597_v7  ;;  %v1978_v7 = vld [vmem:[%s2956_s2 + $0x1cc] sm:$0xf]  ;;  %v1893_v11 = vor.u32 %v1977_v0, %v1890_v2  ;;  %v1856_v13 = vld [vmem:[%s2956_s2 + $0x180] sm:$0xf]  ;;  %v1858_v17 = vld [vmem:[%s2956_s2 + $0x1a0] sm:$0xf0] }
  0x3b   : > { %v1901_v16 = vor.u32 %v1978_v7, %v1898_v8  ;;  %v1864_v18 = vld [vmem:[%s2956_s2 + $0x188] sm:$0xf]  ;;  %v1970_v20 = vld [vmem:[%s2956_s2 + $0x18c] sm:$0xf]  ;;  %v1826_v30 = vld [vmem:[%s2956_s2 + $0x160] sm:$0xf0] }
  0x3c   : > { %737 = vmatpush.bf16.msrb.mxu0 %v1553_v12  ;;  %750 = vmatpush.bf16.msrb.mxu1 %v1557_v14  ;;  %v1897_v12 = vor.u32 %v1982_v4, %v1896_v3  ;;  %v1973_v14 = vld [vmem:[%s2956_s2 + $0x19c] sm:$0xf0]  ;;  %v1866_v21 = vld [vmem:[%s2956_s2 + $0x1a8] sm:$0xf0]  ;;  %v1832_v31 = vld [vmem:[%s2956_s2 + $0x148] sm:$0xf] }
  0x3d   : > { %763 = vmatpush.bf16.msrb.mxu2 %v1561_v15  ;;  %v1969_v15 = vld [vmem:[%s2956_s2 + $0x184] sm:$0xf]  ;;  %v1857_v22 = vor.u32 %v1973_v14, %v1856_v13  ;;  %v1869_v29 = vor.u32 %v1970_v20, %v1866_v21  ;;  %v1962_v33 = vld [vmem:[%s2956_s2 + $0x14c] sm:$0xf]  ;;  %v1792_v36 = vld [vmem:[%s2956_s2 + $0x100] sm:$0xf] }
  0x3e   : > { %776 = vmatpush.bf16.msrb.mxu3 %v1565_v19  ;;  %v1974_v19 = vld [vmem:[%s2956_s2 + $0x1a4] sm:$0xf0]  ;;  %v1861_v23 = vor.u32 %v1969_v15, %v1858_v17  ;;  %v1834_v34 = vld [vmem:[%s2956_s2 + $0x168] sm:$0xf0]  ;;  %v230_v41 = vld [vmem:[%s212_s28] sm:$0xff] }
  0x3f   : > { %v1865_v24 = vor.u32 %v1974_v19, %v1864_v18  ;;  %v1837_v42 = vor.u32 %v1962_v33, %v1834_v34  ;;  %v1794_v43 = vld [vmem:[%s2956_s2 + $0x120] sm:$0xf0]  ;;  %v1958_v45 = vld [vmem:[%s2956_s2 + $0x124] sm:$0xf0]  ;;  %v1954_v46 = vld [vmem:[%s2956_s2 + $0x10c] sm:$0xf]  ;;  %v231_v49 = vpack.c.bf16 %v230_v41, %v230_v41 }
  0x40   : > { %738 = vmatpush.bf16.msrb.mxu0 %v1521_v26  ;;  %751 = vmatpush.bf16.msrb.mxu1 %v1525_v27  ;;  %v1824_v26 = vld [vmem:[%s2956_s2 + $0x140] sm:$0xf]  ;;  %v1802_v47 = vld [vmem:[%s2956_s2 + $0x128] sm:$0xf0]  ;;  %v1762_v56 = vld [vmem:[%s2956_s2 + $0xe0] sm:$0xf0] }
  0x41   : > { %764 = vmatpush.bf16.msrb.mxu2 %v1529_v28  ;;  %v1965_v27 = vld [vmem:[%s2956_s2 + $0x15c] sm:$0xf0]  ;;  %v1961_v28 = vld [vmem:[%s2956_s2 + $0x144] sm:$0xf]  ;;  %v1805_v55 = vor.u32 %v1954_v46, %v1802_v47  ;;  %v1768_v57 = vld [vmem:[%s2956_s2 + $0xc8] sm:$0xf]  ;;  %v788_v62 = vunpack.c.l.b16 %v231_v49 }
  0x42   : > { %777 = vmatpush.bf16.msrb.mxu3 %v1533_v32  ;;  %v1966_v32 = vld [vmem:[%s2956_s2 + $0x164] sm:$0xf0]  ;;  %v1825_v35 = vor.u32 %v1965_v27, %v1824_v26  ;;  %v1829_v37 = vor.u32 %v1961_v28, %v1826_v30  ;;  %v1760_v52 = vld [vmem:[%s2956_s2 + $0xc0] sm:$0xf]  ;;  %v1946_v59 = vld [vmem:[%s2956_s2 + $0xcc] sm:$0xf] }
  0x43   : > { %v1770_v60 = vld [vmem:[%s2956_s2 + $0xe8] sm:$0xf0]  ;;  %v1728_v2 = vld [vmem:[%s2956_s2 + $0x80] sm:$0xf]  ;;  %v1937_v4 = vld [vmem:[%s2956_s2 + $0x84] sm:$0xf] }
  0x44   : > { %739 = vmatpush.bf16.msrb.mxu0 %v1489_v38  ;;  %752 = vmatpush.bf16.msrb.mxu1 %v1493_v39  ;;  %v1833_v38 = vor.u32 %v1966_v32, %v1832_v31  ;;  %v1957_v39 = vld [vmem:[%s2956_s2 + $0x11c] sm:$0xf0]  ;;  %v1942_v7 = vld [vmem:[%s2956_s2 + $0xa4] sm:$0xf0]  ;;  %v1938_v8 = vld [vmem:[%s2956_s2 + $0x8c] sm:$0xf] }
  0x45   : > { %765 = vmatpush.bf16.msrb.mxu2 %v1497_v40  ;;  %v1953_v40 = vld [vmem:[%s2956_s2 + $0x104] sm:$0xf]  ;;  %v1793_v48 = vor.u32 %v1957_v39, %v1792_v36  ;;  %v1941_v3 = vld [vmem:[%s2956_s2 + $0x9c] sm:$0xf0]  ;;  %v1704_v19 = vld [vmem:[%s2956_s2 + $0x48] sm:$0xf] }
  0x46   : > { %778 = vmatpush.bf16.msrb.mxu3 %v1501_v44  ;;  %v1800_v44 = vld [vmem:[%s2956_s2 + $0x108] sm:$0xf]  ;;  %v1696_v14 = vld [vmem:[%s2956_s2 + $0x40] sm:$0xf]  ;;  %v1698_v18 = vld [vmem:[%s2956_s2 + $0x60] sm:$0xf0] }
  0x47   : > { %v1801_v51 = vor.u32 %v1958_v45, %v1800_v44  ;;  %v1933_v15 = vld [vmem:[%s2956_s2 + $0x5c] sm:$0xf0]  ;;  %v1934_v20 = vld [vmem:[%s2956_s2 + $0x64] sm:$0xf0]  ;;  %v1930_v21 = vld [vmem:[%s2956_s2 + $0x4c] sm:$0xf] }
  0x48   : > { %740 = vmatpush.bf16.msrb.mxu0 %v1457_v50  ;;  %753 = vmatpush.bf16.msrb.mxu1 %v1461_v53  ;;  %v1797_v50 = vor.u32 %v1953_v40, %v1794_v43  ;;  %v1949_v53 = vld [vmem:[%s2956_s2 + $0xdc] sm:$0xf0]  ;;  %v1921_v27 = vld [vmem:[%s2956_s2 + $0x4] sm:$0xf]  ;;  %v1705_v31 = vor.u32 %v1934_v20, %v1704_v19  ;;  %v1672_v33 = vld [vmem:[%s2956_s2 + $0x8] sm:$0xf] }
  0x49   : > { %766 = vmatpush.bf16.msrb.mxu2 %v1465_v54  ;;  %v1945_v54 = vld [vmem:[%s2956_s2 + $0xc4] sm:$0xf]  ;;  %v1761_v61 = vor.u32 %v1949_v53, %v1760_v52  ;;  %v1925_v26 = vld [vmem:[%s2956_s2 + $0x1c] sm:$0xf0]  ;;  %v1926_v34 = vld [vmem:[%s2956_s2 + $0x24] sm:$0xf0] }
  0x4a   : > { %779 = vmatpush.bf16.msrb.mxu3 %v1469_v58  ;;  %v1950_v58 = vld [vmem:[%s2956_s2 + $0xe4] sm:$0xf0]  ;;  %v1765_v0 = vor.u32 %v1945_v54, %v1762_v56  ;;  %v1666_v32 = vld [vmem:[%s2956_s2 + $0x20] sm:$0xf0]  ;;  %v1922_v36 = vld [vmem:[%s2956_s2 + $0xc] sm:$0xf] }
  0x4b   : > { %v1983_v39 = vld [vmem:[%s2956_s2 + $0x1ec] sm:$0xf0]  ;;  %v1979_v40 = vld [vmem:[%s2956_s2 + $0x1d4] sm:$0xf]  ;;  %v1912_v43 = vld [vmem:[%s2956_s2 + $0x1d8] sm:$0xf]  ;;  %v1669_v47 = vor.u32 %v1921_v27, %v1666_v32 }
  0x4c   : > { %741 = vmatpush.bf16.msrb.mxu0 %v1425_v1  ;;  %754 = vmatpush.bf16.msrb.mxu1 %v1429_v5  ;;  %v1769_v1 = vor.u32 %v1950_v58, %v1768_v57  ;;  %v1773_v5 = vor.u32 %v1946_v59, %v1770_v60  ;;  %v1906_v41 = vld [vmem:[%s2956_s2 + $0x1f0] sm:$0xf0]  ;;  %v1984_v44 = vld [vmem:[%s2956_s2 + $0x1f4] sm:$0xf0]  ;;  %v1980_v49 = vld [vmem:[%s2956_s2 + $0x1dc] sm:$0xf] }
  0x4d   : > { %767 = vmatpush.bf16.msrb.mxu2 %v1433_v6  ;;  %v1736_v6 = vld [vmem:[%s2956_s2 + $0x88] sm:$0xf]  ;;  %v1909_v53 = vor.u32 %v1979_v40, %v1906_v41  ;;  %v1913_v54 = vor.u32 %v1984_v44, %v1912_v43  ;;  %v1975_v56 = vld [vmem:[%s2956_s2 + $0x1ac] sm:$0xf0]  ;;  %v1971_v57 = vld [vmem:[%s2956_s2 + $0x194] sm:$0xf] }
  0x4e   : > { %780 = vmatpush.bf16.msrb.mxu3 %v1437_v9  ;;  %v1738_v9 = vld [vmem:[%s2956_s2 + $0xa8] sm:$0xf0]  ;;  %v1737_v13 = vor.u32 %v1942_v7, %v1736_v6  ;;  %v1874_v60 = vld [vmem:[%s2956_s2 + $0x1b0] sm:$0xf0]  ;;  %v1816_v20 = vld [vmem:[%s2956_s2 + $0x118] sm:$0xf] }
  0x4f   : > { %742 = vmatmul.bf16.vlgmr.msrb.gmra.mxu0 %v2459_v25  ;;  %755 = vmatmul.bf16.vlgmr.msrb.gmra.mxu1 %v2459_v25  ;;  %v1741_v17 = vor.u32 %v1938_v8, %v1738_v9  ;;  %v1842_v7 = vld [vmem:[%s2956_s2 + $0x170] sm:$0xf0]  ;;  %v1848_v8 = vld [vmem:[%s2956_s2 + $0x158] sm:$0xf]  ;;  %v1744_v40 = vld [vmem:[%s2956_s2 + $0x90] sm:$0xf] }
  0x50   : > { %1120 = vmatpush.bf16.msra.mxu0 %v1889_v10  ;;  %1133 = vmatpush.bf16.msra.mxu1 %v1893_v11  ;;  %v1729_v10 = vor.u32 %v1941_v3, %v1728_v2  ;;  %v790_v11 = vpack.c.b16 %v789_v63, %v788_v62  ;;  %v1976_v62 = vld [vmem:[%s2956_s2 + $0x1b4] sm:$0xf0]  ;;  %v1972_v63 = vld [vmem:[%s2956_s2 + $0x19c] sm:$0xf]  ;;  %v1877_v2 = vor.u32 %v1971_v57, %v1874_v60  ;;  %v1810_v19 = vld [vmem:[%s2956_s2 + $0x130] sm:$0xf0] }
  0x51   : > { %1146 = vmatpush.bf16.msra.mxu2 %v1897_v12  ;;  %781 = vmatmul.bf16.vlgmr.msrb.gmra.mxu3 %v2459_v25  ;;  %v1968_v9 = vld [vmem:[%s2956_s2 + $0x174] sm:$0xf0]  ;;  %v1778_v32 = vld [vmem:[%s2956_s2 + $0xf0] sm:$0xf0]  ;;  %v1943_v41 = vld [vmem:[%s2956_s2 + $0xac] sm:$0xf0] }
  0x52   : > { %1159 = vmatpush.bf16.msra.mxu3 %v1901_v16  ;;  %768 = vmatmul.bf16.vlgmr.msrb.gmra.mxu2 %v2459_v25  ;;  %v1730_v25 = vld [vmem:[%s2956_s2 + $0xa0] sm:$0xf0]  ;;  %v792_v28 = vshrl.u32 %v790_v11, 16  ;;  %v1746_v44 = vld [vmem:[%s2956_s2 + $0xb0] sm:$0xf0] }
  0x53   : > { %v1733_v12 = vor.u32 %v1937_v4, %v1730_v25  ;;  %v1929_v16 = vld [vmem:[%s2956_s2 + $0x44] sm:$0xf]  ;;  %v1840_v4 = vld [vmem:[%s2956_s2 + $0x150] sm:$0xf]  ;;  %v1963_v25 = vld [vmem:[%s2956_s2 + $0x154] sm:$0xf] }
  0x54   : > { %1121 = vmatpush.bf16.msra.mxu0 %v1857_v22  ;;  %1134 = vmatpush.bf16.msra.mxu1 %v1861_v23  ;;  %v1706_v22 = vld [vmem:[%s2956_s2 + $0x68] sm:$0xf0]  ;;  %v1664_v23 = vld [vmem:[%s2956_s2] sm:$0xf]  ;;  %v1701_v30 = vor.u32 %v1929_v16, %v1698_v18  ;;  %v794_v45 = vrot.slane %v792_v28, 3 }
  0x55   : > { %1147 = vmatpush.bf16.msra.mxu2 %v1865_v24  ;;  %v1697_v24 = vor.u32 %v1933_v15, %v1696_v14  ;;  %v1849_v14 = vor.u32 %v1968_v9, %v1848_v8  ;;  %v1808_v15 = vld [vmem:[%s2956_s2 + $0x110] sm:$0xf]  ;;  %v1720_v57 = vld [vmem:[%s2956_s2 + $0x58] sm:$0xf]  ;;  %v1932_v60 = vld [vmem:[%s2956_s2 + $0x5c] sm:$0xf] }
  0x56   : > { %1160 = vmatpush.bf16.msra.mxu3 %v1869_v29  ;;  %v795_v29 = vshll.u32 %v790_v11, 16  ;;  %v1850_v11 = vld [vmem:[%s2956_s2 + $0x178] sm:$0xf0]  ;;  %v1959_v16 = vld [vmem:[%s2956_s2 + $0x12c] sm:$0xf0] }
  0x57   : > { %v1776_v28 = vld [vmem:[%s2956_s2 + $0xd0] sm:$0xf]  ;;  %v1690_v8 = vld [vmem:[%s2956_s2 + $0x38] sm:$0xf0] }
  0x58   : > { %1122 = vmatpush.bf16.msra.mxu0 %v1825_v35  ;;  %1135 = vmatpush.bf16.msra.mxu1 %v1829_v37  ;;  %v1709_v35 = vor.u32 %v1930_v21, %v1706_v22  ;;  %v1674_v37 = vld [vmem:[%s2956_s2 + $0x28] sm:$0xf0]  ;;  %v797_v46 = vrot.slane %v795_v29, 4  ;;  %v1960_v21 = vld [vmem:[%s2956_s2 + $0x134] sm:$0xf0] }
  0x59   : > { %1148 = vmatpush.bf16.msra.mxu2 %v1833_v38  ;;  %v1904_v38 = vld [vmem:[%s2956_s2 + $0x1d0] sm:$0xf]  ;;  %v1956_v22 = vld [vmem:[%s2956_s2 + $0x11c] sm:$0xf]  ;;  %v1817_v27 = vor.u32 %v1960_v21, %v1816_v20 }
  0x5a   : > { %1161 = vmatpush.bf16.msra.mxu3 %v1837_v42  ;;  %v1665_v42 = vor.u32 %v1925_v26, %v1664_v23  ;;  %v1905_v52 = vor.u32 %v1983_v39, %v1904_v38  ;;  %v2772_v59 = vor.u32 %v797_v46, %v794_v45  ;;  %v1818_v23 = vld [vmem:[%s2956_s2 + $0x138] sm:$0xf0]  ;;  %v1951_v29 = vld [vmem:[%s2956_s2 + $0xec] sm:$0xf0]  ;;  %v1752_v45 = vld [vmem:[%s2956_s2 + $0x98] sm:$0xf] }
  0x5b   : > { %v1944_v46 = vld [vmem:[%s2956_s2 + $0xb4] sm:$0xf0] }
  0x5c   : > { %1123 = vmatpush.bf16.msra.mxu0 %v1793_v48  ;;  %1136 = vmatpush.bf16.msra.mxu1 %v1797_v50  ;;  %v1673_v48 = vor.u32 %v1926_v34, %v1672_v33  ;;  %v1914_v50 = vld [vmem:[%s2956_s2 + $0x1f8] sm:$0xf0]  ;;  %v1784_v33 = vld [vmem:[%s2956_s2 + $0xd8] sm:$0xf] }
  0x5d   : > { %1149 = vmatpush.bf16.msra.mxu2 %v1801_v51  ;;  %v1677_v51 = vor.u32 %v1922_v36, %v1674_v37  ;;  %v1917_v58 = vor.u32 %v1980_v49, %v1914_v50  ;;  %v1952_v34 = vld [vmem:[%s2956_s2 + $0xf4] sm:$0xf0]  ;;  %v1786_v36 = vld [vmem:[%s2956_s2 + $0xf8] sm:$0xf0]  ;;  %v1777_v37 = vor.u32 %v1951_v29, %v1776_v28  ;;  %v1745_v49 = vor.u32 %v1943_v41, %v1744_v40 }
  0x5e   : > { %1162 = vmatpush.bf16.msra.mxu3 %v1805_v55  ;;  %v1872_v55 = vld [vmem:[%s2956_s2 + $0x190] sm:$0xf]  ;;  %v1785_v39 = vor.u32 %v1952_v34, %v1784_v33 }
  0x60   : > { %1124 = vmatpush.bf16.msra.mxu0 %v1761_v61  ;;  %1137 = vmatpush.bf16.msra.mxu1 %v1765_v0  ;;  %v1880_v61 = vld [vmem:[%s2956_s2 + $0x198] sm:$0xf]  ;;  %v1882_v0 = vld [vmem:[%s2956_s2 + $0x1b8] sm:$0xf0] }
  0x61   : > { %1150 = vmatpush.bf16.msra.mxu2 %v1769_v1  ;;  %v1873_v1 = vor.u32 %v1975_v56, %v1872_v55  ;;  %v1881_v3 = vor.u32 %v1976_v62, %v1880_v61  ;;  %v1885_v6 = vor.u32 %v1972_v63, %v1882_v0  ;;  %v1714_v56 = vld [vmem:[%s2956_s2 + $0x70] sm:$0xf0]  ;;  %v1722_v61 = vld [vmem:[%s2956_s2 + $0x78] sm:$0xf0] }
  0x62   : > { %1163 = vmatpush.bf16.msra.mxu3 %v1773_v5  ;;  %v1967_v5 = vld [vmem:[%s2956_s2 + $0x16c] sm:$0xf0] }
  0x64   : > { %1125 = vmatpush.bf16.msra.mxu0 %v1729_v10  ;;  %1138 = vmatpush.bf16.msra.mxu1 %v1733_v12  ;;  %v1964_v10 = vld [vmem:[%s2956_s2 + $0x15c] sm:$0xf]  ;;  %v1841_v12 = vor.u32 %v1967_v5, %v1840_v4  ;;  %v1725_v4 = vor.u32 %v1932_v60, %v1722_v61  ;;  %v1682_v5 = vld [vmem:[%s2956_s2 + $0x30] sm:$0xf0] }
  0x65   : > { %1151 = vmatpush.bf16.msra.mxu2 %v1737_v13  ;;  %v1845_v13 = vor.u32 %v1963_v25, %v1842_v7  ;;  %v1853_v18 = vor.u32 %v1964_v10, %v1850_v11  ;;  %v1688_v25 = vld [vmem:[%s2956_s2 + $0x18] sm:$0xf]  ;;  %v1924_v7 = vld [vmem:[%s2956_s2 + $0x1c] sm:$0xf] }
  0x66   : > { %1164 = vmatpush.bf16.msra.mxu3 %v1741_v17  ;;  %v1955_v17 = vld [vmem:[%s2956_s2 + $0x114] sm:$0xf] }
  0x67   : > { %v1813_v26 = vor.u32 %v1955_v17, %v1810_v19 }
  0x68   : > { %1126 = vmatpush.bf16.msra.mxu0 %v1697_v24  ;;  %1139 = vmatpush.bf16.msra.mxu1 %v1701_v30  ;;  %v1809_v24 = vor.u32 %v1959_v16, %v1808_v15  ;;  %v1947_v30 = vld [vmem:[%s2956_s2 + $0xd4] sm:$0xf] }
  0x69   : > { %1152 = vmatpush.bf16.msra.mxu2 %v1705_v31  ;;  %v1821_v31 = vor.u32 %v1956_v22, %v1818_v23  ;;  %v1781_v38 = vor.u32 %v1947_v30, %v1778_v32 }
  0x6a   : > { %1165 = vmatpush.bf16.msra.mxu3 %v1709_v35  ;;  %v1948_v35 = vld [vmem:[%s2956_s2 + $0xdc] sm:$0xf] }
  0x6b   : > { %v1789_v43 = vor.u32 %v1948_v35, %v1786_v36 }
  0x6c   : > { %1127 = vmatpush.bf16.msra.mxu0 %v1665_v42  ;;  %1140 = vmatpush.bf16.msra.mxu1 %v1669_v47  ;;  %v1939_v42 = vld [vmem:[%s2956_s2 + $0x94] sm:$0xf]  ;;  %v1940_v47 = vld [vmem:[%s2956_s2 + $0x9c] sm:$0xf] }
  0x6d   : > { %1153 = vmatpush.bf16.msra.mxu2 %v1673_v48  ;;  %v1754_v48 = vld [vmem:[%s2956_s2 + $0xb8] sm:$0xf0]  ;;  %v1749_v50 = vor.u32 %v1939_v42, %v1746_v44 }
  0x6e   : > { %1166 = vmatpush.bf16.msra.mxu3 %v1677_v51  ;;  %v1753_v51 = vor.u32 %v1944_v46, %v1752_v45  ;;  %v1757_v55 = vor.u32 %v1940_v47, %v1754_v48 }
  0x6f   : > { %1128 = vmatmul.bf16.vlgmr.msra.gmra.mxu0 %v2772_v59  ;;  %1141 = vmatmul.bf16.vlgmr.msra.gmra.mxu1 %v2772_v59 }
  0x70   : > { %1172 = vmatpush.bf16.msrb.mxu0 %v1905_v52  ;;  %1185 = vmatpush.bf16.msrb.mxu1 %v1909_v53  ;;  %v1712_v52 = vld [vmem:[%s2956_s2 + $0x50] sm:$0xf] }
  0x71   : > { %1198 = vmatpush.bf16.msrb.mxu2 %v1913_v54  ;;  %1167 = vmatmul.bf16.vlgmr.msra.gmra.mxu3 %v2772_v59  ;;  %v1935_v53 = vld [vmem:[%s2956_s2 + $0x6c] sm:$0xf0]  ;;  %v1931_v54 = vld [vmem:[%s2956_s2 + $0x54] sm:$0xf] }
  0x72   : > { %1211 = vmatpush.bf16.msrb.mxu3 %v1917_v58  ;;  %1154 = vmatmul.bf16.vlgmr.msra.gmra.mxu2 %v2772_v59  ;;  %v1936_v58 = vld [vmem:[%s2956_s2 + $0x74] sm:$0xf0]  ;;  %v1713_v62 = vor.u32 %v1935_v53, %v1712_v52  ;;  %v1717_v63 = vor.u32 %v1931_v54, %v1714_v56 }
  0x73   : > { %v1721_v0 = vor.u32 %v1936_v58, %v1720_v57 }
  0x74   : > { %1173 = vmatpush.bf16.msrb.mxu0 %v1873_v1  ;;  %1186 = vmatpush.bf16.msrb.mxu1 %v1877_v2  ;;  %v1680_v1 = vld [vmem:[%s2956_s2 + $0x10] sm:$0xf] }
  0x75   : > { %1199 = vmatpush.bf16.msrb.mxu2 %v1881_v3  ;;  %v1927_v2 = vld [vmem:[%s2956_s2 + $0x2c] sm:$0xf0]  ;;  %v1923_v3 = vld [vmem:[%s2956_s2 + $0x14] sm:$0xf] }
  0x76   : > { %1212 = vmatpush.bf16.msrb.mxu3 %v1885_v6  ;;  %v1928_v6 = vld [vmem:[%s2956_s2 + $0x34] sm:$0xf0]  ;;  %v1681_v9 = vor.u32 %v1927_v2, %v1680_v1  ;;  %v1685_v10 = vor.u32 %v1923_v3, %v1682_v5 }
  0x77   : > { %v1689_v11 = vor.u32 %v1928_v6, %v1688_v25 }
  0x78   : > { %1174 = vmatpush.bf16.msrb.mxu0 %v1841_v12  ;;  %1187 = vmatpush.bf16.msrb.mxu1 %v1845_v13  ;;  %v1693_v12 = vor.u32 %v1924_v7, %v1690_v8 }
  0x79   : > { %1200 = vmatpush.bf16.msrb.mxu2 %v1849_v14 }
  0x7a   : > { %1213 = vmatpush.bf16.msrb.mxu3 %v1853_v18 }
  0x7c   : > { %1175 = vmatpush.bf16.msrb.mxu0 %v1809_v24  ;;  %1188 = vmatpush.bf16.msrb.mxu1 %v1813_v26 }
  0x7d   : > { %1201 = vmatpush.bf16.msrb.mxu2 %v1817_v27 }
  0x7e   : > { %1214 = vmatpush.bf16.msrb.mxu3 %v1821_v31 }
  0x80   : > { %1176 = vmatpush.bf16.msrb.mxu0 %v1777_v37  ;;  %1189 = vmatpush.bf16.msrb.mxu1 %v1781_v38 }
  0x81   : > { %1202 = vmatpush.bf16.msrb.mxu2 %v1785_v39 }
  0x82   : > { %1215 = vmatpush.bf16.msrb.mxu3 %v1789_v43 }
  0x84   : > { %1177 = vmatpush.bf16.msrb.mxu0 %v1745_v49  ;;  %1190 = vmatpush.bf16.msrb.mxu1 %v1749_v50 }
  0x85   : > { %1203 = vmatpush.bf16.msrb.mxu2 %v1753_v51 }
  0x86   : > { %1216 = vmatpush.bf16.msrb.mxu3 %v1757_v55 }
  0x88   : > { %1178 = vmatpush.bf16.msrb.mxu0 %v1713_v62  ;;  %1191 = vmatpush.bf16.msrb.mxu1 %v1717_v63 }
  0x89   : > { %1204 = vmatpush.bf16.msrb.mxu2 %v1721_v0 }
  0x8a   : > { %1217 = vmatpush.bf16.msrb.mxu3 %v1725_v4 }
  0x8c   : > { %1179 = vmatpush.bf16.msrb.mxu0 %v1681_v9  ;;  %1192 = vmatpush.bf16.msrb.mxu1 %v1685_v10 }
  0x8d   : > { %1205 = vmatpush.bf16.msrb.mxu2 %v1689_v11 }
  0x8e   : > { %1218 = vmatpush.bf16.msrb.mxu3 %v1693_v12 }
  0x8f   : > { %1180 = vmatmul.bf16.vlgmr.msrb.gmra.mxu0 %v2772_v59  ;;  %1193 = vmatmul.bf16.vlgmr.msrb.gmra.mxu1 %v2772_v59 }
  0x90   : > { %1206 = vmatmul.bf16.vlgmr.msrb.gmra.mxu2 %v2772_v59 }
  0x91   : > { %1219 = vmatmul.bf16.vlgmr.msrb.gmra.mxu3 %v2772_v59 }
  0xb0   : > { %v691_v13 = vpop.f32.mrf.mxu0  ;;  %v704_v14 = vpop.f32.mrf.mxu1 }
  0xb4   : > { %v730_v16 = vpop.f32.mrf.mxu3 }
  0xb5   : > { %v717_v15 = vpop.f32.mrf.mxu2 }
  0xb8   : > { %v693_v17 = vpop.f32.mrf.mxu0  ;;  %v706_v18 = vpop.f32.mrf.mxu1 }
  0xbc   : > { %v732_v20 = vpop.f32.mrf.mxu3 }
  0xbd   : > { %v719_v19 = vpop.f32.mrf.mxu2 }
  0xcc   : > { %v743_v21 = vpop.f32.mrf.mxu0  ;;  %v756_v22 = vpop.f32.mrf.mxu1 }
  0xd4   : > { %v782_v24 = vpop.f32.mrf.mxu3  ;;  %v745_v26 = vpop.f32.mrf.mxu0 }
  0xd5   : > { %v769_v23 = vpop.f32.mrf.mxu2  ;;  %v758_v27 = vpop.f32.mrf.mxu1 }
  0xdc   : > { %v784_v29 = vpop.f32.mrf.mxu3 }
  0xdd   : > { %v771_v28 = vpop.f32.mrf.mxu2 }
  0xec   : > { %v1129_v30 = vpop.f32.mrf.mxu0  ;;  %v1142_v31 = vpop.f32.mrf.mxu1 }
  0xed   : > { %v1130_v59 = vadd.f32 %v1129_v30, %v691_v13  ;;  %v1143_v32 = vadd.f32 %v1142_v31, %v704_v14 }
  0xef   : > { %v1224_v33 = vpack.c.bf16 %v1143_v32, %v1130_v59 }
  0xf1   : > { %1228 = vst [vmem:[%s228_s9] sm:$0xff] %v1224_v33 }
  0xf4   : > { %v1168_v36 = vpop.f32.mrf.mxu3  ;;  %v1131_v37 = vpop.f32.mrf.mxu0 }
  0xf5   : > { %v1155_v34 = vpop.f32.mrf.mxu2  ;;  %v1169_v38 = vadd.f32 %v1168_v36, %v730_v16  ;;  %v1144_v39 = vpop.f32.mrf.mxu1 }
  0xf6   : > { %v1156_v35 = vadd.f32 %v1155_v34, %v717_v15 }
  0xf8   : > { %v1225_v40 = vpack.c.bf16 %v1169_v38, %v1156_v35 }
  0xfa   : > { %1229 = vst [vmem:[%s228_s9 + $0x8] sm:$0xff] %v1225_v40 }
  0xfc   : > { %v1170_v42 = vpop.f32.mrf.mxu3 }
  0xfd   : > { %v1157_v41 = vpop.f32.mrf.mxu2 }
 0x10c   : > { %v1181_v43 = vpop.f32.mrf.mxu0  ;;  %v1194_v45 = vpop.f32.mrf.mxu1 }
 0x10d   : > { %v1182_v44 = vadd.f32 %v1181_v43, %v743_v21  ;;  %v1195_v46 = vadd.f32 %v1194_v45, %v756_v22 }
 0x10f   : > { %v1226_v47 = vpack.c.bf16 %v1195_v46, %v1182_v44 }
 0x111   : > { %1230 = vst [vmem:[%s228_s9 + $0x10] sm:$0xff] %v1226_v47 }
 0x113   : > { %v1207_v48 = vpop.f32.mrf.mxu2 }
 0x114   : > { %v1208_v49 = vadd.f32 %v1207_v48, %v769_v23  ;;  %v1220_v50 = vpop.f32.mrf.mxu3  ;;  %v1183_v51 = vpop.f32.mrf.mxu0 }
 0x115   : > { %v1221_v52 = vadd.f32 %v1220_v50, %v782_v24  ;;  %v1196_v53 = vpop.f32.mrf.mxu1 }
 0x117   : > { %v1227_v54 = vpack.c.bf16 %v1221_v52, %v1208_v49 }
 0x119   : > { %1231 = vst [vmem:[%s228_s9 + $0x18] sm:$0xff] %v1227_v54 }
 0x11b   : > { %v1209_v55 = vpop.f32.mrf.mxu2 }
 0x11c   : > { %v1222_v56 = vpop.f32.mrf.mxu3 }
 0x11d PF: > { %s13_s14 = sadd.s32 1, %s2095_s14   ;;  %s2958_s12 = smov %s2091_s13 }
 0x11e   : > { %p10_p5 = scmp.ge.s32.totalorder %s13_s14, 4   ;;  %s2959_s13 = smov %s2961_s15 }
 0x120   :  { %12 = sbr.rel (!%p10_p5) target bundleno = 2 (0x2), region = 66 }

// kernel: generator_forward.23
= control target key start
LH: loop header
LB: loop body
LE: loop exit
PB: predicated region body
PF: predicated region fallthrough
CT: control target
= control target key end

     0   :  { %s1000_s21 = smov 0   ;;  %s1002_s22 = smov 0   ;;  %s1114_s0 = inlined_call_operand.vmem [shape: bf16[2,1,24,8], index: 0, kind: input, shape index: {}]   ;;  %s1115_s1 = inlined_call_operand.vmem [shape: bf16[2,24,8], index: 1, kind: input, shape index: {}]   ;;  %s1116_s2 = inlined_call_operand.vmem [shape: bf16[7,8,8], index: 2, kind: input, shape index: {}]   ;;  %s1117_s3 = inlined_call_operand.vmem [shape: f32[1,8], index: 3, kind: input, shape index: {}]   ;;  %s1118_s4 = inlined_call_operand.vmem [shape: bf16[8,8], index: 4, kind: input, shape index: {}]   ;;  %s1119_s5 = inlined_call_operand.vmem [shape: f32[1,8], index: 5, kind: input, shape index: {}]   ;;  %s1120_s6 = inlined_call_operand.vmem [shape: bf16[2,24,8], index: 6, kind: output, shape index: {}]  }
   0x1   :  { %s1004_s23 = smov 0  }
   0x2 LB: > { %s28_s24 = sadd.s32 1, %s959_s22  ;;  %p851_p0 = scmp.ge.s32.totalorder %s963_s23, 1  ;;  %s963_s23 = sphi %s1004_s23, %s16_s23   ;;  %s959_s22 = sphi %s1002_s22, %s1122_s22   ;;  %s955_s21 = sphi %s1000_s21, %s1121_s21  }
   0x3   : > { %p30_p1 = scmp.ge.s32.totalorder %s28_s24, 2  ;;  %p249_p2 = scmp.lt.s32.totalorder %s963_s23, 3 }
   0x5   : > { %s1124_s24 = smov (%p30_p1, %s28_s24), 0  ;;  %p250_p3 = pnand %p851_p0, %p249_p2 }
   0x6   : > { %p296_p4 = scmp.lt.s32.totalorder (!%p250_p3), %s955_s21, 1 }
   0x7   : > { %253 = sbr.rel (%p250_p3) target bundleno = 395 (0x18b), region = 44 }
   0xc   : > { %v380_v0 = vld [vmem:[%s1116_s2] sm:$0xf]  ;;  %vm416_vm0 = vcmask 1043456   ;;  %v866_v1 = vld [vmem:[%s1116_s2 + $0x8] sm:$0xf]  ;;  %s1126_s21 = smov (!%p296_p4, %s955_s21), 1 }
   0xd   : > { %v453_v2 = vsel %vm416_vm0, %v380_v0, 0  ;;  %v486_v3 = vsel %vm416_vm0, %v866_v1, 0  ;;  %s1026_s29 = smul.u32 12, %s1126_s21  ;;  %v861_v4 = vld [vmem:[%s1116_s2 + $0x4] sm:$0xf]  ;;  %vm409_vm6 = vcmask 64512  }
   0xe   : > { %462 = vmatpush.bf16.msra.mxu1 %v453_v2  ;;  %495 = vmatpush.bf16.msra.mxu2 %v486_v3  ;;  %v869_v5 = vld [vmem:[%s1116_s2 + $0xc] sm:$0xf]  ;;  %v418_v6 = vsel %vm416_vm0, %v861_v4, 0  ;;  %v878_v8 = vld [vmem:[%s1116_s2 + $0x18] sm:$0xf]  ;;  %vm442_vm7 = vcmask 1044480  }
   0xf   : > { %s304_s12 = scalar_lea.vmem %s1114_s0, %s1026_s29  ;;  %s313_s15 = scalar_lea.vmem %s1115_s1, %s1026_s29  ;;  %v526_v7 = vsel %vm416_vm0, %v869_v5, 0  ;;  %427 = vmatpush.bf16.msra.mxu0 %v418_v6  ;;  %v647_v12 = vsel %vm416_vm0, %v878_v8, 0  ;;  %v872_v23 = vld [vmem:[%s1116_s2 + $0x10] sm:$0xf]  ;;  %v875_v26 = vld [vmem:[%s1116_s2 + $0x14] sm:$0xf] }
  0x10   : > { %v889_v9 = vld [vmem:[%s313_s15] sm:$0xff]   ;;  %v334_v11 = vld [vmem:[%s304_s12 + $0x8] sm:$0xf]  ;;  %535 = vmatpush.bf16.msra.mxu3 %v526_v7  ;;  %v565_v25 = vsel %vm416_vm0, %v872_v23, 0  ;;  %v615_v32 = vsel %vm416_vm0, %v875_v26, 0  ;;  %vm475_vm8 = vcmask 1045504   ;;  %s323_s10 = scalar_lea.vmem %s1120_s6, %s1026_s29 }
  0x11   : > { %v893_v10 = vld [vmem:[%s304_s12] sm:$0xff]   ;;  %v1048_v13 = vunpack.c.l.bf16 %v889_v9  ;;  %v337_v16 = vunpack.c.l.bf16 %v334_v11  ;;  %v1050_v17 = vunpack.c.h.bf16 %v889_v9  ;;  %v328_v18 = vld [vmem:[%s313_s15 + $0x8] sm:$0xf]  ;;  %vm393_vm9 = vsmask.f32 7424 }
  0x12   : > { %v894_v14 = vunpack.c.l.bf16 %v893_v10  ;;  %v895_v15 = vunpack.c.h.bf16 %v893_v10  ;;  %656 = vmatpush.bf16.msrb.mxu2 %v647_v12  ;;  %v1061_v30 = vunpack.c.l.bf16 %v328_v18  ;;  %624 = vmatpush.bf16.msrb.mxu1 %v615_v32  ;;  %vm511_vm11 = vsmask.f32 4352 }
  0x13   : > { %v346_v21 = vmin.f32 %v337_v16, 0.0  ;;  %v347_v22 = vmin.f32 %v1048_v13, 0.0  ;;  %v348_v24 = vmin.f32 %v1050_v17, 0.0  ;;  %574 = vmatpush.bf16.msrb.mxu0 %v565_v25  ;;  %vm340_vm3 = vcmp.gt.f32.partialorder %v337_v16, 0.0 }
  0x14   : > { %v344_v19 = vmin.f32 %v894_v14, 0.0  ;;  %v345_v20 = vmin.f32 %v895_v15, 0.0  ;;  %v349_v34 = vmin.f32 %v1061_v30, 0.0  ;;  %vm338_vm1 = vcmp.gt.f32.partialorder %v894_v14, 0.0 }
  0x15   : > { %v354_v29 = vmul.f32 1.442695, %v346_v21  ;;  %v356_v31 = vmul.f32 1.442695, %v347_v22  ;;  %v358_v33 = vmul.f32 1.442695, %v348_v24 }
  0x16   : > { %v350_v27 = vmul.f32 1.442695, %v344_v19  ;;  %v352_v28 = vmul.f32 1.442695, %v345_v20  ;;  %v360_v36 = vmul.f32 1.442695, %v349_v34 }
  0x17   : > { %vm339_vm2 = vcmp.gt.f32.partialorder %v895_v15, 0.0  ;;  %vm341_vm4 = vcmp.gt.f32.partialorder %v1048_v13, 0.0  ;;  %vm342_vm5 = vcmp.gt.f32.partialorder %v1050_v17, 0.0  ;;  %vm343_vm10 = vcmp.gt.f32.partialorder %v1061_v30, 0.0 }
  0x18   : > { %923 = vpow2.f32 %v350_v27  ;;  %vm590_vm12 = vsmask.f32 5376  ;;  %vm554_vm13 = vcmask 1046528  }
  0x19   : > { %925 = vpow2.f32 %v352_v28 }
  0x1a   : > { %927 = vpow2.f32 %v354_v29 }
  0x1b   : > { %929 = vpow2.f32 %v356_v31 }
  0x1c   : > { %931 = vpow2.f32 %v358_v33 }
  0x1d   : > { %933 = vpow2.f32 %v360_v36 }
  0x1e   : > { %v924_v35 = vpop.eup %923 }
  0x1f   : > { %v926_v37 = vpop.eup %925  ;;  %v855_v38 = vadd.f32 -1.0, %v924_v35 }
  0x20   : > { %v928_v39 = vpop.eup %927  ;;  %v856_v40 = vadd.f32 -1.0, %v926_v37 }
  0x21   : > { %v930_v41 = vpop.eup %929  ;;  %v857_v42 = vadd.f32 -1.0, %v928_v39  ;;  %v368_v43 = vsel %vm338_vm1, %v894_v14, %v855_v38  ;;  %vm735_vm1 = vcmask 60416  }
  0x22   : > { %v932_v44 = vpop.eup %931  ;;  %v858_v45 = vadd.f32 -1.0, %v930_v41  ;;  %v369_v46 = vsel %vm339_vm2, %v895_v15, %v856_v40  ;;  %v374_v47 = vpack.c.bf16 %v368_v43, %v368_v43 }
  0x23   : > { %v370_v48 = vsel %vm340_vm3, %v337_v16, %v857_v42  ;;  %v375_v49 = vpack.c.bf16 %v369_v46, %v369_v46  ;;  %v859_v50 = vadd.f32 -1.0, %v932_v44  ;;  %v934_v61 = vpop.eup %933 }
  0x24   : > { %v371_v51 = vsel %vm341_vm4, %v1048_v13, %v858_v45  ;;  %v376_v52 = vpack.c.bf16 %v370_v48, %v370_v48  ;;  %v439_v53 = vunpack.c.l.b16 %v374_v47  ;;  %v860_v7 = vadd.f32 -1.0, %v934_v61 }
  0x25   : > { %v377_v54 = vpack.c.bf16 %v371_v51, %v371_v51  ;;  %v387_v55 = vunpack.c.l.b16 %v375_v49  ;;  %v372_v56 = vsel %vm342_vm5, %v1050_v17, %v859_v50  ;;  %v697_v49 = vld [vmem:[%s1118_s4] sm:$0xf] }
  0x26   : > { %v388_v57 = vunpack.c.l.b16 %v376_v52  ;;  %v378_v58 = vpack.c.bf16 %v372_v56, %v372_v56  ;;  %v373_v24 = vsel %vm343_vm10, %v1061_v30, %v860_v7  ;;  %v709_v50 = vsel %vm416_vm0, %v697_v49, 0 }
  0x27   : > { %v389_v59 = vunpack.c.l.b16 %v377_v54  ;;  %v440_v60 = vpack.c.b16 %v387_v55, %v439_v53  ;;  %v379_v27 = vpack.c.bf16 %v373_v24, %v373_v24  ;;  %718 = vmatpush.bf16.msrb.mxu3 %v709_v50 }
  0x28   : > { %v390_v62 = vunpack.c.l.b16 %v378_v58  ;;  %v391_v63 = vpack.c.b16 %v388_v57, %v387_v55 }
  0x29   : > { %v441_v0 = vpack.c.b16 %v389_v59, %v388_v57  ;;  %v443_v1 = vrot.slane %v440_v60, 3  ;;  %v552_v28 = vunpack.c.l.b16 %v379_v27 }
  0x2a   : > { %v392_v2 = vpack.c.b16 %v390_v62, %v389_v59  ;;  %v476_v3 = vrot.slane %v391_v63, 2  ;;  %v395_v4 = vshrl.u32 %v391_v63, 16  ;;  %v397_v5 = vshll.u32 %v391_v63, 16 }
  0x2b   : > { %v444_v6 = vrot.slane %v441_v0, 3  ;;  %v553_v29 = vpack.c.b16 %v552_v28, %v390_v62  ;;  %v592_v32 = vshrl.u32 %v441_v0, 16  ;;  %v595_v33 = vshll.u32 %v441_v0, 16 }
  0x2c   : > { %v477_v8 = vrot.slane %v392_v2, 2  ;;  %v399_v9 = vrot.slane %v397_v5, 1  ;;  %v402_v10 = vshll.u32 %v392_v2, 16  ;;  %v406_v11 = vshrl.u32 %v392_v2, 16 }
  0x2d   : > { %v445_v12 = vsel %vm442_vm7, %v443_v1, %v444_v6  ;;  %v512_v14 = vrot.slane %v395_v4, 3  ;;  %v513_v15 = vrot.slane %v397_v5, 4  ;;  %v600_v34 = vshrl.u32 %v553_v29, 16 }
  0x2e   : > { %864 = vmatmul.msk.bf16.vlgmr.msra.gmra.mxu1 %vm409_vm6, %v445_v12  ;;  %v478_v16 = vsel %vm475_vm8, %v476_v3, %v477_v8  ;;  %v400_v18 = vor.u32 %v399_v9, %v395_v4  ;;  %v404_v19 = vrot.slane %v402_v10, 1  ;;  %v515_v20 = vrot.slane %v406_v11, 3  ;;  %v921_v9 = vld [vmem:[%s1117_s3] ss:$0 sm:$0xff] }
  0x2f   : > { %867 = vmatmul.msk.bf16.vlgmr.msra.gmra.mxu2 %vm409_vm6, %v478_v16  ;;  %v514_v21 = vor.u32 %v513_v15, %v512_v14  ;;  %v516_v22 = vrot.slane %v402_v10, 4  ;;  %v603_v35 = vshll.u32 %v553_v29, 16  ;;  %v594_v36 = vrot.slane %v592_v32, 2 }
  0x30   : > { %v405_v23 = vsel %vm393_vm9, %v400_v18, %v404_v19  ;;  %v408_v31 = vor.u32 %v406_v11, %v404_v19  ;;  %v597_v37 = vrot.slane %v595_v33, 3  ;;  %v602_v38 = vrot.slane %v600_v34, 2 }
  0x31   : > { %862 = vmatmul.msk.bf16.vlgmr.msra.gmra.mxu0 %vm409_vm6, %v405_v23  ;;  %v517_v25 = vor.u32 %v516_v22, %v515_v20  ;;  %v605_v39 = vrot.slane %v603_v35, 3  ;;  %v555_v42 = vrot.slane %v441_v0, 1  ;;  %v556_v43 = vrot.slane %v553_v29, 1 }
  0x32   : > { %v598_v40 = vor.u32 %v597_v37, %v594_v36  ;;  %v640_v46 = vpack.c.b16 %v552_v28, %v552_v28 }
  0x33   : > { %v518_v26 = vsel %vm511_vm11, %v514_v21, %v517_v25  ;;  %v606_v41 = vor.u32 %v605_v39, %v602_v38  ;;  %v557_v45 = vsel %vm554_vm13, %v555_v42, %v556_v43 }
  0x34   : > { %870 = vmatmul.msk.bf16.vlgmr.msra.gmra.mxu3 %vm409_vm6, %v518_v26 }
  0x35   : > { %v607_v44 = vsel %vm590_vm12, %v598_v40, %v606_v41 }
  0x3e   : > { %865 = vmatmul.msk.bf16.gmra.mxu1 %vm409_vm6, %v444_v6 }
  0x3f   : > { %868 = vmatmul.msk.bf16.gmra.mxu2 %vm409_vm6, %v477_v8 }
  0x41   : > { %863 = vmatmul.msk.bf16.gmra.mxu0 %vm409_vm6, %v408_v31 }
  0x44   : > { %871 = vmatmul.msk.bf16.gmra.mxu3 %vm409_vm6, %v517_v25 }
  0x4e   : > { %876 = vmatmul.msk.bf16.vlgmr.msrb.gmra.mxu1 %vm409_vm6, %v607_v44 }
  0x4f   : > { %879 = vmatmul.msk.bf16.vlgmr.msrb.gmra.mxu2 %vm409_vm6, %v392_v2 }
  0x51   : > { %873 = vmatmul.msk.bf16.vlgmr.msrb.gmra.mxu0 %vm409_vm6, %v557_v45 }
  0x5e   : > { %877 = vmatmul.msk.bf16.gmra.mxu1 %vm409_vm6, %v606_v41 }
  0x5f   : > { %880 = vmatmul.msk.bf16.gmra.mxu2 %vm409_vm6, %v640_v46 }
  0x61   : > { %874 = vmatmul.msk.bf16.gmra.mxu0 %vm409_vm6, %v556_v43 }
  0xab   : > { %v464_v47 = vpop.f32.mrf.mxu1 }
  0xae   : > { %v429_v48 = vpop.f32.mrf.mxu0 }
  0xaf   : > { %v465_v62 = vadd.f32 %v464_v47, %v429_v48 }
  0xb2   : > { %v497_v51 = vpop.f32.mrf.mxu2 }
  0xb3   : > { %v466_v52 = vpop.f32.mrf.mxu1  ;;  %v506_v1 = vadd.f32 %v497_v51, %v465_v62 }
  0xb6   : > { %v431_v53 = vpop.f32.mrf.mxu0 }
  0xb7   : > { %v537_v54 = vpop.f32.mrf.mxu3  ;;  %v467_v5 = vadd.f32 %v466_v52, %v431_v53 }
  0xb8   : > { %v546_v3 = vadd.f32 %v537_v54, %v506_v1 }
  0xba   : > { %v499_v55 = vpop.f32.mrf.mxu2 }
  0xbb   : > { %v469_v56 = vpop.f32.mrf.mxu1  ;;  %v507_v11 = vadd.f32 %v499_v55, %v467_v5  ;;  %v922_v55 = vld [vmem:[%s1119_s5] ss:$0 sm:$0xff] }
  0xbe   : > { %v434_v57 = vpop.f32.mrf.mxu0 }
  0xbf   : > { %v539_v58 = vpop.f32.mrf.mxu3  ;;  %v470_v19 = vadd.f32 %v469_v56, %v434_v57 }
  0xc0   : > { %v547_v15 = vadd.f32 %v539_v58, %v507_v11 }
  0xc2   : > { %v502_v59 = vpop.f32.mrf.mxu2 }
  0xc3   : > { %v471_v60 = vpop.f32.mrf.mxu1  ;;  %v508_v24 = vadd.f32 %v502_v59, %v470_v19 }
  0xc6   : > { %v436_v61 = vpop.f32.mrf.mxu0 }
  0xc7   : > { %v542_v63 = vpop.f32.mrf.mxu3 }
  0xc8   : > { %v548_v28 = vadd.f32 %v542_v63, %v508_v24 }
  0xca   : > { %v504_v0 = vpop.f32.mrf.mxu2 }
  0xcb   : > { %v626_v2 = vpop.f32.mrf.mxu1 }
  0xce   : > { %v576_v4 = vpop.f32.mrf.mxu0 }
  0xcf   : > { %v585_v6 = vadd.f32 %v576_v4, %v546_v3  ;;  %v544_v7 = vpop.f32.mrf.mxu3 }
  0xd1   : > { %v635_v8 = vadd.f32 %v626_v2, %v585_v6 }
  0xd2   : > { %v658_v10 = vpop.f32.mrf.mxu2 }
  0xd3   : > { %v667_v12 = vadd.f32 %v658_v10, %v635_v8  ;;  %v628_v14 = vpop.f32.mrf.mxu1 }
  0xd5   : > { %v674_v16 = vadd.f32 %v921_v9, %v667_v12 }
  0xd6   : > { %v578_v18 = vpop.f32.mrf.mxu0 }
  0xd7   : > { %v680_v20 = vmin.f32 %v674_v16, 0.0  ;;  %v586_v21 = vadd.f32 %v578_v18, %v547_v15  ;;  %vm677_vm14 = vcmp.gt.f32.partialorder %v674_v16, 0.0 }
  0xd9   : > { %v636_v22 = vadd.f32 %v628_v14, %v586_v21  ;;  %v683_v25 = vmul.f32 1.442695, %v680_v20 }
  0xda   : > { %v660_v23 = vpop.f32.mrf.mxu2 }
  0xdb   : > { %v668_v26 = vadd.f32 %v660_v23, %v636_v22  ;;  %v631_v27 = vpop.f32.mrf.mxu1  ;;  %935 = vpow2.f32 %v683_v25 }
  0xdd   : > { %v675_v29 = vadd.f32 %v921_v9, %v668_v26 }
  0xde   : > { %v581_v31 = vpop.f32.mrf.mxu0 }
  0xdf   : > { %v681_v32 = vmin.f32 %v675_v29, 0.0  ;;  %v587_v33 = vadd.f32 %v581_v31, %v548_v28  ;;  %vm678_vm15 = vcmp.gt.f32.partialorder %v675_v29, 0.0 }
  0xe1   : > { %v685_v34 = vmul.f32 1.442695, %v681_v32  ;;  %v637_v35 = vadd.f32 %v631_v27, %v587_v33  ;;  %v936_v39 = vpop.eup %935 }
  0xe2   : > { %v663_v36 = vpop.f32.mrf.mxu2  ;;  %v881_v43 = vadd.f32 -1.0, %v936_v39 }
  0xe3   : > { %937 = vpow2.f32 %v685_v34  ;;  %v669_v37 = vadd.f32 %v663_v36, %v637_v35  ;;  %v633_v38 = vpop.f32.mrf.mxu1 }
  0xe4   : > { %v692_v48 = vsel %vm677_vm14, %v674_v16, %v881_v43 }
  0xe5   : > { %v676_v40 = vadd.f32 %v921_v9, %v669_v37 }
  0xe6   : > { %v583_v41 = vpop.f32.mrf.mxu0 }
  0xe7   : > { %v682_v42 = vmin.f32 %v676_v40, 0.0  ;;  %vm679_vm0 = vcmp.gt.f32.partialorder %v676_v40, 0.0 }
  0xe9   : > { %v938_v44 = vpop.eup %937  ;;  %v687_v45 = vmul.f32 1.442695, %v682_v42 }
  0xea   : > { %v882_v46 = vadd.f32 -1.0, %v938_v44  ;;  %v665_v47 = vpop.f32.mrf.mxu2 }
  0xeb   : > { %939 = vpow2.f32 %v687_v45 }
  0xec   : > { %v693_v49 = vsel %vm678_vm15, %v675_v29, %v882_v46 }
  0xed   : > { %v695_v50 = vpack.c.bf16 %v693_v49, %v692_v48 }
  0xef   : > { %884 = vmatmul.msk.bf16.vlgmr.msrb.gmra.mxu3 %vm409_vm6, %v695_v50 }
  0xf1   : > { %v940_v51 = vpop.eup %939 }
  0xf2   : > { %v883_v52 = vadd.f32 -1.0, %v940_v51 }
  0xf4   : > { %v694_v53 = vsel %vm679_vm0, %v676_v40, %v883_v52 }
  0xf5   : > { %v696_v54 = vpack.c.bf16 %v694_v53, %v694_v53 }
  0xff   : > { %885 = vmatmul.msk.bf16.gmra.mxu3 %vm409_vm6, %v696_v54 }
 0x172   : > { %v720_v56 = vpop.f32.mrf.mxu3 }
 0x173   : > { %v721_v57 = vadd.f32 %v922_v55, %v720_v56 }
 0x175   : > { %v729_v58 = vadd.f32 %v1048_v13, %v721_v57 }
 0x177   : > { %v732_v59 = vpack.c.bf16 %v729_v58, %v729_v58 }
 0x179   : > { %736 = vst.msk [vmem:[%s323_s10] sm:$0xf] %vm735_vm1, %v732_v59 }
 0x17a   : > { %v722_v60 = vpop.f32.mrf.mxu3 }
 0x17b   : > { %v723_v61 = vadd.f32 %v922_v55, %v722_v60 }
 0x17d   : > { %v730_v62 = vadd.f32 %v1050_v17, %v723_v61 }
 0x17f   : > { %v733_v63 = vpack.c.bf16 %v730_v62, %v730_v62 }
 0x181   : > { %737 = vst.msk [vmem:[%s323_s10 + $0x4] sm:$0xf] %vm735_vm1, %v733_v63 }
 0x182   : > { %v725_v0 = vpop.f32.mrf.mxu3 }
 0x183   : > { %v726_v1 = vadd.f32 %v922_v55, %v725_v0 }
 0x185   : > { %v731_v2 = vadd.f32 %v726_v1, %v1061_v30 }
 0x187   : > { %v734_v3 = vpack.c.bf16 %v731_v2, %v731_v2 }
 0x189   : > { %738 = vst.msk [vmem:[%s323_s10 + $0x8] sm:$0xf] %vm735_vm1, %v734_v3 }
 0x18a   : > { %v727_v13 = vpop.f32.mrf.mxu3 }
 0x18b PF: > { %s16_s23 = sadd.s32 1, %s963_s23   ;;  %s1121_s21 = smov %s959_s22 }
 0x18c   : > { %p13_p5 = scmp.ge.s32.totalorder %s16_s23, 4   ;;  %s1122_s22 = smov %s1124_s24 }
 0x18e   :  { %15 = sbr.rel (!%p13_p5) target bundleno = 2 (0x2), region = 83 }

// kernel: generator_forward.22
= control target key start
LH: loop header
LB: loop body
LE: loop exit
PB: predicated region body
PF: predicated region fallthrough
CT: control target
= control target key end

     0   :  { %s947_s21 = smov 0   ;;  %s949_s22 = smov 0   ;;  %s1063_s0 = inlined_call_operand.vmem [shape: bf16[2,1,8,8], index: 0, kind: input, shape index: {}]   ;;  %s1064_s1 = inlined_call_operand.vmem [shape: bf16[2,24,8], index: 1, kind: input, shape index: {}]   ;;  %s1065_s2 = inlined_call_operand.vmem [shape: bf16[7,8,8], index: 2, kind: input, shape index: {}]   ;;  %s1066_s3 = inlined_call_operand.vmem [shape: f32[1,8], index: 3, kind: input, shape index: {}]   ;;  %s1067_s4 = inlined_call_operand.vmem [shape: bf16[8,8], index: 4, kind: input, shape index: {}]   ;;  %s1068_s5 = inlined_call_operand.vmem [shape: f32[1,8], index: 5, kind: input, shape index: {}]   ;;  %s1069_s6 = inlined_call_operand.vmem [shape: bf16[2,24,8], index: 6, kind: output, shape index: {}]  }
   0x1   :  { %s951_s23 = smov 0  }
   0x2 LB: > { %s28_s24 = sadd.s32 1, %s906_s22  ;;  %p808_p0 = scmp.ge.s32.totalorder %s910_s23, 1  ;;  %s910_s23 = sphi %s951_s23, %s16_s23   ;;  %s906_s22 = sphi %s949_s22, %s1071_s22   ;;  %s902_s21 = sphi %s947_s21, %s1070_s21  }
   0x3   : > { %p30_p1 = scmp.ge.s32.totalorder %s28_s24, 2  ;;  %p247_p2 = scmp.lt.s32.totalorder %s910_s23, 3 }
   0x5   : > { %s1073_s24 = smov (%p30_p1, %s28_s24), 0  ;;  %p248_p3 = pnand %p808_p0, %p247_p2 }
   0x6   : > { %p292_p4 = scmp.lt.s32.totalorder (!%p248_p3), %s902_s21, 1 }
   0x7   : > { %251 = sbr.rel (%p248_p3) target bundleno = 396 (0x18c), region = 44 }
   0xc   : > { %v356_v0 = vld [vmem:[%s1065_s2] sm:$0xf]  ;;  %vm394_vm0 = vcmask 1043456   ;;  %v821_v1 = vld [vmem:[%s1065_s2 + $0x8] sm:$0xf]  ;;  %s1075_s21 = smov (!%p292_p4, %s902_s21), 1 }
   0xd   : > { %v427_v2 = vsel %vm394_vm0, %v356_v0, 0  ;;  %v460_v3 = vsel %vm394_vm0, %v821_v1, 0  ;;  %v816_v4 = vld [vmem:[%s1065_s2 + $0x4] sm:$0xf]  ;;  %v824_v5 = vld [vmem:[%s1065_s2 + $0xc] sm:$0xf] }
   0xe   : > { %436 = vmatpush.bf16.msra.mxu1 %v427_v2  ;;  %469 = vmatpush.bf16.msra.mxu2 %v460_v3  ;;  %v396_v6 = vsel %vm394_vm0, %v816_v4, 0  ;;  %v500_v7 = vsel %vm394_vm0, %v824_v5, 0  ;;  %v833_v8 = vld [vmem:[%s1065_s2 + $0x18] sm:$0xf]  ;;  %s809_s11 = sshll.u32 %s1075_s21, 2  ;;  %s847_s12 = smul.u32 12, %s1075_s21 }
   0xf   : > { %405 = vmatpush.bf16.msra.mxu0 %v396_v6  ;;  %509 = vmatpush.bf16.msra.mxu3 %v500_v7  ;;  %v610_v9 = vsel %vm394_vm0, %v833_v8, 0  ;;  %s298_s15 = scalar_lea.vmem %s1063_s0, %s809_s11  ;;  %v827_v17 = vld [vmem:[%s1065_s2 + $0x10] sm:$0xf]  ;;  %v830_v18 = vld [vmem:[%s1065_s2 + $0x14] sm:$0xf]  ;;  %vm387_vm5 = vcmask 64512  }
  0x10   : > { %s307_s18 = scalar_lea.vmem %s1064_s1, %s847_s12  ;;  %v326_v10 = vld [vmem:[%s298_s15] sm:$0xf]  ;;  %v536_v20 = vsel %vm394_vm0, %v827_v17, 0  ;;  %v576_v21 = vsel %vm394_vm0, %v830_v18, 0  ;;  %vm416_vm6 = vcmask 1046528   ;;  %vm449_vm7 = vcmask 1045504   ;;  %s317_s11 = scalar_lea.vmem %s1069_s6, %s847_s12 }
  0x11   : > { %v844_v11 = vld [vmem:[%s307_s18] sm:$0xff]   ;;  %v322_v12 = vld [vmem:[%s307_s18 + $0x8] sm:$0xf]  ;;  %v327_v13 = vunpack.c.l.bf16 %v326_v10  ;;  %vm369_vm8 = vsmask.f32 6400  ;;  %vm525_vm11 = vcmask 1044480  }
  0x12   : > { %619 = vmatpush.bf16.msrb.mxu2 %v610_v9  ;;  %v997_v14 = vunpack.c.l.bf16 %v844_v11  ;;  %v999_v15 = vunpack.c.h.bf16 %v844_v11  ;;  %v1001_v16 = vunpack.c.l.bf16 %v322_v12  ;;  %585 = vmatpush.bf16.msrb.mxu1 %v576_v21  ;;  %vm485_vm9 = vsmask.f32 5376 }
  0x13   : > { %v332_v19 = vmin.f32 %v327_v13, 0.0  ;;  %545 = vmatpush.bf16.msrb.mxu0 %v536_v20  ;;  %vm328_vm1 = vcmp.gt.f32.partialorder %v327_v13, 0.0  ;;  %vm561_vm10 = vsmask.f32 4352  ;;  %vm698_vm15 = vcmask 60416  }
  0x14   : > { %v333_v22 = vmin.f32 %v997_v14, 0.0  ;;  %v334_v23 = vmin.f32 %v999_v15, 0.0  ;;  %v335_v24 = vmin.f32 %v1001_v16, 0.0  ;;  %vm329_vm2 = vcmp.gt.f32.partialorder %v997_v14, 0.0 }
  0x15   : > { %v336_v25 = vmul.f32 1.442695, %v332_v19  ;;  %vm330_vm3 = vcmp.gt.f32.partialorder %v999_v15, 0.0  ;;  %vm331_vm4 = vcmp.gt.f32.partialorder %v1001_v16, 0.0 }
  0x16   : > { %v338_v26 = vmul.f32 1.442695, %v333_v22  ;;  %v340_v27 = vmul.f32 1.442695, %v334_v23  ;;  %v342_v28 = vmul.f32 1.442695, %v335_v24 }
  0x17   : > { %874 = vpow2.f32 %v336_v25 }
  0x18   : > { %876 = vpow2.f32 %v338_v26 }
  0x19   : > { %878 = vpow2.f32 %v340_v27 }
  0x1a   : > { %880 = vpow2.f32 %v342_v28 }
  0x1d   : > { %v875_v29 = vpop.eup %874 }
  0x1e   : > { %v877_v30 = vpop.eup %876  ;;  %v812_v31 = vadd.f32 -1.0, %v875_v29  ;;  %v660_v29 = vld [vmem:[%s1067_s4] sm:$0xf] }
  0x1f   : > { %v879_v32 = vpop.eup %878  ;;  %v813_v33 = vadd.f32 -1.0, %v877_v30  ;;  %v672_v30 = vsel %vm394_vm0, %v660_v29, 0 }
  0x20   : > { %v881_v34 = vpop.eup %880  ;;  %v814_v35 = vadd.f32 -1.0, %v879_v32  ;;  %v348_v36 = vsel %vm328_vm1, %v327_v13, %v812_v31  ;;  %681 = vmatpush.bf16.msrb.mxu3 %v672_v30 }
  0x21   : > { %v815_v37 = vadd.f32 -1.0, %v881_v34  ;;  %v349_v38 = vsel %vm329_vm2, %v997_v14, %v813_v33  ;;  %v352_v39 = vpack.c.bf16 %v348_v36, %v348_v36 }
  0x22   : > { %v350_v40 = vsel %vm330_vm3, %v999_v15, %v814_v35  ;;  %v353_v41 = vpack.c.bf16 %v349_v38, %v349_v38 }
  0x23   : > { %v351_v42 = vsel %vm331_vm4, %v1001_v16, %v815_v37  ;;  %v354_v43 = vpack.c.bf16 %v350_v40, %v350_v40  ;;  %v363_v44 = vunpack.c.l.b16 %v352_v39 }
  0x24   : > { %v355_v45 = vpack.c.bf16 %v351_v42, %v351_v42  ;;  %v364_v46 = vunpack.c.l.b16 %v353_v41 }
  0x25   : > { %v365_v47 = vunpack.c.l.b16 %v354_v43 }
  0x26   : > { %v366_v48 = vunpack.c.l.b16 %v355_v45  ;;  %v367_v49 = vpack.c.b16 %v364_v46, %v363_v44 }
  0x27   : > { %v601_v20 = vpack.c.b16 %v365_v47, %v364_v46 }
  0x28   : > { %v368_v50 = vpack.c.b16 %v366_v48, %v365_v47  ;;  %v417_v51 = vrot.slane %v367_v49, 1  ;;  %v450_v52 = vrot.slane %v367_v49, 2  ;;  %v371_v53 = vshrl.u32 %v367_v49, 16 }
  0x29   : > { %v374_v54 = vshll.u32 %v367_v49, 16  ;;  %v526_v22 = vrot.slane %v367_v49, 3  ;;  %v602_v25 = vpack.c.b16 %v366_v48, %v366_v48 }
  0x2a   : > { %v418_v55 = vrot.slane %v368_v50, 1  ;;  %v451_v56 = vrot.slane %v368_v50, 2  ;;  %v373_v57 = vrot.slane %v371_v53, 1  ;;  %v379_v58 = vshrl.u32 %v368_v50, 16 }
  0x2b   : > { %v376_v59 = vrot.slane %v374_v54, 2  ;;  %v382_v60 = vshll.u32 %v368_v50, 16  ;;  %v486_v61 = vrot.slane %v371_v53, 2  ;;  %v487_v62 = vrot.slane %v374_v54, 3 }
  0x2c   : > { %v419_v63 = vsel %vm416_vm6, %v417_v51, %v418_v55  ;;  %v452_v0 = vsel %vm449_vm7, %v450_v52, %v451_v56  ;;  %v381_v1 = vrot.slane %v379_v58, 1  ;;  %v489_v2 = vrot.slane %v379_v58, 2 }
  0x2d   : > { %819 = vmatmul.msk.bf16.vlgmr.msra.gmra.mxu1 %vm387_vm5, %v419_v63  ;;  %822 = vmatmul.msk.bf16.vlgmr.msra.gmra.mxu2 %vm387_vm5, %v452_v0  ;;  %v377_v3 = vor.u32 %v376_v59, %v373_v57  ;;  %v384_v4 = vrot.slane %v382_v60, 2  ;;  %v488_v5 = vor.u32 %v487_v62, %v486_v61  ;;  %v490_v6 = vrot.slane %v382_v60, 3 }
  0x2e   : > { %v562_v11 = vrot.slane %v371_v53, 3  ;;  %v563_v12 = vrot.slane %v374_v54, 4  ;;  %v565_v13 = vrot.slane %v379_v58, 3  ;;  %v566_v17 = vrot.slane %v382_v60, 4  ;;  %v872_v53 = vld [vmem:[%s1066_s3] ss:$0 sm:$0xff] }
  0x2f   : > { %v385_v7 = vor.u32 %v384_v4, %v381_v1  ;;  %v491_v8 = vor.u32 %v490_v6, %v489_v2  ;;  %v527_v23 = vrot.slane %v368_v50, 3 }
  0x30   : > { %v564_v18 = vor.u32 %v563_v12, %v562_v11  ;;  %v567_v19 = vor.u32 %v566_v17, %v565_v13 }
  0x31   : > { %v386_v9 = vsel %vm369_vm8, %v377_v3, %v385_v7  ;;  %v492_v10 = vsel %vm485_vm9, %v488_v5, %v491_v8  ;;  %v528_v24 = vsel %vm525_vm11, %v526_v22, %v527_v23 }
  0x32   : > { %817 = vmatmul.msk.bf16.vlgmr.msra.gmra.mxu0 %vm387_vm5, %v386_v9  ;;  %825 = vmatmul.msk.bf16.vlgmr.msra.gmra.mxu3 %vm387_vm5, %v492_v10  ;;  %v568_v21 = vsel %vm561_vm10, %v564_v18, %v567_v19 }
  0x3d   : > { %820 = vmatmul.msk.bf16.gmra.mxu1 %vm387_vm5, %v418_v55  ;;  %823 = vmatmul.msk.bf16.gmra.mxu2 %vm387_vm5, %v451_v56 }
  0x42   : > { %818 = vmatmul.msk.bf16.gmra.mxu0 %vm387_vm5, %v385_v7  ;;  %826 = vmatmul.msk.bf16.gmra.mxu3 %vm387_vm5, %v491_v8 }
  0x4d   : > { %831 = vmatmul.msk.bf16.vlgmr.msrb.gmra.mxu1 %vm387_vm5, %v568_v21  ;;  %834 = vmatmul.msk.bf16.vlgmr.msrb.gmra.mxu2 %vm387_vm5, %v601_v20 }
  0x52   : > { %828 = vmatmul.msk.bf16.vlgmr.msrb.gmra.mxu0 %vm387_vm5, %v528_v24 }
  0x5d   : > { %835 = vmatmul.msk.bf16.gmra.mxu2 %vm387_vm5, %v602_v25  ;;  %832 = vmatmul.msk.bf16.gmra.mxu1 %vm387_vm5, %v567_v19 }
  0x62   : > { %829 = vmatmul.msk.bf16.gmra.mxu0 %vm387_vm5, %v527_v23 }
  0xaa   : > { %v438_v26 = vpop.f32.mrf.mxu1 }
  0xaf   : > { %v407_v27 = vpop.f32.mrf.mxu0 }
  0xb0   : > { %v471_v28 = vpop.f32.mrf.mxu2  ;;  %v439_v42 = vadd.f32 %v438_v26, %v407_v27 }
  0xb2   : > { %v440_v31 = vpop.f32.mrf.mxu1  ;;  %v480_v45 = vadd.f32 %v471_v28, %v439_v42 }
  0xb5   : > { %v511_v32 = vpop.f32.mrf.mxu3 }
  0xb6   : > { %v520_v47 = vadd.f32 %v511_v32, %v480_v45 }
  0xb7   : > { %v409_v33 = vpop.f32.mrf.mxu0 }
  0xb8   : > { %v473_v34 = vpop.f32.mrf.mxu2  ;;  %v441_v49 = vadd.f32 %v440_v31, %v409_v33 }
  0xba   : > { %v443_v35 = vpop.f32.mrf.mxu1  ;;  %v481_v55 = vadd.f32 %v473_v34, %v441_v49  ;;  %v873_v34 = vld [vmem:[%s1068_s5] ss:$0 sm:$0xff] }
  0xbd   : > { %v513_v36 = vpop.f32.mrf.mxu3 }
  0xbe   : > { %v521_v57 = vadd.f32 %v513_v36, %v481_v55 }
  0xbf   : > { %v412_v37 = vpop.f32.mrf.mxu0 }
  0xc0   : > { %v476_v38 = vpop.f32.mrf.mxu2  ;;  %v444_v60 = vadd.f32 %v443_v35, %v412_v37 }
  0xc2   : > { %v445_v39 = vpop.f32.mrf.mxu1  ;;  %v482_v2 = vadd.f32 %v476_v38, %v444_v60 }
  0xc5   : > { %v516_v40 = vpop.f32.mrf.mxu3 }
  0xc6   : > { %v522_v5 = vadd.f32 %v516_v40, %v482_v2 }
  0xc7   : > { %v414_v41 = vpop.f32.mrf.mxu0 }
  0xc8   : > { %v478_v43 = vpop.f32.mrf.mxu2 }
  0xca   : > { %v587_v44 = vpop.f32.mrf.mxu1 }
  0xcd   : > { %v518_v46 = vpop.f32.mrf.mxu3 }
  0xcf   : > { %v547_v48 = vpop.f32.mrf.mxu0 }
  0xd0   : > { %v556_v50 = vadd.f32 %v547_v48, %v520_v47  ;;  %v621_v51 = vpop.f32.mrf.mxu2 }
  0xd2   : > { %v596_v52 = vadd.f32 %v587_v44, %v556_v50  ;;  %v589_v54 = vpop.f32.mrf.mxu1 }
  0xd4   : > { %v630_v56 = vadd.f32 %v621_v51, %v596_v52 }
  0xd6   : > { %v637_v58 = vadd.f32 %v872_v53, %v630_v56 }
  0xd7   : > { %v549_v59 = vpop.f32.mrf.mxu0 }
  0xd8   : > { %v643_v61 = vmin.f32 %v637_v58, 0.0  ;;  %v557_v62 = vadd.f32 %v549_v59, %v521_v57  ;;  %v623_v63 = vpop.f32.mrf.mxu2  ;;  %vm640_vm12 = vcmp.gt.f32.partialorder %v637_v58, 0.0 }
  0xda   : > { %v597_v0 = vadd.f32 %v589_v54, %v557_v62  ;;  %v592_v1 = vpop.f32.mrf.mxu1  ;;  %v646_v3 = vmul.f32 1.442695, %v643_v61 }
  0xdc   : > { %v631_v4 = vadd.f32 %v623_v63, %v597_v0  ;;  %882 = vpow2.f32 %v646_v3 }
  0xde   : > { %v638_v6 = vadd.f32 %v872_v53, %v631_v4 }
  0xdf   : > { %v552_v7 = vpop.f32.mrf.mxu0 }
  0xe0   : > { %v644_v8 = vmin.f32 %v638_v6, 0.0  ;;  %v558_v9 = vadd.f32 %v552_v7, %v522_v5  ;;  %v626_v10 = vpop.f32.mrf.mxu2  ;;  %vm641_vm13 = vcmp.gt.f32.partialorder %v638_v6, 0.0 }
  0xe2   : > { %v648_v11 = vmul.f32 1.442695, %v644_v8  ;;  %v598_v12 = vadd.f32 %v592_v1, %v558_v9  ;;  %v594_v13 = vpop.f32.mrf.mxu1  ;;  %v883_v18 = vpop.eup %882 }
  0xe3   : > { %v836_v23 = vadd.f32 -1.0, %v883_v18 }
  0xe4   : > { %884 = vpow2.f32 %v648_v11  ;;  %v632_v17 = vadd.f32 %v626_v10, %v598_v12 }
  0xe5   : > { %v655_v27 = vsel %vm640_vm12, %v637_v58, %v836_v23 }
  0xe6   : > { %v639_v19 = vadd.f32 %v872_v53, %v632_v17 }
  0xe7   : > { %v554_v20 = vpop.f32.mrf.mxu0 }
  0xe8   : > { %v645_v21 = vmin.f32 %v639_v19, 0.0  ;;  %v628_v22 = vpop.f32.mrf.mxu2  ;;  %vm642_vm14 = vcmp.gt.f32.partialorder %v639_v19, 0.0 }
  0xea   : > { %v885_v24 = vpop.eup %884  ;;  %v650_v25 = vmul.f32 1.442695, %v645_v21 }
  0xeb   : > { %v837_v26 = vadd.f32 -1.0, %v885_v24 }
  0xec   : > { %886 = vpow2.f32 %v650_v25 }
  0xed   : > { %v656_v28 = vsel %vm641_vm13, %v638_v6, %v837_v26 }
  0xee   : > { %v658_v29 = vpack.c.bf16 %v656_v28, %v655_v27 }
  0xf0   : > { %839 = vmatmul.msk.bf16.vlgmr.msrb.gmra.mxu3 %vm387_vm5, %v658_v29 }
  0xf2   : > { %v887_v30 = vpop.eup %886 }
  0xf3   : > { %v838_v31 = vadd.f32 -1.0, %v887_v30 }
  0xf5   : > { %v657_v32 = vsel %vm642_vm14, %v639_v19, %v838_v31 }
  0xf6   : > { %v659_v33 = vpack.c.bf16 %v657_v32, %v657_v32 }
 0x100   : > { %840 = vmatmul.msk.bf16.gmra.mxu3 %vm387_vm5, %v659_v33 }
 0x173   : > { %v683_v35 = vpop.f32.mrf.mxu3 }
 0x174   : > { %v684_v36 = vadd.f32 %v873_v34, %v683_v35 }
 0x176   : > { %v692_v37 = vadd.f32 %v997_v14, %v684_v36 }
 0x178   : > { %v695_v38 = vpack.c.bf16 %v692_v37, %v692_v37 }
 0x17a   : > { %699 = vst.msk [vmem:[%s317_s11] sm:$0xf] %vm698_vm15, %v695_v38 }
 0x17b   : > { %v685_v39 = vpop.f32.mrf.mxu3 }
 0x17c   : > { %v686_v40 = vadd.f32 %v873_v34, %v685_v39 }
 0x17e   : > { %v693_v41 = vadd.f32 %v999_v15, %v686_v40 }
 0x180   : > { %v696_v42 = vpack.c.bf16 %v693_v41, %v693_v41 }
 0x182   : > { %700 = vst.msk [vmem:[%s317_s11 + $0x4] sm:$0xf] %vm698_vm15, %v696_v42 }
 0x183   : > { %v688_v43 = vpop.f32.mrf.mxu3 }
 0x184   : > { %v689_v44 = vadd.f32 %v873_v34, %v688_v43 }
 0x186   : > { %v694_v45 = vadd.f32 %v689_v44, %v1001_v16 }
 0x188   : > { %v697_v46 = vpack.c.bf16 %v694_v45, %v694_v45 }
 0x18a   : > { %701 = vst.msk [vmem:[%s317_s11 + $0x8] sm:$0xf] %vm698_vm15, %v697_v46 }
 0x18b   : > { %v690_v14 = vpop.f32.mrf.mxu3 }
 0x18c PF: > { %s16_s23 = sadd.s32 1, %s910_s23   ;;  %s1070_s21 = smov %s906_s22 }
 0x18d   : > { %p13_p5 = scmp.ge.s32.totalorder %s16_s23, 4   ;;  %s1071_s22 = smov %s1073_s24 }
 0x18f   :  { %15 = sbr.rel (!%p13_p5) target bundleno = 2 (0x2), region = 83 }

// kernel: generator_forward.24
= control target key start
LH: loop header
LB: loop body
LE: loop exit
PB: predicated region body
PF: predicated region fallthrough
CT: control target
= control target key end

     0   :  { %s1072_s21 = smov 0   ;;  %s1074_s22 = smov 0   ;;  %s1241_s0 = inlined_call_operand.vmem [shape: bf16[2,1,56,8], index: 0, kind: input, shape index: {}]   ;;  %s1242_s1 = inlined_call_operand.vmem [shape: bf16[2,24,8], index: 1, kind: input, shape index: {}]   ;;  %s1243_s2 = inlined_call_operand.vmem [shape: bf16[7,8,8], index: 2, kind: input, shape index: {}]   ;;  %s1244_s3 = inlined_call_operand.vmem [shape: f32[1,8], index: 3, kind: input, shape index: {}]   ;;  %s1245_s4 = inlined_call_operand.vmem [shape: bf16[8,8], index: 4, kind: input, shape index: {}]   ;;  %s1246_s5 = inlined_call_operand.vmem [shape: f32[1,8], index: 5, kind: input, shape index: {}]   ;;  %s1247_s6 = inlined_call_operand.vmem [shape: bf16[2,24,8], index: 6, kind: output, shape index: {}]  }
   0x1   :  { %s1076_s23 = smov 0  }
   0x2 LB: > { %s28_s24 = sadd.s32 1, %s1031_s22  ;;  %p900_p0 = scmp.ge.s32.totalorder %s1035_s23, 1  ;;  %s1035_s23 = sphi %s1076_s23, %s16_s23   ;;  %s1031_s22 = sphi %s1074_s22, %s1249_s22   ;;  %s1027_s21 = sphi %s1072_s21, %s1248_s21  }
   0x3   : > { %p30_p1 = scmp.ge.s32.totalorder %s28_s24, 2  ;;  %p249_p2 = scmp.lt.s32.totalorder %s1035_s23, 3 }
   0x5   : > { %s1251_s24 = smov (%p30_p1, %s28_s24), 0  ;;  %p250_p3 = pnand %p900_p0, %p249_p2 }
   0x6   : > { %p296_p4 = scmp.lt.s32.totalorder (!%p250_p3), %s1027_s21, 1 }
   0x7   : > { %253 = sbr.rel (%p250_p3) target bundleno = 396 (0x18c), region = 44 }
   0xc   : > { %v416_v0 = vld [vmem:[%s1243_s2] sm:$0xf]  ;;  %vm454_vm0 = vcmask 1043456   ;;  %v919_v1 = vld [vmem:[%s1243_s2 + $0x8] sm:$0xf]  ;;  %s1253_s21 = smov (!%p296_p4, %s1027_s21), 1 }
   0xd   : > { %v491_v2 = vsel %vm454_vm0, %v416_v0, 0  ;;  %v527_v3 = vsel %vm454_vm0, %v919_v1, 0  ;;  %s959_s29 = smul.u32 28, %s1253_s21  ;;  %v914_v4 = vld [vmem:[%s1243_s2 + $0x4] sm:$0xf]  ;;  %vm480_vm7 = vcmask 1046528  }
   0xe   : > { %500 = vmatpush.bf16.msra.mxu1 %v491_v2  ;;  %536 = vmatpush.bf16.msra.mxu2 %v527_v3  ;;  %s960_s30 = smul.u32 12, %s1253_s21  ;;  %v922_v5 = vld [vmem:[%s1243_s2 + $0xc] sm:$0xf]  ;;  %v456_v9 = vsel %vm454_vm0, %v914_v4, 0  ;;  %v931_v15 = vld [vmem:[%s1243_s2 + $0x18] sm:$0xf] }
   0xf   : > { %s304_s9 = scalar_lea.vmem %s1241_s0, %s959_s29  ;;  %v575_v10 = vsel %vm454_vm0, %v922_v5, 0  ;;  %465 = vmatpush.bf16.msra.mxu0 %v456_v9  ;;  %v696_v18 = vsel %vm454_vm0, %v931_v15, 0  ;;  %v925_v36 = vld [vmem:[%s1243_s2 + $0x10] sm:$0xf]  ;;  %v928_v38 = vld [vmem:[%s1243_s2 + $0x14] sm:$0xf] }
  0x10   : > { %v946_v6 = vld [vmem:[%s304_s9] sm:$0xff]   ;;  %v957_v7 = vld [vmem:[%s304_s9 + $0x8] sm:$0xff]   ;;  %v958_v8 = vld [vmem:[%s304_s9 + $0x10] sm:$0xff]   ;;  %s1118_s16 = scalar_lea.vmem %s1242_s1, %s960_s30  ;;  %584 = vmatpush.bf16.msra.mxu3 %v575_v10  ;;  %v614_v37 = vsel %vm454_vm0, %v925_v36, 0  ;;  %v662_v42 = vsel %vm454_vm0, %v928_v38, 0  ;;  %vm447_vm8 = vcmask 64512   ;;  %s323_s12 = scalar_lea.vmem %s1247_s6, %s960_s30 }
  0x11   : > { %v947_v11 = vunpack.c.l.bf16 %v946_v6  ;;  %v1120_v12 = vunpack.c.h.bf16 %v946_v6  ;;  %v1122_v13 = vunpack.c.l.bf16 %v957_v7  ;;  %v1124_v14 = vunpack.c.h.bf16 %v957_v7  ;;  %v338_v19 = vld [vmem:[%s304_s9 + $0x18] sm:$0xf]  ;;  %v942_v20 = vld [vmem:[%s1118_s16] sm:$0xff]  }
  0x12   : > { %v1129_v16 = vunpack.c.l.bf16 %v958_v8  ;;  %v1131_v17 = vunpack.c.h.bf16 %v958_v8  ;;  %705 = vmatpush.bf16.msrb.mxu2 %v696_v18  ;;  %v1140_v30 = vunpack.c.l.bf16 %v338_v19  ;;  %v1142_v33 = vunpack.c.l.bf16 %v942_v20  ;;  %671 = vmatpush.bf16.msrb.mxu1 %v662_v42 }
  0x13   : > { %v356_v21 = vmin.f32 %v947_v11, 0.0  ;;  %v357_v22 = vmin.f32 %v1120_v12, 0.0  ;;  %v358_v23 = vmin.f32 %v1122_v13, 0.0  ;;  %v359_v24 = vmin.f32 %v1124_v14, 0.0  ;;  %623 = vmatpush.bf16.msrb.mxu0 %v614_v37 }
  0x14   : > { %v360_v25 = vmin.f32 %v1129_v16, 0.0  ;;  %v361_v26 = vmin.f32 %v1131_v17, 0.0  ;;  %v362_v35 = vmin.f32 %v1140_v30, 0.0  ;;  %v1152_v39 = vunpack.c.h.bf16 %v942_v20 }
  0x15   : > { %v366_v27 = vmul.f32 1.442695, %v356_v21  ;;  %v368_v28 = vmul.f32 1.442695, %v357_v22  ;;  %v370_v29 = vmul.f32 1.442695, %v358_v23 }
  0x16   : > { %v372_v31 = vmul.f32 1.442695, %v359_v24  ;;  %v374_v32 = vmul.f32 1.442695, %v360_v25  ;;  %v376_v34 = vmul.f32 1.442695, %v361_v26 }
  0x17   : > { %987 = vpow2.f32 %v366_v27  ;;  %v363_v40 = vmin.f32 %v1142_v33, 0.0  ;;  %v378_v41 = vmul.f32 1.442695, %v362_v35  ;;  %v364_v43 = vmin.f32 %v1152_v39, 0.0 }
  0x18   : > { %989 = vpow2.f32 %v368_v28  ;;  %vm346_vm1 = vcmp.gt.f32.partialorder %v947_v11, 0.0  ;;  %vm347_vm2 = vcmp.gt.f32.partialorder %v1120_v12, 0.0  ;;  %vm348_vm3 = vcmp.gt.f32.partialorder %v1122_v13, 0.0 }
  0x19   : > { %991 = vpow2.f32 %v370_v29  ;;  %v380_v44 = vmul.f32 1.442695, %v363_v40  ;;  %v382_v46 = vmul.f32 1.442695, %v364_v43  ;;  %vm349_vm4 = vcmp.gt.f32.partialorder %v1124_v14, 0.0 }
  0x1a   : > { %993 = vpow2.f32 %v372_v31  ;;  %vm350_vm5 = vcmp.gt.f32.partialorder %v1129_v16, 0.0  ;;  %vm351_vm6 = vcmp.gt.f32.partialorder %v1131_v17, 0.0  ;;  %vm352_vm9 = vcmp.gt.f32.partialorder %v1140_v30, 0.0 }
  0x1b   : > { %995 = vpow2.f32 %v374_v32  ;;  %vm516_vm10 = vcmask 1045504   ;;  %vm429_vm11 = vsmask.f32 6400  ;;  %vm353_vm12 = vcmp.gt.f32.partialorder %v1142_v33, 0.0 }
  0x1c   : > { %997 = vpow2.f32 %v376_v34  ;;  %vm354_vm13 = vcmp.gt.f32.partialorder %v1152_v39, 0.0  ;;  %vm555_vm14 = vsmask.f32 5376  ;;  %vm642_vm15 = vsmask.f32 4352 }
  0x1d   : > { %v988_v45 = vpop.eup %987  ;;  %999 = vpow2.f32 %v378_v41 }
  0x1e   : > { %v990_v47 = vpop.eup %989  ;;  %v904_v48 = vadd.f32 -1.0, %v988_v45  ;;  %1001 = vpow2.f32 %v380_v44 }
  0x1f   : > { %v992_v49 = vpop.eup %991  ;;  %v905_v50 = vadd.f32 -1.0, %v990_v47  ;;  %1003 = vpow2.f32 %v382_v46 }
  0x20   : > { %v994_v51 = vpop.eup %993  ;;  %v906_v52 = vadd.f32 -1.0, %v992_v49  ;;  %v396_v53 = vsel %vm346_vm1, %v947_v11, %v904_v48  ;;  %vm603_vm1 = vcmask 1044480  }
  0x21   : > { %v996_v54 = vpop.eup %995  ;;  %v907_v55 = vadd.f32 -1.0, %v994_v51  ;;  %v397_v56 = vsel %vm347_vm2, %v1120_v12, %v905_v50  ;;  %v406_v57 = vpack.c.bf16 %v396_v53, %v396_v53 }
  0x22   : > { %v998_v58 = vpop.eup %997  ;;  %v398_v59 = vsel %vm348_vm3, %v1122_v13, %v906_v52  ;;  %v407_v60 = vpack.c.bf16 %v397_v56, %v397_v56  ;;  %v908_v61 = vadd.f32 -1.0, %v996_v54 }
  0x23   : > { %v1000_v62 = vpop.eup %999  ;;  %v399_v63 = vsel %vm349_vm4, %v1124_v14, %v907_v55  ;;  %v408_v0 = vpack.c.bf16 %v398_v59, %v398_v59  ;;  %v477_v1 = vunpack.c.l.b16 %v406_v57  ;;  %v909_v2 = vadd.f32 -1.0, %v998_v58  ;;  %v328_v59 = vld [vmem:[%s1118_s16 + $0x8] sm:$0xf] }
  0x24   : > { %v409_v3 = vpack.c.bf16 %v399_v63, %v399_v63  ;;  %v423_v4 = vunpack.c.l.b16 %v407_v60  ;;  %v400_v5 = vsel %vm350_vm5, %v1129_v16, %v908_v61  ;;  %v910_v6 = vadd.f32 -1.0, %v1000_v62  ;;  %v1002_v7 = vpop.eup %1001 }
  0x25   : > { %v424_v8 = vunpack.c.l.b16 %v408_v0  ;;  %v401_v9 = vsel %vm351_vm6, %v1131_v17, %v909_v2  ;;  %v410_v10 = vpack.c.bf16 %v400_v5, %v400_v5  ;;  %v1004_v15 = vpop.eup %1003  ;;  %v911_v17 = vadd.f32 -1.0, %v1002_v7 }
  0x26   : > { %v425_v11 = vunpack.c.l.b16 %v409_v3  ;;  %v478_v12 = vpack.c.b16 %v423_v4, %v477_v1  ;;  %v411_v13 = vpack.c.bf16 %v401_v9, %v401_v9  ;;  %v402_v14 = vsel %vm352_vm9, %v1140_v30, %v910_v6 }
  0x27   : > { %v426_v18 = vunpack.c.l.b16 %v410_v10  ;;  %v427_v16 = vpack.c.b16 %v424_v8, %v423_v4  ;;  %v412_v19 = vpack.c.bf16 %v402_v14, %v402_v14  ;;  %v912_v31 = vadd.f32 -1.0, %v1004_v15 }
  0x28   : > { %v479_v20 = vpack.c.b16 %v425_v11, %v424_v8  ;;  %v481_v21 = vrot.slane %v478_v12, 1  ;;  %v514_v22 = vunpack.c.l.b16 %v411_v13  ;;  %v403_v49 = vsel %vm353_vm12, %v1142_v33, %v911_v17 }
  0x29   : > { %v428_v23 = vpack.c.b16 %v426_v18, %v425_v11  ;;  %v431_v24 = vshrl.u32 %v427_v16, 16  ;;  %v434_v25 = vshll.u32 %v427_v16, 16  ;;  %v553_v26 = vunpack.c.l.b16 %v412_v19 }
  0x2a   : > { %v482_v27 = vrot.slane %v479_v20, 1  ;;  %v1180_v28 = vpack.c.b16 %v514_v22, %v426_v18  ;;  %v517_v29 = vrot.slane %v479_v20, 2  ;;  %v404_v50 = vsel %vm354_vm13, %v1152_v39, %v912_v31 }
  0x2b   : > { %v433_v30 = vrot.slane %v431_v24, 1  ;;  %v436_v32 = vrot.slane %v434_v25, 2  ;;  %v439_v34 = vshrl.u32 %v428_v23, 16  ;;  %v442_v35 = vshll.u32 %v428_v23, 16  ;;  %v746_v23 = vld [vmem:[%s1245_s4] sm:$0xf] }
  0x2c   : > { %v483_v36 = vsel %vm480_vm7, %v481_v21, %v482_v27  ;;  %v518_v37 = vrot.slane %v1180_v28, 2  ;;  %v554_v38 = vpack.c.b16 %v553_v26, %v514_v22  ;;  %v413_v56 = vpack.c.bf16 %v403_v49, %v403_v49 }
  0x2d   : > { %917 = vmatmul.msk.bf16.vlgmr.msra.gmra.mxu1 %vm447_vm8, %v483_v36  ;;  %v437_v40 = vor.u32 %v436_v32, %v433_v30  ;;  %v441_v41 = vrot.slane %v439_v34, 1  ;;  %v444_v42 = vrot.slane %v442_v35, 2  ;;  %v556_v43 = vrot.slane %v439_v34, 2 }
  0x2e   : > { %v519_v44 = vsel %vm516_vm10, %v517_v29, %v518_v37  ;;  %v557_v45 = vrot.slane %v442_v35, 3  ;;  %v560_v46 = vshrl.u32 %v554_v38, 16  ;;  %v563_v47 = vshll.u32 %v554_v38, 16 }
  0x2f   : > { %920 = vmatmul.msk.bf16.vlgmr.msra.gmra.mxu2 %vm447_vm8, %v519_v44  ;;  %v445_v48 = vor.u32 %v444_v42, %v441_v41  ;;  %v414_v57 = vpack.c.bf16 %v404_v50, %v404_v50  ;;  %v601_v60 = vunpack.c.l.b16 %v413_v56  ;;  %v1196_v62 = vunpack.c.l.bf16 %v328_v59  ;;  %v985_v50 = vld [vmem:[%s1244_s3] ss:$0 sm:$0xff] }
  0x30   : > { %v558_v51 = vor.u32 %v557_v45, %v556_v43  ;;  %v562_v52 = vrot.slane %v560_v46, 2  ;;  %v565_v53 = vrot.slane %v563_v47, 3  ;;  %v643_v4 = vrot.slane %v560_v46, 3 }
  0x31   : > { %v446_v54 = vsel %vm429_vm11, %v437_v40, %v445_v48  ;;  %v640_v61 = vunpack.c.l.b16 %v414_v57  ;;  %v365_v0 = vmin.f32 %v1196_v62, 0.0  ;;  %v644_v5 = vrot.slane %v563_v47, 4 }
  0x32   : > { %915 = vmatmul.msk.bf16.vlgmr.msra.gmra.mxu0 %vm447_vm8, %v446_v54  ;;  %v566_v55 = vor.u32 %v565_v53, %v562_v52  ;;  %v602_v10 = vpack.c.b16 %v601_v60, %v553_v26  ;;  %v604_v13 = vrot.slane %v1180_v28, 3  ;;  %vm355_vm2 = vcmp.gt.f32.partialorder %v1196_v62, 0.0 }
  0x33   : > { %v641_v63 = vpack.c.b16 %v640_v61, %v601_v60  ;;  %v384_v3 = vmul.f32 1.442695, %v365_v0  ;;  %v645_v8 = vor.u32 %v644_v5, %v643_v4  ;;  %v758_v24 = vsel %vm454_vm0, %v746_v23, 0 }
  0x34   : > { %v567_v58 = vsel %vm555_vm14, %v558_v51, %v566_v55  ;;  %v605_v14 = vrot.slane %v602_v10, 3  ;;  %767 = vmatpush.bf16.msrb.mxu3 %v758_v24  ;;  %vm784_vm5 = vcmask 60416  }
  0x35   : > { %923 = vmatmul.msk.bf16.vlgmr.msra.gmra.mxu3 %vm447_vm8, %v567_v58  ;;  %v647_v1 = vshrl.u32 %v641_v63, 16  ;;  %v650_v2 = vshll.u32 %v641_v63, 16  ;;  %1005 = vpow2.f32 %v384_v3 }
  0x36   : > { %v606_v18 = vsel %vm603_vm1, %v604_v13, %v605_v14 }
  0x37   : > { %v649_v6 = vrot.slane %v647_v1, 3  ;;  %v652_v7 = vrot.slane %v650_v2, 4 }
  0x39   : > { %v653_v9 = vor.u32 %v652_v7, %v649_v6 }
  0x3b   : > { %v1006_v11 = vpop.eup %1005  ;;  %v654_v12 = vsel %vm642_vm15, %v645_v8, %v653_v9 }
  0x3c   : > { %v913_v15 = vadd.f32 -1.0, %v1006_v11 }
  0x3d   : > { %918 = vmatmul.msk.bf16.gmra.mxu1 %vm447_vm8, %v482_v27 }
  0x3e   : > { %v405_v16 = vsel %vm355_vm2, %v1196_v62, %v913_v15 }
  0x3f   : > { %921 = vmatmul.msk.bf16.gmra.mxu2 %vm447_vm8, %v518_v37  ;;  %v415_v19 = vpack.c.bf16 %v405_v16, %v405_v16 }
  0x41   : > { %v688_v20 = vunpack.c.l.b16 %v415_v19 }
  0x42   : > { %916 = vmatmul.msk.bf16.gmra.mxu0 %vm447_vm8, %v445_v48 }
  0x43   : > { %v689_v21 = vpack.c.b16 %v688_v20, %v688_v20 }
  0x45   : > { %924 = vmatmul.msk.bf16.gmra.mxu3 %vm447_vm8, %v566_v55 }
  0x4d   : > { %929 = vmatmul.msk.bf16.vlgmr.msrb.gmra.mxu1 %vm447_vm8, %v654_v12 }
  0x4f   : > { %932 = vmatmul.msk.bf16.vlgmr.msrb.gmra.mxu2 %vm447_vm8, %v641_v63 }
  0x52   : > { %926 = vmatmul.msk.bf16.vlgmr.msrb.gmra.mxu0 %vm447_vm8, %v606_v18 }
  0x5d   : > { %930 = vmatmul.msk.bf16.gmra.mxu1 %vm447_vm8, %v653_v9 }
  0x5f   : > { %933 = vmatmul.msk.bf16.gmra.mxu2 %vm447_vm8, %v689_v21 }
  0x62   : > { %927 = vmatmul.msk.bf16.gmra.mxu0 %vm447_vm8, %v605_v14 }
  0xaa   : > { %v502_v22 = vpop.f32.mrf.mxu1 }
  0xaf   : > { %v467_v17 = vpop.f32.mrf.mxu0 }
  0xb0   : > { %v503_v37 = vadd.f32 %v502_v22, %v467_v17 }
  0xb2   : > { %v538_v25 = vpop.f32.mrf.mxu2  ;;  %v504_v26 = vpop.f32.mrf.mxu1 }
  0xb3   : > { %v547_v42 = vadd.f32 %v538_v25, %v503_v37 }
  0xb7   : > { %v469_v27 = vpop.f32.mrf.mxu0 }
  0xb8   : > { %v586_v28 = vpop.f32.mrf.mxu3  ;;  %v505_v45 = vadd.f32 %v504_v26, %v469_v27 }
  0xb9   : > { %v595_v43 = vadd.f32 %v586_v28, %v547_v42 }
  0xba   : > { %v540_v29 = vpop.f32.mrf.mxu2  ;;  %v507_v31 = vpop.f32.mrf.mxu1 }
  0xbb   : > { %v548_v52 = vadd.f32 %v540_v29, %v505_v45  ;;  %v986_v29 = vld [vmem:[%s1246_s5] ss:$0 sm:$0xff] }
  0xbf   : > { %v472_v30 = vpop.f32.mrf.mxu0 }
  0xc0   : > { %v588_v32 = vpop.f32.mrf.mxu3  ;;  %v508_v57 = vadd.f32 %v507_v31, %v472_v30 }
  0xc1   : > { %v596_v54 = vadd.f32 %v588_v32, %v548_v52 }
  0xc2   : > { %v543_v34 = vpop.f32.mrf.mxu2  ;;  %v509_v35 = vpop.f32.mrf.mxu1 }
  0xc3   : > { %v549_v0 = vadd.f32 %v543_v34, %v508_v57 }
  0xc7   : > { %v474_v36 = vpop.f32.mrf.mxu0 }
  0xc8   : > { %v591_v38 = vpop.f32.mrf.mxu3 }
  0xc9   : > { %v597_v3 = vadd.f32 %v591_v38, %v549_v0 }
  0xca   : > { %v545_v40 = vpop.f32.mrf.mxu2  ;;  %v673_v41 = vpop.f32.mrf.mxu1 }
  0xcf   : > { %v625_v44 = vpop.f32.mrf.mxu0 }
  0xd0   : > { %v634_v46 = vadd.f32 %v625_v44, %v595_v43  ;;  %v593_v47 = vpop.f32.mrf.mxu3 }
  0xd2   : > { %v682_v48 = vadd.f32 %v673_v41, %v634_v46  ;;  %v707_v49 = vpop.f32.mrf.mxu2  ;;  %v675_v51 = vpop.f32.mrf.mxu1 }
  0xd4   : > { %v716_v53 = vadd.f32 %v707_v49, %v682_v48 }
  0xd6   : > { %v723_v55 = vadd.f32 %v985_v50, %v716_v53 }
  0xd7   : > { %v627_v56 = vpop.f32.mrf.mxu0 }
  0xd8   : > { %v729_v58 = vmin.f32 %v723_v55, 0.0  ;;  %v635_v59 = vadd.f32 %v627_v56, %v596_v54  ;;  %vm726_vm0 = vcmp.gt.f32.partialorder %v723_v55, 0.0 }
  0xda   : > { %v683_v60 = vadd.f32 %v675_v51, %v635_v59  ;;  %v709_v61 = vpop.f32.mrf.mxu2  ;;  %v678_v63 = vpop.f32.mrf.mxu1  ;;  %v732_v1 = vmul.f32 1.442695, %v729_v58 }
  0xdc   : > { %v717_v2 = vadd.f32 %v709_v61, %v683_v60  ;;  %1007 = vpow2.f32 %v732_v1 }
  0xde   : > { %v724_v4 = vadd.f32 %v985_v50, %v717_v2 }
  0xdf   : > { %v630_v5 = vpop.f32.mrf.mxu0 }
  0xe0   : > { %v730_v6 = vmin.f32 %v724_v4, 0.0  ;;  %v636_v7 = vadd.f32 %v630_v5, %v597_v3  ;;  %vm727_vm3 = vcmp.gt.f32.partialorder %v724_v4, 0.0 }
  0xe2   : > { %v734_v8 = vmul.f32 1.442695, %v730_v6  ;;  %v684_v9 = vadd.f32 %v678_v63, %v636_v7  ;;  %v712_v10 = vpop.f32.mrf.mxu2  ;;  %v680_v11 = vpop.f32.mrf.mxu1 }
  0xe3   : > { %v1008_v13 = vpop.eup %1007 }
  0xe4   : > { %1009 = vpow2.f32 %v734_v8  ;;  %v718_v12 = vadd.f32 %v712_v10, %v684_v9  ;;  %v934_v16 = vadd.f32 -1.0, %v1008_v13 }
  0xe6   : > { %v725_v14 = vadd.f32 %v985_v50, %v718_v12  ;;  %v741_v17 = vsel %vm726_vm0, %v723_v55, %v934_v16 }
  0xe7   : > { %v632_v15 = vpop.f32.mrf.mxu0 }
  0xe8   : > { %v731_v18 = vmin.f32 %v725_v14, 0.0  ;;  %vm728_vm4 = vcmp.gt.f32.partialorder %v725_v14, 0.0 }
  0xea   : > { %v1010_v19 = vpop.eup %1009  ;;  %v736_v20 = vmul.f32 1.442695, %v731_v18  ;;  %v714_v21 = vpop.f32.mrf.mxu2 }
  0xeb   : > { %v935_v22 = vadd.f32 -1.0, %v1010_v19 }
  0xec   : > { %1011 = vpow2.f32 %v736_v20 }
  0xed   : > { %v742_v23 = vsel %vm727_vm3, %v724_v4, %v935_v22 }
  0xee   : > { %v744_v24 = vpack.c.bf16 %v742_v23, %v741_v17 }
  0xf0   : > { %937 = vmatmul.msk.bf16.vlgmr.msrb.gmra.mxu3 %vm447_vm8, %v744_v24 }
  0xf2   : > { %v1012_v25 = vpop.eup %1011 }
  0xf3   : > { %v936_v26 = vadd.f32 -1.0, %v1012_v25 }
  0xf5   : > { %v743_v27 = vsel %vm728_vm4, %v725_v14, %v936_v26 }
  0xf6   : > { %v745_v28 = vpack.c.bf16 %v743_v27, %v743_v27 }
 0x100   : > { %938 = vmatmul.msk.bf16.gmra.mxu3 %vm447_vm8, %v745_v28 }
 0x173   : > { %v769_v31 = vpop.f32.mrf.mxu3 }
 0x174   : > { %v770_v30 = vadd.f32 %v986_v29, %v769_v31 }
 0x176   : > { %v778_v32 = vadd.f32 %v1142_v33, %v770_v30 }
 0x178   : > { %v781_v34 = vpack.c.bf16 %v778_v32, %v778_v32 }
 0x17a   : > { %785 = vst.msk [vmem:[%s323_s12] sm:$0xf] %vm784_vm5, %v781_v34 }
 0x17b   : > { %v771_v35 = vpop.f32.mrf.mxu3 }
 0x17c   : > { %v772_v36 = vadd.f32 %v986_v29, %v771_v35 }
 0x17e   : > { %v779_v37 = vadd.f32 %v1152_v39, %v772_v36 }
 0x180   : > { %v782_v38 = vpack.c.bf16 %v779_v37, %v779_v37 }
 0x182   : > { %786 = vst.msk [vmem:[%s323_s12 + $0x4] sm:$0xf] %vm784_vm5, %v782_v38 }
 0x183   : > { %v774_v40 = vpop.f32.mrf.mxu3 }
 0x184   : > { %v775_v41 = vadd.f32 %v986_v29, %v774_v40 }
 0x186   : > { %v780_v42 = vadd.f32 %v775_v41, %v1196_v62 }
 0x188   : > { %v783_v43 = vpack.c.bf16 %v780_v42, %v780_v42 }
 0x18a   : > { %787 = vst.msk [vmem:[%s323_s12 + $0x8] sm:$0xf] %vm784_vm5, %v783_v43 }
 0x18b   : > { %v776_v33 = vpop.f32.mrf.mxu3 }
 0x18c PF: > { %s16_s23 = sadd.s32 1, %s1035_s23   ;;  %s1248_s21 = smov %s1031_s22 }
 0x18d   : > { %p13_p5 = scmp.ge.s32.totalorder %s16_s23, 4   ;;  %s1249_s22 = smov %s1251_s24 }
 0x18f   :  { %15 = sbr.rel (!%p13_p5) target bundleno = 2 (0x2), region = 83 }

// kernel: generator_forward.25
= control target key start
LH: loop header
LB: loop body
LE: loop exit
PB: predicated region body
PF: predicated region fallthrough
CT: control target
= control target key end

     0   :  { %s573_s15 = smov 0   ;;  %s575_s16 = smov 0   ;;  %s628_s0 = inlined_call_operand.vmem [shape: bf16[2,1,8,16], index: 0, kind: input, shape index: {}]   ;;  %s629_s1 = inlined_call_operand.vmem [shape: bf16[2,16,16], index: 1, kind: input, shape index: {}]   ;;  %s630_s2 = inlined_call_operand.vmem [shape: bf16[2,16,16], index: 2, kind: input, shape index: {}]   ;;  %s631_s3 = inlined_call_operand.vmem [shape: f32[1,16], index: 3, kind: input, shape index: {}]   ;;  %s632_s4 = inlined_call_operand.vmem [shape: bf16[2,16,16], index: 4, kind: output, shape index: {}]  }
   0x1   :  { %s577_s17 = smov 0  }
   0x2 LB: > { %s26_s18 = sadd.s32 1, %s542_s16  ;;  %p471_p0 = scmp.ge.s32.totalorder %s546_s17, 1  ;;  %s546_s17 = sphi %s577_s17, %s14_s17   ;;  %s542_s16 = sphi %s575_s16, %s634_s16   ;;  %s538_s15 = sphi %s573_s15, %s633_s15  }
   0x3   : > { %p28_p1 = scmp.ge.s32.totalorder %s26_s18, 2  ;;  %p197_p2 = scmp.lt.s32.totalorder %s546_s17, 3 }
   0x5   : > { %s636_s18 = smov (%p28_p1, %s26_s18), 0  ;;  %p198_p3 = pnand %p471_p0, %p197_p2 }
   0x6   : > { %p238_p4 = scmp.lt.s32.totalorder (!%p198_p3), %s538_s15, 1 }
   0x7   : > { %201 = sbr.rel (%p198_p3) target bundleno = 173 (0xad), region = 36 }
   0xc   : > { %v494_v0 = vld [vmem:[%s630_s2 + $0x8] sm:$0xff]  ;;  %v493_v1 = vld [vmem:[%s630_s2] sm:$0xff]  ;;  %s638_s15 = smov (!%p238_p4, %s538_s15), 1  ;;  %vm291_vm0 = vcmask 130048   ;;  %vm313_vm1 = vsmask.f32 4352 }
   0xd   : > { %302 = vmatpush.bf16.msra.mxu0 %v494_v0  ;;  %347 = vmatpush.bf16.msra.mxu1 %v493_v1  ;;  %s472_s23 = sshll.u32 %s638_s15, 2  ;;  %s491_s24 = sshll.u32 %s638_s15, 3  ;;  %v523_v28 = vld [vmem:[%s631_s3] ss:$0 sm:$0xff]  ;;  %vm362_vm2 = vcmask 125952  }
   0xe   : > { %s244_s27 = scalar_lea.vmem %s628_s0, %s472_s23  ;;  %s253_s30 = scalar_lea.vmem %s629_s1, %s491_s24 }
   0xf   : > { %v496_v2 = vld [vmem:[%s253_s30] sm:$0xff]   ;;  %s263_s9 = scalar_lea.vmem %s632_s4, %s491_s24 }
  0x10   : > { %v270_v3 = vld [vmem:[%s244_s27] sm:$0xf]  ;;  %v497_v4 = vunpack.c.l.bf16 %v496_v2  ;;  %v498_v5 = vunpack.c.h.bf16 %v496_v2 }
  0x11   : > { %v271_v6 = vunpack.c.l.bf16 %v270_v3 }
  0x12   : > { %v273_v8 = vpack.c.bf16 %v497_v4, %v497_v4  ;;  %v274_v9 = vpack.c.bf16 %v498_v5, %v498_v5 }
  0x13   : > { %v272_v7 = vpack.c.bf16 %v271_v6, %v271_v6 }
  0x14   : > { %v282_v10 = vunpack.c.l.b16 %v273_v8  ;;  %v283_v11 = vunpack.c.l.b16 %v274_v9 }
  0x15   : > { %v310_v12 = vunpack.c.l.b16 %v272_v7 }
  0x16   : > { %v284_v13 = vpack.c.b16 %v283_v11, %v282_v10  ;;  %v312_v15 = vpack.c.b16 %v283_v11, %v283_v11 }
  0x17   : > { %v311_v14 = vpack.c.b16 %v282_v10, %v310_v12 }
  0x18   : > { %483 = vmatmul.msk.bf16.vlgmr.msra.gmra.mxu0 %vm291_vm0, %v284_v13  ;;  %v323_v18 = vshrl.u32 %v312_v15, 16  ;;  %v326_v19 = vshll.u32 %v312_v15, 16 }
  0x19   : > { %v315_v16 = vshrl.u32 %v311_v14, 16  ;;  %v318_v17 = vshll.u32 %v311_v14, 16 }
  0x1a   : > { %v325_v22 = vrot.slane %v323_v18, 3  ;;  %v328_v23 = vrot.slane %v326_v19, 4 }
  0x1b   : > { %v317_v20 = vrot.slane %v315_v16, 3  ;;  %v320_v21 = vrot.slane %v318_v17, 4 }
  0x1c   : > { %v329_v25 = vor.u32 %v328_v23, %v325_v22 }
  0x1d   : > { %v321_v24 = vor.u32 %v320_v21, %v317_v20 }
  0x1f   : > { %v330_v26 = vsel %vm313_vm1, %v321_v24, %v329_v25 }
  0x20   : > { %488 = vmatmul.msk.bf16.vlgmr.msra.gmra.mxu1 %vm291_vm0, %v330_v26 }
  0x95   : > { %v304_v27 = vpop.f32.mrf.mxu0 }
  0x9d   : > { %v349_v29 = vpop.f32.mrf.mxu1  ;;  %v306_v33 = vpop.f32.mrf.mxu0 }
  0x9e   : > { %v350_v30 = vadd.f32 %v349_v29, %v304_v27 }
  0xa0   : > { %v358_v31 = vadd.f32 %v523_v28, %v350_v30 }
  0xa2   : > { %v360_v32 = vpack.c.bf16 %v358_v31, %v358_v31 }
  0xa4   : > { %363 = vst.msk [vmem:[%s263_s9] sm:$0xf] %vm362_vm2, %v360_v32 }
  0xa5   : > { %v351_v34 = vpop.f32.mrf.mxu1 }
  0xa6   : > { %v352_v35 = vadd.f32 %v351_v34, %v306_v33 }
  0xa8   : > { %v359_v36 = vadd.f32 %v523_v28, %v352_v35 }
  0xaa   : > { %v361_v37 = vpack.c.bf16 %v359_v36, %v359_v36 }
  0xac   : > { %364 = vst.msk [vmem:[%s263_s9 + $0x4] sm:$0xf] %vm362_vm2, %v361_v37 }
  0xad PF: > { %s14_s17 = sadd.s32 1, %s546_s17   ;;  %s633_s15 = smov %s542_s16 }
  0xae   : > { %p11_p5 = scmp.ge.s32.totalorder %s14_s17, 4   ;;  %s634_s16 = smov %s636_s18 }
  0xb0   :  { %13 = sbr.rel (!%p11_p5) target bundleno = 2 (0x2), region = 70 }

// kernel: generator_forward.26
= control target key start
LH: loop header
LB: loop body
LE: loop exit
PB: predicated region body
PF: predicated region fallthrough
CT: control target
= control target key end

     0   :  { %s929_s21 = smov 0   ;;  %s931_s22 = smov 0   ;;  %s1024_s0 = inlined_call_operand.vmem [shape: bf16[2,1,8,16], index: 0, kind: input, shape index: {}]   ;;  %s1025_s1 = inlined_call_operand.vmem [shape: bf16[2,16,16], index: 1, kind: input, shape index: {}]   ;;  %s1026_s2 = inlined_call_operand.vmem [shape: bf16[7,16,16], index: 2, kind: input, shape index: {}]   ;;  %s1027_s3 = inlined_call_operand.vmem [shape: f32[1,16], index: 3, kind: input, shape index: {}]   ;;  %s1028_s4 = inlined_call_operand.vmem [shape: bf16[16,16], index: 4, kind: input, shape index: {}]   ;;  %s1029_s5 = inlined_call_operand.vmem [shape: f32[1,16], index: 5, kind: input, shape index: {}]   ;;  %s1030_s6 = inlined_call_operand.vmem [shape: bf16[2,16,16], index: 6, kind: output, shape index: {}]  }
   0x1   :  { %s933_s23 = smov 0  }
   0x2 LB: > { %s28_s24 = sadd.s32 1, %s888_s22  ;;  %p755_p0 = scmp.ge.s32.totalorder %s892_s23, 1  ;;  %s892_s23 = sphi %s933_s23, %s16_s23   ;;  %s888_s22 = sphi %s931_s22, %s1032_s22   ;;  %s884_s21 = sphi %s929_s21, %s1031_s21  }
   0x3   : > { %p30_p1 = scmp.ge.s32.totalorder %s28_s24, 2  ;;  %p247_p2 = scmp.lt.s32.totalorder %s892_s23, 3 }
   0x5   : > { %s1034_s24 = smov (%p30_p1, %s28_s24), 0  ;;  %p248_p3 = pnand %p755_p0, %p247_p2 }
   0x6   : > { %p292_p4 = scmp.lt.s32.totalorder (!%p248_p3), %s884_s21, 1 }
   0x7   : > { %251 = sbr.rel (%p248_p3) target bundleno = 369 (0x171), region = 44 }
   0xc   : > { %v822_v0 = vld [vmem:[%s1026_s2] sm:$0xff]  ;;  %v824_v1 = vld [vmem:[%s1026_s2 + $0x10] sm:$0xff]  ;;  %v823_v2 = vld [vmem:[%s1026_s2 + $0x8] sm:$0xff]  ;;  %s1036_s21 = smov (!%p292_p4, %s884_s21), 1  ;;  %vm384_vm3 = vcmask 130048   ;;  %vm402_vm4 = vcmask 1046528  }
   0xd   : > { %v825_v3 = vld [vmem:[%s1026_s2 + $0x18] sm:$0xff]  ;;  %422 = vmatpush.bf16.msra.mxu1 %v822_v0  ;;  %452 = vmatpush.bf16.msra.mxu2 %v824_v1  ;;  %v828_v4 = vld [vmem:[%s1026_s2 + $0x30] sm:$0xff]  ;;  %s756_s11 = sshll.u32 %s1036_s21, 2  ;;  %s820_s12 = sshll.u32 %s1036_s21, 3  ;;  %v826_v10 = vld [vmem:[%s1026_s2 + $0x20] sm:$0xff]  ;;  %vm432_vm5 = vcmask 1045504  }
   0xe   : > { %395 = vmatpush.bf16.msra.mxu0 %v823_v2  ;;  %488 = vmatpush.bf16.msra.mxu3 %v825_v3  ;;  %s298_s15 = scalar_lea.vmem %s1024_s0, %s756_s11  ;;  %s307_s18 = scalar_lea.vmem %s1025_s1, %s820_s12  ;;  %v827_v11 = vld [vmem:[%s1026_s2 + $0x28] sm:$0xff]  ;;  %vm360_vm6 = vsmask.f32 6400  ;;  %vm464_vm7 = vsmask.f32 5376  ;;  %vm500_vm9 = vcmask 1044480  }
   0xf   : > { %v831_v5 = vld [vmem:[%s307_s18] sm:$0xff]   ;;  %vm532_vm8 = vsmask.f32 4352  ;;  %s317_s11 = scalar_lea.vmem %s1030_s6, %s820_s12  ;;  %vm646_vm12 = vcmask 125952  }
  0x10   : > { %v324_v6 = vld [vmem:[%s298_s15] sm:$0xf]  ;;  %v974_v7 = vunpack.c.l.bf16 %v831_v5  ;;  %v976_v8 = vunpack.c.h.bf16 %v831_v5 }
  0x11   : > { %585 = vmatpush.bf16.msrb.mxu2 %v828_v4  ;;  %v325_v9 = vunpack.c.l.bf16 %v324_v6  ;;  %556 = vmatpush.bf16.msrb.mxu1 %v827_v11 }
  0x12   : > { %520 = vmatpush.bf16.msrb.mxu0 %v826_v10  ;;  %v330_v13 = vmin.f32 %v974_v7, 0.0  ;;  %v331_v14 = vmin.f32 %v976_v8, 0.0  ;;  %vm327_vm1 = vcmp.gt.f32.partialorder %v974_v7, 0.0  ;;  %vm328_vm2 = vcmp.gt.f32.partialorder %v976_v8, 0.0 }
  0x13   : > { %v329_v12 = vmin.f32 %v325_v9, 0.0  ;;  %vm326_vm0 = vcmp.gt.f32.partialorder %v325_v9, 0.0 }
  0x14   : > { %v334_v16 = vmul.f32 1.442695, %v330_v13  ;;  %v336_v17 = vmul.f32 1.442695, %v331_v14 }
  0x15   : > { %v332_v15 = vmul.f32 1.442695, %v329_v12 }
  0x17   : > { %860 = vpow2.f32 %v332_v15 }
  0x18   : > { %862 = vpow2.f32 %v334_v16 }
  0x19   : > { %864 = vpow2.f32 %v336_v17  ;;  %v829_v17 = vld [vmem:[%s1028_s4] sm:$0xff] }
  0x1a   : > { %635 = vmatpush.bf16.msrb.mxu3 %v829_v17 }
  0x1d   : > { %v861_v18 = vpop.eup %860 }
  0x1e   : > { %v863_v19 = vpop.eup %862  ;;  %v761_v20 = vadd.f32 -1.0, %v861_v18 }
  0x1f   : > { %v865_v21 = vpop.eup %864  ;;  %v762_v22 = vadd.f32 -1.0, %v863_v19 }
  0x20   : > { %v763_v23 = vadd.f32 -1.0, %v865_v21  ;;  %v341_v24 = vsel %vm326_vm0, %v325_v9, %v761_v20 }
  0x21   : > { %v342_v25 = vsel %vm327_vm1, %v974_v7, %v762_v22  ;;  %v344_v26 = vpack.c.bf16 %v341_v24, %v341_v24 }
  0x22   : > { %v343_v27 = vsel %vm328_vm2, %v976_v8, %v763_v23  ;;  %v345_v28 = vpack.c.bf16 %v342_v25, %v342_v25  ;;  %v858_v25 = vld [vmem:[%s1027_s3] ss:$0 sm:$0xff] }
  0x23   : > { %v346_v29 = vpack.c.bf16 %v343_v27, %v343_v27  ;;  %v355_v30 = vunpack.c.l.b16 %v344_v26 }
  0x24   : > { %v356_v31 = vunpack.c.l.b16 %v345_v28 }
  0x25   : > { %v357_v32 = vunpack.c.l.b16 %v346_v29 }
  0x26   : > { %v358_v33 = vpack.c.b16 %v356_v31, %v355_v30 }
  0x27   : > { %v359_v34 = vpack.c.b16 %v357_v32, %v357_v32  ;;  %v568_v1 = vpack.c.b16 %v357_v32, %v356_v31 }
  0x28   : > { %v403_v35 = vrot.slane %v358_v33, 1  ;;  %v433_v36 = vrot.slane %v358_v33, 2  ;;  %v362_v37 = vshrl.u32 %v358_v33, 16  ;;  %v365_v38 = vshll.u32 %v358_v33, 16 }
  0x29   : > { %v404_v39 = vrot.slane %v359_v34, 1  ;;  %v434_v40 = vrot.slane %v359_v34, 2  ;;  %v370_v41 = vshrl.u32 %v359_v34, 16  ;;  %v373_v42 = vshll.u32 %v359_v34, 16 }
  0x2a   : > { %v364_v43 = vrot.slane %v362_v37, 1  ;;  %v367_v44 = vrot.slane %v365_v38, 2  ;;  %v465_v45 = vrot.slane %v362_v37, 2  ;;  %v466_v46 = vrot.slane %v365_v38, 3 }
  0x2b   : > { %v405_v47 = vsel %vm402_vm4, %v403_v35, %v404_v39  ;;  %v435_v48 = vsel %vm432_vm5, %v433_v36, %v434_v40  ;;  %v372_v49 = vrot.slane %v370_v41, 1  ;;  %v375_v50 = vrot.slane %v373_v42, 2 }
  0x2c   : > { %775 = vmatmul.msk.bf16.vlgmr.msra.gmra.mxu1 %vm384_vm3, %v405_v47  ;;  %782 = vmatmul.msk.bf16.vlgmr.msra.gmra.mxu2 %vm384_vm3, %v435_v48  ;;  %v368_v51 = vor.u32 %v367_v44, %v364_v43  ;;  %v467_v52 = vor.u32 %v466_v46, %v465_v45  ;;  %v468_v53 = vrot.slane %v370_v41, 2  ;;  %v469_v54 = vrot.slane %v373_v42, 3 }
  0x2d   : > { %v376_v55 = vor.u32 %v375_v50, %v372_v49  ;;  %v533_v59 = vrot.slane %v362_v37, 3  ;;  %v534_v60 = vrot.slane %v365_v38, 4  ;;  %v536_v61 = vrot.slane %v370_v41, 3  ;;  %v859_v49 = vld [vmem:[%s1029_s5] ss:$0 sm:$0xff] }
  0x2e   : > { %v470_v56 = vor.u32 %v469_v54, %v468_v53  ;;  %v537_v62 = vrot.slane %v373_v42, 4  ;;  %v501_v3 = vrot.slane %v358_v33, 3  ;;  %v502_v4 = vrot.slane %v359_v34, 3 }
  0x2f   : > { %v377_v57 = vsel %vm360_vm6, %v368_v51, %v376_v55  ;;  %v535_v63 = vor.u32 %v534_v60, %v533_v59 }
  0x30   : > { %770 = vmatmul.msk.bf16.vlgmr.msra.gmra.mxu0 %vm384_vm3, %v377_v57  ;;  %v471_v58 = vsel %vm464_vm7, %v467_v52, %v470_v56  ;;  %v538_v0 = vor.u32 %v537_v62, %v536_v61  ;;  %v503_v5 = vsel %vm500_vm9, %v501_v3, %v502_v4 }
  0x31   : > { %789 = vmatmul.msk.bf16.vlgmr.msra.gmra.mxu3 %vm384_vm3, %v471_v58 }
  0x32   : > { %v539_v2 = vsel %vm532_vm8, %v535_v63, %v538_v0 }
  0x3c   : > { %803 = vmatmul.msk.bf16.vlgmr.msrb.gmra.mxu1 %vm384_vm3, %v539_v2  ;;  %810 = vmatmul.msk.bf16.vlgmr.msrb.gmra.mxu2 %vm384_vm3, %v568_v1 }
  0x40   : > { %796 = vmatmul.msk.bf16.vlgmr.msrb.gmra.mxu0 %vm384_vm3, %v503_v5 }
  0xa9   : > { %v424_v6 = vpop.f32.mrf.mxu1 }
  0xad   : > { %v397_v9 = vpop.f32.mrf.mxu0 }
  0xae   : > { %v425_v13 = vadd.f32 %v424_v6, %v397_v9 }
  0xaf   : > { %v454_v10 = vpop.f32.mrf.mxu2 }
  0xb0   : > { %v459_v16 = vadd.f32 %v454_v10, %v425_v13 }
  0xb1   : > { %v426_v11 = vpop.f32.mrf.mxu1 }
  0xb4   : > { %v490_v14 = vpop.f32.mrf.mxu3 }
  0xb5   : > { %v399_v12 = vpop.f32.mrf.mxu0  ;;  %v495_v18 = vadd.f32 %v490_v14, %v459_v16 }
  0xb6   : > { %v427_v21 = vadd.f32 %v426_v11, %v399_v12 }
  0xb7   : > { %v456_v15 = vpop.f32.mrf.mxu2 }
  0xb8   : > { %v460_v27 = vadd.f32 %v456_v15, %v427_v21 }
  0xb9   : > { %v558_v19 = vpop.f32.mrf.mxu1 }
  0xbc   : > { %v492_v26 = vpop.f32.mrf.mxu3 }
  0xbd   : > { %v522_v20 = vpop.f32.mrf.mxu0  ;;  %v496_v29 = vadd.f32 %v492_v26, %v460_v27 }
  0xbe   : > { %v527_v22 = vadd.f32 %v522_v20, %v495_v18 }
  0xbf   : > { %v587_v23 = vpop.f32.mrf.mxu2 }
  0xc0   : > { %v563_v24 = vadd.f32 %v558_v19, %v527_v22 }
  0xc1   : > { %v560_v34 = vpop.f32.mrf.mxu1 }
  0xc2   : > { %v592_v28 = vadd.f32 %v587_v23, %v563_v24 }
  0xc4   : > { %v598_v30 = vadd.f32 %v858_v25, %v592_v28 }
  0xc5   : > { %v524_v31 = vpop.f32.mrf.mxu0 }
  0xc6   : > { %v602_v32 = vmin.f32 %v598_v30, 0.0  ;;  %v528_v33 = vadd.f32 %v524_v31, %v496_v29  ;;  %vm600_vm10 = vcmp.gt.f32.partialorder %v598_v30, 0.0 }
  0xc7   : > { %v589_v36 = vpop.f32.mrf.mxu2 }
  0xc8   : > { %v564_v35 = vadd.f32 %v560_v34, %v528_v33  ;;  %v604_v37 = vmul.f32 1.442695, %v602_v32 }
  0xca   : > { %v593_v38 = vadd.f32 %v589_v36, %v564_v35  ;;  %866 = vpow2.f32 %v604_v37 }
  0xcc   : > { %v599_v39 = vadd.f32 %v858_v25, %v593_v38 }
  0xce   : > { %v603_v40 = vmin.f32 %v599_v39, 0.0  ;;  %vm601_vm11 = vcmp.gt.f32.partialorder %v599_v39, 0.0 }
  0xd0   : > { %v606_v41 = vmul.f32 1.442695, %v603_v40  ;;  %v867_v42 = vpop.eup %866 }
  0xd1   : > { %v811_v43 = vadd.f32 -1.0, %v867_v42 }
  0xd2   : > { %868 = vpow2.f32 %v606_v41 }
  0xd3   : > { %v610_v46 = vsel %vm600_vm10, %v598_v30, %v811_v43 }
  0xd8   : > { %v869_v44 = vpop.eup %868 }
  0xd9   : > { %v812_v45 = vadd.f32 -1.0, %v869_v44 }
  0xdb   : > { %v611_v47 = vsel %vm601_vm11, %v599_v39, %v812_v45 }
  0xdc   : > { %v612_v48 = vpack.c.bf16 %v611_v47, %v610_v46 }
  0xde   : > { %817 = vmatmul.msk.bf16.vlgmr.msrb.gmra.mxu3 %vm384_vm3, %v612_v48 }
 0x161   : > { %v637_v50 = vpop.f32.mrf.mxu3 }
 0x162   : > { %v638_v51 = vadd.f32 %v859_v49, %v637_v50 }
 0x164   : > { %v642_v52 = vadd.f32 %v974_v7, %v638_v51 }
 0x166   : > { %v644_v53 = vpack.c.bf16 %v642_v52, %v642_v52 }
 0x168   : > { %647 = vst.msk [vmem:[%s317_s11] sm:$0xf] %vm646_vm12, %v644_v53 }
 0x169   : > { %v639_v54 = vpop.f32.mrf.mxu3 }
 0x16a   : > { %v640_v55 = vadd.f32 %v859_v49, %v639_v54 }
 0x16c   : > { %v643_v56 = vadd.f32 %v976_v8, %v640_v55 }
 0x16e   : > { %v645_v57 = vpack.c.bf16 %v643_v56, %v643_v56 }
 0x170   : > { %648 = vst.msk [vmem:[%s317_s11 + $0x4] sm:$0xf] %vm646_vm12, %v645_v57 }
 0x171 PF: > { %s16_s23 = sadd.s32 1, %s892_s23   ;;  %s1031_s21 = smov %s888_s22 }
 0x172   : > { %p13_p5 = scmp.ge.s32.totalorder %s16_s23, 4   ;;  %s1032_s22 = smov %s1034_s24 }
 0x174   :  { %15 = sbr.rel (!%p13_p5) target bundleno = 2 (0x2), region = 83 }

// kernel: generator_forward.29
= control target key start
LH: loop header
LB: loop body
LE: loop exit
PB: predicated region body
PF: predicated region fallthrough
CT: control target
= control target key end

     0   :  { %s573_s15 = smov 0   ;;  %s575_s16 = smov 0   ;;  %s635_s0 = inlined_call_operand.vmem [shape: bf16[2,1,8,48], index: 0, kind: input, shape index: {}]   ;;  %s636_s1 = inlined_call_operand.vmem [shape: bf16[2,8,48], index: 1, kind: input, shape index: {}]   ;;  %s637_s2 = inlined_call_operand.vmem [shape: bf16[2,48,32], index: 2, kind: input, shape index: {}]   ;;  %s638_s3 = inlined_call_operand.vmem [shape: f32[1,32], index: 3, kind: input, shape index: {}]   ;;  %s639_s4 = inlined_call_operand.vmem [shape: bf16[2,8,32], index: 4, kind: output, shape index: {}]  }
   0x1   :  { %s577_s17 = smov 0  }
   0x2 LB: > { %s26_s18 = sadd.s32 1, %s542_s16  ;;  %p455_p0 = scmp.ge.s32.totalorder %s546_s17, 1  ;;  %s546_s17 = sphi %s577_s17, %s14_s17   ;;  %s542_s16 = sphi %s575_s16, %s641_s16   ;;  %s538_s15 = sphi %s573_s15, %s640_s15  }
   0x3   : > { %p28_p1 = scmp.ge.s32.totalorder %s26_s18, 2  ;;  %p194_p2 = scmp.lt.s32.totalorder %s546_s17, 3 }
   0x5   : > { %s643_s18 = smov (%p28_p1, %s26_s18), 0  ;;  %p195_p3 = pnand %p455_p0, %p194_p2 }
   0x6   : > { %p231_p4 = scmp.lt.s32.totalorder (!%p195_p3), %s538_s15, 1 }
   0x7   : > { %198 = sbr.rel (%p195_p3) target bundleno = 165 (0xa5), region = 36 }
   0xc   : > { %v498_v0 = vld [vmem:[%s637_s2 + $0x28] sm:$0xff]  ;;  %v495_v1 = vld [vmem:[%s637_s2 + $0x10] sm:$0xff]  ;;  %v497_v2 = vld [vmem:[%s637_s2 + $0x20] sm:$0xff]  ;;  %s645_s15 = smov (!%p231_p4, %s538_s15), 1  ;;  %vm290_vm0 = vcmask 392192   ;;  %vm360_vm1 = vcmask 257024  }
   0xd   : > { %299 = vmatpush.bf16.msra.mxu0 %v498_v0  ;;  %346 = vmatpush.bf16.msra.mxu1 %v495_v1  ;;  %v494_v3 = vld [vmem:[%s637_s2 + $0x8] sm:$0xff]  ;;  %s603_s27 = sshll.u32 %s645_s15, 2  ;;  %v496_v4 = vld [vmem:[%s637_s2 + $0x18] sm:$0xff]  ;;  %v493_v7 = vld [vmem:[%s637_s2] sm:$0xff] }
   0xe   : > { %s237_s6 = scalar_lea.vmem %s635_s0, %s603_s27  ;;  %s244_s9 = scalar_lea.vmem %s636_s1, %s603_s27  ;;  %v523_v21 = vld [vmem:[%s638_s3] ss:$0 sm:$0xff] }
   0xf   : > { %v253_v5 = vld [vmem:[%s244_s9] sm:$0xf]  ;;  %s251_s19 = scalar_lea.vmem %s639_s4, %s603_s27 }
  0x10   : > { %v255_v6 = vld [vmem:[%s237_s6] sm:$0xf]  ;;  %v254_v8 = vunpack.c.l.bf16 %v253_v5 }
  0x11   : > { %300 = vmatpush.bf16.msra.mxu0 %v497_v2  ;;  %347 = vmatpush.bf16.msra.mxu1 %v494_v3  ;;  %v256_v9 = vunpack.c.l.bf16 %v255_v6 }
  0x12   : > { %v258_v11 = vpack.c.bf16 %v254_v8, %v254_v8 }
  0x13   : > { %v257_v10 = vpack.c.bf16 %v256_v9, %v256_v9 }
  0x14   : > { %v310_v13 = vunpack.c.l.b16 %v258_v11 }
  0x15   : > { %301 = vmatpush.bf16.msra.mxu0 %v496_v4  ;;  %348 = vmatpush.bf16.msra.mxu1 %v493_v7  ;;  %v309_v12 = vunpack.c.l.b16 %v257_v10 }
  0x17   : > { %v311_v14 = vpack.c.b16 %v310_v13, %v309_v12 }
  0x18   : > { %477 = vmatmul.msk.bf16.vlgmr.msra.gmra.mxu0 %vm290_vm0, %v258_v11 }
  0x19   : > { %v313_v15 = vshrl.u32 %v311_v14, 16  ;;  %v316_v16 = vshll.u32 %v311_v14, 16 }
  0x1b   : > { %v315_v17 = vrot.slane %v313_v15, 3  ;;  %v318_v18 = vrot.slane %v316_v16, 4 }
  0x1d   : > { %v319_v19 = vor.u32 %v318_v18, %v315_v17 }
  0x1f   : > { %490 = vmatmul.msk.bf16.vlgmr.msra.gmra.mxu1 %vm290_vm0, %v319_v19 }
  0x95   : > { %v303_v20 = vpop.f32.mrf.mxu0 }
  0x9c   : > { %v350_v22 = vpop.f32.mrf.mxu1 }
  0x9d   : > { %v305_v23 = vpop.f32.mrf.mxu0  ;;  %v351_v24 = vadd.f32 %v350_v22, %v303_v20 }
  0x9f   : > { %v358_v25 = vadd.f32 %v523_v21, %v351_v24 }
  0xa1   : > { %v359_v26 = vpack.c.bf16 %v358_v25, %v358_v25 }
  0xa3   : > { %361 = vst.msk [vmem:[%s251_s19] sm:$0xf] %vm360_vm1, %v359_v26 }
  0xa4   : > { %v352_v27 = vpop.f32.mrf.mxu1 }
  0xa5 PF: > { %s14_s17 = sadd.s32 1, %s546_s17   ;;  %s640_s15 = smov %s542_s16 }
  0xa6   : > { %p11_p5 = scmp.ge.s32.totalorder %s14_s17, 4   ;;  %s641_s16 = smov %s643_s18 }
  0xa8   :  { %13 = sbr.rel (!%p11_p5) target bundleno = 2 (0x2), region = 70 }

// kernel: generator_forward.27
= control target key start
LH: loop header
LB: loop body
LE: loop exit
PB: predicated region body
PF: predicated region fallthrough
CT: control target
= control target key end

     0   :  { %s985_s21 = smov 0   ;;  %s987_s22 = smov 0   ;;  %s1082_s0 = inlined_call_operand.vmem [shape: bf16[2,1,24,16], index: 0, kind: input, shape index: {}]   ;;  %s1083_s1 = inlined_call_operand.vmem [shape: bf16[2,16,16], index: 1, kind: input, shape index: {}]   ;;  %s1084_s2 = inlined_call_operand.vmem [shape: bf16[7,16,16], index: 2, kind: input, shape index: {}]   ;;  %s1085_s3 = inlined_call_operand.vmem [shape: f32[1,16], index: 3, kind: input, shape index: {}]   ;;  %s1086_s4 = inlined_call_operand.vmem [shape: bf16[16,16], index: 4, kind: input, shape index: {}]   ;;  %s1087_s5 = inlined_call_operand.vmem [shape: f32[1,16], index: 5, kind: input, shape index: {}]   ;;  %s1088_s6 = inlined_call_operand.vmem [shape: bf16[2,16,16], index: 6, kind: output, shape index: {}]  }
   0x1   :  { %s989_s23 = smov 0  }
   0x2 LB: > { %s28_s24 = sadd.s32 1, %s944_s22  ;;  %p800_p0 = scmp.ge.s32.totalorder %s948_s23, 1  ;;  %s948_s23 = sphi %s989_s23, %s16_s23   ;;  %s944_s22 = sphi %s987_s22, %s1090_s22   ;;  %s940_s21 = sphi %s985_s21, %s1089_s21  }
   0x3   : > { %p30_p1 = scmp.ge.s32.totalorder %s28_s24, 2  ;;  %p249_p2 = scmp.lt.s32.totalorder %s948_s23, 3 }
   0x5   : > { %s1092_s24 = smov (%p30_p1, %s28_s24), 0  ;;  %p250_p3 = pnand %p800_p0, %p249_p2 }
   0x6   : > { %p296_p4 = scmp.lt.s32.totalorder (!%p250_p3), %s940_s21, 1 }
   0x7   : > { %253 = sbr.rel (%p250_p3) target bundleno = 369 (0x171), region = 44 }
   0xc   : > { %v869_v0 = vld [vmem:[%s1084_s2] sm:$0xff]  ;;  %v871_v1 = vld [vmem:[%s1084_s2 + $0x10] sm:$0xff]  ;;  %s1094_s21 = smov (!%p296_p4, %s940_s21), 1  ;;  %v870_v2 = vld [vmem:[%s1084_s2 + $0x8] sm:$0xff]  ;;  %vm403_vm5 = vcmask 130048   ;;  %vm425_vm6 = vcmask 1044480  }
   0xd   : > { %445 = vmatpush.bf16.msra.mxu1 %v869_v0  ;;  %475 = vmatpush.bf16.msra.mxu2 %v871_v1  ;;  %v872_v3 = vld [vmem:[%s1084_s2 + $0x18] sm:$0xff]  ;;  %v875_v4 = vld [vmem:[%s1084_s2 + $0x30] sm:$0xff]  ;;  %s885_s11 = smul.u32 12, %s1094_s21  ;;  %s867_s12 = sshll.u32 %s1094_s21, 3  ;;  %v873_v13 = vld [vmem:[%s1084_s2 + $0x20] sm:$0xff]  ;;  %vm455_vm7 = vcmask 1045504  }
   0xe   : > { %414 = vmatpush.bf16.msra.mxu0 %v870_v2  ;;  %513 = vmatpush.bf16.msra.mxu3 %v872_v3  ;;  %s313_s15 = scalar_lea.vmem %s1083_s1, %s867_s12  ;;  %v874_v14 = vld [vmem:[%s1084_s2 + $0x28] sm:$0xff]  ;;  %vm384_vm8 = vsmask.f32 7424  ;;  %vm487_vm9 = vsmask.f32 4352  ;;  %vm529_vm11 = vcmask 1046528  }
   0xf   : > { %s304_s18 = scalar_lea.vmem %s1082_s0, %s885_s11  ;;  %v878_v5 = vld [vmem:[%s313_s15] sm:$0xff]   ;;  %vm561_vm10 = vsmask.f32 5376  ;;  %s323_s11 = scalar_lea.vmem %s1088_s6, %s867_s12  ;;  %vm685_vm14 = vcmask 125952  }
  0x10   : > { %v1030_v6 = vunpack.c.l.bf16 %v878_v5  ;;  %v1032_v7 = vunpack.c.h.bf16 %v878_v5  ;;  %v882_v8 = vld [vmem:[%s304_s18] sm:$0xff]   ;;  %v332_v9 = vld [vmem:[%s304_s18 + $0x8] sm:$0xf] }
  0x11   : > { %624 = vmatpush.bf16.msrb.mxu2 %v875_v4  ;;  %v883_v10 = vunpack.c.l.bf16 %v882_v8  ;;  %v884_v11 = vunpack.c.h.bf16 %v882_v8  ;;  %v335_v12 = vunpack.c.l.bf16 %v332_v9  ;;  %595 = vmatpush.bf16.msrb.mxu1 %v874_v14 }
  0x12   : > { %v344_v15 = vmin.f32 %v1030_v6, 0.0  ;;  %v345_v16 = vmin.f32 %v1032_v7, 0.0  ;;  %549 = vmatpush.bf16.msrb.mxu0 %v873_v13  ;;  %vm339_vm0 = vcmp.gt.f32.partialorder %v1030_v6, 0.0  ;;  %vm340_vm4 = vcmp.gt.f32.partialorder %v1032_v7, 0.0 }
  0x13   : > { %v341_v17 = vmin.f32 %v883_v10, 0.0  ;;  %v342_v18 = vmin.f32 %v884_v11, 0.0  ;;  %v343_v19 = vmin.f32 %v335_v12, 0.0  ;;  %vm336_vm1 = vcmp.gt.f32.partialorder %v883_v10, 0.0 }
  0x14   : > { %v352_v20 = vmul.f32 1.442695, %v344_v15  ;;  %v354_v24 = vmul.f32 1.442695, %v345_v16  ;;  %vm337_vm2 = vcmp.gt.f32.partialorder %v884_v11, 0.0  ;;  %vm338_vm3 = vcmp.gt.f32.partialorder %v335_v12, 0.0 }
  0x15   : > { %v346_v21 = vmul.f32 1.442695, %v341_v17  ;;  %v348_v22 = vmul.f32 1.442695, %v342_v18  ;;  %v350_v23 = vmul.f32 1.442695, %v343_v19 }
  0x16   : > { %912 = vpow2.f32 %v352_v20 }
  0x17   : > { %914 = vpow2.f32 %v346_v21 }
  0x18   : > { %916 = vpow2.f32 %v348_v22 }
  0x19   : > { %918 = vpow2.f32 %v350_v23 }
  0x1a   : > { %920 = vpow2.f32 %v354_v24 }
  0x1c   : > { %v913_v25 = vpop.eup %912 }
  0x1d   : > { %v915_v26 = vpop.eup %914  ;;  %v809_v27 = vadd.f32 -1.0, %v913_v25 }
  0x1e   : > { %v917_v28 = vpop.eup %916  ;;  %v806_v29 = vadd.f32 -1.0, %v915_v26 }
  0x1f   : > { %v919_v30 = vpop.eup %918  ;;  %v807_v31 = vadd.f32 -1.0, %v917_v28  ;;  %v364_v32 = vsel %vm339_vm0, %v1030_v6, %v809_v27 }
  0x20   : > { %v921_v33 = vpop.eup %920  ;;  %v808_v34 = vadd.f32 -1.0, %v919_v30  ;;  %v361_v35 = vsel %vm336_vm1, %v883_v10, %v806_v29  ;;  %v369_v36 = vpack.c.bf16 %v364_v32, %v364_v32 }
  0x21   : > { %v362_v37 = vsel %vm337_vm2, %v884_v11, %v807_v31  ;;  %v366_v38 = vpack.c.bf16 %v361_v35, %v361_v35  ;;  %v810_v39 = vadd.f32 -1.0, %v921_v33 }
  0x22   : > { %v363_v40 = vsel %vm338_vm3, %v335_v12, %v808_v34  ;;  %v367_v41 = vpack.c.bf16 %v362_v37, %v362_v37  ;;  %v381_v42 = vunpack.c.l.b16 %v369_v36 }
  0x23   : > { %v368_v43 = vpack.c.bf16 %v363_v40, %v363_v40  ;;  %v422_v44 = vunpack.c.l.b16 %v366_v38  ;;  %v365_v45 = vsel %vm340_vm4, %v1032_v7, %v810_v39  ;;  %v876_v39 = vld [vmem:[%s1086_s4] sm:$0xff] }
  0x24   : > { %v379_v46 = vunpack.c.l.b16 %v367_v41  ;;  %v383_v47 = vpack.c.b16 %v381_v42, %v381_v42  ;;  %v370_v48 = vpack.c.bf16 %v365_v45, %v365_v45  ;;  %674 = vmatpush.bf16.msrb.mxu3 %v876_v39 }
  0x25   : > { %v380_v49 = vunpack.c.l.b16 %v368_v43 }
  0x26   : > { %v423_v50 = vpack.c.b16 %v379_v46, %v422_v44  ;;  %v393_v51 = vshll.u32 %v383_v47, 16  ;;  %v491_v52 = vshrl.u32 %v383_v47, 16  ;;  %v457_v55 = vrot.slane %v383_v47, 2  ;;  %v910_v47 = vld [vmem:[%s1085_s3] ss:$0 sm:$0xff] }
  0x27   : > { %v424_v53 = vpack.c.b16 %v380_v49, %v380_v49  ;;  %v382_v54 = vpack.c.b16 %v380_v49, %v379_v46  ;;  %v526_v56 = vunpack.c.l.b16 %v370_v48  ;;  %v527_v60 = vpack.c.b16 %v381_v42, %v380_v49 }
  0x28   : > { %v426_v57 = vrot.slane %v423_v50, 3  ;;  %v493_v58 = vrot.slane %v491_v52, 3  ;;  %v494_v59 = vrot.slane %v393_v51, 4  ;;  %v395_v1 = vrot.slane %v393_v51, 1 }
  0x29   : > { %v427_v61 = vrot.slane %v424_v53, 3  ;;  %v456_v62 = vrot.slane %v382_v54, 2  ;;  %v386_v63 = vshrl.u32 %v382_v54, 16  ;;  %v388_v0 = vshll.u32 %v382_v54, 16 }
  0x2a   : > { %v528_v2 = vpack.c.b16 %v526_v56, %v526_v56  ;;  %v495_v10 = vor.u32 %v494_v59, %v493_v58  ;;  %v563_v11 = vshrl.u32 %v527_v60, 16  ;;  %v566_v13 = vshll.u32 %v527_v60, 16 }
  0x2b   : > { %v428_v3 = vsel %vm425_vm6, %v426_v57, %v427_v61  ;;  %v458_v4 = vsel %vm455_vm7, %v456_v62, %v457_v55  ;;  %v390_v5 = vrot.slane %v388_v0, 1  ;;  %v488_v8 = vrot.slane %v386_v63, 3 }
  0x2c   : > { %822 = vmatmul.msk.bf16.vlgmr.msra.gmra.mxu1 %vm403_vm5, %v428_v3  ;;  %829 = vmatmul.msk.bf16.vlgmr.msra.gmra.mxu2 %vm403_vm5, %v458_v4  ;;  %v489_v9 = vrot.slane %v388_v0, 4  ;;  %v571_v14 = vshrl.u32 %v528_v2, 16  ;;  %v574_v15 = vshll.u32 %v528_v2, 16  ;;  %v565_v19 = vrot.slane %v563_v11, 2 }
  0x2d   : > { %v391_v12 = vor.u32 %v390_v5, %v386_v63  ;;  %v568_v20 = vrot.slane %v566_v13, 3  ;;  %v607_v25 = vpack.c.b16 %v526_v56, %v381_v42  ;;  %v530_v27 = vrot.slane %v527_v60, 1 }
  0x2e   : > { %v490_v16 = vor.u32 %v489_v9, %v488_v8  ;;  %v573_v21 = vrot.slane %v571_v14, 2  ;;  %v576_v22 = vrot.slane %v574_v15, 3  ;;  %v531_v28 = vrot.slane %v528_v2, 1  ;;  %v911_v9 = vld [vmem:[%s1087_s5] ss:$0 sm:$0xff] }
  0x2f   : > { %v396_v17 = vsel %vm384_vm8, %v391_v12, %v395_v1  ;;  %v569_v23 = vor.u32 %v568_v20, %v565_v19 }
  0x30   : > { %817 = vmatmul.msk.bf16.vlgmr.msra.gmra.mxu0 %vm403_vm5, %v396_v17  ;;  %v496_v18 = vsel %vm487_vm9, %v490_v16, %v495_v10  ;;  %v577_v24 = vor.u32 %v576_v22, %v573_v21  ;;  %v532_v29 = vsel %vm529_vm11, %v530_v27, %v531_v28 }
  0x31   : > { %836 = vmatmul.msk.bf16.vlgmr.msra.gmra.mxu3 %vm403_vm5, %v496_v18 }
  0x32   : > { %v578_v26 = vsel %vm561_vm10, %v569_v23, %v577_v24 }
  0x3c   : > { %850 = vmatmul.msk.bf16.vlgmr.msrb.gmra.mxu1 %vm403_vm5, %v578_v26  ;;  %857 = vmatmul.msk.bf16.vlgmr.msrb.gmra.mxu2 %vm403_vm5, %v607_v25 }
  0x40   : > { %843 = vmatmul.msk.bf16.vlgmr.msrb.gmra.mxu0 %vm403_vm5, %v532_v29 }
  0xa9   : > { %v447_v30 = vpop.f32.mrf.mxu1 }
  0xad   : > { %v416_v31 = vpop.f32.mrf.mxu0 }
  0xae   : > { %v448_v35 = vadd.f32 %v447_v30, %v416_v31 }
  0xaf   : > { %v477_v32 = vpop.f32.mrf.mxu2 }
  0xb0   : > { %v482_v38 = vadd.f32 %v477_v32, %v448_v35 }
  0xb1   : > { %v449_v33 = vpop.f32.mrf.mxu1 }
  0xb4   : > { %v515_v36 = vpop.f32.mrf.mxu3 }
  0xb5   : > { %v418_v34 = vpop.f32.mrf.mxu0  ;;  %v520_v40 = vadd.f32 %v515_v36, %v482_v38 }
  0xb6   : > { %v450_v43 = vadd.f32 %v449_v33, %v418_v34 }
  0xb7   : > { %v479_v37 = vpop.f32.mrf.mxu2 }
  0xb8   : > { %v483_v49 = vadd.f32 %v479_v37, %v450_v43 }
  0xb9   : > { %v597_v41 = vpop.f32.mrf.mxu1 }
  0xbc   : > { %v517_v48 = vpop.f32.mrf.mxu3 }
  0xbd   : > { %v551_v42 = vpop.f32.mrf.mxu0  ;;  %v521_v51 = vadd.f32 %v517_v48, %v483_v49 }
  0xbe   : > { %v556_v44 = vadd.f32 %v551_v42, %v520_v40 }
  0xbf   : > { %v626_v45 = vpop.f32.mrf.mxu2 }
  0xc0   : > { %v602_v46 = vadd.f32 %v597_v41, %v556_v44 }
  0xc1   : > { %v599_v56 = vpop.f32.mrf.mxu1 }
  0xc2   : > { %v631_v50 = vadd.f32 %v626_v45, %v602_v46 }
  0xc4   : > { %v637_v52 = vadd.f32 %v910_v47, %v631_v50 }
  0xc5   : > { %v553_v53 = vpop.f32.mrf.mxu0 }
  0xc6   : > { %v641_v54 = vmin.f32 %v637_v52, 0.0  ;;  %v557_v55 = vadd.f32 %v553_v53, %v521_v51  ;;  %vm639_vm12 = vcmp.gt.f32.partialorder %v637_v52, 0.0 }
  0xc7   : > { %v628_v58 = vpop.f32.mrf.mxu2 }
  0xc8   : > { %v603_v57 = vadd.f32 %v599_v56, %v557_v55  ;;  %v643_v59 = vmul.f32 1.442695, %v641_v54 }
  0xca   : > { %v632_v60 = vadd.f32 %v628_v58, %v603_v57  ;;  %922 = vpow2.f32 %v643_v59 }
  0xcc   : > { %v638_v61 = vadd.f32 %v910_v47, %v632_v60 }
  0xce   : > { %v642_v62 = vmin.f32 %v638_v61, 0.0  ;;  %vm640_vm13 = vcmp.gt.f32.partialorder %v638_v61, 0.0 }
  0xd0   : > { %v645_v63 = vmul.f32 1.442695, %v642_v62  ;;  %v923_v0 = vpop.eup %922 }
  0xd1   : > { %v858_v1 = vadd.f32 -1.0, %v923_v0 }
  0xd2   : > { %924 = vpow2.f32 %v645_v63 }
  0xd3   : > { %v649_v4 = vsel %vm639_vm12, %v637_v52, %v858_v1 }
  0xd8   : > { %v925_v2 = vpop.eup %924 }
  0xd9   : > { %v859_v3 = vadd.f32 -1.0, %v925_v2 }
  0xdb   : > { %v650_v5 = vsel %vm640_vm13, %v638_v61, %v859_v3 }
  0xdc   : > { %v651_v8 = vpack.c.bf16 %v650_v5, %v649_v4 }
  0xde   : > { %864 = vmatmul.msk.bf16.vlgmr.msrb.gmra.mxu3 %vm403_vm5, %v651_v8 }
 0x161   : > { %v676_v10 = vpop.f32.mrf.mxu3 }
 0x162   : > { %v677_v11 = vadd.f32 %v911_v9, %v676_v10 }
 0x164   : > { %v681_v12 = vadd.f32 %v1030_v6, %v677_v11 }
 0x166   : > { %v683_v13 = vpack.c.bf16 %v681_v12, %v681_v12 }
 0x168   : > { %686 = vst.msk [vmem:[%s323_s11] sm:$0xf] %vm685_vm14, %v683_v13 }
 0x169   : > { %v678_v14 = vpop.f32.mrf.mxu3 }
 0x16a   : > { %v679_v15 = vadd.f32 %v911_v9, %v678_v14 }
 0x16c   : > { %v682_v16 = vadd.f32 %v1032_v7, %v679_v15 }
 0x16e   : > { %v684_v17 = vpack.c.bf16 %v682_v16, %v682_v16 }
 0x170   : > { %687 = vst.msk [vmem:[%s323_s11 + $0x4] sm:$0xf] %vm685_vm14, %v684_v17 }
 0x171 PF: > { %s16_s23 = sadd.s32 1, %s948_s23   ;;  %s1089_s21 = smov %s944_s22 }
 0x172   : > { %p13_p5 = scmp.ge.s32.totalorder %s16_s23, 4   ;;  %s1090_s22 = smov %s1092_s24 }
 0x174   :  { %15 = sbr.rel (!%p13_p5) target bundleno = 2 (0x2), region = 83 }

// kernel: generator_forward.28
= control target key start
LH: loop header
LB: loop body
LE: loop exit
PB: predicated region body
PF: predicated region fallthrough
CT: control target
= control target key end

     0   :  { %s1070_s21 = smov 0   ;;  %s1072_s22 = smov 0   ;;  %s1213_s0 = inlined_call_operand.vmem [shape: bf16[2,1,56,16], index: 0, kind: input, shape index: {}]   ;;  %s1214_s1 = inlined_call_operand.vmem [shape: bf16[2,16,16], index: 1, kind: input, shape index: {}]   ;;  %s1215_s2 = inlined_call_operand.vmem [shape: bf16[7,16,16], index: 2, kind: input, shape index: {}]   ;;  %s1216_s3 = inlined_call_operand.vmem [shape: f32[1,16], index: 3, kind: input, shape index: {}]   ;;  %s1217_s4 = inlined_call_operand.vmem [shape: bf16[16,16], index: 4, kind: input, shape index: {}]   ;;  %s1218_s5 = inlined_call_operand.vmem [shape: f32[1,16], index: 5, kind: input, shape index: {}]   ;;  %s1219_s6 = inlined_call_operand.vmem [shape: bf16[2,16,16], index: 6, kind: output, shape index: {}]  }
   0x1   :  { %s1074_s23 = smov 0  }
   0x2 LB: > { %s28_s24 = sadd.s32 1, %s1029_s22  ;;  %p863_p0 = scmp.ge.s32.totalorder %s1033_s23, 1  ;;  %s1033_s23 = sphi %s1074_s23, %s16_s23   ;;  %s1029_s22 = sphi %s1072_s22, %s1221_s22   ;;  %s1025_s21 = sphi %s1070_s21, %s1220_s21  }
   0x3   : > { %p30_p1 = scmp.ge.s32.totalorder %s28_s24, 2  ;;  %p249_p2 = scmp.lt.s32.totalorder %s1033_s23, 3 }
   0x5   : > { %s1223_s24 = smov (%p30_p1, %s28_s24), 0  ;;  %p250_p3 = pnand %p863_p0, %p249_p2 }
   0x6   : > { %p296_p4 = scmp.lt.s32.totalorder (!%p250_p3), %s1025_s21, 1 }
   0x7   : > { %253 = sbr.rel (%p250_p3) target bundleno = 370 (0x172), region = 44 }
   0xc   : > { %v936_v0 = vld [vmem:[%s1215_s2] sm:$0xff]  ;;  %v938_v1 = vld [vmem:[%s1215_s2 + $0x10] sm:$0xff]  ;;  %s1225_s21 = smov (!%p296_p4, %s1025_s21), 1  ;;  %v937_v2 = vld [vmem:[%s1215_s2 + $0x8] sm:$0xff]  ;;  %vm466_vm5 = vcmask 1046528   ;;  %vm444_vm8 = vcmask 130048  }
   0xd   : > { %486 = vmatpush.bf16.msra.mxu1 %v936_v0  ;;  %520 = vmatpush.bf16.msra.mxu2 %v938_v1  ;;  %s962_s29 = smul.u32 28, %s1225_s21  ;;  %s934_s30 = sshll.u32 %s1225_s21, 3  ;;  %v939_v3 = vld [vmem:[%s1215_s2 + $0x18] sm:$0xff]  ;;  %v942_v4 = vld [vmem:[%s1215_s2 + $0x30] sm:$0xff]  ;;  %v940_v25 = vld [vmem:[%s1215_s2 + $0x20] sm:$0xff]  ;;  %vm500_vm10 = vcmask 1045504  }
   0xe   : > { %s313_s15 = scalar_lea.vmem %s1214_s1, %s934_s30  ;;  %455 = vmatpush.bf16.msra.mxu0 %v937_v2  ;;  %570 = vmatpush.bf16.msra.mxu3 %v939_v3  ;;  %v941_v28 = vld [vmem:[%s1215_s2 + $0x28] sm:$0xff]  ;;  %vm420_vm11 = vsmask.f32 6400  ;;  %vm536_vm13 = vsmask.f32 5376  ;;  %vm586_vm15 = vcmask 1044480   ;;  %s323_s12 = scalar_lea.vmem %s1219_s6, %s934_s30 }
   0xf   : > { %s304_s18 = scalar_lea.vmem %s1213_s0, %s962_s29  ;;  %v945_v12 = vld [vmem:[%s313_s15] sm:$0xff]   ;;  %vm622_vm14 = vsmask.f32 4352 }
  0x10   : > { %v949_v5 = vld [vmem:[%s304_s18] sm:$0xff]   ;;  %v960_v6 = vld [vmem:[%s304_s18 + $0x8] sm:$0xff]   ;;  %v961_v7 = vld [vmem:[%s304_s18 + $0x10] sm:$0xff]   ;;  %v1124_v19 = vunpack.c.l.bf16 %v945_v12  ;;  %v1137_v29 = vunpack.c.h.bf16 %v945_v12 }
  0x11   : > { %687 = vmatpush.bf16.msrb.mxu2 %v942_v4  ;;  %v950_v8 = vunpack.c.l.bf16 %v949_v5  ;;  %v951_v9 = vunpack.c.h.bf16 %v949_v5  ;;  %v1115_v10 = vunpack.c.l.bf16 %v960_v6  ;;  %v1117_v11 = vunpack.c.h.bf16 %v960_v6  ;;  %v336_v13 = vld [vmem:[%s304_s18 + $0x18] sm:$0xf]  ;;  %656 = vmatpush.bf16.msrb.mxu1 %v941_v28 }
  0x12   : > { %v1119_v14 = vunpack.c.l.bf16 %v961_v7  ;;  %v1121_v15 = vunpack.c.h.bf16 %v961_v7  ;;  %v1126_v20 = vunpack.c.l.bf16 %v336_v13  ;;  %606 = vmatpush.bf16.msrb.mxu0 %v940_v25  ;;  %v360_v34 = vmin.f32 %v1124_v19, 0.0 }
  0x13   : > { %v353_v16 = vmin.f32 %v950_v8, 0.0  ;;  %v354_v17 = vmin.f32 %v951_v9, 0.0  ;;  %v355_v18 = vmin.f32 %v1115_v10, 0.0  ;;  %v356_v22 = vmin.f32 %v1117_v11, 0.0 }
  0x14   : > { %v357_v23 = vmin.f32 %v1119_v14, 0.0  ;;  %v358_v24 = vmin.f32 %v1121_v15, 0.0  ;;  %v359_v33 = vmin.f32 %v1126_v20, 0.0  ;;  %v361_v36 = vmin.f32 %v1137_v29, 0.0 }
  0x15   : > { %v362_v21 = vmul.f32 1.442695, %v353_v16  ;;  %v364_v26 = vmul.f32 1.442695, %v354_v17  ;;  %v366_v27 = vmul.f32 1.442695, %v355_v18 }
  0x16   : > { %v368_v30 = vmul.f32 1.442695, %v356_v22  ;;  %v370_v31 = vmul.f32 1.442695, %v357_v23  ;;  %v372_v32 = vmul.f32 1.442695, %v358_v24 }
  0x17   : > { %989 = vpow2.f32 %v362_v21  ;;  %v374_v35 = vmul.f32 1.442695, %v359_v33  ;;  %v376_v37 = vmul.f32 1.442695, %v360_v34  ;;  %vm344_vm0 = vcmp.gt.f32.partialorder %v950_v8, 0.0 }
  0x18   : > { %991 = vpow2.f32 %v364_v26  ;;  %vm345_vm1 = vcmp.gt.f32.partialorder %v951_v9, 0.0  ;;  %v378_v41 = vmul.f32 1.442695, %v361_v36  ;;  %vm346_vm2 = vcmp.gt.f32.partialorder %v1115_v10, 0.0 }
  0x19   : > { %993 = vpow2.f32 %v366_v27  ;;  %vm347_vm3 = vcmp.gt.f32.partialorder %v1117_v11, 0.0  ;;  %vm348_vm4 = vcmp.gt.f32.partialorder %v1119_v14, 0.0  ;;  %vm349_vm6 = vcmp.gt.f32.partialorder %v1121_v15, 0.0 }
  0x1a   : > { %995 = vpow2.f32 %v368_v30  ;;  %vm350_vm7 = vcmp.gt.f32.partialorder %v1126_v20, 0.0  ;;  %vm351_vm9 = vcmp.gt.f32.partialorder %v1124_v19, 0.0  ;;  %vm352_vm12 = vcmp.gt.f32.partialorder %v1137_v29, 0.0 }
  0x1b   : > { %997 = vpow2.f32 %v370_v31 }
  0x1c   : > { %999 = vpow2.f32 %v372_v32 }
  0x1d   : > { %v990_v38 = vpop.eup %989  ;;  %1001 = vpow2.f32 %v374_v35 }
  0x1e   : > { %v992_v39 = vpop.eup %991  ;;  %v869_v40 = vadd.f32 -1.0, %v990_v38  ;;  %1003 = vpow2.f32 %v376_v37 }
  0x1f   : > { %v994_v42 = vpop.eup %993  ;;  %v870_v43 = vadd.f32 -1.0, %v992_v39  ;;  %1005 = vpow2.f32 %v378_v41 }
  0x20   : > { %v996_v44 = vpop.eup %995  ;;  %v871_v45 = vadd.f32 -1.0, %v994_v42  ;;  %v389_v46 = vsel %vm344_vm0, %v950_v8, %v869_v40 }
  0x21   : > { %v998_v47 = vpop.eup %997  ;;  %v390_v48 = vsel %vm345_vm1, %v951_v9, %v870_v43  ;;  %v398_v49 = vpack.c.bf16 %v389_v46, %v389_v46  ;;  %v872_v50 = vadd.f32 -1.0, %v996_v44 }
  0x22   : > { %v1000_v51 = vpop.eup %999  ;;  %v391_v52 = vsel %vm346_vm2, %v1115_v10, %v871_v45  ;;  %v399_v53 = vpack.c.bf16 %v390_v48, %v390_v48  ;;  %v873_v54 = vadd.f32 -1.0, %v998_v47  ;;  %vm748_vm2 = vcmask 125952  }
  0x23   : > { %v1002_v55 = vpop.eup %1001  ;;  %v400_v56 = vpack.c.bf16 %v391_v52, %v391_v52  ;;  %v463_v57 = vunpack.c.l.b16 %v398_v49  ;;  %v392_v58 = vsel %vm347_vm3, %v1117_v11, %v872_v50  ;;  %v874_v59 = vadd.f32 -1.0, %v1000_v51 }
  0x24   : > { %v1004_v60 = vpop.eup %1003  ;;  %v415_v61 = vunpack.c.l.b16 %v399_v53  ;;  %v393_v62 = vsel %vm348_vm4, %v1119_v14, %v873_v54  ;;  %v401_v63 = vpack.c.bf16 %v392_v58, %v392_v58  ;;  %v875_v0 = vadd.f32 -1.0, %v1002_v55 }
  0x25   : > { %v416_v1 = vunpack.c.l.b16 %v400_v56  ;;  %v402_v2 = vpack.c.bf16 %v393_v62, %v393_v62  ;;  %v394_v3 = vsel %vm349_vm6, %v1121_v15, %v874_v59  ;;  %v876_v4 = vadd.f32 -1.0, %v1004_v60  ;;  %v1006_v13 = vpop.eup %1005 }
  0x26   : > { %v464_v5 = vpack.c.b16 %v415_v61, %v463_v57  ;;  %v417_v6 = vunpack.c.l.b16 %v401_v63  ;;  %v403_v7 = vpack.c.bf16 %v394_v3, %v394_v3  ;;  %v395_v8 = vsel %vm350_vm7, %v1126_v20, %v875_v0 }
  0x27   : > { %v465_v9 = vpack.c.b16 %v416_v1, %v416_v1  ;;  %v1165_v10 = vunpack.c.l.b16 %v402_v2  ;;  %v418_v11 = vpack.c.b16 %v416_v1, %v415_v61  ;;  %v396_v12 = vsel %vm351_vm9, %v1124_v19, %v876_v4 }
  0x28   : > { %v467_v14 = vrot.slane %v464_v5, 1  ;;  %v498_v15 = vpack.c.b16 %v417_v6, %v416_v1  ;;  %v419_v16 = vpack.c.b16 %v417_v6, %v417_v6  ;;  %v533_v17 = vunpack.c.l.b16 %v403_v7 }
  0x29   : > { %v468_v18 = vrot.slane %v465_v9, 1  ;;  %v499_v21 = vpack.c.b16 %v1165_v10, %v1165_v10  ;;  %v422_v20 = vshrl.u32 %v418_v11, 16  ;;  %v425_v22 = vshll.u32 %v418_v11, 16 }
  0x2a   : > { %v501_v23 = vrot.slane %v498_v15, 2  ;;  %v430_v24 = vshrl.u32 %v419_v16, 16  ;;  %v433_v25 = vshll.u32 %v419_v16, 16  ;;  %v534_v26 = vpack.c.b16 %v1165_v10, %v417_v6 }
  0x2b   : > { %v469_v27 = vsel %vm466_vm5, %v467_v14, %v468_v18  ;;  %v502_v28 = vrot.slane %v499_v21, 2  ;;  %v424_v30 = vrot.slane %v422_v20, 1  ;;  %v427_v31 = vrot.slane %v425_v22, 2 }
  0x2c   : > { %889 = vmatmul.msk.bf16.vlgmr.msra.gmra.mxu1 %vm444_vm8, %v469_v27  ;;  %v432_v32 = vrot.slane %v430_v24, 1  ;;  %v435_v33 = vrot.slane %v433_v25, 2  ;;  %v535_v34 = vpack.c.b16 %v533_v17, %v533_v17  ;;  %v538_v35 = vshrl.u32 %v534_v26, 16 }
  0x2d   : > { %v503_v36 = vsel %vm500_vm10, %v501_v23, %v502_v28  ;;  %v428_v37 = vor.u32 %v427_v31, %v424_v30  ;;  %v541_v38 = vshll.u32 %v534_v26, 16  ;;  %v404_v39 = vpack.c.bf16 %v395_v8, %v395_v8  ;;  %v943_v23 = vld [vmem:[%s1217_s4] sm:$0xff] }
  0x2e   : > { %896 = vmatmul.msk.bf16.vlgmr.msra.gmra.mxu2 %vm444_vm8, %v503_v36  ;;  %v436_v40 = vor.u32 %v435_v33, %v432_v32  ;;  %v540_v41 = vrot.slane %v538_v35, 2  ;;  %v546_v42 = vshrl.u32 %v535_v34, 16  ;;  %v549_v43 = vshll.u32 %v535_v34, 16  ;;  %737 = vmatpush.bf16.msrb.mxu3 %v943_v23  ;;  %v987_v32 = vld [vmem:[%s1216_s3] ss:$0 sm:$0xff] }
  0x2f   : > { %v543_v44 = vrot.slane %v541_v38, 3  ;;  %v405_v45 = vpack.c.bf16 %v396_v12, %v396_v12  ;;  %v583_v46 = vunpack.c.l.b16 %v404_v39  ;;  %v877_v47 = vadd.f32 -1.0, %v1006_v13 }
  0x30   : > { %v437_v48 = vsel %vm420_vm11, %v428_v37, %v436_v40  ;;  %v548_v49 = vrot.slane %v546_v42, 2  ;;  %v551_v50 = vrot.slane %v549_v43, 3  ;;  %v584_v2 = vpack.c.b16 %v533_v17, %v1165_v10 }
  0x31   : > { %884 = vmatmul.msk.bf16.vlgmr.msra.gmra.mxu0 %vm444_vm8, %v437_v48  ;;  %v544_v51 = vor.u32 %v543_v44, %v540_v41  ;;  %v619_v52 = vunpack.c.l.b16 %v405_v45  ;;  %v620_v53 = vpack.c.b16 %v583_v46, %v533_v17  ;;  %v397_v54 = vsel %vm352_vm12, %v1137_v29, %v877_v47 }
  0x32   : > { %v552_v55 = vor.u32 %v551_v50, %v548_v49  ;;  %v406_v56 = vpack.c.bf16 %v397_v54, %v397_v54  ;;  %v585_v3 = vpack.c.b16 %v583_v46, %v583_v46  ;;  %v587_v9 = vrot.slane %v584_v2, 3 }
  0x33   : > { %v621_v57 = vpack.c.b16 %v619_v52, %v619_v52  ;;  %v624_v58 = vshrl.u32 %v620_v53, 16  ;;  %v627_v59 = vshll.u32 %v620_v53, 16 }
  0x34   : > { %v553_v60 = vsel %vm536_vm13, %v544_v51, %v552_v55  ;;  %v669_v1 = vunpack.c.l.b16 %v406_v56  ;;  %v588_v11 = vrot.slane %v585_v3, 3  ;;  %v988_v56 = vld [vmem:[%s1218_s5] ss:$0 sm:$0xff] }
  0x35   : > { %903 = vmatmul.msk.bf16.vlgmr.msra.gmra.mxu3 %vm444_vm8, %v553_v60  ;;  %v626_v61 = vrot.slane %v624_v58, 3  ;;  %v629_v62 = vrot.slane %v627_v59, 4  ;;  %v632_v63 = vshrl.u32 %v621_v57, 16  ;;  %v635_v0 = vshll.u32 %v621_v57, 16 }
  0x36   : > { %v670_v8 = vpack.c.b16 %v669_v1, %v619_v52  ;;  %v589_v13 = vsel %vm586_vm15, %v587_v9, %v588_v11 }
  0x37   : > { %v630_v4 = vor.u32 %v629_v62, %v626_v61  ;;  %v634_v5 = vrot.slane %v632_v63, 3  ;;  %v637_v6 = vrot.slane %v635_v0, 4 }
  0x39   : > { %v638_v7 = vor.u32 %v637_v6, %v634_v5 }
  0x3b   : > { %v639_v12 = vsel %vm622_vm14, %v630_v4, %v638_v7 }
  0x3c   : > { %917 = vmatmul.msk.bf16.vlgmr.msrb.gmra.mxu1 %vm444_vm8, %v639_v12 }
  0x3e   : > { %924 = vmatmul.msk.bf16.vlgmr.msrb.gmra.mxu2 %vm444_vm8, %v670_v8 }
  0x41   : > { %910 = vmatmul.msk.bf16.vlgmr.msrb.gmra.mxu0 %vm444_vm8, %v589_v13 }
  0xa9   : > { %v488_v14 = vpop.f32.mrf.mxu1 }
  0xae   : > { %v457_v10 = vpop.f32.mrf.mxu0 }
  0xaf   : > { %v489_v18 = vadd.f32 %v488_v14, %v457_v10 }
  0xb1   : > { %v522_v15 = vpop.f32.mrf.mxu2  ;;  %v490_v16 = vpop.f32.mrf.mxu1 }
  0xb2   : > { %v527_v22 = vadd.f32 %v522_v15, %v489_v18 }
  0xb6   : > { %v459_v17 = vpop.f32.mrf.mxu0 }
  0xb7   : > { %v491_v27 = vadd.f32 %v490_v16, %v459_v17 }
  0xb8   : > { %v572_v21 = vpop.f32.mrf.mxu3 }
  0xb9   : > { %v524_v20 = vpop.f32.mrf.mxu2  ;;  %v577_v24 = vadd.f32 %v572_v21, %v527_v22  ;;  %v658_v25 = vpop.f32.mrf.mxu1 }
  0xba   : > { %v528_v34 = vadd.f32 %v524_v20, %v491_v27 }
  0xbe   : > { %v608_v26 = vpop.f32.mrf.mxu0 }
  0xbf   : > { %v613_v28 = vadd.f32 %v608_v26, %v577_v24 }
  0xc0   : > { %v574_v33 = vpop.f32.mrf.mxu3 }
  0xc1   : > { %v663_v30 = vadd.f32 %v658_v25, %v613_v28  ;;  %v689_v31 = vpop.f32.mrf.mxu2  ;;  %v578_v36 = vadd.f32 %v574_v33, %v528_v34  ;;  %v660_v41 = vpop.f32.mrf.mxu1 }
  0xc3   : > { %v694_v35 = vadd.f32 %v689_v31, %v663_v30 }
  0xc5   : > { %v700_v37 = vadd.f32 %v987_v32, %v694_v35 }
  0xc6   : > { %v610_v38 = vpop.f32.mrf.mxu0 }
  0xc7   : > { %v704_v39 = vmin.f32 %v700_v37, 0.0  ;;  %v614_v40 = vadd.f32 %v610_v38, %v578_v36  ;;  %vm702_vm0 = vcmp.gt.f32.partialorder %v700_v37, 0.0 }
  0xc9   : > { %v664_v42 = vadd.f32 %v660_v41, %v614_v40  ;;  %v691_v43 = vpop.f32.mrf.mxu2  ;;  %v706_v44 = vmul.f32 1.442695, %v704_v39 }
  0xcb   : > { %v695_v45 = vadd.f32 %v691_v43, %v664_v42  ;;  %1007 = vpow2.f32 %v706_v44 }
  0xcd   : > { %v701_v46 = vadd.f32 %v987_v32, %v695_v45 }
  0xcf   : > { %v705_v47 = vmin.f32 %v701_v46, 0.0  ;;  %vm703_vm1 = vcmp.gt.f32.partialorder %v701_v46, 0.0 }
  0xd1   : > { %v708_v48 = vmul.f32 1.442695, %v705_v47  ;;  %v1008_v49 = vpop.eup %1007 }
  0xd2   : > { %v925_v50 = vadd.f32 -1.0, %v1008_v49 }
  0xd3   : > { %1009 = vpow2.f32 %v708_v48 }
  0xd4   : > { %v712_v53 = vsel %vm702_vm0, %v700_v37, %v925_v50 }
  0xd9   : > { %v1010_v51 = vpop.eup %1009 }
  0xda   : > { %v926_v52 = vadd.f32 -1.0, %v1010_v51 }
  0xdc   : > { %v713_v54 = vsel %vm703_vm1, %v701_v46, %v926_v52 }
  0xdd   : > { %v714_v55 = vpack.c.bf16 %v713_v54, %v712_v53 }
  0xdf   : > { %931 = vmatmul.msk.bf16.vlgmr.msrb.gmra.mxu3 %vm444_vm8, %v714_v55 }
 0x162   : > { %v739_v57 = vpop.f32.mrf.mxu3 }
 0x163   : > { %v740_v58 = vadd.f32 %v988_v56, %v739_v57 }
 0x165   : > { %v744_v59 = vadd.f32 %v1124_v19, %v740_v58 }
 0x167   : > { %v746_v60 = vpack.c.bf16 %v744_v59, %v744_v59 }
 0x169   : > { %749 = vst.msk [vmem:[%s323_s12] sm:$0xf] %vm748_vm2, %v746_v60 }
 0x16a   : > { %v741_v61 = vpop.f32.mrf.mxu3 }
 0x16b   : > { %v742_v62 = vadd.f32 %v988_v56, %v741_v61 }
 0x16d   : > { %v745_v63 = vadd.f32 %v1137_v29, %v742_v62 }
 0x16f   : > { %v747_v0 = vpack.c.bf16 %v745_v63, %v745_v63 }
 0x171   : > { %750 = vst.msk [vmem:[%s323_s12 + $0x4] sm:$0xf] %vm748_vm2, %v747_v0 }
 0x172 PF: > { %s16_s23 = sadd.s32 1, %s1033_s23   ;;  %s1220_s21 = smov %s1029_s22 }
 0x173   : > { %p13_p5 = scmp.ge.s32.totalorder %s16_s23, 4   ;;  %s1221_s22 = smov %s1223_s24 }
 0x175   :  { %15 = sbr.rel (!%p13_p5) target bundleno = 2 (0x2), region = 83 }

// kernel: generator_forward.30
= control target key start
LH: loop header
LB: loop body
LE: loop exit
PB: predicated region body
PF: predicated region fallthrough
CT: control target
= control target key end

     0   :  { %s556_s12 = smov 0   ;;  %s558_s13 = smov 0   ;;  %s614_s0 = inlined_call_operand.vmem [shape: bf16[2,1,8,32], index: 0, kind: input, shape index: {}]   ;;  %s615_s1 = inlined_call_operand.vmem [shape: bf16[2,8,32], index: 1, kind: input, shape index: {}]   ;;  %s616_s2 = inlined_call_operand.vmem [shape: bf16[3,32,16], index: 2, kind: input, shape index: {}]   ;;  %s617_s3 = inlined_call_operand.vmem [shape: f32[2,8,16], index: 3, kind: output, shape index: {}]  }
   0x1   :  { %s560_s14 = smov 0  }
   0x2 LB: > { %s25_s15 = sadd.s32 1, %s530_s13  ;;  %p441_p0 = scmp.ge.s32.totalorder %s534_s14, 1  ;;  %s534_s14 = sphi %s560_s14, %s13_s14   ;;  %s530_s13 = sphi %s558_s13, %s619_s13   ;;  %s526_s12 = sphi %s556_s12, %s618_s12  }
   0x3   : > { %p27_p1 = scmp.ge.s32.totalorder %s25_s15, 2  ;;  %p169_p2 = scmp.lt.s32.totalorder %s534_s14, 3 }
   0x5   : > { %s621_s15 = smov (%p27_p1, %s25_s15), 0  ;;  %p170_p3 = pnand %p441_p0, %p169_p2 }
   0x6   : > { %p204_p4 = scmp.lt.s32.totalorder (!%p170_p3), %s526_s12, 1 }
   0x7   : > { %173 = sbr.rel (%p170_p3) target bundleno = 165 (0xa5), region = 32 }
   0xc   : > { %v487_v0 = vld [vmem:[%s616_s2 + $0x28] sm:$0xff]  ;;  %v485_v2 = vld [vmem:[%s616_s2 + $0x18] sm:$0xff]  ;;  %v486_v3 = vld [vmem:[%s616_s2 + $0x20] sm:$0xff]  ;;  %s623_s12 = smov (!%p204_p4, %s526_s12), 1  ;;  %vm266_vm0 = vcmask 261120   ;;  %vm346_vm1 = vcmask 130048  }
   0xd   : > { %v483_v1 = vld [vmem:[%s616_s2 + $0x8] sm:$0xff]  ;;  %338 = vmatpush.bf16.msra.mxu2 %v487_v0  ;;  %v482_v4 = vld [vmem:[%s616_s2] sm:$0xff]  ;;  %276 = vmatpush.bf16.msra.mxu0 %v485_v2  ;;  %v484_v5 = vld [vmem:[%s616_s2 + $0x10] sm:$0xff]  ;;  %s442_s28 = sshll.u32 %s623_s12, 2  ;;  %s444_s8 = sshll.u32 %s623_s12, 3 }
   0xe   : > { %305 = vmatpush.bf16.msra.mxu1 %v483_v1  ;;  %s210_s4 = scalar_lea.vmem %s614_s0, %s442_s28  ;;  %s217_s7 = scalar_lea.vmem %s615_s1, %s442_s28 }
   0xf   : > { %v226_v6 = vld [vmem:[%s217_s7] sm:$0xf]  ;;  %s224_s11 = scalar_lea.vmem %s617_s3, %s444_s8 }
  0x10   : > { %v228_v7 = vld [vmem:[%s210_s4] sm:$0xf]  ;;  %v227_v8 = vunpack.c.l.bf16 %v226_v6 }
  0x11   : > { %339 = vmatpush.bf16.msra.mxu2 %v486_v3  ;;  %v229_v9 = vunpack.c.l.bf16 %v228_v7  ;;  %277 = vmatpush.bf16.msra.mxu0 %v484_v5 }
  0x12   : > { %306 = vmatpush.bf16.msra.mxu1 %v482_v4  ;;  %v231_v11 = vpack.c.bf16 %v227_v8, %v227_v8 }
  0x13   : > { %v230_v10 = vpack.c.bf16 %v229_v9, %v229_v9 }
  0x14   : > { %v244_v13 = vunpack.c.l.b16 %v231_v11  ;;  %479 = vmatmul.msk.bf16.vlgmr.msra.gmra.mxu2 %vm266_vm0, %v231_v11 }
  0x15   : > { %v243_v12 = vunpack.c.l.b16 %v230_v10 }
  0x17   : > { %v245_v14 = vpack.c.b16 %v244_v13, %v243_v12 }
  0x19   : > { %v283_v15 = vrot.slane %v245_v14, 3  ;;  %v247_v16 = vshrl.u32 %v245_v14, 16  ;;  %v250_v17 = vshll.u32 %v245_v14, 16 }
  0x1b   : > { %466 = vmatmul.msk.bf16.vlgmr.msra.gmra.mxu1 %vm266_vm0, %v283_v15  ;;  %v249_v18 = vrot.slane %v247_v16, 3  ;;  %v252_v19 = vrot.slane %v250_v17, 4 }
  0x1d   : > { %v253_v20 = vor.u32 %v252_v19, %v249_v18 }
  0x1f   : > { %457 = vmatmul.msk.bf16.vlgmr.msra.gmra.mxu0 %vm266_vm0, %v253_v20 }
  0x97   : > { %v341_v22 = vpop.f32.mrf.mxu2 }
  0x98   : > { %v308_v21 = vpop.f32.mrf.mxu1 }
  0x9c   : > { %v279_v23 = vpop.f32.mrf.mxu0 }
  0x9d   : > { %v309_v24 = vadd.f32 %v308_v21, %v279_v23 }
  0x9f   : > { %v345_v25 = vadd.f32 %v341_v22, %v309_v24  ;;  %v343_v27 = vpop.f32.mrf.mxu2 }
  0xa0   : > { %v310_v26 = vpop.f32.mrf.mxu1 }
  0xa1   : > { %347 = vst.msk [vmem:[%s224_s11] sm:$0xff] %vm346_vm1, %v345_v25 }
  0xa4   : > { %v281_v28 = vpop.f32.mrf.mxu0 }
  0xa5 PF: > { %s13_s14 = sadd.s32 1, %s534_s14   ;;  %s618_s12 = smov %s530_s13 }
  0xa6   : > { %p10_p5 = scmp.ge.s32.totalorder %s13_s14, 4   ;;  %s619_s13 = smov %s621_s15 }
  0xa8   :  { %12 = sbr.rel (!%p10_p5) target bundleno = 2 (0x2), region = 67 }

// kernel: tile.13
= control target key start
LH: loop header
LB: loop body
LE: loop exit
PB: predicated region body
PF: predicated region fallthrough
CT: control target
= control target key end

     0   :  { %s22_s0 = inlined_call_operand.vmem [shape: f32[16], index: 0, kind: input, shape index: {}]   ;;  %s23_s1 = inlined_call_operand.vmem [shape: f32[3,16], index: 1, kind: output, shape index: {}]  }
   0x1   :  { %v4_v0 = vld [vmem:[%s22_s0] ss:$0 sm:$0xff] }
   0x2   :  { %5 = vst [vmem:[%s23_s1] sm:$0xf] %v4_v0 }

// kernel: tile.14
= control target key start
LH: loop header
LB: loop body
LE: loop exit
PB: predicated region body
PF: predicated region fallthrough
CT: control target
= control target key end

     0   :  { %s30_s8 = smov 16   ;;  %vm7_vm0 = vcmask 130048   ;;  %vm13_vm1 = vcmask 392448   ;;  %vm19_vm2 = vcmask 261248   ;;  %s47_s0 = inlined_call_operand.vmem [shape: f32[3,16], index: 0, kind: input, shape index: {}]   ;;  %s48_s1 = inlined_call_operand.vmem [shape: f32[1,48], index: 1, kind: output, shape index: {}]  }
   0x1   :  { %v4_v0 = vld [vmem:[%s47_s0] sm:$0xf]  ;;  %s29_s0 = smov 32  }
   0x2   :  { %5 = vst [vmem:[#allocation1] sm:$0xf] %v4_v0 }
   0x9   :  { %v10_v1 = vld [vmem:[#allocation1 + $0x2] sm:$0x1]   ;;  %v16_v2 = vld [vmem:[#allocation1 + $0x1] sm:$0x1]   ;;  %v6_v3 = vld [vmem:[#allocation1] sm:$0x1]  }
   0xa   :  { %11 = vrot.lane.b32.xlu0 %v10_v1, %s29_s0  ;;  %8 = vst.msk [vmem:[#allocation0] sm:$0x1] %vm7_vm0, %v6_v3  }
  0x12   :  { %17 = vrot.lane.b32.xlu0 %v16_v2, %s30_s8 }
  0x7c   :  { %v12_v4 = vpop.permute.xlu0 %11  }
  0x7d   :  { %14 = vst.msk [vmem:[#allocation0] sm:$0x1] %vm13_vm1, %v12_v4  }
  0x84   :  { %v18_v5 = vpop.permute.xlu0 %17  }
  0x85   :  { %20 = vst.msk [vmem:[#allocation0] sm:$0x1] %vm19_vm2, %v18_v5  }
  0x8c   :  { %v23_v6 = vld [vmem:[#allocation0] sm:$0x1] }
  0x8d   :  { %26 = vst [vmem:[%s48_s1] sm:$0x1] %v23_v6 }

// kernel: generator_forward.31
= control target key start
LH: loop header
LB: loop body
LE: loop exit
PB: predicated region body
PF: predicated region fallthrough
CT: control target
= control target key end

     0   :  { %vm30_vm0 = vcmask 523264   ;;  %vm42_vm1 = vcmask 130048   ;;  %v24_v21 = vlaneseq  ;;  %v511_v37 = vmov 0.0   ;;  %s667_s1 = inlined_call_operand.vmem [shape: f32[4,16,64], index: 1, kind: input, shape index: {}]   ;;  %s668_s0 = inlined_call_operand.vmem [shape: f32[8,16], index: 0, kind: input, shape index: {}]   ;;  %s669_s3 = inlined_call_operand.vmem [shape: f32[1,4,64], index: 3, kind: output, shape index: {1}]   ;;  %s670_s2 = inlined_call_operand.vmem [shape: f32[8,16], index: 2, kind: output, shape index: {0}]   ;;  %s671_s4 = inlined_call_operand.vmem [shape: f32[1,4,1], index: 4, kind: output, shape index: {2}]  }
   0x1   :  { %v26_v0 = vld [vmem:[%s667_s1] sm:$0xff]  ;;  %v27_v1 = vld [vmem:[%s667_s1 + $0x8] sm:$0xff]  ;;  %v489_v39 = vld [vmem:[%s667_s1 + $0x10] sm:$0xff]  ;;  %vm459_vm8 = vcmask 1040384   ;;  %vm461_vm12 = vcmask 1041408  }
   0x2   :  { %v546_v2 = vld [vmem:[%s668_s0] sm:$0xff]  ;;  %v28_v3 = vmul.f32 %v26_v0, %v26_v0  ;;  %v29_v4 = vmul.f32 %v27_v1, %v27_v1  ;;  %v41_v5 = vpack.c.bf16 %v27_v1, %v26_v0  ;;  %486 = vmatpush.xpose.msk.msra.mxu1 %vm30_vm0, %v27_v1  ;;  %v556_v22 = vand.u32 127, %v24_v21  ;;  %v490_v40 = vld [vmem:[%s667_s1 + $0x18] sm:$0xff] }
   0x3   :  { %v40_v6 = vpack.c.bf16 %v546_v2, %v546_v2  ;;  %v150_v41 = vpack.c.bf16 %v490_v40, %v489_v39  ;;  %493 = vmatpush.xpose.msk.msra.mxu3 %vm30_vm0, %v490_v40  ;;  %v138_v42 = vmul.f32 %v489_v39, %v489_v39  ;;  %v139_v43 = vmul.f32 %v490_v40, %v490_v40 }
   0x4   :  { %v31_v7 = vsel %vm30_vm0, %v28_v3, 0.0  ;;  %v32_v8 = vsel %vm30_vm0, %v29_v4, 0.0  ;;  %53 = vmatpush.bf16.msra.mxu0 %v41_v5 }
   0x5   :  { %v33_v9 = vadd.f32 %v32_v8, %v31_v7  ;;  %161 = vmatpush.bf16.msra.mxu2 %v150_v41  ;;  %v140_v44 = vsel %vm30_vm0, %v138_v42, 0.0  ;;  %v141_v45 = vsel %vm30_vm0, %v139_v43, 0.0  ;;  %v496_v7 = vld [vmem:[%s667_s1 + $0x20] sm:$0xff]  ;;  %v497_v8 = vld [vmem:[%s667_s1 + $0x28] sm:$0xff] }
   0x6   :  { %487 = vmatpush.xpose.msk.msra.mxu1 %vm30_vm0, %v26_v0  ;;  %v142_v46 = vadd.f32 %v141_v45, %v140_v44 }
   0x7   :  { %484 = vmatmul.msk.bf16.vlgmr.msra.gmra.mxu0 %vm42_vm1, %v40_v6  ;;  %v34_v10 = vrot.slane %v33_v9, 4  ;;  %494 = vmatpush.xpose.msk.msra.mxu3 %vm30_vm0, %v489_v39 }
   0x8   :  { %v143_v50 = vrot.slane %v142_v46, 4 }
   0x9   :  { %v35_v11 = vadd.f32 %v34_v10, %v33_v9  ;;  %v246_v9 = vmul.f32 %v496_v7, %v496_v7  ;;  %v247_v10 = vmul.f32 %v497_v8, %v497_v8 }
   0xa   :  { %v144_v51 = vadd.f32 %v143_v50, %v142_v46 }
   0xb   :  { %v36_v12 = vrot.slane %v35_v11, 2  ;;  %500 = vmatpush.xpose.msk.msrb.mxu3 %vm30_vm0, %v497_v8 }
   0xc   :  { %v145_v52 = vrot.slane %v144_v51, 2 }
   0xd   :  { %v37_v13 = vadd.f32 %v36_v12, %v35_v11  ;;  %v258_v11 = vpack.c.bf16 %v497_v8, %v496_v7  ;;  %v248_v12 = vsel %vm30_vm0, %v246_v9, 0.0 }
   0xe   :  { %v146_v53 = vadd.f32 %v145_v52, %v144_v51 }
   0xf   :  { %v38_v14 = vrot.slane %v37_v13, 1  ;;  %269 = vmatpush.bf16.msrb.mxu1 %v258_v11  ;;  %501 = vmatpush.xpose.msk.msrb.mxu3 %vm30_vm0, %v496_v7 }
  0x10   :  { %v147_v54 = vrot.slane %v146_v53, 1 }
  0x11   :  { %v39_v15 = vadd.f32 %v38_v14, %v37_v13  ;;  %v249_v13 = vsel %vm30_vm0, %v247_v10, 0.0 }
  0x12   :  { %v148_v55 = vadd.f32 %v147_v54, %v146_v53  ;;  %v250_v14 = vadd.f32 %v249_v13, %v248_v12 }
  0x14   :  { %v251_v41 = vrot.slane %v250_v14, 4 }
  0x16   :  { %v252_v42 = vadd.f32 %v251_v41, %v250_v14 }
  0x18   :  { %v253_v43 = vrot.slane %v252_v42, 2 }
  0x1a   :  { %v254_v44 = vadd.f32 %v253_v43, %v252_v42 }
  0x1c   :  { %v255_v45 = vrot.slane %v254_v44, 1 }
  0x1e   :  { %v256_v46 = vadd.f32 %v255_v45, %v254_v44 }
  0x84   :  { %v55_v16 = vpop.f32.mrf.mxu0 }
  0x85   :  { %v59_v17 = vmul.f32 2.0, %v55_v16 }
  0x87   :  { %v60_v18 = vsub.f32 %v39_v15, %v59_v17 }
  0x89   :  { %v61_v19 = vsel %vm30_vm0, %v60_v18, inf }
  0x8a   :  { %62 = vmin.xlane.f32.xlu0 %v61_v19 }
  0x8c   :  { %v57_v20 = vpop.f32.mrf.mxu0 }
  0xfd   :  { %v63_v23 = vpop.xlane.xlu0 %62 }
  0xfe   :  { %vm64_vm2 = vcmp.le.f32.partialorder %v60_v18, %v63_v23 }
  0xff   :  { %v65_v24 = vsel %vm64_vm2, %v556_v22, 64  ;;  %vm463_vm2 = vcmask 1042432  }
 0x100   :  { %v66_v25 = vsel %vm30_vm0, %v65_v24, 2147483647 }
 0x101   :  { %v68_v26 = vshra.s32 %v66_v25, 16  ;;  %v67_v28 = vand.u32 65535, %v66_v25 }
 0x103   :  { %v70_v27 = vcvt.s32.f32 %v68_v26  ;;  %v69_v30 = vcvt.s32.f32 %v67_v28 }
 0x105   :  { %71 = vmin.xlane.f32.xlu0 %v70_v27 }
 0x178   :  { %v72_v29 = vpop.xlane.xlu0 %71 }
 0x179   :  { %vm73_vm3 = vcmp.eq.f32.partialorder %v70_v27, %v72_v29  ;;  %v78_v32 = vcvt.f32.s32 %v72_v29 }
 0x17a   :  { %v74_v31 = vsel %vm73_vm3, %v69_v30, inf  ;;  %vm465_vm3 = vcmask 519168  }
 0x17b   :  { %75 = vmin.xlane.f32.xlu1 %v74_v31  ;;  %v79_v34 = vshll.u32 %v78_v32, 16 }
 0x1ee   :  { %v76_v33 = vpop.xlane.xlu1 %75 }
 0x1ef   :  { %v77_v35 = vcvt.f32.s32 %v76_v33 }
 0x1f1   :  { %v80_v36 = vadd.s32 %v79_v34, %v77_v35 }
 0x1f3   :  { %vm81_vm4 = vcmp.eq.s32.totalorder %v556_v22, %v80_v36 }
 0x1f4   :  { %v485_v38 = vsel %vm81_vm4, 1.0, %v511_v37 }
 0x1f5   :  { %488 = vmatmul.msk.f32.vlgmr.msra.gmra.mxu1 %vm30_vm0, %v485_v38  ;;  %v126_v15 = vsel %vm30_vm0, %v485_v38, 0.0 }
 0x1f6   :  { %v127_v17 = vrot.slane %v126_v15, 4 }
 0x1f8   :  { %v128_v21 = vadd.f32 %v127_v17, %v126_v15 }
 0x1fa   :  { %v129_v24 = vrot.slane %v128_v21, 2 }
 0x1fc   :  { %v130_v28 = vadd.f32 %v129_v24, %v128_v21 }
 0x1fe   :  { %v131_v31 = vrot.slane %v130_v28, 1 }
 0x200   :  { %v132_v34 = vadd.f32 %v131_v31, %v130_v28 }
 0x272   :  { %v573_v47 = vpop.f32.mrf.mxu1 }
 0x273   :  { %v577_v48 = vsub.f32 %v546_v2, %v573_v47 }
 0x275   :  { %v149_v49 = vpack.c.bf16 %v577_v48, %v577_v48 }
 0x277   :  { %491 = vmatmul.msk.bf16.vlgmr.msra.gmra.mxu2 %vm42_vm1, %v149_v49 }
 0x2fa   :  { %v163_v56 = vpop.f32.mrf.mxu2 }
 0x2fb   :  { %v167_v57 = vmul.f32 2.0, %v163_v56 }
 0x2fd   :  { %v168_v58 = vsub.f32 %v148_v55, %v167_v57 }
 0x2ff   :  { %v169_v59 = vsel %vm30_vm0, %v168_v58, inf }
 0x300   :  { %170 = vmin.xlane.f32.xlu1 %v169_v59 }
 0x302   :  { %v165_v60 = vpop.f32.mrf.mxu2 }
 0x373   :  { %v171_v61 = vpop.xlane.xlu1 %170 }
 0x374   :  { %vm172_vm5 = vcmp.le.f32.partialorder %v168_v58, %v171_v61 }
 0x375   :  { %v173_v62 = vsel %vm172_vm5, %v556_v22, 64 }
 0x376   :  { %v174_v63 = vsel %vm30_vm0, %v173_v62, 2147483647 }
 0x377   :  { %v176_v0 = vshra.s32 %v174_v63, 16  ;;  %v175_v3 = vand.u32 65535, %v174_v63  ;;  %v503_v63 = vld [vmem:[%s667_s1 + $0x30] sm:$0xff] }
 0x379   :  { %v178_v1 = vcvt.s32.f32 %v176_v0  ;;  %v177_v5 = vcvt.s32.f32 %v175_v3  ;;  %v504_v0 = vld [vmem:[%s667_s1 + $0x38] sm:$0xff] }
 0x37a   :  { %v355_v3 = vmul.f32 %v504_v0, %v504_v0  ;;  %507 = vmatpush.xpose.msk.msrb.mxu2 %vm30_vm0, %v504_v0 }
 0x37b   :  { %179 = vmin.xlane.f32.xlu2 %v178_v1 }
 0x37e   :  { %508 = vmatpush.xpose.msk.msrb.mxu2 %vm30_vm0, %v503_v63 }
 0x3ee   :  { %v180_v4 = vpop.xlane.xlu2 %179 }
 0x3ef   :  { %vm181_vm6 = vcmp.eq.f32.partialorder %v178_v1, %v180_v4  ;;  %v186_v16 = vcvt.f32.s32 %v180_v4  ;;  %v354_v1 = vmul.f32 %v503_v63, %v503_v63  ;;  %v366_v4 = vpack.c.bf16 %v504_v0, %v503_v63 }
 0x3f0   :  { %v182_v6 = vsel %vm181_vm6, %v177_v5, inf }
 0x3f1   :  { %183 = vmin.xlane.f32.xlu2 %v182_v6  ;;  %v187_v19 = vshll.u32 %v186_v16, 16  ;;  %v356_v5 = vsel %vm30_vm0, %v354_v1, 0.0  ;;  %v357_v6 = vsel %vm30_vm0, %v355_v3, 0.0  ;;  %377 = vmatpush.bf16.msrb.mxu0 %v366_v4 }
 0x3f2   :  { %v358_v7 = vadd.f32 %v357_v6, %v356_v5 }
 0x464   :  { %v184_v18 = vpop.xlane.xlu2 %183 }
 0x465   :  { %v185_v20 = vcvt.f32.s32 %v184_v18 }
 0x467   :  { %v188_v23 = vadd.s32 %v187_v19, %v185_v20 }
 0x469   :  { %vm189_vm7 = vcmp.eq.s32.totalorder %v556_v22, %v188_v23 }
 0x46a   :  { %v492_v25 = vsel %vm189_vm7, 1.0, %v511_v37 }
 0x46b   :  { %495 = vmatmul.msk.f32.vlgmr.msra.gmra.mxu3 %vm30_vm0, %v492_v25  ;;  %v234_v26 = vsel %vm30_vm0, %v492_v25, 0.0 }
 0x46c   :  { %v235_v27 = vrot.slane %v234_v26, 4 }
 0x46e   :  { %v236_v29 = vadd.f32 %v235_v27, %v234_v26  ;;  %v359_v26 = vrot.slane %v358_v7, 4 }
 0x470   :  { %v237_v30 = vrot.slane %v236_v29, 2  ;;  %v360_v27 = vadd.f32 %v359_v26, %v358_v7 }
 0x472   :  { %v238_v32 = vadd.f32 %v237_v30, %v236_v29  ;;  %v361_v28 = vrot.slane %v360_v27, 2 }
 0x474   :  { %v239_v33 = vrot.slane %v238_v32, 1  ;;  %v362_v29 = vadd.f32 %v361_v28, %v360_v27 }
 0x476   :  { %v240_v35 = vadd.f32 %v239_v33, %v238_v32  ;;  %v363_v30 = vrot.slane %v362_v29, 1 }
 0x478   :  { %v460_v36 = vsel %vm459_vm8, %v132_v34, %v240_v35  ;;  %v364_v31 = vadd.f32 %v363_v30, %v362_v29 }
 0x4ee   :  { %v601_v38 = vpop.f32.mrf.mxu3 }
 0x4ef   :  { %v605_v39 = vsub.f32 %v577_v48, %v601_v38 }
 0x4f1   :  { %v257_v40 = vpack.c.bf16 %v605_v39, %v605_v39 }
 0x4f3   :  { %498 = vmatmul.msk.bf16.vlgmr.msrb.gmra.mxu1 %vm42_vm1, %v257_v40 }
 0x570   :  { %v271_v49 = vpop.f32.mrf.mxu1 }
 0x571   :  { %v275_v50 = vmul.f32 2.0, %v271_v49 }
 0x573   :  { %v276_v51 = vsub.f32 %v256_v46, %v275_v50  ;;  %v221_v50 = vsub.f32 %v601_v38, %v577_v48 }
 0x575   :  { %v277_v52 = vsel %vm30_vm0, %v276_v51, inf }
 0x576   :  { %278 = vmin.xlane.f32.xlu0 %v277_v52 }
 0x578   :  { %v273_v53 = vpop.f32.mrf.mxu1 }
 0x5e9   :  { %v279_v54 = vpop.xlane.xlu0 %278 }
 0x5ea   :  { %vm280_vm9 = vcmp.le.f32.partialorder %v276_v51, %v279_v54  ;;  %v222_v51 = vmul.f32 %v221_v50, %v221_v50 }
 0x5eb   :  { %v281_v55 = vsel %vm280_vm9, %v556_v22, 64 }
 0x5ec   :  { %v282_v56 = vsel %vm30_vm0, %v281_v55, 2147483647 }
 0x5ed   :  { %v284_v57 = vshra.s32 %v282_v56, 16  ;;  %v283_v59 = vand.u32 65535, %v282_v56 }
 0x5ef   :  { %v286_v58 = vcvt.s32.f32 %v284_v57  ;;  %v285_v61 = vcvt.s32.f32 %v283_v59 }
 0x5f1   :  { %287 = vmin.xlane.f32.xlu1 %v286_v58 }
 0x664   :  { %v288_v60 = vpop.xlane.xlu1 %287 }
 0x665   :  { %vm289_vm10 = vcmp.eq.f32.partialorder %v286_v58, %v288_v60  ;;  %v294_v8 = vcvt.f32.s32 %v288_v60 }
 0x666   :  { %v290_v62 = vsel %vm289_vm10, %v285_v61, inf }
 0x667   :  { %291 = vmin.xlane.f32.xlu2 %v290_v62  ;;  %v295_v10 = vshll.u32 %v294_v8, 16 }
 0x6da   :  { %v292_v9 = vpop.xlane.xlu2 %291 }
 0x6db   :  { %v293_v11 = vcvt.f32.s32 %v292_v9 }
 0x6dd   :  { %v296_v12 = vadd.s32 %v295_v10, %v293_v11 }
 0x6df   :  { %vm297_vm11 = vcmp.eq.s32.totalorder %v556_v22, %v296_v12 }
 0x6e0   :  { %v499_v13 = vsel %vm297_vm11, 1.0, %v511_v37 }
 0x6e1   :  { %502 = vmatmul.msk.f32.vlgmr.msrb.gmra.mxu3 %vm30_vm0, %v499_v13  ;;  %v342_v14 = vsel %vm30_vm0, %v499_v13, 0.0 }
 0x6e2   :  { %v343_v15 = vrot.slane %v342_v14, 4 }
 0x6e4   :  { %v344_v16 = vadd.f32 %v343_v15, %v342_v14 }
 0x6e6   :  { %v345_v17 = vrot.slane %v344_v16, 2 }
 0x6e8   :  { %v346_v18 = vadd.f32 %v345_v17, %v344_v16 }
 0x6ea   :  { %v347_v19 = vrot.slane %v346_v18, 1 }
 0x6ec   :  { %v348_v20 = vadd.f32 %v347_v19, %v346_v18 }
 0x6ee   :  { %v462_v21 = vsel %vm461_vm12, %v460_v36, %v348_v20  ;;  %v113_v36 = vsub.f32 %v573_v47, %v546_v2  ;;  %v224_v2 = vsel %vm42_vm1, %v222_v51, 0.0 }
 0x6f0   :  { %v114_v41 = vmul.f32 %v113_v36, %v113_v36 }
 0x6f2   :  { %v116_v42 = vsel %vm42_vm1, %v114_v41, 0.0 }
 0x764   :  { %v326_v23 = vpop.f32.mrf.mxu3 }
 0x765   :  { %v629_v24 = vsub.f32 %v605_v39, %v326_v23  ;;  %v329_v55 = vsub.f32 %v326_v23, %v605_v39 }
 0x767   :  { %v365_v25 = vpack.c.bf16 %v629_v24, %v629_v24  ;;  %v330_v57 = vmul.f32 %v329_v55, %v329_v55 }
 0x769   :  { %505 = vmatmul.msk.bf16.vlgmr.msrb.gmra.mxu0 %vm42_vm1, %v365_v25  ;;  %v332_v58 = vsel %vm42_vm1, %v330_v57, 0.0 }
 0x7e6   :  { %v379_v32 = vpop.f32.mrf.mxu0 }
 0x7e7   :  { %v383_v33 = vmul.f32 2.0, %v379_v32 }
 0x7e9   :  { %v384_v34 = vsub.f32 %v364_v31, %v383_v33 }
 0x7eb   :  { %v385_v35 = vsel %vm30_vm0, %v384_v34, inf }
 0x7ec   :  { %386 = vmin.xlane.f32.xlu0 %v385_v35 }
 0x7ee   :  { %v381_v40 = vpop.f32.mrf.mxu0 }
 0x7f4   :  { %117 = vadd.xlane.f32.xlu0 %v116_v42 }
 0x85f   :  { %v387_v43 = vpop.xlane.xlu0 %386 }
 0x860   :  { %vm388_vm13 = vcmp.le.f32.partialorder %v384_v34, %v387_v43 }
 0x861   :  { %v389_v44 = vsel %vm388_vm13, %v556_v22, 64 }
 0x862   :  { %v390_v45 = vsel %vm30_vm0, %v389_v44, 2147483647 }
 0x863   :  { %v392_v46 = vshra.s32 %v390_v45, 16  ;;  %v391_v52 = vand.u32 65535, %v390_v45 }
 0x865   :  { %v394_v49 = vcvt.s32.f32 %v392_v46  ;;  %v393_v54 = vcvt.s32.f32 %v391_v52 }
 0x867   :  { %395 = vmin.xlane.f32.xlu1 %v394_v49  ;;  %v118_v15 = vpop.xlane.xlu0 %117 }
 0x86f   :  { %225 = vadd.xlane.f32.xlu1 %v224_v2 }
 0x8da   :  { %v396_v53 = vpop.xlane.xlu1 %395 }
 0x8db   :  { %vm397_vm14 = vcmp.eq.f32.partialorder %v394_v49, %v396_v53  ;;  %v402_v59 = vcvt.f32.s32 %v396_v53 }
 0x8dc   :  { %v398_v56 = vsel %vm397_vm14, %v393_v54, inf }
 0x8dd   :  { %399 = vmin.xlane.f32.xlu2 %v398_v56  ;;  %v403_v48 = vshll.u32 %v402_v59, 16 }
 0x8e2   :  { %v226_v13 = vpop.xlane.xlu1 %225 }
 0x8e3   :  { %v227_v16 = vrot.slane %v226_v13, 4 }
 0x8e5   :  { %333 = vadd.xlane.f32.xlu2 %v332_v58 }
 0x950   :  { %v400_v60 = vpop.xlane.xlu2 %399 }
 0x951   :  { %v401_v61 = vcvt.f32.s32 %v400_v60 }
 0x953   :  { %v404_v62 = vadd.s32 %v403_v48, %v401_v61 }
 0x955   :  { %vm405_vm15 = vcmp.eq.s32.totalorder %v556_v22, %v404_v62  ;;  %v242_v22 = vadd.f32 %v601_v38, %v573_v47  ;;  %v119_v47 = vrot.slane %v118_v15, 4  ;;  %v228_v38 = vadd.f32 %v227_v16, %v226_v13 }
 0x956   :  { %v506_v63 = vsel %vm405_vm15, 1.0, %v511_v37 }
 0x957   :  { %509 = vmatmul.msk.f32.vlgmr.msrb.gmra.mxu2 %vm30_vm0, %v506_v63  ;;  %v450_v0 = vsel %vm30_vm0, %v506_v63, 0.0  ;;  %v350_v37 = vadd.f32 %v326_v23, %v242_v22  ;;  %v120_v19 = vadd.f32 %v119_v47, %v118_v15  ;;  %v229_v20 = vrot.slane %v228_v38, 2 }
 0x958   :  { %v451_v39 = vrot.slane %v450_v0, 4  ;;  %v334_v14 = vpop.xlane.xlu2 %333  ;;  %vm470_vm0 = vcmask 3072  }
 0x959   :  { %v335_v17 = vrot.slane %v334_v14, 4  ;;  %v121_v23 = vrot.slane %v120_v19, 2 }
 0x95a   :  { %v452_v1 = vadd.f32 %v451_v39, %v450_v0 }
 0x95b   :  { %v336_v18 = vadd.f32 %v335_v17, %v334_v14  ;;  %v122_v27 = vadd.f32 %v121_v23, %v120_v19 }
 0x95c   :  { %v453_v3 = vrot.slane %v452_v1, 2 }
 0x95d   :  { %v123_v32 = vrot.slane %v122_v27, 1 }
 0x95e   :  { %v454_v4 = vadd.f32 %v453_v3, %v452_v1 }
 0x95f   :  { %v124_v40 = vadd.f32 %v123_v32, %v122_v27 }
 0x960   :  { %v455_v5 = vrot.slane %v454_v4, 1 }
 0x962   :  { %v456_v6 = vadd.f32 %v455_v5, %v454_v4 }
 0x964   :  { %v464_v7 = vsel %vm463_vm2, %v462_v21, %v456_v6  ;;  %v337_v21 = vrot.slane %v336_v18, 2 }
 0x965   :  { %466 = vst.msk [vmem:[%s669_s3] sm:$0xf] %vm465_vm3, %v464_v7 }
 0x966   :  { %v338_v25 = vadd.f32 %v337_v21, %v336_v18 }
 0x968   :  { %v339_v31 = vrot.slane %v338_v25, 1 }
 0x96a   :  { %v340_v36 = vadd.f32 %v339_v31, %v338_v25 }
 0x9da   :  { %v434_v8 = vpop.f32.mrf.mxu2 }
 0x9db   :  { %v437_v9 = vsub.f32 %v434_v8, %v629_v24  ;;  %v457_v10 = vadd.f32 %v434_v8, %v350_v37  ;;  %v230_v24 = vadd.f32 %v229_v20, %v228_v38 }
 0x9dd   :  { %v438_v11 = vmul.f32 %v437_v9, %v437_v9  ;;  %458 = vst.msk [vmem:[%s670_s2] sm:$0xff] %vm42_vm1, %v457_v10  ;;  %v231_v29 = vrot.slane %v230_v24, 1 }
 0x9df   :  { %v440_v12 = vsel %vm42_vm1, %v438_v11, 0.0  ;;  %v232_v34 = vadd.f32 %v231_v29, %v230_v24 }
 0x9e0   :  { %441 = vadd.xlane.f32.xlu0 %v440_v12 }
 0x9e1   :  { %v467_v42 = vsel %vm459_vm8, %v124_v40, %v232_v34 }
 0x9e2   :  { %v468_v44 = vsel %vm461_vm12, %v467_v42, %v340_v36 }
 0xa53   :  { %v442_v26 = vpop.xlane.xlu0 %441 }
 0xa54   :  { %v443_v28 = vrot.slane %v442_v26, 4 }
 0xa56   :  { %v444_v30 = vadd.f32 %v443_v28, %v442_v26 }
 0xa58   :  { %v445_v33 = vrot.slane %v444_v30, 2 }
 0xa5a   :  { %v446_v35 = vadd.f32 %v445_v33, %v444_v30 }
 0xa5c   :  { %v447_v41 = vrot.slane %v446_v35, 1 }
 0xa5e   :  { %v448_v43 = vadd.f32 %v447_v41, %v446_v35 }
 0xa60   :  { %v469_v45 = vsel %vm463_vm2, %v468_v44, %v448_v43 }
 0xa61   :  { %471 = vst.msk [vmem:[%s671_s4] sm:$0xf] %vm470_vm0, %v469_v45 }

// kernel: generator_forward.32
= control target key start
LH: loop header
LB: loop body
LE: loop exit
PB: predicated region body
PF: predicated region fallthrough
CT: control target
= control target key end

     0   :  { %s656_s12 = smov 0   ;;  %s658_s13 = smov 0   ;;  %s724_s0 = inlined_call_operand.vmem [shape: f32[2,1,8,16], index: 0, kind: input, shape index: {}]   ;;  %s725_s1 = inlined_call_operand.vmem [shape: f32[2,8,16], index: 1, kind: input, shape index: {}]   ;;  %s726_s2 = inlined_call_operand.vmem [shape: bf16[7,16,32], index: 2, kind: input, shape index: {}]   ;;  %s727_s3 = inlined_call_operand.vmem [shape: bf16[2,8,32], index: 3, kind: output, shape index: {}]  }
   0x1   :  { %s660_s14 = smov 0  }
   0x2 LB: > { %s25_s15 = sadd.s32 1, %s630_s13  ;;  %p528_p0 = scmp.ge.s32.totalorder %s634_s14, 1  ;;  %s634_s14 = sphi %s660_s14, %s13_s14   ;;  %s630_s13 = sphi %s658_s13, %s729_s13   ;;  %s626_s12 = sphi %s656_s12, %s728_s12  }
   0x3   : > { %p27_p1 = scmp.ge.s32.totalorder %s25_s15, 2  ;;  %p169_p2 = scmp.lt.s32.totalorder %s634_s14, 3 }
   0x5   : > { %s731_s15 = smov (%p27_p1, %s25_s15), 0  ;;  %p170_p3 = pnand %p528_p0, %p169_p2 }
   0x6   : > { %p204_p4 = scmp.lt.s32.totalorder (!%p170_p3), %s626_s12, 1 }
   0x7   : > { %173 = sbr.rel (%p170_p3) target bundleno = 181 (0xb5), region = 32 }
   0xc   : > { %v581_v0 = vld [vmem:[%s726_s2] sm:$0xff]  ;;  %v583_v1 = vld [vmem:[%s726_s2 + $0x10] sm:$0xff]  ;;  %v582_v3 = vld [vmem:[%s726_s2 + $0x8] sm:$0xff]  ;;  %s733_s12 = smov (!%p204_p4, %s626_s12), 1  ;;  %vm254_vm0 = vcmask 130048   ;;  %vm433_vm1 = vcmask 257024  }
   0xd   : > { %v587_v2 = vld [vmem:[%s726_s2 + $0x30] sm:$0xff]  ;;  %v584_v4 = vld [vmem:[%s726_s2 + $0x18] sm:$0xff]  ;;  %v585_v5 = vld [vmem:[%s726_s2 + $0x20] sm:$0xff]  ;;  %288 = vmatpush.bf16.msra.mxu1 %v581_v0  ;;  %314 = vmatpush.bf16.msra.mxu2 %v583_v1  ;;  %s529_s30 = sshll.u32 %s733_s12, 3  ;;  %s531_s10 = sshll.u32 %s733_s12, 2 }
   0xe   : > { %v586_v6 = vld [vmem:[%s726_s2 + $0x28] sm:$0xff]  ;;  %265 = vmatpush.bf16.msra.mxu0 %v582_v3  ;;  %343 = vmatpush.bf16.msra.mxu3 %v584_v4  ;;  %s210_s6 = scalar_lea.vmem %s724_s0, %s529_s30  ;;  %s217_s9 = scalar_lea.vmem %s725_s1, %s529_s30 }
   0xf   : > { %v226_v7 = vld [vmem:[%s217_s9] sm:$0xff]  ;;  %s224_s17 = scalar_lea.vmem %s727_s3, %s531_s10 }
  0x10   : > { %v227_v8 = vld [vmem:[%s210_s6] sm:$0xff]  ;;  %v229_v10 = vpack.c.bf16 %v226_v7, %v226_v7 }
  0x11   : > { %425 = vmatpush.bf16.msrb.mxu2 %v587_v2  ;;  %399 = vmatpush.bf16.msrb.mxu1 %v586_v6  ;;  %v228_v9 = vpack.c.bf16 %v227_v8, %v227_v8 }
  0x12   : > { %370 = vmatpush.bf16.msrb.mxu0 %v585_v5  ;;  %v238_v12 = vunpack.c.l.b16 %v229_v10 }
  0x13   : > { %v237_v11 = vunpack.c.l.b16 %v228_v9 }
  0x15   : > { %v239_v13 = vpack.c.b16 %v238_v12, %v237_v11 }
  0x17   : > { %v271_v14 = vrot.slane %v239_v13, 1  ;;  %v297_v15 = vrot.slane %v239_v13, 2  ;;  %v241_v16 = vshrl.u32 %v239_v13, 16  ;;  %v244_v17 = vshll.u32 %v239_v13, 16 }
  0x18   : > { %v353_v27 = vrot.slane %v239_v13, 3 }
  0x19   : > { %543 = vmatmul.msk.bf16.vlgmr.msra.gmra.mxu1 %vm254_vm0, %v271_v14  ;;  %550 = vmatmul.msk.bf16.vlgmr.msra.gmra.mxu2 %vm254_vm0, %v297_v15  ;;  %v243_v18 = vrot.slane %v241_v16, 1  ;;  %v246_v19 = vrot.slane %v244_v17, 2  ;;  %v324_v20 = vrot.slane %v241_v16, 2  ;;  %v325_v21 = vrot.slane %v244_v17, 3 }
  0x1a   : > { %v380_v24 = vrot.slane %v241_v16, 3  ;;  %v381_v25 = vrot.slane %v244_v17, 4 }
  0x1b   : > { %v247_v22 = vor.u32 %v246_v19, %v243_v18  ;;  %v326_v23 = vor.u32 %v325_v21, %v324_v20 }
  0x1c   : > { %v382_v26 = vor.u32 %v381_v25, %v380_v24 }
  0x1d   : > { %538 = vmatmul.msk.bf16.vlgmr.msra.gmra.mxu0 %vm254_vm0, %v247_v22  ;;  %557 = vmatmul.msk.bf16.vlgmr.msra.gmra.mxu3 %vm254_vm0, %v326_v23 }
  0x29   : > { %571 = vmatmul.msk.bf16.vlgmr.msrb.gmra.mxu1 %vm254_vm0, %v382_v26  ;;  %578 = vmatmul.msk.bf16.vlgmr.msrb.gmra.mxu2 %vm254_vm0, %v229_v10 }
  0x2d   : > { %564 = vmatmul.msk.bf16.vlgmr.msrb.gmra.mxu0 %vm254_vm0, %v353_v27 }
  0x96   : > { %v290_v28 = vpop.f32.mrf.mxu1 }
  0x9a   : > { %v267_v29 = vpop.f32.mrf.mxu0 }
  0x9b   : > { %v291_v34 = vadd.f32 %v290_v28, %v267_v29 }
  0x9c   : > { %v316_v30 = vpop.f32.mrf.mxu2 }
  0x9d   : > { %v320_v37 = vadd.f32 %v316_v30, %v291_v34 }
  0x9e   : > { %v292_v31 = vpop.f32.mrf.mxu1 }
  0xa0   : > { %v345_v32 = vpop.f32.mrf.mxu3 }
  0xa1   : > { %v349_v39 = vadd.f32 %v345_v32, %v320_v37 }
  0xa2   : > { %v269_v33 = vpop.f32.mrf.mxu0 }
  0xa4   : > { %v318_v35 = vpop.f32.mrf.mxu2 }
  0xa6   : > { %v401_v36 = vpop.f32.mrf.mxu1 }
  0xa8   : > { %v347_v38 = vpop.f32.mrf.mxu3 }
  0xaa   : > { %v372_v40 = vpop.f32.mrf.mxu0 }
  0xab   : > { %v376_v41 = vadd.f32 %v372_v40, %v349_v39 }
  0xac   : > { %v427_v42 = vpop.f32.mrf.mxu2 }
  0xad   : > { %v405_v43 = vadd.f32 %v401_v36, %v376_v41 }
  0xae   : > { %v403_v44 = vpop.f32.mrf.mxu1 }
  0xaf   : > { %v431_v45 = vadd.f32 %v427_v42, %v405_v43 }
  0xb1   : > { %v432_v46 = vpack.c.bf16 %v431_v45, %v431_v45 }
  0xb2   : > { %v374_v47 = vpop.f32.mrf.mxu0 }
  0xb3   : > { %434 = vst.msk [vmem:[%s224_s17] sm:$0xf] %vm433_vm1, %v432_v46 }
  0xb4   : > { %v429_v48 = vpop.f32.mrf.mxu2 }
  0xb5 PF: > { %s13_s14 = sadd.s32 1, %s634_s14   ;;  %s728_s12 = smov %s630_s13 }
  0xb6   : > { %p10_p5 = scmp.ge.s32.totalorder %s13_s14, 4   ;;  %s729_s13 = smov %s731_s15 }
  0xb8   :  { %12 = sbr.rel (!%p10_p5) target bundleno = 2 (0x2), region = 71 }

// kernel: tile.18
= control target key start
LH: loop header
LB: loop body
LE: loop exit
PB: predicated region body
PF: predicated region fallthrough
CT: control target
= control target key end

     0   :  { %s22_s0 = inlined_call_operand.vmem [shape: f32[8], index: 0, kind: input, shape index: {}]   ;;  %s23_s1 = inlined_call_operand.vmem [shape: f32[2,8], index: 1, kind: output, shape index: {}]  }
   0x1   :  { %v4_v0 = vld [vmem:[%s22_s0] ss:$0 sm:$0xff] }
   0x2   :  { %5 = vst [vmem:[%s23_s1] sm:$0x3] %v4_v0 }

// kernel: tile.19
= control target key start
LH: loop header
LB: loop body
LE: loop exit
PB: predicated region body
PF: predicated region fallthrough
CT: control target
= control target key end

     0   :  { %vm7_vm0 = vcmask 64512   ;;  %vm13_vm1 = vcmask 130112   ;;  %s39_s0 = inlined_call_operand.vmem [shape: f32[2,8], index: 0, kind: input, shape index: {}]   ;;  %s40_s1 = inlined_call_operand.vmem [shape: f32[1,16], index: 1, kind: output, shape index: {}]  }
   0x1   :  { %v4_v0 = vld [vmem:[%s39_s0] sm:$0x3]  ;;  %s22_s0 = smov 8  }
   0x2   :  { %5 = vst [vmem:[#allocation1] sm:$0x3] %v4_v0 }
   0x9   :  { %v10_v1 = vld [vmem:[#allocation1 + $0x1] sm:$0x1]   ;;  %v6_v2 = vld [vmem:[#allocation1] sm:$0x1]  }
   0xa   :  { %11 = vrot.lane.b32.xlu0 %v10_v1, %s22_s0  ;;  %8 = vst.msk [vmem:[#allocation0] sm:$0x1] %vm7_vm0, %v6_v2  }
  0x7c   :  { %v12_v3 = vpop.permute.xlu0 %11  }
  0x7d   :  { %14 = vst.msk [vmem:[#allocation0] sm:$0x1] %vm13_vm1, %v12_v3  }
  0x84   :  { %v17_v4 = vld [vmem:[#allocation0] sm:$0x1] }
  0x85   :  { %20 = vst [vmem:[%s40_s1] sm:$0x1] %v17_v4 }

// kernel: generator_forward.33
= control target key start
LH: loop header
LB: loop body
LE: loop exit
PB: predicated region body
PF: predicated region fallthrough
CT: control target
= control target key end

     0   :  { %s545_s15 = smov 0   ;;  %s547_s16 = smov 0   ;;  %s601_s0 = inlined_call_operand.vmem [shape: bf16[2,1,8,32], index: 0, kind: input, shape index: {}]   ;;  %s602_s1 = inlined_call_operand.vmem [shape: bf16[2,8,32], index: 1, kind: input, shape index: {}]   ;;  %s603_s2 = inlined_call_operand.vmem [shape: bf16[2,32,48], index: 2, kind: input, shape index: {}]   ;;  %s604_s3 = inlined_call_operand.vmem [shape: f32[1,48], index: 3, kind: input, shape index: {}]   ;;  %s605_s4 = inlined_call_operand.vmem [shape: bf16[2,8,48], index: 4, kind: output, shape index: {}]  }
   0x1   :  { %s549_s17 = smov 0  }
   0x2 LB: > { %s26_s18 = sadd.s32 1, %s514_s16  ;;  %p439_p0 = scmp.ge.s32.totalorder %s518_s17, 1  ;;  %s518_s17 = sphi %s549_s17, %s14_s17   ;;  %s514_s16 = sphi %s547_s16, %s607_s16   ;;  %s510_s15 = sphi %s545_s15, %s606_s15  }
   0x3   : > { %p28_p1 = scmp.ge.s32.totalorder %s26_s18, 2  ;;  %p194_p2 = scmp.lt.s32.totalorder %s518_s17, 3 }
   0x5   : > { %s609_s18 = smov (%p28_p1, %s26_s18), 0  ;;  %p195_p3 = pnand %p439_p0, %p194_p2 }
   0x6   : > { %p231_p4 = scmp.lt.s32.totalorder (!%p195_p3), %s510_s15, 1 }
   0x7   : > { %198 = sbr.rel (%p195_p3) target bundleno = 165 (0xa5), region = 36 }
   0xc   : > { %v470_v0 = vld [vmem:[%s603_s2 + $0x18] sm:$0xff]  ;;  %v468_v1 = vld [vmem:[%s603_s2 + $0x8] sm:$0xff]  ;;  %v469_v2 = vld [vmem:[%s603_s2 + $0x10] sm:$0xff]  ;;  %s611_s15 = smov (!%p231_p4, %s510_s15), 1  ;;  %vm280_vm0 = vcmask 261120   ;;  %vm344_vm1 = vcmask 388096  }
   0xd   : > { %290 = vmatpush.bf16.msra.mxu0 %v470_v0  ;;  %331 = vmatpush.bf16.msra.mxu1 %v468_v1  ;;  %v467_v3 = vld [vmem:[%s603_s2] sm:$0xff]  ;;  %s575_s27 = sshll.u32 %s611_s15, 2 }
   0xe   : > { %s237_s30 = scalar_lea.vmem %s601_s0, %s575_s27  ;;  %s244_s7 = scalar_lea.vmem %s602_s1, %s575_s27  ;;  %v495_v20 = vld [vmem:[%s604_s3] ss:$0 sm:$0xff] }
   0xf   : > { %v253_v4 = vld [vmem:[%s244_s7] sm:$0xf]  ;;  %s251_s12 = scalar_lea.vmem %s605_s4, %s575_s27 }
  0x10   : > { %v255_v5 = vld [vmem:[%s237_s30] sm:$0xf]  ;;  %v254_v6 = vunpack.c.l.bf16 %v253_v4 }
  0x11   : > { %291 = vmatpush.bf16.msra.mxu0 %v469_v2  ;;  %332 = vmatpush.bf16.msra.mxu1 %v467_v3  ;;  %v256_v7 = vunpack.c.l.bf16 %v255_v5 }
  0x12   : > { %v258_v9 = vpack.c.bf16 %v254_v6, %v254_v6 }
  0x13   : > { %v257_v8 = vpack.c.bf16 %v256_v7, %v256_v7 }
  0x14   : > { %455 = vmatmul.msk.bf16.vlgmr.msra.gmra.mxu0 %vm280_vm0, %v258_v9  ;;  %v300_v11 = vunpack.c.l.b16 %v258_v9 }
  0x15   : > { %v299_v10 = vunpack.c.l.b16 %v257_v8 }
  0x17   : > { %v301_v12 = vpack.c.b16 %v300_v11, %v299_v10 }
  0x19   : > { %v303_v13 = vshrl.u32 %v301_v12, 16  ;;  %v306_v14 = vshll.u32 %v301_v12, 16 }
  0x1b   : > { %v305_v15 = vrot.slane %v303_v13, 3  ;;  %v308_v16 = vrot.slane %v306_v14, 4 }
  0x1d   : > { %v309_v17 = vor.u32 %v308_v16, %v305_v15 }
  0x1f   : > { %464 = vmatmul.msk.bf16.vlgmr.msra.gmra.mxu1 %vm280_vm0, %v309_v17 }
  0x91   : > { %v293_v18 = vpop.f32.mrf.mxu0 }
  0x99   : > { %v295_v19 = vpop.f32.mrf.mxu0 }
  0x9c   : > { %v334_v21 = vpop.f32.mrf.mxu1 }
  0x9d   : > { %v335_v22 = vadd.f32 %v334_v21, %v293_v18 }
  0x9f   : > { %v342_v23 = vadd.f32 %v495_v20, %v335_v22 }
  0xa1   : > { %v343_v24 = vpack.c.bf16 %v342_v23, %v342_v23 }
  0xa3   : > { %345 = vst.msk [vmem:[%s251_s12] sm:$0xf] %vm344_vm1, %v343_v24 }
  0xa4   : > { %v336_v25 = vpop.f32.mrf.mxu1 }
  0xa5 PF: > { %s14_s17 = sadd.s32 1, %s518_s17   ;;  %s606_s15 = smov %s514_s16 }
  0xa6   : > { %p11_p5 = scmp.ge.s32.totalorder %s14_s17, 4   ;;  %s607_s16 = smov %s609_s18 }
  0xa8   :  { %13 = sbr.rel (!%p11_p5) target bundleno = 2 (0x2), region = 70 }

// kernel: generator_forward.41
= control target key start
LH: loop header
LB: loop body
LE: loop exit
PB: predicated region body
PF: predicated region fallthrough
CT: control target
= control target key end

     0   :  { %s2574_s12 = smov 0   ;;  %s2576_s13 = smov 0   ;;  %s3058_s0 = inlined_call_operand.vmem [shape: bf16[2,1,8,1024], index: 0, kind: input, shape index: {}]   ;;  %s3059_s1 = inlined_call_operand.vmem [shape: bf16[2,8,1024], index: 1, kind: input, shape index: {}]   ;;  %s3060_s2 = inlined_call_operand.vmem [shape: bf16[2,1024,128], index: 2, kind: input, shape index: {}]   ;;  %s3061_s3 = inlined_call_operand.vmem [shape: f32[2,8,128], index: 3, kind: output, shape index: {}]  }
   0x1   :  { %s2578_s14 = smov 0  }
   0x2 LB: > { %s25_s15 = sadd.s32 1, %s2548_s13  ;;  %p1728_p0 = scmp.ge.s32.totalorder %s2552_s14, 1  ;;  %s2552_s14 = sphi %s2578_s14, %s13_s14   ;;  %s2548_s13 = sphi %s2576_s13, %s3063_s13   ;;  %s2544_s12 = sphi %s2574_s12, %s3062_s12  }
   0x3   : > { %p27_p1 = scmp.ge.s32.totalorder %s25_s15, 2  ;;  %p173_p2 = scmp.lt.s32.totalorder %s2552_s14, 3 }
   0x5   : > { %s3065_s15 = smov (%p27_p1, %s25_s15), 0  ;;  %p174_p3 = pnand %p1728_p0, %p173_p2 }
   0x6   : > { %p212_p4 = scmp.lt.s32.totalorder (!%p174_p3), %s2544_s12, 1 }
   0x7   : > { %177 = sbr.rel (%p174_p3) target bundleno = 283 (0x11b), region = 32 }
   0xc   : > { %v2449_v0 = vld [vmem:[%s3060_s2 + $0x238] sm:$0xff]  ;;  %v2448_v4 = vld [vmem:[%s3060_s2 + $0x230] sm:$0xff]  ;;  %v2447_v8 = vld [vmem:[%s3060_s2 + $0x228] sm:$0xff]  ;;  %s3067_s12 = smov (!%p212_p4, %s2544_s12), 1 }
   0xd   : > { %v2457_v1 = vld [vmem:[%s3060_s2 + $0x278] sm:$0xff]  ;;  %938 = vmatpush.bf16.msra.mxu0 %v2449_v0  ;;  %v2456_v5 = vld [vmem:[%s3060_s2 + $0x270] sm:$0xff]  ;;  %v2455_v9 = vld [vmem:[%s3060_s2 + $0x268] sm:$0xff]  ;;  %s2376_s6 = sshll.u32 %s3067_s12, 5  ;;  %s1733_s9 = sshll.u32 %s3067_s12, 3 }
   0xe   : > { %v2465_v2 = vld [vmem:[%s3060_s2 + $0x2b8] sm:$0xff]  ;;  %951 = vmatpush.bf16.msra.mxu1 %v2457_v1  ;;  %v2464_v6 = vld [vmem:[%s3060_s2 + $0x2b0] sm:$0xff]  ;;  %v2463_v10 = vld [vmem:[%s3060_s2 + $0x2a8] sm:$0xff]  ;;  %s2676_s21 = scalar_lea.vmem %s3059_s1, %s2376_s6  ;;  %s2869_s16 = scalar_lea.vmem %s3058_s0, %s2376_s6 }
   0xf   : > { %v2473_v3 = vld [vmem:[%s3060_s2 + $0x2f8] sm:$0xff]  ;;  %964 = vmatpush.bf16.msra.mxu2 %v2465_v2  ;;  %v2472_v7 = vld [vmem:[%s3060_s2 + $0x2f0] sm:$0xff]  ;;  %v2471_v11 = vld [vmem:[%s3060_s2 + $0x2e8] sm:$0xff]  ;;  %s236_s11 = scalar_lea.vmem %s3061_s3, %s1733_s9 }
  0x10   : > { %977 = vmatpush.bf16.msra.mxu3 %v2473_v3  ;;  %v2446_v12 = vld [vmem:[%s3060_s2 + $0x220] sm:$0xff]  ;;  %v2445_v16 = vld [vmem:[%s3060_s2 + $0x218] sm:$0xff]  ;;  %v2444_v20 = vld [vmem:[%s3060_s2 + $0x210] sm:$0xff] }
  0x11   : > { %939 = vmatpush.bf16.msra.mxu0 %v2448_v4  ;;  %v2454_v13 = vld [vmem:[%s3060_s2 + $0x260] sm:$0xff]  ;;  %v2453_v17 = vld [vmem:[%s3060_s2 + $0x258] sm:$0xff]  ;;  %v2452_v21 = vld [vmem:[%s3060_s2 + $0x250] sm:$0xff] }
  0x12   : > { %952 = vmatpush.bf16.msra.mxu1 %v2456_v5  ;;  %v2462_v14 = vld [vmem:[%s3060_s2 + $0x2a0] sm:$0xff]  ;;  %v2461_v18 = vld [vmem:[%s3060_s2 + $0x298] sm:$0xff]  ;;  %v2460_v22 = vld [vmem:[%s3060_s2 + $0x290] sm:$0xff] }
  0x13   : > { %965 = vmatpush.bf16.msra.mxu2 %v2464_v6  ;;  %v2470_v15 = vld [vmem:[%s3060_s2 + $0x2e0] sm:$0xff]  ;;  %v2469_v19 = vld [vmem:[%s3060_s2 + $0x2d8] sm:$0xff]  ;;  %v2468_v23 = vld [vmem:[%s3060_s2 + $0x2d0] sm:$0xff] }
  0x14   : > { %978 = vmatpush.bf16.msra.mxu3 %v2472_v7  ;;  %v2443_v24 = vld [vmem:[%s3060_s2 + $0x208] sm:$0xff]  ;;  %v237_v29 = vld [vmem:[%s2676_s21] sm:$0xff]  ;;  %v2481_v38 = vld [vmem:[%s3060_s2 + $0x338] sm:$0xff] }
  0x15   : > { %940 = vmatpush.bf16.msra.mxu0 %v2447_v8  ;;  %v2451_v25 = vld [vmem:[%s3060_s2 + $0x248] sm:$0xff]  ;;  %v2442_v30 = vld [vmem:[%s3060_s2 + $0x200] sm:$0xff]  ;;  %v2700_v33 = vunpack.c.l.b16 %v237_v29  ;;  %v2710_v37 = vunpack.c.h.b16 %v237_v29  ;;  %v2489_v39 = vld [vmem:[%s3060_s2 + $0x378] sm:$0xff] }
  0x16   : > { %953 = vmatpush.bf16.msra.mxu1 %v2455_v9  ;;  %v2459_v26 = vld [vmem:[%s3060_s2 + $0x288] sm:$0xff]  ;;  %v2450_v31 = vld [vmem:[%s3060_s2 + $0x240] sm:$0xff]  ;;  %v2497_v40 = vld [vmem:[%s3060_s2 + $0x3b8] sm:$0xff] }
  0x17   : > { %966 = vmatpush.bf16.msra.mxu2 %v2463_v10  ;;  %v2467_v27 = vld [vmem:[%s3060_s2 + $0x2c8] sm:$0xff]  ;;  %v2458_v34 = vld [vmem:[%s3060_s2 + $0x280] sm:$0xff]  ;;  %v2505_v41 = vld [vmem:[%s3060_s2 + $0x3f8] sm:$0xff]  ;;  %v538_v43 = vpack.c.b16 %v2700_v33, %v2700_v33  ;;  %v539_v45 = vpack.c.b16 %v2710_v37, %v2710_v37 }
  0x18   : > { %979 = vmatpush.bf16.msra.mxu3 %v2471_v11  ;;  %v238_v28 = vld [vmem:[%s2676_s21 + $0x8] sm:$0xff]  ;;  %v2466_v35 = vld [vmem:[%s3060_s2 + $0x2c0] sm:$0xff]  ;;  %v2480_v46 = vld [vmem:[%s3060_s2 + $0x330] sm:$0xff] }
  0x19   : > { %941 = vmatpush.bf16.msra.mxu0 %v2446_v12  ;;  %v2698_v32 = vunpack.c.l.b16 %v238_v28  ;;  %v2708_v36 = vunpack.c.h.b16 %v238_v28  ;;  %v2488_v47 = vld [vmem:[%s3060_s2 + $0x370] sm:$0xff]  ;;  %v2479_v50 = vld [vmem:[%s3060_s2 + $0x328] sm:$0xff]  ;;  %v2478_v54 = vld [vmem:[%s3060_s2 + $0x320] sm:$0xff] }
  0x1a   : > { %954 = vmatpush.bf16.msra.mxu1 %v2454_v13  ;;  %v2496_v48 = vld [vmem:[%s3060_s2 + $0x3b0] sm:$0xff]  ;;  %v2487_v51 = vld [vmem:[%s3060_s2 + $0x368] sm:$0xff]  ;;  %v2486_v55 = vld [vmem:[%s3060_s2 + $0x360] sm:$0xff] }
  0x1b   : > { %967 = vmatpush.bf16.msra.mxu2 %v2462_v14  ;;  %v540_v42 = vpack.c.b16 %v2698_v32, %v2698_v32  ;;  %v541_v44 = vpack.c.b16 %v2708_v36, %v2708_v36  ;;  %v2504_v49 = vld [vmem:[%s3060_s2 + $0x3f0] sm:$0xff]  ;;  %v2495_v52 = vld [vmem:[%s3060_s2 + $0x3a8] sm:$0xff]  ;;  %v2494_v56 = vld [vmem:[%s3060_s2 + $0x3a0] sm:$0xff] }
  0x1c   : > { %980 = vmatpush.bf16.msra.mxu3 %v2470_v15  ;;  %v2503_v53 = vld [vmem:[%s3060_s2 + $0x3e8] sm:$0xff]  ;;  %v2502_v57 = vld [vmem:[%s3060_s2 + $0x3e0] sm:$0xff]  ;;  %v2477_v58 = vld [vmem:[%s3060_s2 + $0x318] sm:$0xff] }
  0x1d   : > { %942 = vmatpush.bf16.msra.mxu0 %v2445_v16  ;;  %v2485_v59 = vld [vmem:[%s3060_s2 + $0x358] sm:$0xff]  ;;  %v2476_v62 = vld [vmem:[%s3060_s2 + $0x310] sm:$0xff]  ;;  %v2475_v2 = vld [vmem:[%s3060_s2 + $0x308] sm:$0xff] }
  0x1e   : > { %955 = vmatpush.bf16.msra.mxu1 %v2453_v17  ;;  %v2493_v60 = vld [vmem:[%s3060_s2 + $0x398] sm:$0xff]  ;;  %v2484_v63 = vld [vmem:[%s3060_s2 + $0x350] sm:$0xff]  ;;  %v2483_v3 = vld [vmem:[%s3060_s2 + $0x348] sm:$0xff] }
  0x1f   : > { %968 = vmatpush.bf16.msra.mxu2 %v2461_v18  ;;  %v2501_v61 = vld [vmem:[%s3060_s2 + $0x3d8] sm:$0xff]  ;;  %v2492_v0 = vld [vmem:[%s3060_s2 + $0x390] sm:$0xff]  ;;  %v2491_v4 = vld [vmem:[%s3060_s2 + $0x388] sm:$0xff] }
  0x20   : > { %981 = vmatpush.bf16.msra.mxu3 %v2469_v19  ;;  %v2500_v1 = vld [vmem:[%s3060_s2 + $0x3d0] sm:$0xff]  ;;  %v2499_v5 = vld [vmem:[%s3060_s2 + $0x3c8] sm:$0xff]  ;;  %v240_v6 = vld [vmem:[%s2676_s21 + $0x18] sm:$0xff] }
  0x21   : > { %943 = vmatpush.bf16.msra.mxu0 %v2444_v20  ;;  %v239_v7 = vld [vmem:[%s2676_s21 + $0x10] sm:$0xff]  ;;  %v2474_v8 = vld [vmem:[%s3060_s2 + $0x300] sm:$0xff]  ;;  %v2812_v10 = vunpack.c.l.b16 %v240_v6  ;;  %v2822_v14 = vunpack.c.h.b16 %v240_v6  ;;  %v2385_v16 = vld [vmem:[%s3060_s2 + $0x38] sm:$0xff] }
  0x22   : > { %956 = vmatpush.bf16.msra.mxu1 %v2452_v21  ;;  %v2482_v9 = vld [vmem:[%s3060_s2 + $0x340] sm:$0xff]  ;;  %v2814_v11 = vunpack.c.l.b16 %v239_v7  ;;  %v2824_v15 = vunpack.c.h.b16 %v239_v7  ;;  %v2393_v17 = vld [vmem:[%s3060_s2 + $0x78] sm:$0xff]  ;;  %v2383_v28 = vld [vmem:[%s3060_s2 + $0x28] sm:$0xff] }
  0x23   : > { %969 = vmatpush.bf16.msra.mxu2 %v2460_v22  ;;  %v2490_v12 = vld [vmem:[%s3060_s2 + $0x380] sm:$0xff]  ;;  %v2401_v18 = vld [vmem:[%s3060_s2 + $0xb8] sm:$0xff]  ;;  %v544_v20 = vpack.c.b16 %v2812_v10, %v2812_v10  ;;  %v545_v22 = vpack.c.b16 %v2822_v14, %v2822_v14  ;;  %v2391_v29 = vld [vmem:[%s3060_s2 + $0x68] sm:$0xff] }
  0x24   : > { %982 = vmatpush.bf16.msra.mxu3 %v2468_v23  ;;  %v2498_v13 = vld [vmem:[%s3060_s2 + $0x3c0] sm:$0xff]  ;;  %v2409_v19 = vld [vmem:[%s3060_s2 + $0xf8] sm:$0xff]  ;;  %v542_v21 = vpack.c.b16 %v2814_v11, %v2814_v11  ;;  %v543_v23 = vpack.c.b16 %v2824_v15, %v2824_v15 }
  0x25   : > { %944 = vmatpush.bf16.msra.mxu0 %v2443_v24  ;;  %v2384_v24 = vld [vmem:[%s3060_s2 + $0x30] sm:$0xff]  ;;  %v2378_v6 = vld [vmem:[%s3060_s2] sm:$0xff] }
  0x26   : > { %957 = vmatpush.bf16.msra.mxu1 %v2451_v25  ;;  %v2392_v25 = vld [vmem:[%s3060_s2 + $0x70] sm:$0xff]  ;;  %v2386_v7 = vld [vmem:[%s3060_s2 + $0x40] sm:$0xff] }
  0x27   : > { %970 = vmatpush.bf16.msra.mxu2 %v2459_v26  ;;  %v2400_v26 = vld [vmem:[%s3060_s2 + $0xb0] sm:$0xff] }
  0x28   : > { %983 = vmatpush.bf16.msra.mxu3 %v2467_v27  ;;  %v2408_v27 = vld [vmem:[%s3060_s2 + $0xf0] sm:$0xff] }
  0x29   : > { %945 = vmatpush.bf16.msra.mxu0 %v2442_v30  ;;  %v2399_v30 = vld [vmem:[%s3060_s2 + $0xa8] sm:$0xff] }
  0x2a   : > { %958 = vmatpush.bf16.msra.mxu1 %v2450_v31  ;;  %v2407_v31 = vld [vmem:[%s3060_s2 + $0xe8] sm:$0xff] }
  0x2b   : > { %971 = vmatpush.bf16.msra.mxu2 %v2458_v34  ;;  %v250_v34 = vld [vmem:[%s2869_s16 + $0x8] sm:$0xff] }
  0x2c   : > { %984 = vmatpush.bf16.msra.mxu3 %v2466_v35  ;;  %946 = vmatmul.bf16.vlgmr.msra.gmra.mxu0 %v538_v43  ;;  %v2382_v35 = vld [vmem:[%s3060_s2 + $0x20] sm:$0xff] }
  0x2d   : > { %990 = vmatpush.bf16.msrb.mxu0 %v2481_v38  ;;  %959 = vmatmul.bf16.vlgmr.msra.gmra.mxu1 %v539_v45  ;;  %v2390_v38 = vld [vmem:[%s3060_s2 + $0x60] sm:$0xff]  ;;  %v2389_v45 = vld [vmem:[%s3060_s2 + $0x58] sm:$0xff] }
  0x2e   : > { %1003 = vmatpush.bf16.msrb.mxu1 %v2489_v39  ;;  %972 = vmatmul.bf16.vlgmr.msra.gmra.mxu2 %v540_v42  ;;  %v249_v39 = vld [vmem:[%s2869_s16] sm:$0xff]  ;;  %v1048_v42 = vunpack.c.l.b16 %v250_v34 }
  0x2f   : > { %1016 = vmatpush.bf16.msrb.mxu2 %v2497_v40  ;;  %985 = vmatmul.bf16.vlgmr.msra.gmra.mxu3 %v541_v44  ;;  %v2398_v40 = vld [vmem:[%s3060_s2 + $0xa0] sm:$0xff]  ;;  %v1046_v43 = vunpack.c.l.b16 %v249_v39  ;;  %v2381_v44 = vld [vmem:[%s3060_s2 + $0x18] sm:$0xff] }
  0x30   : > { %1029 = vmatpush.bf16.msrb.mxu3 %v2505_v41  ;;  %v2406_v41 = vld [vmem:[%s3060_s2 + $0xe0] sm:$0xff] }
  0x31   : > { %991 = vmatpush.bf16.msrb.mxu0 %v2480_v46  ;;  %v1049_v46 = vunpack.c.h.b16 %v250_v34  ;;  %v2431_v34 = vld [vmem:[%s3060_s2 + $0x1a8] sm:$0xff] }
  0x32   : > { %1004 = vmatpush.bf16.msrb.mxu1 %v2488_v47  ;;  %v1047_v47 = vunpack.c.h.b16 %v249_v39  ;;  %v2414_v39 = vld [vmem:[%s3060_s2 + $0x120] sm:$0xff] }
  0x33   : > { %1017 = vmatpush.bf16.msrb.mxu2 %v2496_v48  ;;  %v2397_v48 = vld [vmem:[%s3060_s2 + $0x98] sm:$0xff] }
  0x34   : > { %1030 = vmatpush.bf16.msrb.mxu3 %v2504_v49  ;;  %v2405_v49 = vld [vmem:[%s3060_s2 + $0xd8] sm:$0xff] }
  0x35   : > { %992 = vmatpush.bf16.msrb.mxu0 %v2479_v50  ;;  %v1056_v50 = vpack.c.b16 %v2698_v32, %v1048_v42  ;;  %v2396_v32 = vld [vmem:[%s3060_s2 + $0x90] sm:$0xff]  ;;  %v2430_v42 = vld [vmem:[%s3060_s2 + $0x1a0] sm:$0xff] }
  0x36   : > { %1005 = vmatpush.bf16.msrb.mxu1 %v2487_v51  ;;  %v1054_v51 = vpack.c.b16 %v2700_v33, %v1046_v43  ;;  %v2404_v33 = vld [vmem:[%s3060_s2 + $0xd0] sm:$0xff]  ;;  %v2438_v43 = vld [vmem:[%s3060_s2 + $0x1e0] sm:$0xff] }
  0x37   : > { %1018 = vmatpush.bf16.msrb.mxu2 %v2495_v52  ;;  %v2380_v52 = vld [vmem:[%s3060_s2 + $0x10] sm:$0xff] }
  0x38   : > { %1031 = vmatpush.bf16.msrb.mxu3 %v2503_v53  ;;  %v2388_v53 = vld [vmem:[%s3060_s2 + $0x50] sm:$0xff] }
  0x39   : > { %993 = vmatpush.bf16.msrb.mxu0 %v2478_v54  ;;  %v1057_v54 = vpack.c.b16 %v2708_v36, %v1049_v46  ;;  %v2379_v36 = vld [vmem:[%s3060_s2 + $0x8] sm:$0xff] }
  0x3a   : > { %1006 = vmatpush.bf16.msrb.mxu1 %v2486_v55  ;;  %v1055_v55 = vpack.c.b16 %v2710_v37, %v1047_v47  ;;  %v2387_v37 = vld [vmem:[%s3060_s2 + $0x48] sm:$0xff] }
  0x3b   : > { %1019 = vmatpush.bf16.msrb.mxu2 %v2494_v56  ;;  %v1079_v56 = vshrl.u32 %v1056_v50, 16 }
  0x3c   : > { %1032 = vmatpush.bf16.msrb.mxu3 %v2502_v57  ;;  %v1082_v57 = vshll.u32 %v1056_v50, 16  ;;  %v2429_v50 = vld [vmem:[%s3060_s2 + $0x198] sm:$0xff] }
  0x3d   : > { %994 = vmatpush.bf16.msrb.mxu0 %v2477_v58  ;;  %v1063_v58 = vshrl.u32 %v1054_v51, 16 }
  0x3e   : > { %1007 = vmatpush.bf16.msrb.mxu1 %v2485_v59  ;;  %v1066_v59 = vshll.u32 %v1054_v51, 16  ;;  %v2437_v51 = vld [vmem:[%s3060_s2 + $0x1d8] sm:$0xff] }
  0x3f   : > { %1020 = vmatpush.bf16.msrb.mxu2 %v2493_v60  ;;  %v1087_v60 = vshrl.u32 %v1057_v54, 16 }
  0x40   : > { %1033 = vmatpush.bf16.msrb.mxu3 %v2501_v61  ;;  %v1090_v61 = vshll.u32 %v1057_v54, 16 }
  0x41   : > { %995 = vmatpush.bf16.msrb.mxu0 %v2476_v62  ;;  %v1071_v62 = vshrl.u32 %v1055_v55, 16 }
  0x42   : > { %1008 = vmatpush.bf16.msrb.mxu1 %v2484_v63  ;;  %v1074_v63 = vshll.u32 %v1055_v55, 16 }
  0x43   : > { %1021 = vmatpush.bf16.msrb.mxu2 %v2492_v0  ;;  %v2395_v0 = vld [vmem:[%s3060_s2 + $0x88] sm:$0xff] }
  0x44   : > { %1034 = vmatpush.bf16.msrb.mxu3 %v2500_v1  ;;  %v2403_v1 = vld [vmem:[%s3060_s2 + $0xc8] sm:$0xff] }
  0x45   : > { %996 = vmatpush.bf16.msrb.mxu0 %v2475_v2  ;;  %v1081_v2 = vrot.slane %v1079_v56, 3 }
  0x46   : > { %1009 = vmatpush.bf16.msrb.mxu1 %v2483_v3  ;;  %v1084_v3 = vrot.slane %v1082_v57, 4 }
  0x47   : > { %1022 = vmatpush.bf16.msrb.mxu2 %v2491_v4  ;;  %v1065_v4 = vrot.slane %v1063_v58, 3  ;;  %v2411_v58 = vld [vmem:[%s3060_s2 + $0x108] sm:$0xff] }
  0x48   : > { %1035 = vmatpush.bf16.msrb.mxu3 %v2499_v5  ;;  %v1068_v5 = vrot.slane %v1066_v59, 4  ;;  %v2419_v59 = vld [vmem:[%s3060_s2 + $0x148] sm:$0xff] }
  0x49   : > { %997 = vmatpush.bf16.msrb.mxu0 %v2474_v8  ;;  %v1089_v8 = vrot.slane %v1087_v60, 3 }
  0x4a   : > { %1010 = vmatpush.bf16.msrb.mxu1 %v2482_v9  ;;  %v1092_v9 = vrot.slane %v1090_v61, 4 }
  0x4b   : > { %1023 = vmatpush.bf16.msrb.mxu2 %v2490_v12  ;;  %v1073_v12 = vrot.slane %v1071_v62, 3  ;;  %v2427_v62 = vld [vmem:[%s3060_s2 + $0x188] sm:$0xff] }
  0x4c   : > { %1036 = vmatpush.bf16.msrb.mxu3 %v2498_v13  ;;  %998 = vmatmul.bf16.vlgmr.msrb.gmra.mxu0 %v542_v21  ;;  %v1076_v13 = vrot.slane %v1074_v63, 4  ;;  %v2441_v21 = vld [vmem:[%s3060_s2 + $0x1f8] sm:$0xff]  ;;  %v2435_v63 = vld [vmem:[%s3060_s2 + $0x1c8] sm:$0xff] }
  0x4d   : > { %1518 = vmatpush.bf16.msra.mxu0 %v2385_v16  ;;  %1011 = vmatmul.bf16.vlgmr.msrb.gmra.mxu1 %v543_v23  ;;  %v2394_v16 = vld [vmem:[%s3060_s2 + $0x80] sm:$0xff]  ;;  %v1085_v23 = vor.u32 %v1084_v3, %v1081_v2 }
  0x4e   : > { %1531 = vmatpush.bf16.msra.mxu1 %v2393_v17  ;;  %1024 = vmatmul.bf16.vlgmr.msrb.gmra.mxu2 %v544_v20  ;;  %v2402_v17 = vld [vmem:[%s3060_s2 + $0xc0] sm:$0xff]  ;;  %v2433_v20 = vld [vmem:[%s3060_s2 + $0x1b8] sm:$0xff] }
  0x4f   : > { %1544 = vmatpush.bf16.msra.mxu2 %v2401_v18  ;;  %1037 = vmatmul.bf16.vlgmr.msrb.gmra.mxu3 %v545_v22  ;;  %v2417_v18 = vld [vmem:[%s3060_s2 + $0x138] sm:$0xff]  ;;  %v1069_v22 = vor.u32 %v1068_v5, %v1065_v4  ;;  %v2410_v4 = vld [vmem:[%s3060_s2 + $0x100] sm:$0xff] }
  0x50   : > { %1557 = vmatpush.bf16.msra.mxu3 %v2409_v19  ;;  %v2425_v19 = vld [vmem:[%s3060_s2 + $0x178] sm:$0xff]  ;;  %v2418_v5 = vld [vmem:[%s3060_s2 + $0x140] sm:$0xff] }
  0x51   : > { %1519 = vmatpush.bf16.msra.mxu0 %v2384_v24  ;;  %v1077_v24 = vor.u32 %v1076_v13, %v1073_v12  ;;  %v2426_v12 = vld [vmem:[%s3060_s2 + $0x180] sm:$0xff] }
  0x52   : > { %1532 = vmatpush.bf16.msra.mxu1 %v2392_v25  ;;  %v1093_v25 = vor.u32 %v1092_v9, %v1089_v8  ;;  %v2434_v13 = vld [vmem:[%s3060_s2 + $0x1c0] sm:$0xff] }
  0x53   : > { %1545 = vmatpush.bf16.msra.mxu2 %v2400_v26  ;;  %v2416_v26 = vld [vmem:[%s3060_s2 + $0x130] sm:$0xff] }
  0x54   : > { %1558 = vmatpush.bf16.msra.mxu3 %v2408_v27  ;;  %v2424_v27 = vld [vmem:[%s3060_s2 + $0x170] sm:$0xff] }
  0x55   : > { %1520 = vmatpush.bf16.msra.mxu0 %v2383_v28  ;;  %v2432_v28 = vld [vmem:[%s3060_s2 + $0x1b0] sm:$0xff] }
  0x56   : > { %1533 = vmatpush.bf16.msra.mxu1 %v2391_v29  ;;  %v2440_v29 = vld [vmem:[%s3060_s2 + $0x1f0] sm:$0xff] }
  0x57   : > { %1546 = vmatpush.bf16.msra.mxu2 %v2399_v30  ;;  %v2415_v30 = vld [vmem:[%s3060_s2 + $0x128] sm:$0xff] }
  0x58   : > { %1559 = vmatpush.bf16.msra.mxu3 %v2407_v31  ;;  %v2423_v31 = vld [vmem:[%s3060_s2 + $0x168] sm:$0xff] }
  0x59   : > { %1521 = vmatpush.bf16.msra.mxu0 %v2382_v35  ;;  %v2439_v35 = vld [vmem:[%s3060_s2 + $0x1e8] sm:$0xff] }
  0x5a   : > { %1534 = vmatpush.bf16.msra.mxu1 %v2390_v38  ;;  %v251_v38 = vld [vmem:[%s2869_s16 + $0x10] sm:$0xff] }
  0x5b   : > { %1547 = vmatpush.bf16.msra.mxu2 %v2398_v40  ;;  %v2422_v40 = vld [vmem:[%s3060_s2 + $0x160] sm:$0xff] }
  0x5c   : > { %1560 = vmatpush.bf16.msra.mxu3 %v2406_v41  ;;  %v252_v41 = vld [vmem:[%s2869_s16 + $0x18] sm:$0xff] }
  0x5d   : > { %1522 = vmatpush.bf16.msra.mxu0 %v2381_v44  ;;  %v1050_v44 = vunpack.c.l.b16 %v251_v38  ;;  %v1052_v46 = vunpack.c.l.b16 %v252_v41  ;;  %v1053_v47 = vunpack.c.h.b16 %v252_v41 }
  0x5e   : > { %1535 = vmatpush.bf16.msra.mxu1 %v2389_v45  ;;  %v1051_v45 = vunpack.c.h.b16 %v251_v38 }
  0x5f   : > { %1548 = vmatpush.bf16.msra.mxu2 %v2397_v48  ;;  %v2413_v48 = vld [vmem:[%s3060_s2 + $0x118] sm:$0xff]  ;;  %v1060_v54 = vpack.c.b16 %v2812_v10, %v1052_v46  ;;  %v1061_v55 = vpack.c.b16 %v2822_v14, %v1053_v47  ;;  %v2436_v10 = vld [vmem:[%s3060_s2 + $0x1d0] sm:$0xff] }
  0x60   : > { %1561 = vmatpush.bf16.msra.mxu3 %v2405_v49  ;;  %v2421_v49 = vld [vmem:[%s3060_s2 + $0x158] sm:$0xff] }
  0x61   : > { %1523 = vmatpush.bf16.msra.mxu0 %v2380_v52  ;;  %v1058_v52 = vpack.c.b16 %v2814_v11, %v1050_v44  ;;  %v2428_v11 = vld [vmem:[%s3060_s2 + $0x190] sm:$0xff]  ;;  %v1119_v60 = vshrl.u32 %v1061_v55, 16  ;;  %v1122_v61 = vshll.u32 %v1061_v55, 16 }
  0x62   : > { %1536 = vmatpush.bf16.msra.mxu1 %v2388_v53  ;;  %v1059_v53 = vpack.c.b16 %v2824_v15, %v1051_v45 }
  0x63   : > { %1549 = vmatpush.bf16.msra.mxu2 %v2396_v32  ;;  %v2412_v32 = vld [vmem:[%s3060_s2 + $0x110] sm:$0xff]  ;;  %v1095_v14 = vshrl.u32 %v1058_v52, 16  ;;  %v1098_v15 = vshll.u32 %v1058_v52, 16  ;;  %v1121_v8 = vrot.slane %v1119_v60, 3  ;;  %v1124_v9 = vrot.slane %v1122_v61, 4 }
  0x64   : > { %1562 = vmatpush.bf16.msra.mxu3 %v2404_v33  ;;  %v2420_v33 = vld [vmem:[%s3060_s2 + $0x150] sm:$0xff]  ;;  %v1103_v56 = vshrl.u32 %v1059_v53, 16  ;;  %v1106_v57 = vshll.u32 %v1059_v53, 16 }
  0x65   : > { %1524 = vmatpush.bf16.msra.mxu0 %v2379_v36  ;;  %v1111_v36 = vshrl.u32 %v1060_v54, 16 }
  0x66   : > { %1537 = vmatpush.bf16.msra.mxu1 %v2387_v37  ;;  %v1114_v37 = vshll.u32 %v1060_v54, 16  ;;  %v1105_v2 = vrot.slane %v1103_v56, 3  ;;  %v1108_v3 = vrot.slane %v1106_v57, 4 }
  0x67   : > { %1550 = vmatpush.bf16.msra.mxu2 %v2395_v0  ;;  %v1097_v0 = vrot.slane %v1095_v14, 3 }
  0x68   : > { %1563 = vmatpush.bf16.msra.mxu3 %v2403_v1  ;;  %v1100_v1 = vrot.slane %v1098_v15, 4 }
  0x69   : > { %1525 = vmatpush.bf16.msra.mxu0 %v2378_v6  ;;  %v1113_v6 = vrot.slane %v1111_v36, 3 }
  0x6a   : > { %1538 = vmatpush.bf16.msra.mxu1 %v2386_v7  ;;  %v1116_v7 = vrot.slane %v1114_v37, 4 }
  0x6b   : > { %1551 = vmatpush.bf16.msra.mxu2 %v2394_v16  ;;  %v1101_v16 = vor.u32 %v1100_v1, %v1097_v0 }
  0x6c   : > { %1564 = vmatpush.bf16.msra.mxu3 %v2402_v17  ;;  %1526 = vmatmul.bf16.vlgmr.msra.gmra.mxu0 %v1069_v22  ;;  %v1109_v17 = vor.u32 %v1108_v3, %v1105_v2 }
  0x6d   : > { %1570 = vmatpush.bf16.msrb.mxu0 %v2417_v18  ;;  %1539 = vmatmul.bf16.vlgmr.msra.gmra.mxu1 %v1077_v24  ;;  %v1117_v18 = vor.u32 %v1116_v7, %v1113_v6 }
  0x6e   : > { %1583 = vmatpush.bf16.msrb.mxu1 %v2425_v19  ;;  %1552 = vmatmul.bf16.vlgmr.msra.gmra.mxu2 %v1085_v23  ;;  %v1125_v19 = vor.u32 %v1124_v9, %v1121_v8 }
  0x6f   : > { %1596 = vmatpush.bf16.msrb.mxu2 %v2433_v20  ;;  %1565 = vmatmul.bf16.vlgmr.msra.gmra.mxu3 %v1093_v25 }
  0x70   : > { %1609 = vmatpush.bf16.msrb.mxu3 %v2441_v21 }
  0x71   : > { %1571 = vmatpush.bf16.msrb.mxu0 %v2416_v26 }
  0x72   : > { %1584 = vmatpush.bf16.msrb.mxu1 %v2424_v27 }
  0x73   : > { %1597 = vmatpush.bf16.msrb.mxu2 %v2432_v28 }
  0x74   : > { %1610 = vmatpush.bf16.msrb.mxu3 %v2440_v29 }
  0x75   : > { %1572 = vmatpush.bf16.msrb.mxu0 %v2415_v30 }
  0x76   : > { %1585 = vmatpush.bf16.msrb.mxu1 %v2423_v31 }
  0x77   : > { %1598 = vmatpush.bf16.msrb.mxu2 %v2431_v34 }
  0x78   : > { %1611 = vmatpush.bf16.msrb.mxu3 %v2439_v35 }
  0x79   : > { %1573 = vmatpush.bf16.msrb.mxu0 %v2414_v39 }
  0x7a   : > { %1586 = vmatpush.bf16.msrb.mxu1 %v2422_v40 }
  0x7b   : > { %1599 = vmatpush.bf16.msrb.mxu2 %v2430_v42 }
  0x7c   : > { %1612 = vmatpush.bf16.msrb.mxu3 %v2438_v43 }
  0x7d   : > { %1574 = vmatpush.bf16.msrb.mxu0 %v2413_v48 }
  0x7e   : > { %1587 = vmatpush.bf16.msrb.mxu1 %v2421_v49 }
  0x7f   : > { %1600 = vmatpush.bf16.msrb.mxu2 %v2429_v50 }
  0x80   : > { %1613 = vmatpush.bf16.msrb.mxu3 %v2437_v51 }
  0x81   : > { %1575 = vmatpush.bf16.msrb.mxu0 %v2412_v32 }
  0x82   : > { %1588 = vmatpush.bf16.msrb.mxu1 %v2420_v33 }
  0x83   : > { %1601 = vmatpush.bf16.msrb.mxu2 %v2428_v11 }
  0x84   : > { %1614 = vmatpush.bf16.msrb.mxu3 %v2436_v10 }
  0x85   : > { %1576 = vmatpush.bf16.msrb.mxu0 %v2411_v58 }
  0x86   : > { %1589 = vmatpush.bf16.msrb.mxu1 %v2419_v59 }
  0x87   : > { %1602 = vmatpush.bf16.msrb.mxu2 %v2427_v62 }
  0x88   : > { %1615 = vmatpush.bf16.msrb.mxu3 %v2435_v63 }
  0x89   : > { %1577 = vmatpush.bf16.msrb.mxu0 %v2410_v4 }
  0x8a   : > { %1590 = vmatpush.bf16.msrb.mxu1 %v2418_v5 }
  0x8b   : > { %1603 = vmatpush.bf16.msrb.mxu2 %v2426_v12 }
  0x8c   : > { %1616 = vmatpush.bf16.msrb.mxu3 %v2434_v13  ;;  %1578 = vmatmul.bf16.vlgmr.msrb.gmra.mxu0 %v1101_v16 }
  0x8d   : > { %1591 = vmatmul.bf16.vlgmr.msrb.gmra.mxu1 %v1109_v17 }
  0x8e   : > { %1604 = vmatmul.bf16.vlgmr.msrb.gmra.mxu2 %v1117_v18 }
  0x8f   : > { %1617 = vmatmul.bf16.vlgmr.msrb.gmra.mxu3 %v1125_v19 }
  0xa9   : > { %v947_v20 = vpop.f32.mrf.mxu0 }
  0xaa   : > { %v960_v21 = vpop.f32.mrf.mxu1 }
  0xab   : > { %v961_v22 = vadd.f32 %v960_v21, %v947_v20 }
  0xb1   : > { %v973_v23 = vpop.f32.mrf.mxu2  ;;  %v949_v26 = vpop.f32.mrf.mxu0 }
  0xb2   : > { %v974_v24 = vadd.f32 %v973_v23, %v961_v22  ;;  %v986_v25 = vpop.f32.mrf.mxu3  ;;  %v962_v28 = vpop.f32.mrf.mxu1 }
  0xb4   : > { %v987_v27 = vadd.f32 %v986_v25, %v974_v24 }
  0xb9   : > { %v975_v29 = vpop.f32.mrf.mxu2 }
  0xba   : > { %v988_v30 = vpop.f32.mrf.mxu3 }
  0xc9   : > { %v999_v31 = vpop.f32.mrf.mxu0 }
  0xca   : > { %v1012_v34 = vpop.f32.mrf.mxu1  ;;  %v1000_v45 = vadd.f32 %v999_v31, %v987_v27 }
  0xcc   : > { %v1013_v49 = vadd.f32 %v1012_v34, %v1000_v45 }
  0xd1   : > { %v1025_v35 = vpop.f32.mrf.mxu2  ;;  %v1001_v39 = vpop.f32.mrf.mxu0 }
  0xd2   : > { %v1038_v38 = vpop.f32.mrf.mxu3  ;;  %v1014_v40 = vpop.f32.mrf.mxu1  ;;  %v1026_v51 = vadd.f32 %v1025_v35, %v1013_v49 }
  0xd4   : > { %v1039_v54 = vadd.f32 %v1038_v38, %v1026_v51 }
  0xd9   : > { %v1027_v41 = vpop.f32.mrf.mxu2 }
  0xda   : > { %v1040_v42 = vpop.f32.mrf.mxu3 }
  0xe9   : > { %v1527_v43 = vpop.f32.mrf.mxu0 }
  0xea   : > { %v1540_v44 = vpop.f32.mrf.mxu1  ;;  %v1528_v55 = vadd.f32 %v1527_v43, %v1039_v54 }
  0xec   : > { %v1541_v32 = vadd.f32 %v1540_v44, %v1528_v55 }
  0xf1   : > { %v1553_v46 = vpop.f32.mrf.mxu2  ;;  %v1529_v48 = vpop.f32.mrf.mxu0 }
  0xf2   : > { %v1566_v47 = vpop.f32.mrf.mxu3  ;;  %v1542_v50 = vpop.f32.mrf.mxu1  ;;  %v1554_v33 = vadd.f32 %v1553_v46, %v1541_v32 }
  0xf4   : > { %v1567_v11 = vadd.f32 %v1566_v47, %v1554_v33 }
  0xf9   : > { %v1555_v52 = vpop.f32.mrf.mxu2 }
  0xfa   : > { %v1568_v53 = vpop.f32.mrf.mxu3 }
 0x109   : > { %v1579_v10 = vpop.f32.mrf.mxu0 }
 0x10a   : > { %v1592_v14 = vpop.f32.mrf.mxu1  ;;  %v1580_v15 = vadd.f32 %v1579_v10, %v1567_v11 }
 0x10c   : > { %v1593_v56 = vadd.f32 %v1592_v14, %v1580_v15 }
 0x111   : > { %v1605_v57 = vpop.f32.mrf.mxu2  ;;  %v1581_v36 = vpop.f32.mrf.mxu0 }
 0x112   : > { %v1618_v58 = vpop.f32.mrf.mxu3  ;;  %v1606_v59 = vadd.f32 %v1605_v57, %v1593_v56  ;;  %v1594_v37 = vpop.f32.mrf.mxu1 }
 0x114   : > { %v1619_v60 = vadd.f32 %v1618_v58, %v1606_v59 }
 0x116   : > { %1622 = vst [vmem:[%s236_s11] sm:$0xff] %v1619_v60 }
 0x119   : > { %v1607_v61 = vpop.f32.mrf.mxu2 }
 0x11a   : > { %v1620_v62 = vpop.f32.mrf.mxu3 }
 0x11b PF: > { %s13_s14 = sadd.s32 1, %s2552_s14   ;;  %s3062_s12 = smov %s2548_s13 }
 0x11c   : > { %p10_p5 = scmp.ge.s32.totalorder %s13_s14, 4   ;;  %s3063_s13 = smov %s3065_s15 }
 0x11e   :  { %12 = sbr.rel (!%p10_p5) target bundleno = 2 (0x2), region = 66 }

</bundles_post_ra>
